<compile_context>
chip_gen: v7x
topology: tpu7x:2x2x1
jax: 0.10.0
libtpu: 0.0.40
codegen_flags: <defaults>
</compile_context>

<pallas_src>
import functools

import numpy as np
import jax
import jax.numpy as jnp
from jax.experimental import pallas as pl
from jax.experimental.pallas import tpu as pltpu

_LANES = 128
_CHUNK_SUB = 8                       # sublanes per chunk: one (8, 128) f32 vreg
_CHUNK_PIX = _CHUNK_SUB * _LANES     # 1024 pixels per chunk
_UNROLL = 8                          # chunk-loop unroll factor


def _kmeans_prob_kernel(clusters_ref, hm_ref, out_ref, *,
                        n_iterations: int, n_chunks: int, width: int):
    K = out_ref.shape[0]
    w_f = jnp.float32(width)
    # Per-chunk coordinate advance: Python constants, so no division in-loop.
    d_row = jnp.float32(_CHUNK_PIX // width)
    d_col = jnp.float32(_CHUNK_PIX % width)

    # ---- pixel coordinates of chunk 0, generated in-kernel (once) ----------
    sub = jax.lax.broadcasted_iota(jnp.int32, (_CHUNK_SUB, _LANES), 0)
    lane = jax.lax.broadcasted_iota(jnp.int32, (_CHUNK_SUB, _LANES), 1)
    off = (sub * _LANES + lane).astype(jnp.float32)            # 0..1023, exact
    q = jnp.floor(off * jnp.float32(1.0 / width))
    r = off - q * w_f
    # fix-ups make the small-number float div/mod exact in both directions
    q = jnp.where(r >= w_f, q + 1.0, q)
    r = jnp.where(r >= w_f, r - w_f, r)
    q = jnp.where(r < 0.0, q - 1.0, q)
    r = jnp.where(r < 0.0, r + w_f, r)
    rows0, cols0 = q, r

    zero_acc = jnp.zeros((_CHUNK_SUB, _LANES), jnp.float32)

    def one_iteration(crs, ccs):
        """crs / ccs: tuples of K scalar cluster coordinates (row, col)."""

        def chunk_body(ci, carry):
            rows, cols, acc_r, acc_c = carry
            base = pl.multiple_of(ci * _CHUNK_SUB, _CHUNK_SUB)
            hm = hm_ref[pl.ds(base, _CHUNK_SUB), :]            # (8, 128)

            # Running argmin on the clamped *squared* distance; strict '<'
            # reproduces the reference's first-occurrence tie-break, and
            # max(1, d^2) has the same ordering/ties as max(1, d).
            dr = crs[0] - rows
            dc = ccs[0] - cols
            best_d2 = jnp.maximum(jnp.float32(1.0), dr * dr + dc * dc)
            best_idx = jnp.zeros((_CHUNK_SUB, _LANES), jnp.int32)
            for c in range(1, K):
                dr = crs[c] - rows
                dc = ccs[c] - cols
                d2 = jnp.maximum(jnp.float32(1.0), dr * dr + dc * dc)
                better = d2 < best_d2
                best_idx = jnp.where(better, jnp.int32(c), best_idx)
                best_d2 = jnp.where(better, d2, best_d2)

            # hm / max(1, dist); padded pixels have hm == 0 -> contribute 0.
            w = hm / jnp.sqrt(best_d2)
            rw = rows * w
            cw = cols * w

            new_r = []
            new_c = []
            for c in range(K):
                m = best_idx == c
                new_r.append(acc_r[c] + jnp.where(m, rw, 0.0))
                new_c.append(acc_c[c] + jnp.where(m, cw, 0.0))

            # Advance coordinates to the next chunk (exact, pure VALU).
            c2 = cols + d_col
            wrap = c2 >= w_f
            cols_n = jnp.where(wrap, c2 - w_f, c2)
            rows_n = rows + d_row + jnp.where(wrap, 1.0, 0.0)
            return (rows_n, cols_n, tuple(new_r), tuple(new_c))

        init = (rows0, cols0, (zero_acc,) * K, (zero_acc,) * K)
        _, _, acc_r, acc_c = jax.lax.fori_loop(
            0, n_chunks, chunk_body, init, unroll=_UNROLL)

        # One tiny (8,128) -> scalar reduction per cluster coordinate.
        new_crs = tuple(jnp.sum(acc_r[c]) for c in range(K))
        new_ccs = tuple(jnp.sum(acc_c[c]) for c in range(K))
        return new_crs, new_ccs

    # Initial clusters: scalar reads from SMEM (splat to vectors in the loop).
    crs = tuple(clusters_ref[c, 0] for c in range(K))
    ccs = tuple(clusters_ref[c, 1] for c in range(K))

    if n_iterations <= 8:
        for _ in range(n_iterations):          # unrolled: LLO sees the whole body
            crs, ccs = one_iteration(crs, ccs)
    else:
        crs, ccs = jax.lax.fori_loop(
            0, n_iterations, lambda _, s: one_iteration(*s), (crs, ccs))

    for c in range(K):
        out_ref[c, 0] = crs[c]
        out_ref[c, 1] = ccs[c]


def _vmem_limit_bytes(hm_bytes: int) -> int:
    try:
        cap = int(pltpu.get_tpu_info().vmem_capacity_bytes)
    except Exception:
        cap = 64 * 1024 * 1024          # conservative: v7x physical VMEM
    want = hm_bytes + (4 << 20)
    return int(min(max(want, 32 << 20), int(cap * 0.85)))


def kmeans_prob_sampler(clusters: jax.Array, heatmap: jax.Array,
                        *, n_targets: int, n_iterations: int) -> jax.Array:
    """Pallas equivalent of KMeansProbSampler(n_targets, n_iterations).forward."""
    if heatmap.ndim == 3:
        assert heatmap.shape[0] == 1, f"Invalid heatmap shape: {heatmap.shape}"
        heatmap = heatmap[0]
    K, two = clusters.shape
    assert K == n_targets and two == 2
    H, W = heatmap.shape
    HW = H * W

    # Lane-dense pixel layout: pad only the tail (fused pad+reshape, no
    # scatter), to (S, 128) with S a multiple of CHUNK_SUB * UNROLL.
    align = _CHUNK_PIX * _UNROLL
    hw_pad = ((HW + align - 1) // align) * align
    S = hw_pad // _LANES
    n_chunks = S // _CHUNK_SUB

    flat = heatmap.reshape(-1).astype(jnp.float32)
    hm = jnp.pad(flat, (0, hw_pad - HW)).reshape(S, _LANES)

    kernel = functools.partial(_kmeans_prob_kernel,
                               n_iterations=n_iterations,
                               n_chunks=n_chunks,
                               width=W)

    return pl.pallas_call(
        kernel,
        out_shape=jax.ShapeDtypeStruct((K, 2), jnp.float32),
        in_specs=[
            pl.BlockSpec(memory_space=pltpu.MemorySpace.SMEM),   # clusters (K, 2)
            pl.BlockSpec(memory_space=pltpu.MemorySpace.VMEM),   # heatmap (S, 128)
        ],
        out_specs=pl.BlockSpec(memory_space=pltpu.MemorySpace.SMEM),
        compiler_params=pltpu.CompilerParams(
            vmem_limit_bytes=_vmem_limit_bytes(hw_pad * 4)),
    )(clusters.astype(jnp.float32), hm)


def _reference_forward(clusters: np.ndarray, hm: np.ndarray, n_iterations: int) -> np.ndarray:
    """Direct numpy port of the PyTorch module (for validation)."""
    cs = np.array(clusters, dtype=np.float32)
    hm = np.array(hm, dtype=np.float32)
    if hm.ndim == 3:
        hm = hm[0]
    n_rows, n_cols = hm.shape
    for _ in range(n_iterations):
        new_cs = np.zeros_like(cs, dtype=np.float32)
        for r in range(n_rows):
            for c in range(n_cols):
                best_k, best_d = None, None
                for k in range(cs.shape[0]):
                    d = max(1, np.sqrt((cs[k, 0] - r) ** 2 + (cs[k, 1] - c) ** 2))
                    if best_d is None or d < best_d:
                        best_k, best_d = k, d
                new_cs[best_k, :] += np.array([r, c], dtype=np.float32) * hm[r, c] / best_d
        cs = new_cs
    return cs


if __name__ == "__main__":
    n_targets = 4
    n_iterations = 3
    H = W = 16

    key = jax.random.PRNGKey(0)
    k1, k2 = jax.random.split(key)
    clusters = jax.random.uniform(
        k1, (n_targets, 2), dtype=jnp.float32, minval=1.0, maxval=float(H - 1))
    heatmap = jax.random.uniform(k2, (1, H, W), dtype=jnp.float32)  # 1-channel map

    out = kmeans_prob_sampler(
        clusters, heatmap, n_targets=n_targets, n_iterations=n_iterations)
    out = jax.block_until_ready(out)

    ref = _reference_forward(np.asarray(clusters), np.asarray(heatmap), n_iterations)
    assert out.shape == (n_targets, 2) and out.dtype == jnp.float32
    assert np.allclose(np.asarray(out), ref, rtol=1e-2, atol=1e-1), (out, ref)

    print("KERNEL_OK")
</pallas_src>

<mosaic_0001>
module attributes {stable_mosaic.version = 11 : i64} {
  func.func @_kmeans_prob_kernel(%arg0: memref<4x2xf32, #tpu.memory_space<smem>>, %arg1: memref<64x128xf32, #tpu.memory_space<vmem>>, %arg2: memref<4x2xf32, #tpu.memory_space<smem>>) attributes {dimension_semantics = [], scalar_prefetch = 0 : i64, scratch_operands = 0 : i64, tpu.core_type = #tpu.core_type<tc>} {
    %0 = tpu.iota {dimensions = array<i32: 0>} : vector<8x128xi32>
    %1 = tpu.iota {dimensions = array<i32: 1>} : vector<8x128xi32>
    %c128_i32 = arith.constant 128 : i32
    %2 = vector.broadcast %c128_i32 : i32 to vector<8x128xi32>
    %3 = arith.muli %0, %2 : vector<8x128xi32>
    %4 = arith.addi %3, %1 : vector<8x128xi32>
    %5 = arith.sitofp %4 : vector<8x128xi32> to vector<8x128xf32>
    %cst = arith.constant 6.250000e-02 : f32
    %6 = vector.broadcast %cst : f32 to vector<8x128xf32>
    %7 = arith.mulf %5, %6 : vector<8x128xf32>
    %8 = math.floor %7 : vector<8x128xf32>
    %cst_0 = arith.constant 1.600000e+01 : f32
    %9 = vector.broadcast %cst_0 : f32 to vector<8x128xf32>
    %10 = arith.mulf %8, %9 : vector<8x128xf32>
    %11 = arith.subf %5, %10 : vector<8x128xf32>
    %cst_1 = arith.constant 1.600000e+01 : f32
    %12 = vector.broadcast %cst_1 : f32 to vector<8x128xf32>
    %13 = arith.cmpf oge, %11, %12 : vector<8x128xf32>
    %cst_2 = arith.constant 1.000000e+00 : f32
    %14 = vector.broadcast %cst_2 : f32 to vector<8x128xf32>
    %15 = arith.addf %8, %14 : vector<8x128xf32>
    %16 = arith.select %13, %15, %8 : vector<8x128xi1>, vector<8x128xf32>
    %cst_3 = arith.constant 1.600000e+01 : f32
    %17 = vector.broadcast %cst_3 : f32 to vector<8x128xf32>
    %18 = arith.cmpf oge, %11, %17 : vector<8x128xf32>
    %cst_4 = arith.constant 1.600000e+01 : f32
    %19 = vector.broadcast %cst_4 : f32 to vector<8x128xf32>
    %20 = arith.subf %11, %19 : vector<8x128xf32>
    %21 = arith.select %18, %20, %11 : vector<8x128xi1>, vector<8x128xf32>
    %cst_5 = arith.constant 0.000000e+00 : f32
    %22 = vector.broadcast %cst_5 : f32 to vector<8x128xf32>
    %23 = arith.cmpf olt, %21, %22 : vector<8x128xf32>
    %cst_6 = arith.constant 1.000000e+00 : f32
    %24 = vector.broadcast %cst_6 : f32 to vector<8x128xf32>
    %25 = arith.subf %16, %24 : vector<8x128xf32>
    %26 = arith.select %23, %25, %16 : vector<8x128xi1>, vector<8x128xf32>
    %cst_7 = arith.constant 0.000000e+00 : f32
    %27 = vector.broadcast %cst_7 : f32 to vector<8x128xf32>
    %28 = arith.cmpf olt, %21, %27 : vector<8x128xf32>
    %cst_8 = arith.constant 1.600000e+01 : f32
    %29 = vector.broadcast %cst_8 : f32 to vector<8x128xf32>
    %30 = arith.addf %21, %29 : vector<8x128xf32>
    %31 = arith.select %28, %30, %21 : vector<8x128xi1>, vector<8x128xf32>
    %cst_9 = arith.constant 0.000000e+00 : f32
    %32 = vector.broadcast %cst_9 : f32 to vector<8x128xf32>
    %c0 = arith.constant 0 : index
    %c0_10 = arith.constant 0 : index
    %33 = memref.load %arg0[%c0, %c0_10] : memref<4x2xf32, #tpu.memory_space<smem>>
    %c1 = arith.constant 1 : index
    %c0_11 = arith.constant 0 : index
    %34 = memref.load %arg0[%c1, %c0_11] : memref<4x2xf32, #tpu.memory_space<smem>>
    %c2 = arith.constant 2 : index
    %c0_12 = arith.constant 0 : index
    %35 = memref.load %arg0[%c2, %c0_12] : memref<4x2xf32, #tpu.memory_space<smem>>
    %c3 = arith.constant 3 : index
    %c0_13 = arith.constant 0 : index
    %36 = memref.load %arg0[%c3, %c0_13] : memref<4x2xf32, #tpu.memory_space<smem>>
    %c0_14 = arith.constant 0 : index
    %c1_15 = arith.constant 1 : index
    %37 = memref.load %arg0[%c0_14, %c1_15] : memref<4x2xf32, #tpu.memory_space<smem>>
    %c1_16 = arith.constant 1 : index
    %c1_17 = arith.constant 1 : index
    %38 = memref.load %arg0[%c1_16, %c1_17] : memref<4x2xf32, #tpu.memory_space<smem>>
    %c2_18 = arith.constant 2 : index
    %c1_19 = arith.constant 1 : index
    %39 = memref.load %arg0[%c2_18, %c1_19] : memref<4x2xf32, #tpu.memory_space<smem>>
    %c3_20 = arith.constant 3 : index
    %c1_21 = arith.constant 1 : index
    %40 = memref.load %arg0[%c3_20, %c1_21] : memref<4x2xf32, #tpu.memory_space<smem>>
    %cst_22 = arith.constant 0.000000e+00 : f32
    %cst_23 = arith.constant 1.600000e+01 : f32
    %cst_24 = arith.constant 6.400000e+01 : f32
    %c0_i32 = arith.constant 0 : i32
    %c8_i32 = arith.constant 8 : i32
    %41 = arith.muli %c0_i32, %c8_i32 : i32
    %42 = tpu.assume_multiple %41, 8 : i32
    %43 = arith.index_cast %42 : i32 to index
    %c0_25 = arith.constant 0 : index
    %44 = vector.load %arg1[%43, %c0_25] : memref<64x128xf32, #tpu.memory_space<vmem>>, vector<8x128xf32>
    %45 = vector.broadcast %33 : f32 to vector<8x128xf32>
    %46 = arith.subf %45, %26 : vector<8x128xf32>
    %47 = vector.broadcast %37 : f32 to vector<8x128xf32>
    %48 = arith.subf %47, %31 : vector<8x128xf32>
    %49 = arith.mulf %46, %46 : vector<8x128xf32>
    %50 = arith.mulf %48, %48 : vector<8x128xf32>
    %51 = arith.addf %49, %50 : vector<8x128xf32>
    %cst_26 = arith.constant 1.000000e+00 : f32
    %52 = vector.broadcast %cst_26 : f32 to vector<8x128xf32>
    %53 = arith.maximumf %52, %51 : vector<8x128xf32>
    %c0_i32_27 = arith.constant 0 : i32
    %54 = vector.broadcast %c0_i32_27 : i32 to vector<8x128xi32>
    %55 = vector.broadcast %34 : f32 to vector<8x128xf32>
    %56 = arith.subf %55, %26 : vector<8x128xf32>
    %57 = vector.broadcast %38 : f32 to vector<8x128xf32>
    %58 = arith.subf %57, %31 : vector<8x128xf32>
    %59 = arith.mulf %56, %56 : vector<8x128xf32>
    %60 = arith.mulf %58, %58 : vector<8x128xf32>
    %61 = arith.addf %59, %60 : vector<8x128xf32>
    %cst_28 = arith.constant 1.000000e+00 : f32
    %62 = vector.broadcast %cst_28 : f32 to vector<8x128xf32>
    %63 = arith.maximumf %62, %61 : vector<8x128xf32>
    %64 = arith.cmpf olt, %63, %53 : vector<8x128xf32>
    %c1_i32 = arith.constant 1 : i32
    %65 = vector.broadcast %c1_i32 : i32 to vector<8x128xi32>
    %66 = arith.select %64, %65, %54 : vector<8x128xi1>, vector<8x128xi32>
    %67 = arith.select %64, %63, %53 : vector<8x128xi1>, vector<8x128xf32>
    %68 = vector.broadcast %35 : f32 to vector<8x128xf32>
    %69 = arith.subf %68, %26 : vector<8x128xf32>
    %70 = vector.broadcast %39 : f32 to vector<8x128xf32>
    %71 = arith.subf %70, %31 : vector<8x128xf32>
    %72 = arith.mulf %69, %69 : vector<8x128xf32>
    %73 = arith.mulf %71, %71 : vector<8x128xf32>
    %74 = arith.addf %72, %73 : vector<8x128xf32>
    %cst_29 = arith.constant 1.000000e+00 : f32
    %75 = vector.broadcast %cst_29 : f32 to vector<8x128xf32>
    %76 = arith.maximumf %75, %74 : vector<8x128xf32>
    %77 = arith.cmpf olt, %76, %67 : vector<8x128xf32>
    %c2_i32 = arith.constant 2 : i32
    %78 = vector.broadcast %c2_i32 : i32 to vector<8x128xi32>
    %79 = arith.select %77, %78, %66 : vector<8x128xi1>, vector<8x128xi32>
    %80 = arith.select %77, %76, %67 : vector<8x128xi1>, vector<8x128xf32>
    %81 = vector.broadcast %36 : f32 to vector<8x128xf32>
    %82 = arith.subf %81, %26 : vector<8x128xf32>
    %83 = vector.broadcast %40 : f32 to vector<8x128xf32>
    %84 = arith.subf %83, %31 : vector<8x128xf32>
    %85 = arith.mulf %82, %82 : vector<8x128xf32>
    %86 = arith.mulf %84, %84 : vector<8x128xf32>
    %87 = arith.addf %85, %86 : vector<8x128xf32>
    %cst_30 = arith.constant 1.000000e+00 : f32
    %88 = vector.broadcast %cst_30 : f32 to vector<8x128xf32>
    %89 = arith.maximumf %88, %87 : vector<8x128xf32>
    %90 = arith.cmpf olt, %89, %80 : vector<8x128xf32>
    %c3_i32 = arith.constant 3 : i32
    %91 = vector.broadcast %c3_i32 : i32 to vector<8x128xi32>
    %92 = arith.select %90, %91, %79 : vector<8x128xi1>, vector<8x128xi32>
    %93 = arith.select %90, %89, %80 : vector<8x128xi1>, vector<8x128xf32>
    %94 = math.sqrt %93 : vector<8x128xf32>
    %95 = arith.divf %44, %94 : vector<8x128xf32>
    %96 = arith.mulf %26, %95 : vector<8x128xf32>
    %97 = arith.mulf %31, %95 : vector<8x128xf32>
    %c0_i32_31 = arith.constant 0 : i32
    %98 = vector.broadcast %c0_i32_31 : i32 to vector<8x128xi32>
    %99 = arith.cmpi eq, %92, %98 : vector<8x128xi32>
    %cst_32 = arith.constant 0.000000e+00 : f32
    %100 = vector.broadcast %cst_32 : f32 to vector<8x128xf32>
    %101 = arith.select %99, %96, %100 : vector<8x128xi1>, vector<8x128xf32>
    %102 = arith.addf %32, %101 : vector<8x128xf32>
    %cst_33 = arith.constant 0.000000e+00 : f32
    %103 = vector.broadcast %cst_33 : f32 to vector<8x128xf32>
    %104 = arith.select %99, %97, %103 : vector<8x128xi1>, vector<8x128xf32>
    %105 = arith.addf %32, %104 : vector<8x128xf32>
    %c1_i32_34 = arith.constant 1 : i32
    %106 = vector.broadcast %c1_i32_34 : i32 to vector<8x128xi32>
    %107 = arith.cmpi eq, %92, %106 : vector<8x128xi32>
    %cst_35 = arith.constant 0.000000e+00 : f32
    %108 = vector.broadcast %cst_35 : f32 to vector<8x128xf32>
    %109 = arith.select %107, %96, %108 : vector<8x128xi1>, vector<8x128xf32>
    %110 = arith.addf %32, %109 : vector<8x128xf32>
    %cst_36 = arith.constant 0.000000e+00 : f32
    %111 = vector.broadcast %cst_36 : f32 to vector<8x128xf32>
    %112 = arith.select %107, %97, %111 : vector<8x128xi1>, vector<8x128xf32>
    %113 = arith.addf %32, %112 : vector<8x128xf32>
    %c2_i32_37 = arith.constant 2 : i32
    %114 = vector.broadcast %c2_i32_37 : i32 to vector<8x128xi32>
    %115 = arith.cmpi eq, %92, %114 : vector<8x128xi32>
    %cst_38 = arith.constant 0.000000e+00 : f32
    %116 = vector.broadcast %cst_38 : f32 to vector<8x128xf32>
    %117 = arith.select %115, %96, %116 : vector<8x128xi1>, vector<8x128xf32>
    %118 = arith.addf %32, %117 : vector<8x128xf32>
    %cst_39 = arith.constant 0.000000e+00 : f32
    %119 = vector.broadcast %cst_39 : f32 to vector<8x128xf32>
    %120 = arith.select %115, %97, %119 : vector<8x128xi1>, vector<8x128xf32>
    %121 = arith.addf %32, %120 : vector<8x128xf32>
    %c3_i32_40 = arith.constant 3 : i32
    %122 = vector.broadcast %c3_i32_40 : i32 to vector<8x128xi32>
    %123 = arith.cmpi eq, %92, %122 : vector<8x128xi32>
    %cst_41 = arith.constant 0.000000e+00 : f32
    %124 = vector.broadcast %cst_41 : f32 to vector<8x128xf32>
    %125 = arith.select %123, %96, %124 : vector<8x128xi1>, vector<8x128xf32>
    %126 = arith.addf %32, %125 : vector<8x128xf32>
    %cst_42 = arith.constant 0.000000e+00 : f32
    %127 = vector.broadcast %cst_42 : f32 to vector<8x128xf32>
    %128 = arith.select %123, %97, %127 : vector<8x128xi1>, vector<8x128xf32>
    %129 = arith.addf %32, %128 : vector<8x128xf32>
    %130 = vector.broadcast %cst_22 : f32 to vector<8x128xf32>
    %131 = arith.addf %31, %130 : vector<8x128xf32>
    %132 = vector.broadcast %cst_23 : f32 to vector<8x128xf32>
    %133 = arith.cmpf oge, %131, %132 : vector<8x128xf32>
    %134 = vector.broadcast %cst_23 : f32 to vector<8x128xf32>
    %135 = arith.subf %131, %134 : vector<8x128xf32>
    %136 = arith.select %133, %135, %131 : vector<8x128xi1>, vector<8x128xf32>
    %137 = vector.broadcast %cst_24 : f32 to vector<8x128xf32>
    %138 = arith.addf %26, %137 : vector<8x128xf32>
    %cst_43 = arith.constant 1.000000e+00 : f32
    %cst_44 = arith.constant 0.000000e+00 : f32
    %139 = vector.broadcast %cst_43 : f32 to vector<8x128xf32>
    %140 = vector.broadcast %cst_44 : f32 to vector<8x128xf32>
    %141 = arith.select %133, %139, %140 : vector<8x128xi1>, vector<8x128xf32>
    %142 = arith.addf %138, %141 : vector<8x128xf32>
    %c1_i32_45 = arith.constant 1 : i32
    %c8_i32_46 = arith.constant 8 : i32
    %143 = arith.muli %c1_i32_45, %c8_i32_46 : i32
    %144 = tpu.assume_multiple %143, 8 : i32
    %145 = arith.index_cast %144 : i32 to index
    %c0_47 = arith.constant 0 : index
    %146 = vector.load %arg1[%145, %c0_47] : memref<64x128xf32, #tpu.memory_space<vmem>>, vector<8x128xf32>
    %147 = vector.broadcast %33 : f32 to vector<8x128xf32>
    %148 = arith.subf %147, %142 : vector<8x128xf32>
    %149 = vector.broadcast %37 : f32 to vector<8x128xf32>
    %150 = arith.subf %149, %136 : vector<8x128xf32>
    %151 = arith.mulf %148, %148 : vector<8x128xf32>
    %152 = arith.mulf %150, %150 : vector<8x128xf32>
    %153 = arith.addf %151, %152 : vector<8x128xf32>
    %cst_48 = arith.constant 1.000000e+00 : f32
    %154 = vector.broadcast %cst_48 : f32 to vector<8x128xf32>
    %155 = arith.maximumf %154, %153 : vector<8x128xf32>
    %c0_i32_49 = arith.constant 0 : i32
    %156 = vector.broadcast %c0_i32_49 : i32 to vector<8x128xi32>
    %157 = vector.broadcast %34 : f32 to vector<8x128xf32>
    %158 = arith.subf %157, %142 : vector<8x128xf32>
    %159 = vector.broadcast %38 : f32 to vector<8x128xf32>
    %160 = arith.subf %159, %136 : vector<8x128xf32>
    %161 = arith.mulf %158, %158 : vector<8x128xf32>
    %162 = arith.mulf %160, %160 : vector<8x128xf32>
    %163 = arith.addf %161, %162 : vector<8x128xf32>
    %cst_50 = arith.constant 1.000000e+00 : f32
    %164 = vector.broadcast %cst_50 : f32 to vector<8x128xf32>
    %165 = arith.maximumf %164, %163 : vector<8x128xf32>
    %166 = arith.cmpf olt, %165, %155 : vector<8x128xf32>
    %c1_i32_51 = arith.constant 1 : i32
    %167 = vector.broadcast %c1_i32_51 : i32 to vector<8x128xi32>
    %168 = arith.select %166, %167, %156 : vector<8x128xi1>, vector<8x128xi32>
    %169 = arith.select %166, %165, %155 : vector<8x128xi1>, vector<8x128xf32>
    %170 = vector.broadcast %35 : f32 to vector<8x128xf32>
    %171 = arith.subf %170, %142 : vector<8x128xf32>
    %172 = vector.broadcast %39 : f32 to vector<8x128xf32>
    %173 = arith.subf %172, %136 : vector<8x128xf32>
    %174 = arith.mulf %171, %171 : vector<8x128xf32>
    %175 = arith.mulf %173, %173 : vector<8x128xf32>
    %176 = arith.addf %174, %175 : vector<8x128xf32>
    %cst_52 = arith.constant 1.000000e+00 : f32
    %177 = vector.broadcast %cst_52 : f32 to vector<8x128xf32>
    %178 = arith.maximumf %177, %176 : vector<8x128xf32>
    %179 = arith.cmpf olt, %178, %169 : vector<8x128xf32>
    %c2_i32_53 = arith.constant 2 : i32
    %180 = vector.broadcast %c2_i32_53 : i32 to vector<8x128xi32>
    %181 = arith.select %179, %180, %168 : vector<8x128xi1>, vector<8x128xi32>
    %182 = arith.select %179, %178, %169 : vector<8x128xi1>, vector<8x128xf32>
    %183 = vector.broadcast %36 : f32 to vector<8x128xf32>
    %184 = arith.subf %183, %142 : vector<8x128xf32>
    %185 = vector.broadcast %40 : f32 to vector<8x128xf32>
    %186 = arith.subf %185, %136 : vector<8x128xf32>
    %187 = arith.mulf %184, %184 : vector<8x128xf32>
    %188 = arith.mulf %186, %186 : vector<8x128xf32>
    %189 = arith.addf %187, %188 : vector<8x128xf32>
    %cst_54 = arith.constant 1.000000e+00 : f32
    %190 = vector.broadcast %cst_54 : f32 to vector<8x128xf32>
    %191 = arith.maximumf %190, %189 : vector<8x128xf32>
    %192 = arith.cmpf olt, %191, %182 : vector<8x128xf32>
    %c3_i32_55 = arith.constant 3 : i32
    %193 = vector.broadcast %c3_i32_55 : i32 to vector<8x128xi32>
    %194 = arith.select %192, %193, %181 : vector<8x128xi1>, vector<8x128xi32>
    %195 = arith.select %192, %191, %182 : vector<8x128xi1>, vector<8x128xf32>
    %196 = math.sqrt %195 : vector<8x128xf32>
    %197 = arith.divf %146, %196 : vector<8x128xf32>
    %198 = arith.mulf %142, %197 : vector<8x128xf32>
    %199 = arith.mulf %136, %197 : vector<8x128xf32>
    %c0_i32_56 = arith.constant 0 : i32
    %200 = vector.broadcast %c0_i32_56 : i32 to vector<8x128xi32>
    %201 = arith.cmpi eq, %194, %200 : vector<8x128xi32>
    %cst_57 = arith.constant 0.000000e+00 : f32
    %202 = vector.broadcast %cst_57 : f32 to vector<8x128xf32>
    %203 = arith.select %201, %198, %202 : vector<8x128xi1>, vector<8x128xf32>
    %204 = arith.addf %102, %203 : vector<8x128xf32>
    %cst_58 = arith.constant 0.000000e+00 : f32
    %205 = vector.broadcast %cst_58 : f32 to vector<8x128xf32>
    %206 = arith.select %201, %199, %205 : vector<8x128xi1>, vector<8x128xf32>
    %207 = arith.addf %105, %206 : vector<8x128xf32>
    %c1_i32_59 = arith.constant 1 : i32
    %208 = vector.broadcast %c1_i32_59 : i32 to vector<8x128xi32>
    %209 = arith.cmpi eq, %194, %208 : vector<8x128xi32>
    %cst_60 = arith.constant 0.000000e+00 : f32
    %210 = vector.broadcast %cst_60 : f32 to vector<8x128xf32>
    %211 = arith.select %209, %198, %210 : vector<8x128xi1>, vector<8x128xf32>
    %212 = arith.addf %110, %211 : vector<8x128xf32>
    %cst_61 = arith.constant 0.000000e+00 : f32
    %213 = vector.broadcast %cst_61 : f32 to vector<8x128xf32>
    %214 = arith.select %209, %199, %213 : vector<8x128xi1>, vector<8x128xf32>
    %215 = arith.addf %113, %214 : vector<8x128xf32>
    %c2_i32_62 = arith.constant 2 : i32
    %216 = vector.broadcast %c2_i32_62 : i32 to vector<8x128xi32>
    %217 = arith.cmpi eq, %194, %216 : vector<8x128xi32>
    %cst_63 = arith.constant 0.000000e+00 : f32
    %218 = vector.broadcast %cst_63 : f32 to vector<8x128xf32>
    %219 = arith.select %217, %198, %218 : vector<8x128xi1>, vector<8x128xf32>
    %220 = arith.addf %118, %219 : vector<8x128xf32>
    %cst_64 = arith.constant 0.000000e+00 : f32
    %221 = vector.broadcast %cst_64 : f32 to vector<8x128xf32>
    %222 = arith.select %217, %199, %221 : vector<8x128xi1>, vector<8x128xf32>
    %223 = arith.addf %121, %222 : vector<8x128xf32>
    %c3_i32_65 = arith.constant 3 : i32
    %224 = vector.broadcast %c3_i32_65 : i32 to vector<8x128xi32>
    %225 = arith.cmpi eq, %194, %224 : vector<8x128xi32>
    %cst_66 = arith.constant 0.000000e+00 : f32
    %226 = vector.broadcast %cst_66 : f32 to vector<8x128xf32>
    %227 = arith.select %225, %198, %226 : vector<8x128xi1>, vector<8x128xf32>
    %228 = arith.addf %126, %227 : vector<8x128xf32>
    %cst_67 = arith.constant 0.000000e+00 : f32
    %229 = vector.broadcast %cst_67 : f32 to vector<8x128xf32>
    %230 = arith.select %225, %199, %229 : vector<8x128xi1>, vector<8x128xf32>
    %231 = arith.addf %129, %230 : vector<8x128xf32>
    %232 = vector.broadcast %cst_22 : f32 to vector<8x128xf32>
    %233 = arith.addf %136, %232 : vector<8x128xf32>
    %234 = vector.broadcast %cst_23 : f32 to vector<8x128xf32>
    %235 = arith.cmpf oge, %233, %234 : vector<8x128xf32>
    %236 = vector.broadcast %cst_23 : f32 to vector<8x128xf32>
    %237 = arith.subf %233, %236 : vector<8x128xf32>
    %238 = arith.select %235, %237, %233 : vector<8x128xi1>, vector<8x128xf32>
    %239 = vector.broadcast %cst_24 : f32 to vector<8x128xf32>
    %240 = arith.addf %142, %239 : vector<8x128xf32>
    %cst_68 = arith.constant 1.000000e+00 : f32
    %cst_69 = arith.constant 0.000000e+00 : f32
    %241 = vector.broadcast %cst_68 : f32 to vector<8x128xf32>
    %242 = vector.broadcast %cst_69 : f32 to vector<8x128xf32>
    %243 = arith.select %235, %241, %242 : vector<8x128xi1>, vector<8x128xf32>
    %244 = arith.addf %240, %243 : vector<8x128xf32>
    %c2_i32_70 = arith.constant 2 : i32
    %c8_i32_71 = arith.constant 8 : i32
    %245 = arith.muli %c2_i32_70, %c8_i32_71 : i32
    %246 = tpu.assume_multiple %245, 8 : i32
    %247 = arith.index_cast %246 : i32 to index
    %c0_72 = arith.constant 0 : index
    %248 = vector.load %arg1[%247, %c0_72] : memref<64x128xf32, #tpu.memory_space<vmem>>, vector<8x128xf32>
    %249 = vector.broadcast %33 : f32 to vector<8x128xf32>
    %250 = arith.subf %249, %244 : vector<8x128xf32>
    %251 = vector.broadcast %37 : f32 to vector<8x128xf32>
    %252 = arith.subf %251, %238 : vector<8x128xf32>
    %253 = arith.mulf %250, %250 : vector<8x128xf32>
    %254 = arith.mulf %252, %252 : vector<8x128xf32>
    %255 = arith.addf %253, %254 : vector<8x128xf32>
    %cst_73 = arith.constant 1.000000e+00 : f32
    %256 = vector.broadcast %cst_73 : f32 to vector<8x128xf32>
    %257 = arith.maximumf %256, %255 : vector<8x128xf32>
    %c0_i32_74 = arith.constant 0 : i32
    %258 = vector.broadcast %c0_i32_74 : i32 to vector<8x128xi32>
    %259 = vector.broadcast %34 : f32 to vector<8x128xf32>
    %260 = arith.subf %259, %244 : vector<8x128xf32>
    %261 = vector.broadcast %38 : f32 to vector<8x128xf32>
    %262 = arith.subf %261, %238 : vector<8x128xf32>
    %263 = arith.mulf %260, %260 : vector<8x128xf32>
    %264 = arith.mulf %262, %262 : vector<8x128xf32>
    %265 = arith.addf %263, %264 : vector<8x128xf32>
    %cst_75 = arith.constant 1.000000e+00 : f32
    %266 = vector.broadcast %cst_75 : f32 to vector<8x128xf32>
    %267 = arith.maximumf %266, %265 : vector<8x128xf32>
    %268 = arith.cmpf olt, %267, %257 : vector<8x128xf32>
    %c1_i32_76 = arith.constant 1 : i32
    %269 = vector.broadcast %c1_i32_76 : i32 to vector<8x128xi32>
    %270 = arith.select %268, %269, %258 : vector<8x128xi1>, vector<8x128xi32>
    %271 = arith.select %268, %267, %257 : vector<8x128xi1>, vector<8x128xf32>
    %272 = vector.broadcast %35 : f32 to vector<8x128xf32>
    %273 = arith.subf %272, %244 : vector<8x128xf32>
    %274 = vector.broadcast %39 : f32 to vector<8x128xf32>
    %275 = arith.subf %274, %238 : vector<8x128xf32>
    %276 = arith.mulf %273, %273 : vector<8x128xf32>
    %277 = arith.mulf %275, %275 : vector<8x128xf32>
    %278 = arith.addf %276, %277 : vector<8x128xf32>
    %cst_77 = arith.constant 1.000000e+00 : f32
    %279 = vector.broadcast %cst_77 : f32 to vector<8x128xf32>
    %280 = arith.maximumf %279, %278 : vector<8x128xf32>
    %281 = arith.cmpf olt, %280, %271 : vector<8x128xf32>
    %c2_i32_78 = arith.constant 2 : i32
    %282 = vector.broadcast %c2_i32_78 : i32 to vector<8x128xi32>
    %283 = arith.select %281, %282, %270 : vector<8x128xi1>, vector<8x128xi32>
    %284 = arith.select %281, %280, %271 : vector<8x128xi1>, vector<8x128xf32>
    %285 = vector.broadcast %36 : f32 to vector<8x128xf32>
    %286 = arith.subf %285, %244 : vector<8x128xf32>
    %287 = vector.broadcast %40 : f32 to vector<8x128xf32>
    %288 = arith.subf %287, %238 : vector<8x128xf32>
    %289 = arith.mulf %286, %286 : vector<8x128xf32>
    %290 = arith.mulf %288, %288 : vector<8x128xf32>
    %291 = arith.addf %289, %290 : vector<8x128xf32>
    %cst_79 = arith.constant 1.000000e+00 : f32
    %292 = vector.broadcast %cst_79 : f32 to vector<8x128xf32>
    %293 = arith.maximumf %292, %291 : vector<8x128xf32>
    %294 = arith.cmpf olt, %293, %284 : vector<8x128xf32>
    %c3_i32_80 = arith.constant 3 : i32
    %295 = vector.broadcast %c3_i32_80 : i32 to vector<8x128xi32>
    %296 = arith.select %294, %295, %283 : vector<8x128xi1>, vector<8x128xi32>
    %297 = arith.select %294, %293, %284 : vector<8x128xi1>, vector<8x128xf32>
    %298 = math.sqrt %297 : vector<8x128xf32>
    %299 = arith.divf %248, %298 : vector<8x128xf32>
    %300 = arith.mulf %244, %299 : vector<8x128xf32>
    %301 = arith.mulf %238, %299 : vector<8x128xf32>
    %c0_i32_81 = arith.constant 0 : i32
    %302 = vector.broadcast %c0_i32_81 : i32 to vector<8x128xi32>
    %303 = arith.cmpi eq, %296, %302 : vector<8x128xi32>
    %cst_82 = arith.constant 0.000000e+00 : f32
    %304 = vector.broadcast %cst_82 : f32 to vector<8x128xf32>
    %305 = arith.select %303, %300, %304 : vector<8x128xi1>, vector<8x128xf32>
    %306 = arith.addf %204, %305 : vector<8x128xf32>
    %cst_83 = arith.constant 0.000000e+00 : f32
    %307 = vector.broadcast %cst_83 : f32 to vector<8x128xf32>
    %308 = arith.select %303, %301, %307 : vector<8x128xi1>, vector<8x128xf32>
    %309 = arith.addf %207, %308 : vector<8x128xf32>
    %c1_i32_84 = arith.constant 1 : i32
    %310 = vector.broadcast %c1_i32_84 : i32 to vector<8x128xi32>
    %311 = arith.cmpi eq, %296, %310 : vector<8x128xi32>
    %cst_85 = arith.constant 0.000000e+00 : f32
    %312 = vector.broadcast %cst_85 : f32 to vector<8x128xf32>
    %313 = arith.select %311, %300, %312 : vector<8x128xi1>, vector<8x128xf32>
    %314 = arith.addf %212, %313 : vector<8x128xf32>
    %cst_86 = arith.constant 0.000000e+00 : f32
    %315 = vector.broadcast %cst_86 : f32 to vector<8x128xf32>
    %316 = arith.select %311, %301, %315 : vector<8x128xi1>, vector<8x128xf32>
    %317 = arith.addf %215, %316 : vector<8x128xf32>
    %c2_i32_87 = arith.constant 2 : i32
    %318 = vector.broadcast %c2_i32_87 : i32 to vector<8x128xi32>
    %319 = arith.cmpi eq, %296, %318 : vector<8x128xi32>
    %cst_88 = arith.constant 0.000000e+00 : f32
    %320 = vector.broadcast %cst_88 : f32 to vector<8x128xf32>
    %321 = arith.select %319, %300, %320 : vector<8x128xi1>, vector<8x128xf32>
    %322 = arith.addf %220, %321 : vector<8x128xf32>
    %cst_89 = arith.constant 0.000000e+00 : f32
    %323 = vector.broadcast %cst_89 : f32 to vector<8x128xf32>
    %324 = arith.select %319, %301, %323 : vector<8x128xi1>, vector<8x128xf32>
    %325 = arith.addf %223, %324 : vector<8x128xf32>
    %c3_i32_90 = arith.constant 3 : i32
    %326 = vector.broadcast %c3_i32_90 : i32 to vector<8x128xi32>
    %327 = arith.cmpi eq, %296, %326 : vector<8x128xi32>
    %cst_91 = arith.constant 0.000000e+00 : f32
    %328 = vector.broadcast %cst_91 : f32 to vector<8x128xf32>
    %329 = arith.select %327, %300, %328 : vector<8x128xi1>, vector<8x128xf32>
    %330 = arith.addf %228, %329 : vector<8x128xf32>
    %cst_92 = arith.constant 0.000000e+00 : f32
    %331 = vector.broadcast %cst_92 : f32 to vector<8x128xf32>
    %332 = arith.select %327, %301, %331 : vector<8x128xi1>, vector<8x128xf32>
    %333 = arith.addf %231, %332 : vector<8x128xf32>
    %334 = vector.broadcast %cst_22 : f32 to vector<8x128xf32>
    %335 = arith.addf %238, %334 : vector<8x128xf32>
    %336 = vector.broadcast %cst_23 : f32 to vector<8x128xf32>
    %337 = arith.cmpf oge, %335, %336 : vector<8x128xf32>
    %338 = vector.broadcast %cst_23 : f32 to vector<8x128xf32>
    %339 = arith.subf %335, %338 : vector<8x128xf32>
    %340 = arith.select %337, %339, %335 : vector<8x128xi1>, vector<8x128xf32>
    %341 = vector.broadcast %cst_24 : f32 to vector<8x128xf32>
    %342 = arith.addf %244, %341 : vector<8x128xf32>
    %cst_93 = arith.constant 1.000000e+00 : f32
    %cst_94 = arith.constant 0.000000e+00 : f32
    %343 = vector.broadcast %cst_93 : f32 to vector<8x128xf32>
    %344 = vector.broadcast %cst_94 : f32 to vector<8x128xf32>
    %345 = arith.select %337, %343, %344 : vector<8x128xi1>, vector<8x128xf32>
    %346 = arith.addf %342, %345 : vector<8x128xf32>
    %c3_i32_95 = arith.constant 3 : i32
    %c8_i32_96 = arith.constant 8 : i32
    %347 = arith.muli %c3_i32_95, %c8_i32_96 : i32
    %348 = tpu.assume_multiple %347, 8 : i32
    %349 = arith.index_cast %348 : i32 to index
    %c0_97 = arith.constant 0 : index
    %350 = vector.load %arg1[%349, %c0_97] : memref<64x128xf32, #tpu.memory_space<vmem>>, vector<8x128xf32>
    %351 = vector.broadcast %33 : f32 to vector<8x128xf32>
    %352 = arith.subf %351, %346 : vector<8x128xf32>
    %353 = vector.broadcast %37 : f32 to vector<8x128xf32>
    %354 = arith.subf %353, %340 : vector<8x128xf32>
    %355 = arith.mulf %352, %352 : vector<8x128xf32>
    %356 = arith.mulf %354, %354 : vector<8x128xf32>
    %357 = arith.addf %355, %356 : vector<8x128xf32>
    %cst_98 = arith.constant 1.000000e+00 : f32
    %358 = vector.broadcast %cst_98 : f32 to vector<8x128xf32>
    %359 = arith.maximumf %358, %357 : vector<8x128xf32>
    %c0_i32_99 = arith.constant 0 : i32
    %360 = vector.broadcast %c0_i32_99 : i32 to vector<8x128xi32>
    %361 = vector.broadcast %34 : f32 to vector<8x128xf32>
    %362 = arith.subf %361, %346 : vector<8x128xf32>
    %363 = vector.broadcast %38 : f32 to vector<8x128xf32>
    %364 = arith.subf %363, %340 : vector<8x128xf32>
    %365 = arith.mulf %362, %362 : vector<8x128xf32>
    %366 = arith.mulf %364, %364 : vector<8x128xf32>
    %367 = arith.addf %365, %366 : vector<8x128xf32>
    %cst_100 = arith.constant 1.000000e+00 : f32
    %368 = vector.broadcast %cst_100 : f32 to vector<8x128xf32>
    %369 = arith.maximumf %368, %367 : vector<8x128xf32>
    %370 = arith.cmpf olt, %369, %359 : vector<8x128xf32>
    %c1_i32_101 = arith.constant 1 : i32
    %371 = vector.broadcast %c1_i32_101 : i32 to vector<8x128xi32>
    %372 = arith.select %370, %371, %360 : vector<8x128xi1>, vector<8x128xi32>
    %373 = arith.select %370, %369, %359 : vector<8x128xi1>, vector<8x128xf32>
    %374 = vector.broadcast %35 : f32 to vector<8x128xf32>
    %375 = arith.subf %374, %346 : vector<8x128xf32>
    %376 = vector.broadcast %39 : f32 to vector<8x128xf32>
    %377 = arith.subf %376, %340 : vector<8x128xf32>
    %378 = arith.mulf %375, %375 : vector<8x128xf32>
    %379 = arith.mulf %377, %377 : vector<8x128xf32>
    %380 = arith.addf %378, %379 : vector<8x128xf32>
    %cst_102 = arith.constant 1.000000e+00 : f32
    %381 = vector.broadcast %cst_102 : f32 to vector<8x128xf32>
    %382 = arith.maximumf %381, %380 : vector<8x128xf32>
    %383 = arith.cmpf olt, %382, %373 : vector<8x128xf32>
    %c2_i32_103 = arith.constant 2 : i32
    %384 = vector.broadcast %c2_i32_103 : i32 to vector<8x128xi32>
    %385 = arith.select %383, %384, %372 : vector<8x128xi1>, vector<8x128xi32>
    %386 = arith.select %383, %382, %373 : vector<8x128xi1>, vector<8x128xf32>
    %387 = vector.broadcast %36 : f32 to vector<8x128xf32>
    %388 = arith.subf %387, %346 : vector<8x128xf32>
    %389 = vector.broadcast %40 : f32 to vector<8x128xf32>
    %390 = arith.subf %389, %340 : vector<8x128xf32>
    %391 = arith.mulf %388, %388 : vector<8x128xf32>
    %392 = arith.mulf %390, %390 : vector<8x128xf32>
    %393 = arith.addf %391, %392 : vector<8x128xf32>
    %cst_104 = arith.constant 1.000000e+00 : f32
    %394 = vector.broadcast %cst_104 : f32 to vector<8x128xf32>
    %395 = arith.maximumf %394, %393 : vector<8x128xf32>
    %396 = arith.cmpf olt, %395, %386 : vector<8x128xf32>
    %c3_i32_105 = arith.constant 3 : i32
    %397 = vector.broadcast %c3_i32_105 : i32 to vector<8x128xi32>
    %398 = arith.select %396, %397, %385 : vector<8x128xi1>, vector<8x128xi32>
    %399 = arith.select %396, %395, %386 : vector<8x128xi1>, vector<8x128xf32>
    %400 = math.sqrt %399 : vector<8x128xf32>
    %401 = arith.divf %350, %400 : vector<8x128xf32>
    %402 = arith.mulf %346, %401 : vector<8x128xf32>
    %403 = arith.mulf %340, %401 : vector<8x128xf32>
    %c0_i32_106 = arith.constant 0 : i32
    %404 = vector.broadcast %c0_i32_106 : i32 to vector<8x128xi32>
    %405 = arith.cmpi eq, %398, %404 : vector<8x128xi32>
    %cst_107 = arith.constant 0.000000e+00 : f32
    %406 = vector.broadcast %cst_107 : f32 to vector<8x128xf32>
    %407 = arith.select %405, %402, %406 : vector<8x128xi1>, vector<8x128xf32>
    %408 = arith.addf %306, %407 : vector<8x128xf32>
    %cst_108 = arith.constant 0.000000e+00 : f32
    %409 = vector.broadcast %cst_108 : f32 to vector<8x128xf32>
    %410 = arith.select %405, %403, %409 : vector<8x128xi1>, vector<8x128xf32>
    %411 = arith.addf %309, %410 : vector<8x128xf32>
    %c1_i32_109 = arith.constant 1 : i32
    %412 = vector.broadcast %c1_i32_109 : i32 to vector<8x128xi32>
    %413 = arith.cmpi eq, %398, %412 : vector<8x128xi32>
    %cst_110 = arith.constant 0.000000e+00 : f32
    %414 = vector.broadcast %cst_110 : f32 to vector<8x128xf32>
    %415 = arith.select %413, %402, %414 : vector<8x128xi1>, vector<8x128xf32>
    %416 = arith.addf %314, %415 : vector<8x128xf32>
    %cst_111 = arith.constant 0.000000e+00 : f32
    %417 = vector.broadcast %cst_111 : f32 to vector<8x128xf32>
    %418 = arith.select %413, %403, %417 : vector<8x128xi1>, vector<8x128xf32>
    %419 = arith.addf %317, %418 : vector<8x128xf32>
    %c2_i32_112 = arith.constant 2 : i32
    %420 = vector.broadcast %c2_i32_112 : i32 to vector<8x128xi32>
    %421 = arith.cmpi eq, %398, %420 : vector<8x128xi32>
    %cst_113 = arith.constant 0.000000e+00 : f32
    %422 = vector.broadcast %cst_113 : f32 to vector<8x128xf32>
    %423 = arith.select %421, %402, %422 : vector<8x128xi1>, vector<8x128xf32>
    %424 = arith.addf %322, %423 : vector<8x128xf32>
    %cst_114 = arith.constant 0.000000e+00 : f32
    %425 = vector.broadcast %cst_114 : f32 to vector<8x128xf32>
    %426 = arith.select %421, %403, %425 : vector<8x128xi1>, vector<8x128xf32>
    %427 = arith.addf %325, %426 : vector<8x128xf32>
    %c3_i32_115 = arith.constant 3 : i32
    %428 = vector.broadcast %c3_i32_115 : i32 to vector<8x128xi32>
    %429 = arith.cmpi eq, %398, %428 : vector<8x128xi32>
    %cst_116 = arith.constant 0.000000e+00 : f32
    %430 = vector.broadcast %cst_116 : f32 to vector<8x128xf32>
    %431 = arith.select %429, %402, %430 : vector<8x128xi1>, vector<8x128xf32>
    %432 = arith.addf %330, %431 : vector<8x128xf32>
    %cst_117 = arith.constant 0.000000e+00 : f32
    %433 = vector.broadcast %cst_117 : f32 to vector<8x128xf32>
    %434 = arith.select %429, %403, %433 : vector<8x128xi1>, vector<8x128xf32>
    %435 = arith.addf %333, %434 : vector<8x128xf32>
    %436 = vector.broadcast %cst_22 : f32 to vector<8x128xf32>
    %437 = arith.addf %340, %436 : vector<8x128xf32>
    %438 = vector.broadcast %cst_23 : f32 to vector<8x128xf32>
    %439 = arith.cmpf oge, %437, %438 : vector<8x128xf32>
    %440 = vector.broadcast %cst_23 : f32 to vector<8x128xf32>
    %441 = arith.subf %437, %440 : vector<8x128xf32>
    %442 = arith.select %439, %441, %437 : vector<8x128xi1>, vector<8x128xf32>
    %443 = vector.broadcast %cst_24 : f32 to vector<8x128xf32>
    %444 = arith.addf %346, %443 : vector<8x128xf32>
    %cst_118 = arith.constant 1.000000e+00 : f32
    %cst_119 = arith.constant 0.000000e+00 : f32
    %445 = vector.broadcast %cst_118 : f32 to vector<8x128xf32>
    %446 = vector.broadcast %cst_119 : f32 to vector<8x128xf32>
    %447 = arith.select %439, %445, %446 : vector<8x128xi1>, vector<8x128xf32>
    %448 = arith.addf %444, %447 : vector<8x128xf32>
    %c4_i32 = arith.constant 4 : i32
    %c8_i32_120 = arith.constant 8 : i32
    %449 = arith.muli %c4_i32, %c8_i32_120 : i32
    %450 = tpu.assume_multiple %449, 8 : i32
    %451 = arith.index_cast %450 : i32 to index
    %c0_121 = arith.constant 0 : index
    %452 = vector.load %arg1[%451, %c0_121] : memref<64x128xf32, #tpu.memory_space<vmem>>, vector<8x128xf32>
    %453 = vector.broadcast %33 : f32 to vector<8x128xf32>
    %454 = arith.subf %453, %448 : vector<8x128xf32>
    %455 = vector.broadcast %37 : f32 to vector<8x128xf32>
    %456 = arith.subf %455, %442 : vector<8x128xf32>
    %457 = arith.mulf %454, %454 : vector<8x128xf32>
    %458 = arith.mulf %456, %456 : vector<8x128xf32>
    %459 = arith.addf %457, %458 : vector<8x128xf32>
    %cst_122 = arith.constant 1.000000e+00 : f32
    %460 = vector.broadcast %cst_122 : f32 to vector<8x128xf32>
    %461 = arith.maximumf %460, %459 : vector<8x128xf32>
    %c0_i32_123 = arith.constant 0 : i32
    %462 = vector.broadcast %c0_i32_123 : i32 to vector<8x128xi32>
    %463 = vector.broadcast %34 : f32 to vector<8x128xf32>
    %464 = arith.subf %463, %448 : vector<8x128xf32>
    %465 = vector.broadcast %38 : f32 to vector<8x128xf32>
    %466 = arith.subf %465, %442 : vector<8x128xf32>
    %467 = arith.mulf %464, %464 : vector<8x128xf32>
    %468 = arith.mulf %466, %466 : vector<8x128xf32>
    %469 = arith.addf %467, %468 : vector<8x128xf32>
    %cst_124 = arith.constant 1.000000e+00 : f32
    %470 = vector.broadcast %cst_124 : f32 to vector<8x128xf32>
    %471 = arith.maximumf %470, %469 : vector<8x128xf32>
    %472 = arith.cmpf olt, %471, %461 : vector<8x128xf32>
    %c1_i32_125 = arith.constant 1 : i32
    %473 = vector.broadcast %c1_i32_125 : i32 to vector<8x128xi32>
    %474 = arith.select %472, %473, %462 : vector<8x128xi1>, vector<8x128xi32>
    %475 = arith.select %472, %471, %461 : vector<8x128xi1>, vector<8x128xf32>
    %476 = vector.broadcast %35 : f32 to vector<8x128xf32>
    %477 = arith.subf %476, %448 : vector<8x128xf32>
    %478 = vector.broadcast %39 : f32 to vector<8x128xf32>
    %479 = arith.subf %478, %442 : vector<8x128xf32>
    %480 = arith.mulf %477, %477 : vector<8x128xf32>
    %481 = arith.mulf %479, %479 : vector<8x128xf32>
    %482 = arith.addf %480, %481 : vector<8x128xf32>
    %cst_126 = arith.constant 1.000000e+00 : f32
    %483 = vector.broadcast %cst_126 : f32 to vector<8x128xf32>
    %484 = arith.maximumf %483, %482 : vector<8x128xf32>
    %485 = arith.cmpf olt, %484, %475 : vector<8x128xf32>
    %c2_i32_127 = arith.constant 2 : i32
    %486 = vector.broadcast %c2_i32_127 : i32 to vector<8x128xi32>
    %487 = arith.select %485, %486, %474 : vector<8x128xi1>, vector<8x128xi32>
    %488 = arith.select %485, %484, %475 : vector<8x128xi1>, vector<8x128xf32>
    %489 = vector.broadcast %36 : f32 to vector<8x128xf32>
    %490 = arith.subf %489, %448 : vector<8x128xf32>
    %491 = vector.broadcast %40 : f32 to vector<8x128xf32>
    %492 = arith.subf %491, %442 : vector<8x128xf32>
    %493 = arith.mulf %490, %490 : vector<8x128xf32>
    %494 = arith.mulf %492, %492 : vector<8x128xf32>
    %495 = arith.addf %493, %494 : vector<8x128xf32>
    %cst_128 = arith.constant 1.000000e+00 : f32
    %496 = vector.broadcast %cst_128 : f32 to vector<8x128xf32>
    %497 = arith.maximumf %496, %495 : vector<8x128xf32>
    %498 = arith.cmpf olt, %497, %488 : vector<8x128xf32>
    %c3_i32_129 = arith.constant 3 : i32
    %499 = vector.broadcast %c3_i32_129 : i32 to vector<8x128xi32>
    %500 = arith.select %498, %499, %487 : vector<8x128xi1>, vector<8x128xi32>
    %501 = arith.select %498, %497, %488 : vector<8x128xi1>, vector<8x128xf32>
    %502 = math.sqrt %501 : vector<8x128xf32>
    %503 = arith.divf %452, %502 : vector<8x128xf32>
    %504 = arith.mulf %448, %503 : vector<8x128xf32>
    %505 = arith.mulf %442, %503 : vector<8x128xf32>
    %c0_i32_130 = arith.constant 0 : i32
    %506 = vector.broadcast %c0_i32_130 : i32 to vector<8x128xi32>
    %507 = arith.cmpi eq, %500, %506 : vector<8x128xi32>
    %cst_131 = arith.constant 0.000000e+00 : f32
    %508 = vector.broadcast %cst_131 : f32 to vector<8x128xf32>
    %509 = arith.select %507, %504, %508 : vector<8x128xi1>, vector<8x128xf32>
    %510 = arith.addf %408, %509 : vector<8x128xf32>
    %cst_132 = arith.constant 0.000000e+00 : f32
    %511 = vector.broadcast %cst_132 : f32 to vector<8x128xf32>
    %512 = arith.select %507, %505, %511 : vector<8x128xi1>, vector<8x128xf32>
    %513 = arith.addf %411, %512 : vector<8x128xf32>
    %c1_i32_133 = arith.constant 1 : i32
    %514 = vector.broadcast %c1_i32_133 : i32 to vector<8x128xi32>
    %515 = arith.cmpi eq, %500, %514 : vector<8x128xi32>
    %cst_134 = arith.constant 0.000000e+00 : f32
    %516 = vector.broadcast %cst_134 : f32 to vector<8x128xf32>
    %517 = arith.select %515, %504, %516 : vector<8x128xi1>, vector<8x128xf32>
    %518 = arith.addf %416, %517 : vector<8x128xf32>
    %cst_135 = arith.constant 0.000000e+00 : f32
    %519 = vector.broadcast %cst_135 : f32 to vector<8x128xf32>
    %520 = arith.select %515, %505, %519 : vector<8x128xi1>, vector<8x128xf32>
    %521 = arith.addf %419, %520 : vector<8x128xf32>
    %c2_i32_136 = arith.constant 2 : i32
    %522 = vector.broadcast %c2_i32_136 : i32 to vector<8x128xi32>
    %523 = arith.cmpi eq, %500, %522 : vector<8x128xi32>
    %cst_137 = arith.constant 0.000000e+00 : f32
    %524 = vector.broadcast %cst_137 : f32 to vector<8x128xf32>
    %525 = arith.select %523, %504, %524 : vector<8x128xi1>, vector<8x128xf32>
    %526 = arith.addf %424, %525 : vector<8x128xf32>
    %cst_138 = arith.constant 0.000000e+00 : f32
    %527 = vector.broadcast %cst_138 : f32 to vector<8x128xf32>
    %528 = arith.select %523, %505, %527 : vector<8x128xi1>, vector<8x128xf32>
    %529 = arith.addf %427, %528 : vector<8x128xf32>
    %c3_i32_139 = arith.constant 3 : i32
    %530 = vector.broadcast %c3_i32_139 : i32 to vector<8x128xi32>
    %531 = arith.cmpi eq, %500, %530 : vector<8x128xi32>
    %cst_140 = arith.constant 0.000000e+00 : f32
    %532 = vector.broadcast %cst_140 : f32 to vector<8x128xf32>
    %533 = arith.select %531, %504, %532 : vector<8x128xi1>, vector<8x128xf32>
    %534 = arith.addf %432, %533 : vector<8x128xf32>
    %cst_141 = arith.constant 0.000000e+00 : f32
    %535 = vector.broadcast %cst_141 : f32 to vector<8x128xf32>
    %536 = arith.select %531, %505, %535 : vector<8x128xi1>, vector<8x128xf32>
    %537 = arith.addf %435, %536 : vector<8x128xf32>
    %538 = vector.broadcast %cst_22 : f32 to vector<8x128xf32>
    %539 = arith.addf %442, %538 : vector<8x128xf32>
    %540 = vector.broadcast %cst_23 : f32 to vector<8x128xf32>
    %541 = arith.cmpf oge, %539, %540 : vector<8x128xf32>
    %542 = vector.broadcast %cst_23 : f32 to vector<8x128xf32>
    %543 = arith.subf %539, %542 : vector<8x128xf32>
    %544 = arith.select %541, %543, %539 : vector<8x128xi1>, vector<8x128xf32>
    %545 = vector.broadcast %cst_24 : f32 to vector<8x128xf32>
    %546 = arith.addf %448, %545 : vector<8x128xf32>
    %cst_142 = arith.constant 1.000000e+00 : f32
    %cst_143 = arith.constant 0.000000e+00 : f32
    %547 = vector.broadcast %cst_142 : f32 to vector<8x128xf32>
    %548 = vector.broadcast %cst_143 : f32 to vector<8x128xf32>
    %549 = arith.select %541, %547, %548 : vector<8x128xi1>, vector<8x128xf32>
    %550 = arith.addf %546, %549 : vector<8x128xf32>
    %c5_i32 = arith.constant 5 : i32
    %c8_i32_144 = arith.constant 8 : i32
    %551 = arith.muli %c5_i32, %c8_i32_144 : i32
    %552 = tpu.assume_multiple %551, 8 : i32
    %553 = arith.index_cast %552 : i32 to index
    %c0_145 = arith.constant 0 : index
    %554 = vector.load %arg1[%553, %c0_145] : memref<64x128xf32, #tpu.memory_space<vmem>>, vector<8x128xf32>
    %555 = vector.broadcast %33 : f32 to vector<8x128xf32>
    %556 = arith.subf %555, %550 : vector<8x128xf32>
    %557 = vector.broadcast %37 : f32 to vector<8x128xf32>
    %558 = arith.subf %557, %544 : vector<8x128xf32>
    %559 = arith.mulf %556, %556 : vector<8x128xf32>
    %560 = arith.mulf %558, %558 : vector<8x128xf32>
    %561 = arith.addf %559, %560 : vector<8x128xf32>
    %cst_146 = arith.constant 1.000000e+00 : f32
    %562 = vector.broadcast %cst_146 : f32 to vector<8x128xf32>
    %563 = arith.maximumf %562, %561 : vector<8x128xf32>
    %c0_i32_147 = arith.constant 0 : i32
    %564 = vector.broadcast %c0_i32_147 : i32 to vector<8x128xi32>
    %565 = vector.broadcast %34 : f32 to vector<8x128xf32>
    %566 = arith.subf %565, %550 : vector<8x128xf32>
    %567 = vector.broadcast %38 : f32 to vector<8x128xf32>
    %568 = arith.subf %567, %544 : vector<8x128xf32>
    %569 = arith.mulf %566, %566 : vector<8x128xf32>
    %570 = arith.mulf %568, %568 : vector<8x128xf32>
    %571 = arith.addf %569, %570 : vector<8x128xf32>
    %cst_148 = arith.constant 1.000000e+00 : f32
    %572 = vector.broadcast %cst_148 : f32 to vector<8x128xf32>
    %573 = arith.maximumf %572, %571 : vector<8x128xf32>
    %574 = arith.cmpf olt, %573, %563 : vector<8x128xf32>
    %c1_i32_149 = arith.constant 1 : i32
    %575 = vector.broadcast %c1_i32_149 : i32 to vector<8x128xi32>
    %576 = arith.select %574, %575, %564 : vector<8x128xi1>, vector<8x128xi32>
    %577 = arith.select %574, %573, %563 : vector<8x128xi1>, vector<8x128xf32>
    %578 = vector.broadcast %35 : f32 to vector<8x128xf32>
    %579 = arith.subf %578, %550 : vector<8x128xf32>
    %580 = vector.broadcast %39 : f32 to vector<8x128xf32>
    %581 = arith.subf %580, %544 : vector<8x128xf32>
    %582 = arith.mulf %579, %579 : vector<8x128xf32>
    %583 = arith.mulf %581, %581 : vector<8x128xf32>
    %584 = arith.addf %582, %583 : vector<8x128xf32>
    %cst_150 = arith.constant 1.000000e+00 : f32
    %585 = vector.broadcast %cst_150 : f32 to vector<8x128xf32>
    %586 = arith.maximumf %585, %584 : vector<8x128xf32>
    %587 = arith.cmpf olt, %586, %577 : vector<8x128xf32>
    %c2_i32_151 = arith.constant 2 : i32
    %588 = vector.broadcast %c2_i32_151 : i32 to vector<8x128xi32>
    %589 = arith.select %587, %588, %576 : vector<8x128xi1>, vector<8x128xi32>
    %590 = arith.select %587, %586, %577 : vector<8x128xi1>, vector<8x128xf32>
    %591 = vector.broadcast %36 : f32 to vector<8x128xf32>
    %592 = arith.subf %591, %550 : vector<8x128xf32>
    %593 = vector.broadcast %40 : f32 to vector<8x128xf32>
    %594 = arith.subf %593, %544 : vector<8x128xf32>
    %595 = arith.mulf %592, %592 : vector<8x128xf32>
    %596 = arith.mulf %594, %594 : vector<8x128xf32>
    %597 = arith.addf %595, %596 : vector<8x128xf32>
    %cst_152 = arith.constant 1.000000e+00 : f32
    %598 = vector.broadcast %cst_152 : f32 to vector<8x128xf32>
    %599 = arith.maximumf %598, %597 : vector<8x128xf32>
    %600 = arith.cmpf olt, %599, %590 : vector<8x128xf32>
    %c3_i32_153 = arith.constant 3 : i32
    %601 = vector.broadcast %c3_i32_153 : i32 to vector<8x128xi32>
    %602 = arith.select %600, %601, %589 : vector<8x128xi1>, vector<8x128xi32>
    %603 = arith.select %600, %599, %590 : vector<8x128xi1>, vector<8x128xf32>
    %604 = math.sqrt %603 : vector<8x128xf32>
    %605 = arith.divf %554, %604 : vector<8x128xf32>
    %606 = arith.mulf %550, %605 : vector<8x128xf32>
    %607 = arith.mulf %544, %605 : vector<8x128xf32>
    %c0_i32_154 = arith.constant 0 : i32
    %608 = vector.broadcast %c0_i32_154 : i32 to vector<8x128xi32>
    %609 = arith.cmpi eq, %602, %608 : vector<8x128xi32>
    %cst_155 = arith.constant 0.000000e+00 : f32
    %610 = vector.broadcast %cst_155 : f32 to vector<8x128xf32>
    %611 = arith.select %609, %606, %610 : vector<8x128xi1>, vector<8x128xf32>
    %612 = arith.addf %510, %611 : vector<8x128xf32>
    %cst_156 = arith.constant 0.000000e+00 : f32
    %613 = vector.broadcast %cst_156 : f32 to vector<8x128xf32>
    %614 = arith.select %609, %607, %613 : vector<8x128xi1>, vector<8x128xf32>
    %615 = arith.addf %513, %614 : vector<8x128xf32>
    %c1_i32_157 = arith.constant 1 : i32
    %616 = vector.broadcast %c1_i32_157 : i32 to vector<8x128xi32>
    %617 = arith.cmpi eq, %602, %616 : vector<8x128xi32>
    %cst_158 = arith.constant 0.000000e+00 : f32
    %618 = vector.broadcast %cst_158 : f32 to vector<8x128xf32>
    %619 = arith.select %617, %606, %618 : vector<8x128xi1>, vector<8x128xf32>
    %620 = arith.addf %518, %619 : vector<8x128xf32>
    %cst_159 = arith.constant 0.000000e+00 : f32
    %621 = vector.broadcast %cst_159 : f32 to vector<8x128xf32>
    %622 = arith.select %617, %607, %621 : vector<8x128xi1>, vector<8x128xf32>
    %623 = arith.addf %521, %622 : vector<8x128xf32>
    %c2_i32_160 = arith.constant 2 : i32
    %624 = vector.broadcast %c2_i32_160 : i32 to vector<8x128xi32>
    %625 = arith.cmpi eq, %602, %624 : vector<8x128xi32>
    %cst_161 = arith.constant 0.000000e+00 : f32
    %626 = vector.broadcast %cst_161 : f32 to vector<8x128xf32>
    %627 = arith.select %625, %606, %626 : vector<8x128xi1>, vector<8x128xf32>
    %628 = arith.addf %526, %627 : vector<8x128xf32>
    %cst_162 = arith.constant 0.000000e+00 : f32
    %629 = vector.broadcast %cst_162 : f32 to vector<8x128xf32>
    %630 = arith.select %625, %607, %629 : vector<8x128xi1>, vector<8x128xf32>
    %631 = arith.addf %529, %630 : vector<8x128xf32>
    %c3_i32_163 = arith.constant 3 : i32
    %632 = vector.broadcast %c3_i32_163 : i32 to vector<8x128xi32>
    %633 = arith.cmpi eq, %602, %632 : vector<8x128xi32>
    %cst_164 = arith.constant 0.000000e+00 : f32
    %634 = vector.broadcast %cst_164 : f32 to vector<8x128xf32>
    %635 = arith.select %633, %606, %634 : vector<8x128xi1>, vector<8x128xf32>
    %636 = arith.addf %534, %635 : vector<8x128xf32>
    %cst_165 = arith.constant 0.000000e+00 : f32
    %637 = vector.broadcast %cst_165 : f32 to vector<8x128xf32>
    %638 = arith.select %633, %607, %637 : vector<8x128xi1>, vector<8x128xf32>
    %639 = arith.addf %537, %638 : vector<8x128xf32>
    %640 = vector.broadcast %cst_22 : f32 to vector<8x128xf32>
    %641 = arith.addf %544, %640 : vector<8x128xf32>
    %642 = vector.broadcast %cst_23 : f32 to vector<8x128xf32>
    %643 = arith.cmpf oge, %641, %642 : vector<8x128xf32>
    %644 = vector.broadcast %cst_23 : f32 to vector<8x128xf32>
    %645 = arith.subf %641, %644 : vector<8x128xf32>
    %646 = arith.select %643, %645, %641 : vector<8x128xi1>, vector<8x128xf32>
    %647 = vector.broadcast %cst_24 : f32 to vector<8x128xf32>
    %648 = arith.addf %550, %647 : vector<8x128xf32>
    %cst_166 = arith.constant 1.000000e+00 : f32
    %cst_167 = arith.constant 0.000000e+00 : f32
    %649 = vector.broadcast %cst_166 : f32 to vector<8x128xf32>
    %650 = vector.broadcast %cst_167 : f32 to vector<8x128xf32>
    %651 = arith.select %643, %649, %650 : vector<8x128xi1>, vector<8x128xf32>
    %652 = arith.addf %648, %651 : vector<8x128xf32>
    %c6_i32 = arith.constant 6 : i32
    %c8_i32_168 = arith.constant 8 : i32
    %653 = arith.muli %c6_i32, %c8_i32_168 : i32
    %654 = tpu.assume_multiple %653, 8 : i32
    %655 = arith.index_cast %654 : i32 to index
    %c0_169 = arith.constant 0 : index
    %656 = vector.load %arg1[%655, %c0_169] : memref<64x128xf32, #tpu.memory_space<vmem>>, vector<8x128xf32>
    %657 = vector.broadcast %33 : f32 to vector<8x128xf32>
    %658 = arith.subf %657, %652 : vector<8x128xf32>
    %659 = vector.broadcast %37 : f32 to vector<8x128xf32>
    %660 = arith.subf %659, %646 : vector<8x128xf32>
    %661 = arith.mulf %658, %658 : vector<8x128xf32>
    %662 = arith.mulf %660, %660 : vector<8x128xf32>
    %663 = arith.addf %661, %662 : vector<8x128xf32>
    %cst_170 = arith.constant 1.000000e+00 : f32
    %664 = vector.broadcast %cst_170 : f32 to vector<8x128xf32>
    %665 = arith.maximumf %664, %663 : vector<8x128xf32>
    %c0_i32_171 = arith.constant 0 : i32
    %666 = vector.broadcast %c0_i32_171 : i32 to vector<8x128xi32>
    %667 = vector.broadcast %34 : f32 to vector<8x128xf32>
    %668 = arith.subf %667, %652 : vector<8x128xf32>
    %669 = vector.broadcast %38 : f32 to vector<8x128xf32>
    %670 = arith.subf %669, %646 : vector<8x128xf32>
    %671 = arith.mulf %668, %668 : vector<8x128xf32>
    %672 = arith.mulf %670, %670 : vector<8x128xf32>
    %673 = arith.addf %671, %672 : vector<8x128xf32>
    %cst_172 = arith.constant 1.000000e+00 : f32
    %674 = vector.broadcast %cst_172 : f32 to vector<8x128xf32>
    %675 = arith.maximumf %674, %673 : vector<8x128xf32>
    %676 = arith.cmpf olt, %675, %665 : vector<8x128xf32>
    %c1_i32_173 = arith.constant 1 : i32
    %677 = vector.broadcast %c1_i32_173 : i32 to vector<8x128xi32>
    %678 = arith.select %676, %677, %666 : vector<8x128xi1>, vector<8x128xi32>
    %679 = arith.select %676, %675, %665 : vector<8x128xi1>, vector<8x128xf32>
    %680 = vector.broadcast %35 : f32 to vector<8x128xf32>
    %681 = arith.subf %680, %652 : vector<8x128xf32>
    %682 = vector.broadcast %39 : f32 to vector<8x128xf32>
    %683 = arith.subf %682, %646 : vector<8x128xf32>
    %684 = arith.mulf %681, %681 : vector<8x128xf32>
    %685 = arith.mulf %683, %683 : vector<8x128xf32>
    %686 = arith.addf %684, %685 : vector<8x128xf32>
    %cst_174 = arith.constant 1.000000e+00 : f32
    %687 = vector.broadcast %cst_174 : f32 to vector<8x128xf32>
    %688 = arith.maximumf %687, %686 : vector<8x128xf32>
    %689 = arith.cmpf olt, %688, %679 : vector<8x128xf32>
    %c2_i32_175 = arith.constant 2 : i32
    %690 = vector.broadcast %c2_i32_175 : i32 to vector<8x128xi32>
    %691 = arith.select %689, %690, %678 : vector<8x128xi1>, vector<8x128xi32>
    %692 = arith.select %689, %688, %679 : vector<8x128xi1>, vector<8x128xf32>
    %693 = vector.broadcast %36 : f32 to vector<8x128xf32>
    %694 = arith.subf %693, %652 : vector<8x128xf32>
    %695 = vector.broadcast %40 : f32 to vector<8x128xf32>
    %696 = arith.subf %695, %646 : vector<8x128xf32>
    %697 = arith.mulf %694, %694 : vector<8x128xf32>
    %698 = arith.mulf %696, %696 : vector<8x128xf32>
    %699 = arith.addf %697, %698 : vector<8x128xf32>
    %cst_176 = arith.constant 1.000000e+00 : f32
    %700 = vector.broadcast %cst_176 : f32 to vector<8x128xf32>
    %701 = arith.maximumf %700, %699 : vector<8x128xf32>
    %702 = arith.cmpf olt, %701, %692 : vector<8x128xf32>
    %c3_i32_177 = arith.constant 3 : i32
    %703 = vector.broadcast %c3_i32_177 : i32 to vector<8x128xi32>
    %704 = arith.select %702, %703, %691 : vector<8x128xi1>, vector<8x128xi32>
    %705 = arith.select %702, %701, %692 : vector<8x128xi1>, vector<8x128xf32>
    %706 = math.sqrt %705 : vector<8x128xf32>
    %707 = arith.divf %656, %706 : vector<8x128xf32>
    %708 = arith.mulf %652, %707 : vector<8x128xf32>
    %709 = arith.mulf %646, %707 : vector<8x128xf32>
    %c0_i32_178 = arith.constant 0 : i32
    %710 = vector.broadcast %c0_i32_178 : i32 to vector<8x128xi32>
    %711 = arith.cmpi eq, %704, %710 : vector<8x128xi32>
    %cst_179 = arith.constant 0.000000e+00 : f32
    %712 = vector.broadcast %cst_179 : f32 to vector<8x128xf32>
    %713 = arith.select %711, %708, %712 : vector<8x128xi1>, vector<8x128xf32>
    %714 = arith.addf %612, %713 : vector<8x128xf32>
    %cst_180 = arith.constant 0.000000e+00 : f32
    %715 = vector.broadcast %cst_180 : f32 to vector<8x128xf32>
    %716 = arith.select %711, %709, %715 : vector<8x128xi1>, vector<8x128xf32>
    %717 = arith.addf %615, %716 : vector<8x128xf32>
    %c1_i32_181 = arith.constant 1 : i32
    %718 = vector.broadcast %c1_i32_181 : i32 to vector<8x128xi32>
    %719 = arith.cmpi eq, %704, %718 : vector<8x128xi32>
    %cst_182 = arith.constant 0.000000e+00 : f32
    %720 = vector.broadcast %cst_182 : f32 to vector<8x128xf32>
    %721 = arith.select %719, %708, %720 : vector<8x128xi1>, vector<8x128xf32>
    %722 = arith.addf %620, %721 : vector<8x128xf32>
    %cst_183 = arith.constant 0.000000e+00 : f32
    %723 = vector.broadcast %cst_183 : f32 to vector<8x128xf32>
    %724 = arith.select %719, %709, %723 : vector<8x128xi1>, vector<8x128xf32>
    %725 = arith.addf %623, %724 : vector<8x128xf32>
    %c2_i32_184 = arith.constant 2 : i32
    %726 = vector.broadcast %c2_i32_184 : i32 to vector<8x128xi32>
    %727 = arith.cmpi eq, %704, %726 : vector<8x128xi32>
    %cst_185 = arith.constant 0.000000e+00 : f32
    %728 = vector.broadcast %cst_185 : f32 to vector<8x128xf32>
    %729 = arith.select %727, %708, %728 : vector<8x128xi1>, vector<8x128xf32>
    %730 = arith.addf %628, %729 : vector<8x128xf32>
    %cst_186 = arith.constant 0.000000e+00 : f32
    %731 = vector.broadcast %cst_186 : f32 to vector<8x128xf32>
    %732 = arith.select %727, %709, %731 : vector<8x128xi1>, vector<8x128xf32>
    %733 = arith.addf %631, %732 : vector<8x128xf32>
    %c3_i32_187 = arith.constant 3 : i32
    %734 = vector.broadcast %c3_i32_187 : i32 to vector<8x128xi32>
    %735 = arith.cmpi eq, %704, %734 : vector<8x128xi32>
    %cst_188 = arith.constant 0.000000e+00 : f32
    %736 = vector.broadcast %cst_188 : f32 to vector<8x128xf32>
    %737 = arith.select %735, %708, %736 : vector<8x128xi1>, vector<8x128xf32>
    %738 = arith.addf %636, %737 : vector<8x128xf32>
    %cst_189 = arith.constant 0.000000e+00 : f32
    %739 = vector.broadcast %cst_189 : f32 to vector<8x128xf32>
    %740 = arith.select %735, %709, %739 : vector<8x128xi1>, vector<8x128xf32>
    %741 = arith.addf %639, %740 : vector<8x128xf32>
    %742 = vector.broadcast %cst_22 : f32 to vector<8x128xf32>
    %743 = arith.addf %646, %742 : vector<8x128xf32>
    %744 = vector.broadcast %cst_23 : f32 to vector<8x128xf32>
    %745 = arith.cmpf oge, %743, %744 : vector<8x128xf32>
    %746 = vector.broadcast %cst_23 : f32 to vector<8x128xf32>
    %747 = arith.subf %743, %746 : vector<8x128xf32>
    %748 = arith.select %745, %747, %743 : vector<8x128xi1>, vector<8x128xf32>
    %749 = vector.broadcast %cst_24 : f32 to vector<8x128xf32>
    %750 = arith.addf %652, %749 : vector<8x128xf32>
    %cst_190 = arith.constant 1.000000e+00 : f32
    %cst_191 = arith.constant 0.000000e+00 : f32
    %751 = vector.broadcast %cst_190 : f32 to vector<8x128xf32>
    %752 = vector.broadcast %cst_191 : f32 to vector<8x128xf32>
    %753 = arith.select %745, %751, %752 : vector<8x128xi1>, vector<8x128xf32>
    %754 = arith.addf %750, %753 : vector<8x128xf32>
    %c7_i32 = arith.constant 7 : i32
    %c8_i32_192 = arith.constant 8 : i32
    %755 = arith.muli %c7_i32, %c8_i32_192 : i32
    %756 = tpu.assume_multiple %755, 8 : i32
    %757 = arith.index_cast %756 : i32 to index
    %c0_193 = arith.constant 0 : index
    %758 = vector.load %arg1[%757, %c0_193] : memref<64x128xf32, #tpu.memory_space<vmem>>, vector<8x128xf32>
    %759 = vector.broadcast %33 : f32 to vector<8x128xf32>
    %760 = arith.subf %759, %754 : vector<8x128xf32>
    %761 = vector.broadcast %37 : f32 to vector<8x128xf32>
    %762 = arith.subf %761, %748 : vector<8x128xf32>
    %763 = arith.mulf %760, %760 : vector<8x128xf32>
    %764 = arith.mulf %762, %762 : vector<8x128xf32>
    %765 = arith.addf %763, %764 : vector<8x128xf32>
    %cst_194 = arith.constant 1.000000e+00 : f32
    %766 = vector.broadcast %cst_194 : f32 to vector<8x128xf32>
    %767 = arith.maximumf %766, %765 : vector<8x128xf32>
    %c0_i32_195 = arith.constant 0 : i32
    %768 = vector.broadcast %c0_i32_195 : i32 to vector<8x128xi32>
    %769 = vector.broadcast %34 : f32 to vector<8x128xf32>
    %770 = arith.subf %769, %754 : vector<8x128xf32>
    %771 = vector.broadcast %38 : f32 to vector<8x128xf32>
    %772 = arith.subf %771, %748 : vector<8x128xf32>
    %773 = arith.mulf %770, %770 : vector<8x128xf32>
    %774 = arith.mulf %772, %772 : vector<8x128xf32>
    %775 = arith.addf %773, %774 : vector<8x128xf32>
    %cst_196 = arith.constant 1.000000e+00 : f32
    %776 = vector.broadcast %cst_196 : f32 to vector<8x128xf32>
    %777 = arith.maximumf %776, %775 : vector<8x128xf32>
    %778 = arith.cmpf olt, %777, %767 : vector<8x128xf32>
    %c1_i32_197 = arith.constant 1 : i32
    %779 = vector.broadcast %c1_i32_197 : i32 to vector<8x128xi32>
    %780 = arith.select %778, %779, %768 : vector<8x128xi1>, vector<8x128xi32>
    %781 = arith.select %778, %777, %767 : vector<8x128xi1>, vector<8x128xf32>
    %782 = vector.broadcast %35 : f32 to vector<8x128xf32>
    %783 = arith.subf %782, %754 : vector<8x128xf32>
    %784 = vector.broadcast %39 : f32 to vector<8x128xf32>
    %785 = arith.subf %784, %748 : vector<8x128xf32>
    %786 = arith.mulf %783, %783 : vector<8x128xf32>
    %787 = arith.mulf %785, %785 : vector<8x128xf32>
    %788 = arith.addf %786, %787 : vector<8x128xf32>
    %cst_198 = arith.constant 1.000000e+00 : f32
    %789 = vector.broadcast %cst_198 : f32 to vector<8x128xf32>
    %790 = arith.maximumf %789, %788 : vector<8x128xf32>
    %791 = arith.cmpf olt, %790, %781 : vector<8x128xf32>
    %c2_i32_199 = arith.constant 2 : i32
    %792 = vector.broadcast %c2_i32_199 : i32 to vector<8x128xi32>
    %793 = arith.select %791, %792, %780 : vector<8x128xi1>, vector<8x128xi32>
    %794 = arith.select %791, %790, %781 : vector<8x128xi1>, vector<8x128xf32>
    %795 = vector.broadcast %36 : f32 to vector<8x128xf32>
    %796 = arith.subf %795, %754 : vector<8x128xf32>
    %797 = vector.broadcast %40 : f32 to vector<8x128xf32>
    %798 = arith.subf %797, %748 : vector<8x128xf32>
    %799 = arith.mulf %796, %796 : vector<8x128xf32>
    %800 = arith.mulf %798, %798 : vector<8x128xf32>
    %801 = arith.addf %799, %800 : vector<8x128xf32>
    %cst_200 = arith.constant 1.000000e+00 : f32
    %802 = vector.broadcast %cst_200 : f32 to vector<8x128xf32>
    %803 = arith.maximumf %802, %801 : vector<8x128xf32>
    %804 = arith.cmpf olt, %803, %794 : vector<8x128xf32>
    %c3_i32_201 = arith.constant 3 : i32
    %805 = vector.broadcast %c3_i32_201 : i32 to vector<8x128xi32>
    %806 = arith.select %804, %805, %793 : vector<8x128xi1>, vector<8x128xi32>
    %807 = arith.select %804, %803, %794 : vector<8x128xi1>, vector<8x128xf32>
    %808 = math.sqrt %807 : vector<8x128xf32>
    %809 = arith.divf %758, %808 : vector<8x128xf32>
    %810 = arith.mulf %754, %809 : vector<8x128xf32>
    %811 = arith.mulf %748, %809 : vector<8x128xf32>
    %c0_i32_202 = arith.constant 0 : i32
    %812 = vector.broadcast %c0_i32_202 : i32 to vector<8x128xi32>
    %813 = arith.cmpi eq, %806, %812 : vector<8x128xi32>
    %cst_203 = arith.constant 0.000000e+00 : f32
    %814 = vector.broadcast %cst_203 : f32 to vector<8x128xf32>
    %815 = arith.select %813, %810, %814 : vector<8x128xi1>, vector<8x128xf32>
    %816 = arith.addf %714, %815 : vector<8x128xf32>
    %cst_204 = arith.constant 0.000000e+00 : f32
    %817 = vector.broadcast %cst_204 : f32 to vector<8x128xf32>
    %818 = arith.select %813, %811, %817 : vector<8x128xi1>, vector<8x128xf32>
    %819 = arith.addf %717, %818 : vector<8x128xf32>
    %c1_i32_205 = arith.constant 1 : i32
    %820 = vector.broadcast %c1_i32_205 : i32 to vector<8x128xi32>
    %821 = arith.cmpi eq, %806, %820 : vector<8x128xi32>
    %cst_206 = arith.constant 0.000000e+00 : f32
    %822 = vector.broadcast %cst_206 : f32 to vector<8x128xf32>
    %823 = arith.select %821, %810, %822 : vector<8x128xi1>, vector<8x128xf32>
    %824 = arith.addf %722, %823 : vector<8x128xf32>
    %cst_207 = arith.constant 0.000000e+00 : f32
    %825 = vector.broadcast %cst_207 : f32 to vector<8x128xf32>
    %826 = arith.select %821, %811, %825 : vector<8x128xi1>, vector<8x128xf32>
    %827 = arith.addf %725, %826 : vector<8x128xf32>
    %c2_i32_208 = arith.constant 2 : i32
    %828 = vector.broadcast %c2_i32_208 : i32 to vector<8x128xi32>
    %829 = arith.cmpi eq, %806, %828 : vector<8x128xi32>
    %cst_209 = arith.constant 0.000000e+00 : f32
    %830 = vector.broadcast %cst_209 : f32 to vector<8x128xf32>
    %831 = arith.select %829, %810, %830 : vector<8x128xi1>, vector<8x128xf32>
    %832 = arith.addf %730, %831 : vector<8x128xf32>
    %cst_210 = arith.constant 0.000000e+00 : f32
    %833 = vector.broadcast %cst_210 : f32 to vector<8x128xf32>
    %834 = arith.select %829, %811, %833 : vector<8x128xi1>, vector<8x128xf32>
    %835 = arith.addf %733, %834 : vector<8x128xf32>
    %c3_i32_211 = arith.constant 3 : i32
    %836 = vector.broadcast %c3_i32_211 : i32 to vector<8x128xi32>
    %837 = arith.cmpi eq, %806, %836 : vector<8x128xi32>
    %cst_212 = arith.constant 0.000000e+00 : f32
    %838 = vector.broadcast %cst_212 : f32 to vector<8x128xf32>
    %839 = arith.select %837, %810, %838 : vector<8x128xi1>, vector<8x128xf32>
    %840 = arith.addf %738, %839 : vector<8x128xf32>
    %cst_213 = arith.constant 0.000000e+00 : f32
    %841 = vector.broadcast %cst_213 : f32 to vector<8x128xf32>
    %842 = arith.select %837, %811, %841 : vector<8x128xi1>, vector<8x128xf32>
    %843 = arith.addf %741, %842 : vector<8x128xf32>
    %844 = vector.broadcast %cst_22 : f32 to vector<8x128xf32>
    %845 = arith.addf %748, %844 : vector<8x128xf32>
    %846 = vector.broadcast %cst_23 : f32 to vector<8x128xf32>
    %847 = arith.cmpf oge, %845, %846 : vector<8x128xf32>
    %848 = vector.broadcast %cst_23 : f32 to vector<8x128xf32>
    %849 = arith.subf %845, %848 : vector<8x128xf32>
    %850 = arith.select %847, %849, %845 : vector<8x128xi1>, vector<8x128xf32>
    %851 = vector.broadcast %cst_24 : f32 to vector<8x128xf32>
    %852 = arith.addf %754, %851 : vector<8x128xf32>
    %cst_214 = arith.constant 1.000000e+00 : f32
    %cst_215 = arith.constant 0.000000e+00 : f32
    %853 = vector.broadcast %cst_214 : f32 to vector<8x128xf32>
    %854 = vector.broadcast %cst_215 : f32 to vector<8x128xf32>
    %855 = arith.select %847, %853, %854 : vector<8x128xi1>, vector<8x128xf32>
    %856 = arith.addf %852, %855 : vector<8x128xf32>
    %c8_i32_216 = arith.constant 8 : i32
    %857 = vector.shape_cast %816 : vector<8x128xf32> to vector<1x8x128xf32>
    %cst_217 = arith.constant dense<0.000000e+00> : vector<1xf32>
    %858 = vector.multi_reduction <add>, %857, %cst_217 [1, 2] : vector<1x8x128xf32> to vector<1xf32>
    %859 = vector.shape_cast %858 : vector<1xf32> to vector<1x1x1xf32>
    %860 = vector.extract %859[0, 0, 0] : f32 from vector<1x1x1xf32>
    %861 = vector.shape_cast %824 : vector<8x128xf32> to vector<1x8x128xf32>
    %cst_218 = arith.constant dense<0.000000e+00> : vector<1xf32>
    %862 = vector.multi_reduction <add>, %861, %cst_218 [1, 2] : vector<1x8x128xf32> to vector<1xf32>
    %863 = vector.shape_cast %862 : vector<1xf32> to vector<1x1x1xf32>
    %864 = vector.extract %863[0, 0, 0] : f32 from vector<1x1x1xf32>
    %865 = vector.shape_cast %832 : vector<8x128xf32> to vector<1x8x128xf32>
    %cst_219 = arith.constant dense<0.000000e+00> : vector<1xf32>
    %866 = vector.multi_reduction <add>, %865, %cst_219 [1, 2] : vector<1x8x128xf32> to vector<1xf32>
    %867 = vector.shape_cast %866 : vector<1xf32> to vector<1x1x1xf32>
    %868 = vector.extract %867[0, 0, 0] : f32 from vector<1x1x1xf32>
    %869 = vector.shape_cast %840 : vector<8x128xf32> to vector<1x8x128xf32>
    %cst_220 = arith.constant dense<0.000000e+00> : vector<1xf32>
    %870 = vector.multi_reduction <add>, %869, %cst_220 [1, 2] : vector<1x8x128xf32> to vector<1xf32>
    %871 = vector.shape_cast %870 : vector<1xf32> to vector<1x1x1xf32>
    %872 = vector.extract %871[0, 0, 0] : f32 from vector<1x1x1xf32>
    %873 = vector.shape_cast %819 : vector<8x128xf32> to vector<1x8x128xf32>
    %cst_221 = arith.constant dense<0.000000e+00> : vector<1xf32>
    %874 = vector.multi_reduction <add>, %873, %cst_221 [1, 2] : vector<1x8x128xf32> to vector<1xf32>
    %875 = vector.shape_cast %874 : vector<1xf32> to vector<1x1x1xf32>
    %876 = vector.extract %875[0, 0, 0] : f32 from vector<1x1x1xf32>
    %877 = vector.shape_cast %827 : vector<8x128xf32> to vector<1x8x128xf32>
    %cst_222 = arith.constant dense<0.000000e+00> : vector<1xf32>
    %878 = vector.multi_reduction <add>, %877, %cst_222 [1, 2] : vector<1x8x128xf32> to vector<1xf32>
    %879 = vector.shape_cast %878 : vector<1xf32> to vector<1x1x1xf32>
    %880 = vector.extract %879[0, 0, 0] : f32 from vector<1x1x1xf32>
    %881 = vector.shape_cast %835 : vector<8x128xf32> to vector<1x8x128xf32>
    %cst_223 = arith.constant dense<0.000000e+00> : vector<1xf32>
    %882 = vector.multi_reduction <add>, %881, %cst_223 [1, 2] : vector<1x8x128xf32> to vector<1xf32>
    %883 = vector.shape_cast %882 : vector<1xf32> to vector<1x1x1xf32>
    %884 = vector.extract %883[0, 0, 0] : f32 from vector<1x1x1xf32>
    %885 = vector.shape_cast %843 : vector<8x128xf32> to vector<1x8x128xf32>
    %cst_224 = arith.constant dense<0.000000e+00> : vector<1xf32>
    %886 = vector.multi_reduction <add>, %885, %cst_224 [1, 2] : vector<1x8x128xf32> to vector<1xf32>
    %887 = vector.shape_cast %886 : vector<1xf32> to vector<1x1x1xf32>
    %888 = vector.extract %887[0, 0, 0] : f32 from vector<1x1x1xf32>
    %cst_225 = arith.constant 0.000000e+00 : f32
    %cst_226 = arith.constant 1.600000e+01 : f32
    %cst_227 = arith.constant 6.400000e+01 : f32
    %c0_i32_228 = arith.constant 0 : i32
    %c8_i32_229 = arith.constant 8 : i32
    %889 = arith.muli %c0_i32_228, %c8_i32_229 : i32
    %890 = tpu.assume_multiple %889, 8 : i32
    %891 = arith.index_cast %890 : i32 to index
    %c0_230 = arith.constant 0 : index
    %892 = vector.load %arg1[%891, %c0_230] : memref<64x128xf32, #tpu.memory_space<vmem>>, vector<8x128xf32>
    %893 = vector.broadcast %860 : f32 to vector<8x128xf32>
    %894 = arith.subf %893, %26 : vector<8x128xf32>
    %895 = vector.broadcast %876 : f32 to vector<8x128xf32>
    %896 = arith.subf %895, %31 : vector<8x128xf32>
    %897 = arith.mulf %894, %894 : vector<8x128xf32>
    %898 = arith.mulf %896, %896 : vector<8x128xf32>
    %899 = arith.addf %897, %898 : vector<8x128xf32>
    %cst_231 = arith.constant 1.000000e+00 : f32
    %900 = vector.broadcast %cst_231 : f32 to vector<8x128xf32>
    %901 = arith.maximumf %900, %899 : vector<8x128xf32>
    %c0_i32_232 = arith.constant 0 : i32
    %902 = vector.broadcast %c0_i32_232 : i32 to vector<8x128xi32>
    %903 = vector.broadcast %864 : f32 to vector<8x128xf32>
    %904 = arith.subf %903, %26 : vector<8x128xf32>
    %905 = vector.broadcast %880 : f32 to vector<8x128xf32>
    %906 = arith.subf %905, %31 : vector<8x128xf32>
    %907 = arith.mulf %904, %904 : vector<8x128xf32>
    %908 = arith.mulf %906, %906 : vector<8x128xf32>
    %909 = arith.addf %907, %908 : vector<8x128xf32>
    %cst_233 = arith.constant 1.000000e+00 : f32
    %910 = vector.broadcast %cst_233 : f32 to vector<8x128xf32>
    %911 = arith.maximumf %910, %909 : vector<8x128xf32>
    %912 = arith.cmpf olt, %911, %901 : vector<8x128xf32>
    %c1_i32_234 = arith.constant 1 : i32
    %913 = vector.broadcast %c1_i32_234 : i32 to vector<8x128xi32>
    %914 = arith.select %912, %913, %902 : vector<8x128xi1>, vector<8x128xi32>
    %915 = arith.select %912, %911, %901 : vector<8x128xi1>, vector<8x128xf32>
    %916 = vector.broadcast %868 : f32 to vector<8x128xf32>
    %917 = arith.subf %916, %26 : vector<8x128xf32>
    %918 = vector.broadcast %884 : f32 to vector<8x128xf32>
    %919 = arith.subf %918, %31 : vector<8x128xf32>
    %920 = arith.mulf %917, %917 : vector<8x128xf32>
    %921 = arith.mulf %919, %919 : vector<8x128xf32>
    %922 = arith.addf %920, %921 : vector<8x128xf32>
    %cst_235 = arith.constant 1.000000e+00 : f32
    %923 = vector.broadcast %cst_235 : f32 to vector<8x128xf32>
    %924 = arith.maximumf %923, %922 : vector<8x128xf32>
    %925 = arith.cmpf olt, %924, %915 : vector<8x128xf32>
    %c2_i32_236 = arith.constant 2 : i32
    %926 = vector.broadcast %c2_i32_236 : i32 to vector<8x128xi32>
    %927 = arith.select %925, %926, %914 : vector<8x128xi1>, vector<8x128xi32>
    %928 = arith.select %925, %924, %915 : vector<8x128xi1>, vector<8x128xf32>
    %929 = vector.broadcast %872 : f32 to vector<8x128xf32>
    %930 = arith.subf %929, %26 : vector<8x128xf32>
    %931 = vector.broadcast %888 : f32 to vector<8x128xf32>
    %932 = arith.subf %931, %31 : vector<8x128xf32>
    %933 = arith.mulf %930, %930 : vector<8x128xf32>
    %934 = arith.mulf %932, %932 : vector<8x128xf32>
    %935 = arith.addf %933, %934 : vector<8x128xf32>
    %cst_237 = arith.constant 1.000000e+00 : f32
    %936 = vector.broadcast %cst_237 : f32 to vector<8x128xf32>
    %937 = arith.maximumf %936, %935 : vector<8x128xf32>
    %938 = arith.cmpf olt, %937, %928 : vector<8x128xf32>
    %c3_i32_238 = arith.constant 3 : i32
    %939 = vector.broadcast %c3_i32_238 : i32 to vector<8x128xi32>
    %940 = arith.select %938, %939, %927 : vector<8x128xi1>, vector<8x128xi32>
    %941 = arith.select %938, %937, %928 : vector<8x128xi1>, vector<8x128xf32>
    %942 = math.sqrt %941 : vector<8x128xf32>
    %943 = arith.divf %892, %942 : vector<8x128xf32>
    %944 = arith.mulf %26, %943 : vector<8x128xf32>
    %945 = arith.mulf %31, %943 : vector<8x128xf32>
    %c0_i32_239 = arith.constant 0 : i32
    %946 = vector.broadcast %c0_i32_239 : i32 to vector<8x128xi32>
    %947 = arith.cmpi eq, %940, %946 : vector<8x128xi32>
    %cst_240 = arith.constant 0.000000e+00 : f32
    %948 = vector.broadcast %cst_240 : f32 to vector<8x128xf32>
    %949 = arith.select %947, %944, %948 : vector<8x128xi1>, vector<8x128xf32>
    %950 = arith.addf %32, %949 : vector<8x128xf32>
    %cst_241 = arith.constant 0.000000e+00 : f32
    %951 = vector.broadcast %cst_241 : f32 to vector<8x128xf32>
    %952 = arith.select %947, %945, %951 : vector<8x128xi1>, vector<8x128xf32>
    %953 = arith.addf %32, %952 : vector<8x128xf32>
    %c1_i32_242 = arith.constant 1 : i32
    %954 = vector.broadcast %c1_i32_242 : i32 to vector<8x128xi32>
    %955 = arith.cmpi eq, %940, %954 : vector<8x128xi32>
    %cst_243 = arith.constant 0.000000e+00 : f32
    %956 = vector.broadcast %cst_243 : f32 to vector<8x128xf32>
    %957 = arith.select %955, %944, %956 : vector<8x128xi1>, vector<8x128xf32>
    %958 = arith.addf %32, %957 : vector<8x128xf32>
    %cst_244 = arith.constant 0.000000e+00 : f32
    %959 = vector.broadcast %cst_244 : f32 to vector<8x128xf32>
    %960 = arith.select %955, %945, %959 : vector<8x128xi1>, vector<8x128xf32>
    %961 = arith.addf %32, %960 : vector<8x128xf32>
    %c2_i32_245 = arith.constant 2 : i32
    %962 = vector.broadcast %c2_i32_245 : i32 to vector<8x128xi32>
    %963 = arith.cmpi eq, %940, %962 : vector<8x128xi32>
    %cst_246 = arith.constant 0.000000e+00 : f32
    %964 = vector.broadcast %cst_246 : f32 to vector<8x128xf32>
    %965 = arith.select %963, %944, %964 : vector<8x128xi1>, vector<8x128xf32>
    %966 = arith.addf %32, %965 : vector<8x128xf32>
    %cst_247 = arith.constant 0.000000e+00 : f32
    %967 = vector.broadcast %cst_247 : f32 to vector<8x128xf32>
    %968 = arith.select %963, %945, %967 : vector<8x128xi1>, vector<8x128xf32>
    %969 = arith.addf %32, %968 : vector<8x128xf32>
    %c3_i32_248 = arith.constant 3 : i32
    %970 = vector.broadcast %c3_i32_248 : i32 to vector<8x128xi32>
    %971 = arith.cmpi eq, %940, %970 : vector<8x128xi32>
    %cst_249 = arith.constant 0.000000e+00 : f32
    %972 = vector.broadcast %cst_249 : f32 to vector<8x128xf32>
    %973 = arith.select %971, %944, %972 : vector<8x128xi1>, vector<8x128xf32>
    %974 = arith.addf %32, %973 : vector<8x128xf32>
    %cst_250 = arith.constant 0.000000e+00 : f32
    %975 = vector.broadcast %cst_250 : f32 to vector<8x128xf32>
    %976 = arith.select %971, %945, %975 : vector<8x128xi1>, vector<8x128xf32>
    %977 = arith.addf %32, %976 : vector<8x128xf32>
    %978 = vector.broadcast %cst_225 : f32 to vector<8x128xf32>
    %979 = arith.addf %31, %978 : vector<8x128xf32>
    %980 = vector.broadcast %cst_226 : f32 to vector<8x128xf32>
    %981 = arith.cmpf oge, %979, %980 : vector<8x128xf32>
    %982 = vector.broadcast %cst_226 : f32 to vector<8x128xf32>
    %983 = arith.subf %979, %982 : vector<8x128xf32>
    %984 = arith.select %981, %983, %979 : vector<8x128xi1>, vector<8x128xf32>
    %985 = vector.broadcast %cst_227 : f32 to vector<8x128xf32>
    %986 = arith.addf %26, %985 : vector<8x128xf32>
    %cst_251 = arith.constant 1.000000e+00 : f32
    %cst_252 = arith.constant 0.000000e+00 : f32
    %987 = vector.broadcast %cst_251 : f32 to vector<8x128xf32>
    %988 = vector.broadcast %cst_252 : f32 to vector<8x128xf32>
    %989 = arith.select %981, %987, %988 : vector<8x128xi1>, vector<8x128xf32>
    %990 = arith.addf %986, %989 : vector<8x128xf32>
    %c1_i32_253 = arith.constant 1 : i32
    %c8_i32_254 = arith.constant 8 : i32
    %991 = arith.muli %c1_i32_253, %c8_i32_254 : i32
    %992 = tpu.assume_multiple %991, 8 : i32
    %993 = arith.index_cast %992 : i32 to index
    %c0_255 = arith.constant 0 : index
    %994 = vector.load %arg1[%993, %c0_255] : memref<64x128xf32, #tpu.memory_space<vmem>>, vector<8x128xf32>
    %995 = vector.broadcast %860 : f32 to vector<8x128xf32>
    %996 = arith.subf %995, %990 : vector<8x128xf32>
    %997 = vector.broadcast %876 : f32 to vector<8x128xf32>
    %998 = arith.subf %997, %984 : vector<8x128xf32>
    %999 = arith.mulf %996, %996 : vector<8x128xf32>
    %1000 = arith.mulf %998, %998 : vector<8x128xf32>
    %1001 = arith.addf %999, %1000 : vector<8x128xf32>
    %cst_256 = arith.constant 1.000000e+00 : f32
    %1002 = vector.broadcast %cst_256 : f32 to vector<8x128xf32>
    %1003 = arith.maximumf %1002, %1001 : vector<8x128xf32>
    %c0_i32_257 = arith.constant 0 : i32
    %1004 = vector.broadcast %c0_i32_257 : i32 to vector<8x128xi32>
    %1005 = vector.broadcast %864 : f32 to vector<8x128xf32>
    %1006 = arith.subf %1005, %990 : vector<8x128xf32>
    %1007 = vector.broadcast %880 : f32 to vector<8x128xf32>
    %1008 = arith.subf %1007, %984 : vector<8x128xf32>
    %1009 = arith.mulf %1006, %1006 : vector<8x128xf32>
    %1010 = arith.mulf %1008, %1008 : vector<8x128xf32>
    %1011 = arith.addf %1009, %1010 : vector<8x128xf32>
    %cst_258 = arith.constant 1.000000e+00 : f32
    %1012 = vector.broadcast %cst_258 : f32 to vector<8x128xf32>
    %1013 = arith.maximumf %1012, %1011 : vector<8x128xf32>
    %1014 = arith.cmpf olt, %1013, %1003 : vector<8x128xf32>
    %c1_i32_259 = arith.constant 1 : i32
    %1015 = vector.broadcast %c1_i32_259 : i32 to vector<8x128xi32>
    %1016 = arith.select %1014, %1015, %1004 : vector<8x128xi1>, vector<8x128xi32>
    %1017 = arith.select %1014, %1013, %1003 : vector<8x128xi1>, vector<8x128xf32>
    %1018 = vector.broadcast %868 : f32 to vector<8x128xf32>
    %1019 = arith.subf %1018, %990 : vector<8x128xf32>
    %1020 = vector.broadcast %884 : f32 to vector<8x128xf32>
    %1021 = arith.subf %1020, %984 : vector<8x128xf32>
    %1022 = arith.mulf %1019, %1019 : vector<8x128xf32>
    %1023 = arith.mulf %1021, %1021 : vector<8x128xf32>
    %1024 = arith.addf %1022, %1023 : vector<8x128xf32>
    %cst_260 = arith.constant 1.000000e+00 : f32
    %1025 = vector.broadcast %cst_260 : f32 to vector<8x128xf32>
    %1026 = arith.maximumf %1025, %1024 : vector<8x128xf32>
    %1027 = arith.cmpf olt, %1026, %1017 : vector<8x128xf32>
    %c2_i32_261 = arith.constant 2 : i32
    %1028 = vector.broadcast %c2_i32_261 : i32 to vector<8x128xi32>
    %1029 = arith.select %1027, %1028, %1016 : vector<8x128xi1>, vector<8x128xi32>
    %1030 = arith.select %1027, %1026, %1017 : vector<8x128xi1>, vector<8x128xf32>
    %1031 = vector.broadcast %872 : f32 to vector<8x128xf32>
    %1032 = arith.subf %1031, %990 : vector<8x128xf32>
    %1033 = vector.broadcast %888 : f32 to vector<8x128xf32>
    %1034 = arith.subf %1033, %984 : vector<8x128xf32>
    %1035 = arith.mulf %1032, %1032 : vector<8x128xf32>
    %1036 = arith.mulf %1034, %1034 : vector<8x128xf32>
    %1037 = arith.addf %1035, %1036 : vector<8x128xf32>
    %cst_262 = arith.constant 1.000000e+00 : f32
    %1038 = vector.broadcast %cst_262 : f32 to vector<8x128xf32>
    %1039 = arith.maximumf %1038, %1037 : vector<8x128xf32>
    %1040 = arith.cmpf olt, %1039, %1030 : vector<8x128xf32>
    %c3_i32_263 = arith.constant 3 : i32
    %1041 = vector.broadcast %c3_i32_263 : i32 to vector<8x128xi32>
    %1042 = arith.select %1040, %1041, %1029 : vector<8x128xi1>, vector<8x128xi32>
    %1043 = arith.select %1040, %1039, %1030 : vector<8x128xi1>, vector<8x128xf32>
    %1044 = math.sqrt %1043 : vector<8x128xf32>
    %1045 = arith.divf %994, %1044 : vector<8x128xf32>
    %1046 = arith.mulf %990, %1045 : vector<8x128xf32>
    %1047 = arith.mulf %984, %1045 : vector<8x128xf32>
    %c0_i32_264 = arith.constant 0 : i32
    %1048 = vector.broadcast %c0_i32_264 : i32 to vector<8x128xi32>
    %1049 = arith.cmpi eq, %1042, %1048 : vector<8x128xi32>
    %cst_265 = arith.constant 0.000000e+00 : f32
    %1050 = vector.broadcast %cst_265 : f32 to vector<8x128xf32>
    %1051 = arith.select %1049, %1046, %1050 : vector<8x128xi1>, vector<8x128xf32>
    %1052 = arith.addf %950, %1051 : vector<8x128xf32>
    %cst_266 = arith.constant 0.000000e+00 : f32
    %1053 = vector.broadcast %cst_266 : f32 to vector<8x128xf32>
    %1054 = arith.select %1049, %1047, %1053 : vector<8x128xi1>, vector<8x128xf32>
    %1055 = arith.addf %953, %1054 : vector<8x128xf32>
    %c1_i32_267 = arith.constant 1 : i32
    %1056 = vector.broadcast %c1_i32_267 : i32 to vector<8x128xi32>
    %1057 = arith.cmpi eq, %1042, %1056 : vector<8x128xi32>
    %cst_268 = arith.constant 0.000000e+00 : f32
    %1058 = vector.broadcast %cst_268 : f32 to vector<8x128xf32>
    %1059 = arith.select %1057, %1046, %1058 : vector<8x128xi1>, vector<8x128xf32>
    %1060 = arith.addf %958, %1059 : vector<8x128xf32>
    %cst_269 = arith.constant 0.000000e+00 : f32
    %1061 = vector.broadcast %cst_269 : f32 to vector<8x128xf32>
    %1062 = arith.select %1057, %1047, %1061 : vector<8x128xi1>, vector<8x128xf32>
    %1063 = arith.addf %961, %1062 : vector<8x128xf32>
    %c2_i32_270 = arith.constant 2 : i32
    %1064 = vector.broadcast %c2_i32_270 : i32 to vector<8x128xi32>
    %1065 = arith.cmpi eq, %1042, %1064 : vector<8x128xi32>
    %cst_271 = arith.constant 0.000000e+00 : f32
    %1066 = vector.broadcast %cst_271 : f32 to vector<8x128xf32>
    %1067 = arith.select %1065, %1046, %1066 : vector<8x128xi1>, vector<8x128xf32>
    %1068 = arith.addf %966, %1067 : vector<8x128xf32>
    %cst_272 = arith.constant 0.000000e+00 : f32
    %1069 = vector.broadcast %cst_272 : f32 to vector<8x128xf32>
    %1070 = arith.select %1065, %1047, %1069 : vector<8x128xi1>, vector<8x128xf32>
    %1071 = arith.addf %969, %1070 : vector<8x128xf32>
    %c3_i32_273 = arith.constant 3 : i32
    %1072 = vector.broadcast %c3_i32_273 : i32 to vector<8x128xi32>
    %1073 = arith.cmpi eq, %1042, %1072 : vector<8x128xi32>
    %cst_274 = arith.constant 0.000000e+00 : f32
    %1074 = vector.broadcast %cst_274 : f32 to vector<8x128xf32>
    %1075 = arith.select %1073, %1046, %1074 : vector<8x128xi1>, vector<8x128xf32>
    %1076 = arith.addf %974, %1075 : vector<8x128xf32>
    %cst_275 = arith.constant 0.000000e+00 : f32
    %1077 = vector.broadcast %cst_275 : f32 to vector<8x128xf32>
    %1078 = arith.select %1073, %1047, %1077 : vector<8x128xi1>, vector<8x128xf32>
    %1079 = arith.addf %977, %1078 : vector<8x128xf32>
    %1080 = vector.broadcast %cst_225 : f32 to vector<8x128xf32>
    %1081 = arith.addf %984, %1080 : vector<8x128xf32>
    %1082 = vector.broadcast %cst_226 : f32 to vector<8x128xf32>
    %1083 = arith.cmpf oge, %1081, %1082 : vector<8x128xf32>
    %1084 = vector.broadcast %cst_226 : f32 to vector<8x128xf32>
    %1085 = arith.subf %1081, %1084 : vector<8x128xf32>
    %1086 = arith.select %1083, %1085, %1081 : vector<8x128xi1>, vector<8x128xf32>
    %1087 = vector.broadcast %cst_227 : f32 to vector<8x128xf32>
    %1088 = arith.addf %990, %1087 : vector<8x128xf32>
    %cst_276 = arith.constant 1.000000e+00 : f32
    %cst_277 = arith.constant 0.000000e+00 : f32
    %1089 = vector.broadcast %cst_276 : f32 to vector<8x128xf32>
    %1090 = vector.broadcast %cst_277 : f32 to vector<8x128xf32>
    %1091 = arith.select %1083, %1089, %1090 : vector<8x128xi1>, vector<8x128xf32>
    %1092 = arith.addf %1088, %1091 : vector<8x128xf32>
    %c2_i32_278 = arith.constant 2 : i32
    %c8_i32_279 = arith.constant 8 : i32
    %1093 = arith.muli %c2_i32_278, %c8_i32_279 : i32
    %1094 = tpu.assume_multiple %1093, 8 : i32
    %1095 = arith.index_cast %1094 : i32 to index
    %c0_280 = arith.constant 0 : index
    %1096 = vector.load %arg1[%1095, %c0_280] : memref<64x128xf32, #tpu.memory_space<vmem>>, vector<8x128xf32>
    %1097 = vector.broadcast %860 : f32 to vector<8x128xf32>
    %1098 = arith.subf %1097, %1092 : vector<8x128xf32>
    %1099 = vector.broadcast %876 : f32 to vector<8x128xf32>
    %1100 = arith.subf %1099, %1086 : vector<8x128xf32>
    %1101 = arith.mulf %1098, %1098 : vector<8x128xf32>
    %1102 = arith.mulf %1100, %1100 : vector<8x128xf32>
    %1103 = arith.addf %1101, %1102 : vector<8x128xf32>
    %cst_281 = arith.constant 1.000000e+00 : f32
    %1104 = vector.broadcast %cst_281 : f32 to vector<8x128xf32>
    %1105 = arith.maximumf %1104, %1103 : vector<8x128xf32>
    %c0_i32_282 = arith.constant 0 : i32
    %1106 = vector.broadcast %c0_i32_282 : i32 to vector<8x128xi32>
    %1107 = vector.broadcast %864 : f32 to vector<8x128xf32>
    %1108 = arith.subf %1107, %1092 : vector<8x128xf32>
    %1109 = vector.broadcast %880 : f32 to vector<8x128xf32>
    %1110 = arith.subf %1109, %1086 : vector<8x128xf32>
    %1111 = arith.mulf %1108, %1108 : vector<8x128xf32>
    %1112 = arith.mulf %1110, %1110 : vector<8x128xf32>
    %1113 = arith.addf %1111, %1112 : vector<8x128xf32>
    %cst_283 = arith.constant 1.000000e+00 : f32
    %1114 = vector.broadcast %cst_283 : f32 to vector<8x128xf32>
    %1115 = arith.maximumf %1114, %1113 : vector<8x128xf32>
    %1116 = arith.cmpf olt, %1115, %1105 : vector<8x128xf32>
    %c1_i32_284 = arith.constant 1 : i32
    %1117 = vector.broadcast %c1_i32_284 : i32 to vector<8x128xi32>
    %1118 = arith.select %1116, %1117, %1106 : vector<8x128xi1>, vector<8x128xi32>
    %1119 = arith.select %1116, %1115, %1105 : vector<8x128xi1>, vector<8x128xf32>
    %1120 = vector.broadcast %868 : f32 to vector<8x128xf32>
    %1121 = arith.subf %1120, %1092 : vector<8x128xf32>
    %1122 = vector.broadcast %884 : f32 to vector<8x128xf32>
    %1123 = arith.subf %1122, %1086 : vector<8x128xf32>
    %1124 = arith.mulf %1121, %1121 : vector<8x128xf32>
    %1125 = arith.mulf %1123, %1123 : vector<8x128xf32>
    %1126 = arith.addf %1124, %1125 : vector<8x128xf32>
    %cst_285 = arith.constant 1.000000e+00 : f32
    %1127 = vector.broadcast %cst_285 : f32 to vector<8x128xf32>
    %1128 = arith.maximumf %1127, %1126 : vector<8x128xf32>
    %1129 = arith.cmpf olt, %1128, %1119 : vector<8x128xf32>
    %c2_i32_286 = arith.constant 2 : i32
    %1130 = vector.broadcast %c2_i32_286 : i32 to vector<8x128xi32>
    %1131 = arith.select %1129, %1130, %1118 : vector<8x128xi1>, vector<8x128xi32>
    %1132 = arith.select %1129, %1128, %1119 : vector<8x128xi1>, vector<8x128xf32>
    %1133 = vector.broadcast %872 : f32 to vector<8x128xf32>
    %1134 = arith.subf %1133, %1092 : vector<8x128xf32>
    %1135 = vector.broadcast %888 : f32 to vector<8x128xf32>
    %1136 = arith.subf %1135, %1086 : vector<8x128xf32>
    %1137 = arith.mulf %1134, %1134 : vector<8x128xf32>
    %1138 = arith.mulf %1136, %1136 : vector<8x128xf32>
    %1139 = arith.addf %1137, %1138 : vector<8x128xf32>
    %cst_287 = arith.constant 1.000000e+00 : f32
    %1140 = vector.broadcast %cst_287 : f32 to vector<8x128xf32>
    %1141 = arith.maximumf %1140, %1139 : vector<8x128xf32>
    %1142 = arith.cmpf olt, %1141, %1132 : vector<8x128xf32>
    %c3_i32_288 = arith.constant 3 : i32
    %1143 = vector.broadcast %c3_i32_288 : i32 to vector<8x128xi32>
    %1144 = arith.select %1142, %1143, %1131 : vector<8x128xi1>, vector<8x128xi32>
    %1145 = arith.select %1142, %1141, %1132 : vector<8x128xi1>, vector<8x128xf32>
    %1146 = math.sqrt %1145 : vector<8x128xf32>
    %1147 = arith.divf %1096, %1146 : vector<8x128xf32>
    %1148 = arith.mulf %1092, %1147 : vector<8x128xf32>
    %1149 = arith.mulf %1086, %1147 : vector<8x128xf32>
    %c0_i32_289 = arith.constant 0 : i32
    %1150 = vector.broadcast %c0_i32_289 : i32 to vector<8x128xi32>
    %1151 = arith.cmpi eq, %1144, %1150 : vector<8x128xi32>
    %cst_290 = arith.constant 0.000000e+00 : f32
    %1152 = vector.broadcast %cst_290 : f32 to vector<8x128xf32>
    %1153 = arith.select %1151, %1148, %1152 : vector<8x128xi1>, vector<8x128xf32>
    %1154 = arith.addf %1052, %1153 : vector<8x128xf32>
    %cst_291 = arith.constant 0.000000e+00 : f32
    %1155 = vector.broadcast %cst_291 : f32 to vector<8x128xf32>
    %1156 = arith.select %1151, %1149, %1155 : vector<8x128xi1>, vector<8x128xf32>
    %1157 = arith.addf %1055, %1156 : vector<8x128xf32>
    %c1_i32_292 = arith.constant 1 : i32
    %1158 = vector.broadcast %c1_i32_292 : i32 to vector<8x128xi32>
    %1159 = arith.cmpi eq, %1144, %1158 : vector<8x128xi32>
    %cst_293 = arith.constant 0.000000e+00 : f32
    %1160 = vector.broadcast %cst_293 : f32 to vector<8x128xf32>
    %1161 = arith.select %1159, %1148, %1160 : vector<8x128xi1>, vector<8x128xf32>
    %1162 = arith.addf %1060, %1161 : vector<8x128xf32>
    %cst_294 = arith.constant 0.000000e+00 : f32
    %1163 = vector.broadcast %cst_294 : f32 to vector<8x128xf32>
    %1164 = arith.select %1159, %1149, %1163 : vector<8x128xi1>, vector<8x128xf32>
    %1165 = arith.addf %1063, %1164 : vector<8x128xf32>
    %c2_i32_295 = arith.constant 2 : i32
    %1166 = vector.broadcast %c2_i32_295 : i32 to vector<8x128xi32>
    %1167 = arith.cmpi eq, %1144, %1166 : vector<8x128xi32>
    %cst_296 = arith.constant 0.000000e+00 : f32
    %1168 = vector.broadcast %cst_296 : f32 to vector<8x128xf32>
    %1169 = arith.select %1167, %1148, %1168 : vector<8x128xi1>, vector<8x128xf32>
    %1170 = arith.addf %1068, %1169 : vector<8x128xf32>
    %cst_297 = arith.constant 0.000000e+00 : f32
    %1171 = vector.broadcast %cst_297 : f32 to vector<8x128xf32>
    %1172 = arith.select %1167, %1149, %1171 : vector<8x128xi1>, vector<8x128xf32>
    %1173 = arith.addf %1071, %1172 : vector<8x128xf32>
    %c3_i32_298 = arith.constant 3 : i32
    %1174 = vector.broadcast %c3_i32_298 : i32 to vector<8x128xi32>
    %1175 = arith.cmpi eq, %1144, %1174 : vector<8x128xi32>
    %cst_299 = arith.constant 0.000000e+00 : f32
    %1176 = vector.broadcast %cst_299 : f32 to vector<8x128xf32>
    %1177 = arith.select %1175, %1148, %1176 : vector<8x128xi1>, vector<8x128xf32>
    %1178 = arith.addf %1076, %1177 : vector<8x128xf32>
    %cst_300 = arith.constant 0.000000e+00 : f32
    %1179 = vector.broadcast %cst_300 : f32 to vector<8x128xf32>
    %1180 = arith.select %1175, %1149, %1179 : vector<8x128xi1>, vector<8x128xf32>
    %1181 = arith.addf %1079, %1180 : vector<8x128xf32>
    %1182 = vector.broadcast %cst_225 : f32 to vector<8x128xf32>
    %1183 = arith.addf %1086, %1182 : vector<8x128xf32>
    %1184 = vector.broadcast %cst_226 : f32 to vector<8x128xf32>
    %1185 = arith.cmpf oge, %1183, %1184 : vector<8x128xf32>
    %1186 = vector.broadcast %cst_226 : f32 to vector<8x128xf32>
    %1187 = arith.subf %1183, %1186 : vector<8x128xf32>
    %1188 = arith.select %1185, %1187, %1183 : vector<8x128xi1>, vector<8x128xf32>
    %1189 = vector.broadcast %cst_227 : f32 to vector<8x128xf32>
    %1190 = arith.addf %1092, %1189 : vector<8x128xf32>
    %cst_301 = arith.constant 1.000000e+00 : f32
    %cst_302 = arith.constant 0.000000e+00 : f32
    %1191 = vector.broadcast %cst_301 : f32 to vector<8x128xf32>
    %1192 = vector.broadcast %cst_302 : f32 to vector<8x128xf32>
    %1193 = arith.select %1185, %1191, %1192 : vector<8x128xi1>, vector<8x128xf32>
    %1194 = arith.addf %1190, %1193 : vector<8x128xf32>
    %c3_i32_303 = arith.constant 3 : i32
    %c8_i32_304 = arith.constant 8 : i32
    %1195 = arith.muli %c3_i32_303, %c8_i32_304 : i32
    %1196 = tpu.assume_multiple %1195, 8 : i32
    %1197 = arith.index_cast %1196 : i32 to index
    %c0_305 = arith.constant 0 : index
    %1198 = vector.load %arg1[%1197, %c0_305] : memref<64x128xf32, #tpu.memory_space<vmem>>, vector<8x128xf32>
    %1199 = vector.broadcast %860 : f32 to vector<8x128xf32>
    %1200 = arith.subf %1199, %1194 : vector<8x128xf32>
    %1201 = vector.broadcast %876 : f32 to vector<8x128xf32>
    %1202 = arith.subf %1201, %1188 : vector<8x128xf32>
    %1203 = arith.mulf %1200, %1200 : vector<8x128xf32>
    %1204 = arith.mulf %1202, %1202 : vector<8x128xf32>
    %1205 = arith.addf %1203, %1204 : vector<8x128xf32>
    %cst_306 = arith.constant 1.000000e+00 : f32
    %1206 = vector.broadcast %cst_306 : f32 to vector<8x128xf32>
    %1207 = arith.maximumf %1206, %1205 : vector<8x128xf32>
    %c0_i32_307 = arith.constant 0 : i32
    %1208 = vector.broadcast %c0_i32_307 : i32 to vector<8x128xi32>
    %1209 = vector.broadcast %864 : f32 to vector<8x128xf32>
    %1210 = arith.subf %1209, %1194 : vector<8x128xf32>
    %1211 = vector.broadcast %880 : f32 to vector<8x128xf32>
    %1212 = arith.subf %1211, %1188 : vector<8x128xf32>
    %1213 = arith.mulf %1210, %1210 : vector<8x128xf32>
    %1214 = arith.mulf %1212, %1212 : vector<8x128xf32>
    %1215 = arith.addf %1213, %1214 : vector<8x128xf32>
    %cst_308 = arith.constant 1.000000e+00 : f32
    %1216 = vector.broadcast %cst_308 : f32 to vector<8x128xf32>
    %1217 = arith.maximumf %1216, %1215 : vector<8x128xf32>
    %1218 = arith.cmpf olt, %1217, %1207 : vector<8x128xf32>
    %c1_i32_309 = arith.constant 1 : i32
    %1219 = vector.broadcast %c1_i32_309 : i32 to vector<8x128xi32>
    %1220 = arith.select %1218, %1219, %1208 : vector<8x128xi1>, vector<8x128xi32>
    %1221 = arith.select %1218, %1217, %1207 : vector<8x128xi1>, vector<8x128xf32>
    %1222 = vector.broadcast %868 : f32 to vector<8x128xf32>
    %1223 = arith.subf %1222, %1194 : vector<8x128xf32>
    %1224 = vector.broadcast %884 : f32 to vector<8x128xf32>
    %1225 = arith.subf %1224, %1188 : vector<8x128xf32>
    %1226 = arith.mulf %1223, %1223 : vector<8x128xf32>
    %1227 = arith.mulf %1225, %1225 : vector<8x128xf32>
    %1228 = arith.addf %1226, %1227 : vector<8x128xf32>
    %cst_310 = arith.constant 1.000000e+00 : f32
    %1229 = vector.broadcast %cst_310 : f32 to vector<8x128xf32>
    %1230 = arith.maximumf %1229, %1228 : vector<8x128xf32>
    %1231 = arith.cmpf olt, %1230, %1221 : vector<8x128xf32>
    %c2_i32_311 = arith.constant 2 : i32
    %1232 = vector.broadcast %c2_i32_311 : i32 to vector<8x128xi32>
    %1233 = arith.select %1231, %1232, %1220 : vector<8x128xi1>, vector<8x128xi32>
    %1234 = arith.select %1231, %1230, %1221 : vector<8x128xi1>, vector<8x128xf32>
    %1235 = vector.broadcast %872 : f32 to vector<8x128xf32>
    %1236 = arith.subf %1235, %1194 : vector<8x128xf32>
    %1237 = vector.broadcast %888 : f32 to vector<8x128xf32>
    %1238 = arith.subf %1237, %1188 : vector<8x128xf32>
    %1239 = arith.mulf %1236, %1236 : vector<8x128xf32>
    %1240 = arith.mulf %1238, %1238 : vector<8x128xf32>
    %1241 = arith.addf %1239, %1240 : vector<8x128xf32>
    %cst_312 = arith.constant 1.000000e+00 : f32
    %1242 = vector.broadcast %cst_312 : f32 to vector<8x128xf32>
    %1243 = arith.maximumf %1242, %1241 : vector<8x128xf32>
    %1244 = arith.cmpf olt, %1243, %1234 : vector<8x128xf32>
    %c3_i32_313 = arith.constant 3 : i32
    %1245 = vector.broadcast %c3_i32_313 : i32 to vector<8x128xi32>
    %1246 = arith.select %1244, %1245, %1233 : vector<8x128xi1>, vector<8x128xi32>
    %1247 = arith.select %1244, %1243, %1234 : vector<8x128xi1>, vector<8x128xf32>
    %1248 = math.sqrt %1247 : vector<8x128xf32>
    %1249 = arith.divf %1198, %1248 : vector<8x128xf32>
    %1250 = arith.mulf %1194, %1249 : vector<8x128xf32>
    %1251 = arith.mulf %1188, %1249 : vector<8x128xf32>
    %c0_i32_314 = arith.constant 0 : i32
    %1252 = vector.broadcast %c0_i32_314 : i32 to vector<8x128xi32>
    %1253 = arith.cmpi eq, %1246, %1252 : vector<8x128xi32>
    %cst_315 = arith.constant 0.000000e+00 : f32
    %1254 = vector.broadcast %cst_315 : f32 to vector<8x128xf32>
    %1255 = arith.select %1253, %1250, %1254 : vector<8x128xi1>, vector<8x128xf32>
    %1256 = arith.addf %1154, %1255 : vector<8x128xf32>
    %cst_316 = arith.constant 0.000000e+00 : f32
    %1257 = vector.broadcast %cst_316 : f32 to vector<8x128xf32>
    %1258 = arith.select %1253, %1251, %1257 : vector<8x128xi1>, vector<8x128xf32>
    %1259 = arith.addf %1157, %1258 : vector<8x128xf32>
    %c1_i32_317 = arith.constant 1 : i32
    %1260 = vector.broadcast %c1_i32_317 : i32 to vector<8x128xi32>
    %1261 = arith.cmpi eq, %1246, %1260 : vector<8x128xi32>
    %cst_318 = arith.constant 0.000000e+00 : f32
    %1262 = vector.broadcast %cst_318 : f32 to vector<8x128xf32>
    %1263 = arith.select %1261, %1250, %1262 : vector<8x128xi1>, vector<8x128xf32>
    %1264 = arith.addf %1162, %1263 : vector<8x128xf32>
    %cst_319 = arith.constant 0.000000e+00 : f32
    %1265 = vector.broadcast %cst_319 : f32 to vector<8x128xf32>
    %1266 = arith.select %1261, %1251, %1265 : vector<8x128xi1>, vector<8x128xf32>
    %1267 = arith.addf %1165, %1266 : vector<8x128xf32>
    %c2_i32_320 = arith.constant 2 : i32
    %1268 = vector.broadcast %c2_i32_320 : i32 to vector<8x128xi32>
    %1269 = arith.cmpi eq, %1246, %1268 : vector<8x128xi32>
    %cst_321 = arith.constant 0.000000e+00 : f32
    %1270 = vector.broadcast %cst_321 : f32 to vector<8x128xf32>
    %1271 = arith.select %1269, %1250, %1270 : vector<8x128xi1>, vector<8x128xf32>
    %1272 = arith.addf %1170, %1271 : vector<8x128xf32>
    %cst_322 = arith.constant 0.000000e+00 : f32
    %1273 = vector.broadcast %cst_322 : f32 to vector<8x128xf32>
    %1274 = arith.select %1269, %1251, %1273 : vector<8x128xi1>, vector<8x128xf32>
    %1275 = arith.addf %1173, %1274 : vector<8x128xf32>
    %c3_i32_323 = arith.constant 3 : i32
    %1276 = vector.broadcast %c3_i32_323 : i32 to vector<8x128xi32>
    %1277 = arith.cmpi eq, %1246, %1276 : vector<8x128xi32>
    %cst_324 = arith.constant 0.000000e+00 : f32
    %1278 = vector.broadcast %cst_324 : f32 to vector<8x128xf32>
    %1279 = arith.select %1277, %1250, %1278 : vector<8x128xi1>, vector<8x128xf32>
    %1280 = arith.addf %1178, %1279 : vector<8x128xf32>
    %cst_325 = arith.constant 0.000000e+00 : f32
    %1281 = vector.broadcast %cst_325 : f32 to vector<8x128xf32>
    %1282 = arith.select %1277, %1251, %1281 : vector<8x128xi1>, vector<8x128xf32>
    %1283 = arith.addf %1181, %1282 : vector<8x128xf32>
    %1284 = vector.broadcast %cst_225 : f32 to vector<8x128xf32>
    %1285 = arith.addf %1188, %1284 : vector<8x128xf32>
    %1286 = vector.broadcast %cst_226 : f32 to vector<8x128xf32>
    %1287 = arith.cmpf oge, %1285, %1286 : vector<8x128xf32>
    %1288 = vector.broadcast %cst_226 : f32 to vector<8x128xf32>
    %1289 = arith.subf %1285, %1288 : vector<8x128xf32>
    %1290 = arith.select %1287, %1289, %1285 : vector<8x128xi1>, vector<8x128xf32>
    %1291 = vector.broadcast %cst_227 : f32 to vector<8x128xf32>
    %1292 = arith.addf %1194, %1291 : vector<8x128xf32>
    %cst_326 = arith.constant 1.000000e+00 : f32
    %cst_327 = arith.constant 0.000000e+00 : f32
    %1293 = vector.broadcast %cst_326 : f32 to vector<8x128xf32>
    %1294 = vector.broadcast %cst_327 : f32 to vector<8x128xf32>
    %1295 = arith.select %1287, %1293, %1294 : vector<8x128xi1>, vector<8x128xf32>
    %1296 = arith.addf %1292, %1295 : vector<8x128xf32>
    %c4_i32_328 = arith.constant 4 : i32
    %c8_i32_329 = arith.constant 8 : i32
    %1297 = arith.muli %c4_i32_328, %c8_i32_329 : i32
    %1298 = tpu.assume_multiple %1297, 8 : i32
    %1299 = arith.index_cast %1298 : i32 to index
    %c0_330 = arith.constant 0 : index
    %1300 = vector.load %arg1[%1299, %c0_330] : memref<64x128xf32, #tpu.memory_space<vmem>>, vector<8x128xf32>
    %1301 = vector.broadcast %860 : f32 to vector<8x128xf32>
    %1302 = arith.subf %1301, %1296 : vector<8x128xf32>
    %1303 = vector.broadcast %876 : f32 to vector<8x128xf32>
    %1304 = arith.subf %1303, %1290 : vector<8x128xf32>
    %1305 = arith.mulf %1302, %1302 : vector<8x128xf32>
    %1306 = arith.mulf %1304, %1304 : vector<8x128xf32>
    %1307 = arith.addf %1305, %1306 : vector<8x128xf32>
    %cst_331 = arith.constant 1.000000e+00 : f32
    %1308 = vector.broadcast %cst_331 : f32 to vector<8x128xf32>
    %1309 = arith.maximumf %1308, %1307 : vector<8x128xf32>
    %c0_i32_332 = arith.constant 0 : i32
    %1310 = vector.broadcast %c0_i32_332 : i32 to vector<8x128xi32>
    %1311 = vector.broadcast %864 : f32 to vector<8x128xf32>
    %1312 = arith.subf %1311, %1296 : vector<8x128xf32>
    %1313 = vector.broadcast %880 : f32 to vector<8x128xf32>
    %1314 = arith.subf %1313, %1290 : vector<8x128xf32>
    %1315 = arith.mulf %1312, %1312 : vector<8x128xf32>
    %1316 = arith.mulf %1314, %1314 : vector<8x128xf32>
    %1317 = arith.addf %1315, %1316 : vector<8x128xf32>
    %cst_333 = arith.constant 1.000000e+00 : f32
    %1318 = vector.broadcast %cst_333 : f32 to vector<8x128xf32>
    %1319 = arith.maximumf %1318, %1317 : vector<8x128xf32>
    %1320 = arith.cmpf olt, %1319, %1309 : vector<8x128xf32>
    %c1_i32_334 = arith.constant 1 : i32
    %1321 = vector.broadcast %c1_i32_334 : i32 to vector<8x128xi32>
    %1322 = arith.select %1320, %1321, %1310 : vector<8x128xi1>, vector<8x128xi32>
    %1323 = arith.select %1320, %1319, %1309 : vector<8x128xi1>, vector<8x128xf32>
    %1324 = vector.broadcast %868 : f32 to vector<8x128xf32>
    %1325 = arith.subf %1324, %1296 : vector<8x128xf32>
    %1326 = vector.broadcast %884 : f32 to vector<8x128xf32>
    %1327 = arith.subf %1326, %1290 : vector<8x128xf32>
    %1328 = arith.mulf %1325, %1325 : vector<8x128xf32>
    %1329 = arith.mulf %1327, %1327 : vector<8x128xf32>
    %1330 = arith.addf %1328, %1329 : vector<8x128xf32>
    %cst_335 = arith.constant 1.000000e+00 : f32
    %1331 = vector.broadcast %cst_335 : f32 to vector<8x128xf32>
    %1332 = arith.maximumf %1331, %1330 : vector<8x128xf32>
    %1333 = arith.cmpf olt, %1332, %1323 : vector<8x128xf32>
    %c2_i32_336 = arith.constant 2 : i32
    %1334 = vector.broadcast %c2_i32_336 : i32 to vector<8x128xi32>
    %1335 = arith.select %1333, %1334, %1322 : vector<8x128xi1>, vector<8x128xi32>
    %1336 = arith.select %1333, %1332, %1323 : vector<8x128xi1>, vector<8x128xf32>
    %1337 = vector.broadcast %872 : f32 to vector<8x128xf32>
    %1338 = arith.subf %1337, %1296 : vector<8x128xf32>
    %1339 = vector.broadcast %888 : f32 to vector<8x128xf32>
    %1340 = arith.subf %1339, %1290 : vector<8x128xf32>
    %1341 = arith.mulf %1338, %1338 : vector<8x128xf32>
    %1342 = arith.mulf %1340, %1340 : vector<8x128xf32>
    %1343 = arith.addf %1341, %1342 : vector<8x128xf32>
    %cst_337 = arith.constant 1.000000e+00 : f32
    %1344 = vector.broadcast %cst_337 : f32 to vector<8x128xf32>
    %1345 = arith.maximumf %1344, %1343 : vector<8x128xf32>
    %1346 = arith.cmpf olt, %1345, %1336 : vector<8x128xf32>
    %c3_i32_338 = arith.constant 3 : i32
    %1347 = vector.broadcast %c3_i32_338 : i32 to vector<8x128xi32>
    %1348 = arith.select %1346, %1347, %1335 : vector<8x128xi1>, vector<8x128xi32>
    %1349 = arith.select %1346, %1345, %1336 : vector<8x128xi1>, vector<8x128xf32>
    %1350 = math.sqrt %1349 : vector<8x128xf32>
    %1351 = arith.divf %1300, %1350 : vector<8x128xf32>
    %1352 = arith.mulf %1296, %1351 : vector<8x128xf32>
    %1353 = arith.mulf %1290, %1351 : vector<8x128xf32>
    %c0_i32_339 = arith.constant 0 : i32
    %1354 = vector.broadcast %c0_i32_339 : i32 to vector<8x128xi32>
    %1355 = arith.cmpi eq, %1348, %1354 : vector<8x128xi32>
    %cst_340 = arith.constant 0.000000e+00 : f32
    %1356 = vector.broadcast %cst_340 : f32 to vector<8x128xf32>
    %1357 = arith.select %1355, %1352, %1356 : vector<8x128xi1>, vector<8x128xf32>
    %1358 = arith.addf %1256, %1357 : vector<8x128xf32>
    %cst_341 = arith.constant 0.000000e+00 : f32
    %1359 = vector.broadcast %cst_341 : f32 to vector<8x128xf32>
    %1360 = arith.select %1355, %1353, %1359 : vector<8x128xi1>, vector<8x128xf32>
    %1361 = arith.addf %1259, %1360 : vector<8x128xf32>
    %c1_i32_342 = arith.constant 1 : i32
    %1362 = vector.broadcast %c1_i32_342 : i32 to vector<8x128xi32>
    %1363 = arith.cmpi eq, %1348, %1362 : vector<8x128xi32>
    %cst_343 = arith.constant 0.000000e+00 : f32
    %1364 = vector.broadcast %cst_343 : f32 to vector<8x128xf32>
    %1365 = arith.select %1363, %1352, %1364 : vector<8x128xi1>, vector<8x128xf32>
    %1366 = arith.addf %1264, %1365 : vector<8x128xf32>
    %cst_344 = arith.constant 0.000000e+00 : f32
    %1367 = vector.broadcast %cst_344 : f32 to vector<8x128xf32>
    %1368 = arith.select %1363, %1353, %1367 : vector<8x128xi1>, vector<8x128xf32>
    %1369 = arith.addf %1267, %1368 : vector<8x128xf32>
    %c2_i32_345 = arith.constant 2 : i32
    %1370 = vector.broadcast %c2_i32_345 : i32 to vector<8x128xi32>
    %1371 = arith.cmpi eq, %1348, %1370 : vector<8x128xi32>
    %cst_346 = arith.constant 0.000000e+00 : f32
    %1372 = vector.broadcast %cst_346 : f32 to vector<8x128xf32>
    %1373 = arith.select %1371, %1352, %1372 : vector<8x128xi1>, vector<8x128xf32>
    %1374 = arith.addf %1272, %1373 : vector<8x128xf32>
    %cst_347 = arith.constant 0.000000e+00 : f32
    %1375 = vector.broadcast %cst_347 : f32 to vector<8x128xf32>
    %1376 = arith.select %1371, %1353, %1375 : vector<8x128xi1>, vector<8x128xf32>
    %1377 = arith.addf %1275, %1376 : vector<8x128xf32>
    %c3_i32_348 = arith.constant 3 : i32
    %1378 = vector.broadcast %c3_i32_348 : i32 to vector<8x128xi32>
    %1379 = arith.cmpi eq, %1348, %1378 : vector<8x128xi32>
    %cst_349 = arith.constant 0.000000e+00 : f32
    %1380 = vector.broadcast %cst_349 : f32 to vector<8x128xf32>
    %1381 = arith.select %1379, %1352, %1380 : vector<8x128xi1>, vector<8x128xf32>
    %1382 = arith.addf %1280, %1381 : vector<8x128xf32>
    %cst_350 = arith.constant 0.000000e+00 : f32
    %1383 = vector.broadcast %cst_350 : f32 to vector<8x128xf32>
    %1384 = arith.select %1379, %1353, %1383 : vector<8x128xi1>, vector<8x128xf32>
    %1385 = arith.addf %1283, %1384 : vector<8x128xf32>
    %1386 = vector.broadcast %cst_225 : f32 to vector<8x128xf32>
    %1387 = arith.addf %1290, %1386 : vector<8x128xf32>
    %1388 = vector.broadcast %cst_226 : f32 to vector<8x128xf32>
    %1389 = arith.cmpf oge, %1387, %1388 : vector<8x128xf32>
    %1390 = vector.broadcast %cst_226 : f32 to vector<8x128xf32>
    %1391 = arith.subf %1387, %1390 : vector<8x128xf32>
    %1392 = arith.select %1389, %1391, %1387 : vector<8x128xi1>, vector<8x128xf32>
    %1393 = vector.broadcast %cst_227 : f32 to vector<8x128xf32>
    %1394 = arith.addf %1296, %1393 : vector<8x128xf32>
    %cst_351 = arith.constant 1.000000e+00 : f32
    %cst_352 = arith.constant 0.000000e+00 : f32
    %1395 = vector.broadcast %cst_351 : f32 to vector<8x128xf32>
    %1396 = vector.broadcast %cst_352 : f32 to vector<8x128xf32>
    %1397 = arith.select %1389, %1395, %1396 : vector<8x128xi1>, vector<8x128xf32>
    %1398 = arith.addf %1394, %1397 : vector<8x128xf32>
    %c5_i32_353 = arith.constant 5 : i32
    %c8_i32_354 = arith.constant 8 : i32
    %1399 = arith.muli %c5_i32_353, %c8_i32_354 : i32
    %1400 = tpu.assume_multiple %1399, 8 : i32
    %1401 = arith.index_cast %1400 : i32 to index
    %c0_355 = arith.constant 0 : index
    %1402 = vector.load %arg1[%1401, %c0_355] : memref<64x128xf32, #tpu.memory_space<vmem>>, vector<8x128xf32>
    %1403 = vector.broadcast %860 : f32 to vector<8x128xf32>
    %1404 = arith.subf %1403, %1398 : vector<8x128xf32>
    %1405 = vector.broadcast %876 : f32 to vector<8x128xf32>
    %1406 = arith.subf %1405, %1392 : vector<8x128xf32>
    %1407 = arith.mulf %1404, %1404 : vector<8x128xf32>
    %1408 = arith.mulf %1406, %1406 : vector<8x128xf32>
    %1409 = arith.addf %1407, %1408 : vector<8x128xf32>
    %cst_356 = arith.constant 1.000000e+00 : f32
    %1410 = vector.broadcast %cst_356 : f32 to vector<8x128xf32>
    %1411 = arith.maximumf %1410, %1409 : vector<8x128xf32>
    %c0_i32_357 = arith.constant 0 : i32
    %1412 = vector.broadcast %c0_i32_357 : i32 to vector<8x128xi32>
    %1413 = vector.broadcast %864 : f32 to vector<8x128xf32>
    %1414 = arith.subf %1413, %1398 : vector<8x128xf32>
    %1415 = vector.broadcast %880 : f32 to vector<8x128xf32>
    %1416 = arith.subf %1415, %1392 : vector<8x128xf32>
    %1417 = arith.mulf %1414, %1414 : vector<8x128xf32>
    %1418 = arith.mulf %1416, %1416 : vector<8x128xf32>
    %1419 = arith.addf %1417, %1418 : vector<8x128xf32>
    %cst_358 = arith.constant 1.000000e+00 : f32
    %1420 = vector.broadcast %cst_358 : f32 to vector<8x128xf32>
    %1421 = arith.maximumf %1420, %1419 : vector<8x128xf32>
    %1422 = arith.cmpf olt, %1421, %1411 : vector<8x128xf32>
    %c1_i32_359 = arith.constant 1 : i32
    %1423 = vector.broadcast %c1_i32_359 : i32 to vector<8x128xi32>
    %1424 = arith.select %1422, %1423, %1412 : vector<8x128xi1>, vector<8x128xi32>
    %1425 = arith.select %1422, %1421, %1411 : vector<8x128xi1>, vector<8x128xf32>
    %1426 = vector.broadcast %868 : f32 to vector<8x128xf32>
    %1427 = arith.subf %1426, %1398 : vector<8x128xf32>
    %1428 = vector.broadcast %884 : f32 to vector<8x128xf32>
    %1429 = arith.subf %1428, %1392 : vector<8x128xf32>
    %1430 = arith.mulf %1427, %1427 : vector<8x128xf32>
    %1431 = arith.mulf %1429, %1429 : vector<8x128xf32>
    %1432 = arith.addf %1430, %1431 : vector<8x128xf32>
    %cst_360 = arith.constant 1.000000e+00 : f32
    %1433 = vector.broadcast %cst_360 : f32 to vector<8x128xf32>
    %1434 = arith.maximumf %1433, %1432 : vector<8x128xf32>
    %1435 = arith.cmpf olt, %1434, %1425 : vector<8x128xf32>
    %c2_i32_361 = arith.constant 2 : i32
    %1436 = vector.broadcast %c2_i32_361 : i32 to vector<8x128xi32>
    %1437 = arith.select %1435, %1436, %1424 : vector<8x128xi1>, vector<8x128xi32>
    %1438 = arith.select %1435, %1434, %1425 : vector<8x128xi1>, vector<8x128xf32>
    %1439 = vector.broadcast %872 : f32 to vector<8x128xf32>
    %1440 = arith.subf %1439, %1398 : vector<8x128xf32>
    %1441 = vector.broadcast %888 : f32 to vector<8x128xf32>
    %1442 = arith.subf %1441, %1392 : vector<8x128xf32>
    %1443 = arith.mulf %1440, %1440 : vector<8x128xf32>
    %1444 = arith.mulf %1442, %1442 : vector<8x128xf32>
    %1445 = arith.addf %1443, %1444 : vector<8x128xf32>
    %cst_362 = arith.constant 1.000000e+00 : f32
    %1446 = vector.broadcast %cst_362 : f32 to vector<8x128xf32>
    %1447 = arith.maximumf %1446, %1445 : vector<8x128xf32>
    %1448 = arith.cmpf olt, %1447, %1438 : vector<8x128xf32>
    %c3_i32_363 = arith.constant 3 : i32
    %1449 = vector.broadcast %c3_i32_363 : i32 to vector<8x128xi32>
    %1450 = arith.select %1448, %1449, %1437 : vector<8x128xi1>, vector<8x128xi32>
    %1451 = arith.select %1448, %1447, %1438 : vector<8x128xi1>, vector<8x128xf32>
    %1452 = math.sqrt %1451 : vector<8x128xf32>
    %1453 = arith.divf %1402, %1452 : vector<8x128xf32>
    %1454 = arith.mulf %1398, %1453 : vector<8x128xf32>
    %1455 = arith.mulf %1392, %1453 : vector<8x128xf32>
    %c0_i32_364 = arith.constant 0 : i32
    %1456 = vector.broadcast %c0_i32_364 : i32 to vector<8x128xi32>
    %1457 = arith.cmpi eq, %1450, %1456 : vector<8x128xi32>
    %cst_365 = arith.constant 0.000000e+00 : f32
    %1458 = vector.broadcast %cst_365 : f32 to vector<8x128xf32>
    %1459 = arith.select %1457, %1454, %1458 : vector<8x128xi1>, vector<8x128xf32>
    %1460 = arith.addf %1358, %1459 : vector<8x128xf32>
    %cst_366 = arith.constant 0.000000e+00 : f32
    %1461 = vector.broadcast %cst_366 : f32 to vector<8x128xf32>
    %1462 = arith.select %1457, %1455, %1461 : vector<8x128xi1>, vector<8x128xf32>
    %1463 = arith.addf %1361, %1462 : vector<8x128xf32>
    %c1_i32_367 = arith.constant 1 : i32
    %1464 = vector.broadcast %c1_i32_367 : i32 to vector<8x128xi32>
    %1465 = arith.cmpi eq, %1450, %1464 : vector<8x128xi32>
    %cst_368 = arith.constant 0.000000e+00 : f32
    %1466 = vector.broadcast %cst_368 : f32 to vector<8x128xf32>
    %1467 = arith.select %1465, %1454, %1466 : vector<8x128xi1>, vector<8x128xf32>
    %1468 = arith.addf %1366, %1467 : vector<8x128xf32>
    %cst_369 = arith.constant 0.000000e+00 : f32
    %1469 = vector.broadcast %cst_369 : f32 to vector<8x128xf32>
    %1470 = arith.select %1465, %1455, %1469 : vector<8x128xi1>, vector<8x128xf32>
    %1471 = arith.addf %1369, %1470 : vector<8x128xf32>
    %c2_i32_370 = arith.constant 2 : i32
    %1472 = vector.broadcast %c2_i32_370 : i32 to vector<8x128xi32>
    %1473 = arith.cmpi eq, %1450, %1472 : vector<8x128xi32>
    %cst_371 = arith.constant 0.000000e+00 : f32
    %1474 = vector.broadcast %cst_371 : f32 to vector<8x128xf32>
    %1475 = arith.select %1473, %1454, %1474 : vector<8x128xi1>, vector<8x128xf32>
    %1476 = arith.addf %1374, %1475 : vector<8x128xf32>
    %cst_372 = arith.constant 0.000000e+00 : f32
    %1477 = vector.broadcast %cst_372 : f32 to vector<8x128xf32>
    %1478 = arith.select %1473, %1455, %1477 : vector<8x128xi1>, vector<8x128xf32>
    %1479 = arith.addf %1377, %1478 : vector<8x128xf32>
    %c3_i32_373 = arith.constant 3 : i32
    %1480 = vector.broadcast %c3_i32_373 : i32 to vector<8x128xi32>
    %1481 = arith.cmpi eq, %1450, %1480 : vector<8x128xi32>
    %cst_374 = arith.constant 0.000000e+00 : f32
    %1482 = vector.broadcast %cst_374 : f32 to vector<8x128xf32>
    %1483 = arith.select %1481, %1454, %1482 : vector<8x128xi1>, vector<8x128xf32>
    %1484 = arith.addf %1382, %1483 : vector<8x128xf32>
    %cst_375 = arith.constant 0.000000e+00 : f32
    %1485 = vector.broadcast %cst_375 : f32 to vector<8x128xf32>
    %1486 = arith.select %1481, %1455, %1485 : vector<8x128xi1>, vector<8x128xf32>
    %1487 = arith.addf %1385, %1486 : vector<8x128xf32>
    %1488 = vector.broadcast %cst_225 : f32 to vector<8x128xf32>
    %1489 = arith.addf %1392, %1488 : vector<8x128xf32>
    %1490 = vector.broadcast %cst_226 : f32 to vector<8x128xf32>
    %1491 = arith.cmpf oge, %1489, %1490 : vector<8x128xf32>
    %1492 = vector.broadcast %cst_226 : f32 to vector<8x128xf32>
    %1493 = arith.subf %1489, %1492 : vector<8x128xf32>
    %1494 = arith.select %1491, %1493, %1489 : vector<8x128xi1>, vector<8x128xf32>
    %1495 = vector.broadcast %cst_227 : f32 to vector<8x128xf32>
    %1496 = arith.addf %1398, %1495 : vector<8x128xf32>
    %cst_376 = arith.constant 1.000000e+00 : f32
    %cst_377 = arith.constant 0.000000e+00 : f32
    %1497 = vector.broadcast %cst_376 : f32 to vector<8x128xf32>
    %1498 = vector.broadcast %cst_377 : f32 to vector<8x128xf32>
    %1499 = arith.select %1491, %1497, %1498 : vector<8x128xi1>, vector<8x128xf32>
    %1500 = arith.addf %1496, %1499 : vector<8x128xf32>
    %c6_i32_378 = arith.constant 6 : i32
    %c8_i32_379 = arith.constant 8 : i32
    %1501 = arith.muli %c6_i32_378, %c8_i32_379 : i32
    %1502 = tpu.assume_multiple %1501, 8 : i32
    %1503 = arith.index_cast %1502 : i32 to index
    %c0_380 = arith.constant 0 : index
    %1504 = vector.load %arg1[%1503, %c0_380] : memref<64x128xf32, #tpu.memory_space<vmem>>, vector<8x128xf32>
    %1505 = vector.broadcast %860 : f32 to vector<8x128xf32>
    %1506 = arith.subf %1505, %1500 : vector<8x128xf32>
    %1507 = vector.broadcast %876 : f32 to vector<8x128xf32>
    %1508 = arith.subf %1507, %1494 : vector<8x128xf32>
    %1509 = arith.mulf %1506, %1506 : vector<8x128xf32>
    %1510 = arith.mulf %1508, %1508 : vector<8x128xf32>
    %1511 = arith.addf %1509, %1510 : vector<8x128xf32>
    %cst_381 = arith.constant 1.000000e+00 : f32
    %1512 = vector.broadcast %cst_381 : f32 to vector<8x128xf32>
    %1513 = arith.maximumf %1512, %1511 : vector<8x128xf32>
    %c0_i32_382 = arith.constant 0 : i32
    %1514 = vector.broadcast %c0_i32_382 : i32 to vector<8x128xi32>
    %1515 = vector.broadcast %864 : f32 to vector<8x128xf32>
    %1516 = arith.subf %1515, %1500 : vector<8x128xf32>
    %1517 = vector.broadcast %880 : f32 to vector<8x128xf32>
    %1518 = arith.subf %1517, %1494 : vector<8x128xf32>
    %1519 = arith.mulf %1516, %1516 : vector<8x128xf32>
    %1520 = arith.mulf %1518, %1518 : vector<8x128xf32>
    %1521 = arith.addf %1519, %1520 : vector<8x128xf32>
    %cst_383 = arith.constant 1.000000e+00 : f32
    %1522 = vector.broadcast %cst_383 : f32 to vector<8x128xf32>
    %1523 = arith.maximumf %1522, %1521 : vector<8x128xf32>
    %1524 = arith.cmpf olt, %1523, %1513 : vector<8x128xf32>
    %c1_i32_384 = arith.constant 1 : i32
    %1525 = vector.broadcast %c1_i32_384 : i32 to vector<8x128xi32>
    %1526 = arith.select %1524, %1525, %1514 : vector<8x128xi1>, vector<8x128xi32>
    %1527 = arith.select %1524, %1523, %1513 : vector<8x128xi1>, vector<8x128xf32>
    %1528 = vector.broadcast %868 : f32 to vector<8x128xf32>
    %1529 = arith.subf %1528, %1500 : vector<8x128xf32>
    %1530 = vector.broadcast %884 : f32 to vector<8x128xf32>
    %1531 = arith.subf %1530, %1494 : vector<8x128xf32>
    %1532 = arith.mulf %1529, %1529 : vector<8x128xf32>
    %1533 = arith.mulf %1531, %1531 : vector<8x128xf32>
    %1534 = arith.addf %1532, %1533 : vector<8x128xf32>
    %cst_385 = arith.constant 1.000000e+00 : f32
    %1535 = vector.broadcast %cst_385 : f32 to vector<8x128xf32>
    %1536 = arith.maximumf %1535, %1534 : vector<8x128xf32>
    %1537 = arith.cmpf olt, %1536, %1527 : vector<8x128xf32>
    %c2_i32_386 = arith.constant 2 : i32
    %1538 = vector.broadcast %c2_i32_386 : i32 to vector<8x128xi32>
    %1539 = arith.select %1537, %1538, %1526 : vector<8x128xi1>, vector<8x128xi32>
    %1540 = arith.select %1537, %1536, %1527 : vector<8x128xi1>, vector<8x128xf32>
    %1541 = vector.broadcast %872 : f32 to vector<8x128xf32>
    %1542 = arith.subf %1541, %1500 : vector<8x128xf32>
    %1543 = vector.broadcast %888 : f32 to vector<8x128xf32>
    %1544 = arith.subf %1543, %1494 : vector<8x128xf32>
    %1545 = arith.mulf %1542, %1542 : vector<8x128xf32>
    %1546 = arith.mulf %1544, %1544 : vector<8x128xf32>
    %1547 = arith.addf %1545, %1546 : vector<8x128xf32>
    %cst_387 = arith.constant 1.000000e+00 : f32
    %1548 = vector.broadcast %cst_387 : f32 to vector<8x128xf32>
    %1549 = arith.maximumf %1548, %1547 : vector<8x128xf32>
    %1550 = arith.cmpf olt, %1549, %1540 : vector<8x128xf32>
    %c3_i32_388 = arith.constant 3 : i32
    %1551 = vector.broadcast %c3_i32_388 : i32 to vector<8x128xi32>
    %1552 = arith.select %1550, %1551, %1539 : vector<8x128xi1>, vector<8x128xi32>
    %1553 = arith.select %1550, %1549, %1540 : vector<8x128xi1>, vector<8x128xf32>
    %1554 = math.sqrt %1553 : vector<8x128xf32>
    %1555 = arith.divf %1504, %1554 : vector<8x128xf32>
    %1556 = arith.mulf %1500, %1555 : vector<8x128xf32>
    %1557 = arith.mulf %1494, %1555 : vector<8x128xf32>
    %c0_i32_389 = arith.constant 0 : i32
    %1558 = vector.broadcast %c0_i32_389 : i32 to vector<8x128xi32>
    %1559 = arith.cmpi eq, %1552, %1558 : vector<8x128xi32>
    %cst_390 = arith.constant 0.000000e+00 : f32
    %1560 = vector.broadcast %cst_390 : f32 to vector<8x128xf32>
    %1561 = arith.select %1559, %1556, %1560 : vector<8x128xi1>, vector<8x128xf32>
    %1562 = arith.addf %1460, %1561 : vector<8x128xf32>
    %cst_391 = arith.constant 0.000000e+00 : f32
    %1563 = vector.broadcast %cst_391 : f32 to vector<8x128xf32>
    %1564 = arith.select %1559, %1557, %1563 : vector<8x128xi1>, vector<8x128xf32>
    %1565 = arith.addf %1463, %1564 : vector<8x128xf32>
    %c1_i32_392 = arith.constant 1 : i32
    %1566 = vector.broadcast %c1_i32_392 : i32 to vector<8x128xi32>
    %1567 = arith.cmpi eq, %1552, %1566 : vector<8x128xi32>
    %cst_393 = arith.constant 0.000000e+00 : f32
    %1568 = vector.broadcast %cst_393 : f32 to vector<8x128xf32>
    %1569 = arith.select %1567, %1556, %1568 : vector<8x128xi1>, vector<8x128xf32>
    %1570 = arith.addf %1468, %1569 : vector<8x128xf32>
    %cst_394 = arith.constant 0.000000e+00 : f32
    %1571 = vector.broadcast %cst_394 : f32 to vector<8x128xf32>
    %1572 = arith.select %1567, %1557, %1571 : vector<8x128xi1>, vector<8x128xf32>
    %1573 = arith.addf %1471, %1572 : vector<8x128xf32>
    %c2_i32_395 = arith.constant 2 : i32
    %1574 = vector.broadcast %c2_i32_395 : i32 to vector<8x128xi32>
    %1575 = arith.cmpi eq, %1552, %1574 : vector<8x128xi32>
    %cst_396 = arith.constant 0.000000e+00 : f32
    %1576 = vector.broadcast %cst_396 : f32 to vector<8x128xf32>
    %1577 = arith.select %1575, %1556, %1576 : vector<8x128xi1>, vector<8x128xf32>
    %1578 = arith.addf %1476, %1577 : vector<8x128xf32>
    %cst_397 = arith.constant 0.000000e+00 : f32
    %1579 = vector.broadcast %cst_397 : f32 to vector<8x128xf32>
    %1580 = arith.select %1575, %1557, %1579 : vector<8x128xi1>, vector<8x128xf32>
    %1581 = arith.addf %1479, %1580 : vector<8x128xf32>
    %c3_i32_398 = arith.constant 3 : i32
    %1582 = vector.broadcast %c3_i32_398 : i32 to vector<8x128xi32>
    %1583 = arith.cmpi eq, %1552, %1582 : vector<8x128xi32>
    %cst_399 = arith.constant 0.000000e+00 : f32
    %1584 = vector.broadcast %cst_399 : f32 to vector<8x128xf32>
    %1585 = arith.select %1583, %1556, %1584 : vector<8x128xi1>, vector<8x128xf32>
    %1586 = arith.addf %1484, %1585 : vector<8x128xf32>
    %cst_400 = arith.constant 0.000000e+00 : f32
    %1587 = vector.broadcast %cst_400 : f32 to vector<8x128xf32>
    %1588 = arith.select %1583, %1557, %1587 : vector<8x128xi1>, vector<8x128xf32>
    %1589 = arith.addf %1487, %1588 : vector<8x128xf32>
    %1590 = vector.broadcast %cst_225 : f32 to vector<8x128xf32>
    %1591 = arith.addf %1494, %1590 : vector<8x128xf32>
    %1592 = vector.broadcast %cst_226 : f32 to vector<8x128xf32>
    %1593 = arith.cmpf oge, %1591, %1592 : vector<8x128xf32>
    %1594 = vector.broadcast %cst_226 : f32 to vector<8x128xf32>
    %1595 = arith.subf %1591, %1594 : vector<8x128xf32>
    %1596 = arith.select %1593, %1595, %1591 : vector<8x128xi1>, vector<8x128xf32>
    %1597 = vector.broadcast %cst_227 : f32 to vector<8x128xf32>
    %1598 = arith.addf %1500, %1597 : vector<8x128xf32>
    %cst_401 = arith.constant 1.000000e+00 : f32
    %cst_402 = arith.constant 0.000000e+00 : f32
    %1599 = vector.broadcast %cst_401 : f32 to vector<8x128xf32>
    %1600 = vector.broadcast %cst_402 : f32 to vector<8x128xf32>
    %1601 = arith.select %1593, %1599, %1600 : vector<8x128xi1>, vector<8x128xf32>
    %1602 = arith.addf %1598, %1601 : vector<8x128xf32>
    %c7_i32_403 = arith.constant 7 : i32
    %c8_i32_404 = arith.constant 8 : i32
    %1603 = arith.muli %c7_i32_403, %c8_i32_404 : i32
    %1604 = tpu.assume_multiple %1603, 8 : i32
    %1605 = arith.index_cast %1604 : i32 to index
    %c0_405 = arith.constant 0 : index
    %1606 = vector.load %arg1[%1605, %c0_405] : memref<64x128xf32, #tpu.memory_space<vmem>>, vector<8x128xf32>
    %1607 = vector.broadcast %860 : f32 to vector<8x128xf32>
    %1608 = arith.subf %1607, %1602 : vector<8x128xf32>
    %1609 = vector.broadcast %876 : f32 to vector<8x128xf32>
    %1610 = arith.subf %1609, %1596 : vector<8x128xf32>
    %1611 = arith.mulf %1608, %1608 : vector<8x128xf32>
    %1612 = arith.mulf %1610, %1610 : vector<8x128xf32>
    %1613 = arith.addf %1611, %1612 : vector<8x128xf32>
    %cst_406 = arith.constant 1.000000e+00 : f32
    %1614 = vector.broadcast %cst_406 : f32 to vector<8x128xf32>
    %1615 = arith.maximumf %1614, %1613 : vector<8x128xf32>
    %c0_i32_407 = arith.constant 0 : i32
    %1616 = vector.broadcast %c0_i32_407 : i32 to vector<8x128xi32>
    %1617 = vector.broadcast %864 : f32 to vector<8x128xf32>
    %1618 = arith.subf %1617, %1602 : vector<8x128xf32>
    %1619 = vector.broadcast %880 : f32 to vector<8x128xf32>
    %1620 = arith.subf %1619, %1596 : vector<8x128xf32>
    %1621 = arith.mulf %1618, %1618 : vector<8x128xf32>
    %1622 = arith.mulf %1620, %1620 : vector<8x128xf32>
    %1623 = arith.addf %1621, %1622 : vector<8x128xf32>
    %cst_408 = arith.constant 1.000000e+00 : f32
    %1624 = vector.broadcast %cst_408 : f32 to vector<8x128xf32>
    %1625 = arith.maximumf %1624, %1623 : vector<8x128xf32>
    %1626 = arith.cmpf olt, %1625, %1615 : vector<8x128xf32>
    %c1_i32_409 = arith.constant 1 : i32
    %1627 = vector.broadcast %c1_i32_409 : i32 to vector<8x128xi32>
    %1628 = arith.select %1626, %1627, %1616 : vector<8x128xi1>, vector<8x128xi32>
    %1629 = arith.select %1626, %1625, %1615 : vector<8x128xi1>, vector<8x128xf32>
    %1630 = vector.broadcast %868 : f32 to vector<8x128xf32>
    %1631 = arith.subf %1630, %1602 : vector<8x128xf32>
    %1632 = vector.broadcast %884 : f32 to vector<8x128xf32>
    %1633 = arith.subf %1632, %1596 : vector<8x128xf32>
    %1634 = arith.mulf %1631, %1631 : vector<8x128xf32>
    %1635 = arith.mulf %1633, %1633 : vector<8x128xf32>
    %1636 = arith.addf %1634, %1635 : vector<8x128xf32>
    %cst_410 = arith.constant 1.000000e+00 : f32
    %1637 = vector.broadcast %cst_410 : f32 to vector<8x128xf32>
    %1638 = arith.maximumf %1637, %1636 : vector<8x128xf32>
    %1639 = arith.cmpf olt, %1638, %1629 : vector<8x128xf32>
    %c2_i32_411 = arith.constant 2 : i32
    %1640 = vector.broadcast %c2_i32_411 : i32 to vector<8x128xi32>
    %1641 = arith.select %1639, %1640, %1628 : vector<8x128xi1>, vector<8x128xi32>
    %1642 = arith.select %1639, %1638, %1629 : vector<8x128xi1>, vector<8x128xf32>
    %1643 = vector.broadcast %872 : f32 to vector<8x128xf32>
    %1644 = arith.subf %1643, %1602 : vector<8x128xf32>
    %1645 = vector.broadcast %888 : f32 to vector<8x128xf32>
    %1646 = arith.subf %1645, %1596 : vector<8x128xf32>
    %1647 = arith.mulf %1644, %1644 : vector<8x128xf32>
    %1648 = arith.mulf %1646, %1646 : vector<8x128xf32>
    %1649 = arith.addf %1647, %1648 : vector<8x128xf32>
    %cst_412 = arith.constant 1.000000e+00 : f32
    %1650 = vector.broadcast %cst_412 : f32 to vector<8x128xf32>
    %1651 = arith.maximumf %1650, %1649 : vector<8x128xf32>
    %1652 = arith.cmpf olt, %1651, %1642 : vector<8x128xf32>
    %c3_i32_413 = arith.constant 3 : i32
    %1653 = vector.broadcast %c3_i32_413 : i32 to vector<8x128xi32>
    %1654 = arith.select %1652, %1653, %1641 : vector<8x128xi1>, vector<8x128xi32>
    %1655 = arith.select %1652, %1651, %1642 : vector<8x128xi1>, vector<8x128xf32>
    %1656 = math.sqrt %1655 : vector<8x128xf32>
    %1657 = arith.divf %1606, %1656 : vector<8x128xf32>
    %1658 = arith.mulf %1602, %1657 : vector<8x128xf32>
    %1659 = arith.mulf %1596, %1657 : vector<8x128xf32>
    %c0_i32_414 = arith.constant 0 : i32
    %1660 = vector.broadcast %c0_i32_414 : i32 to vector<8x128xi32>
    %1661 = arith.cmpi eq, %1654, %1660 : vector<8x128xi32>
    %cst_415 = arith.constant 0.000000e+00 : f32
    %1662 = vector.broadcast %cst_415 : f32 to vector<8x128xf32>
    %1663 = arith.select %1661, %1658, %1662 : vector<8x128xi1>, vector<8x128xf32>
    %1664 = arith.addf %1562, %1663 : vector<8x128xf32>
    %cst_416 = arith.constant 0.000000e+00 : f32
    %1665 = vector.broadcast %cst_416 : f32 to vector<8x128xf32>
    %1666 = arith.select %1661, %1659, %1665 : vector<8x128xi1>, vector<8x128xf32>
    %1667 = arith.addf %1565, %1666 : vector<8x128xf32>
    %c1_i32_417 = arith.constant 1 : i32
    %1668 = vector.broadcast %c1_i32_417 : i32 to vector<8x128xi32>
    %1669 = arith.cmpi eq, %1654, %1668 : vector<8x128xi32>
    %cst_418 = arith.constant 0.000000e+00 : f32
    %1670 = vector.broadcast %cst_418 : f32 to vector<8x128xf32>
    %1671 = arith.select %1669, %1658, %1670 : vector<8x128xi1>, vector<8x128xf32>
    %1672 = arith.addf %1570, %1671 : vector<8x128xf32>
    %cst_419 = arith.constant 0.000000e+00 : f32
    %1673 = vector.broadcast %cst_419 : f32 to vector<8x128xf32>
    %1674 = arith.select %1669, %1659, %1673 : vector<8x128xi1>, vector<8x128xf32>
    %1675 = arith.addf %1573, %1674 : vector<8x128xf32>
    %c2_i32_420 = arith.constant 2 : i32
    %1676 = vector.broadcast %c2_i32_420 : i32 to vector<8x128xi32>
    %1677 = arith.cmpi eq, %1654, %1676 : vector<8x128xi32>
    %cst_421 = arith.constant 0.000000e+00 : f32
    %1678 = vector.broadcast %cst_421 : f32 to vector<8x128xf32>
    %1679 = arith.select %1677, %1658, %1678 : vector<8x128xi1>, vector<8x128xf32>
    %1680 = arith.addf %1578, %1679 : vector<8x128xf32>
    %cst_422 = arith.constant 0.000000e+00 : f32
    %1681 = vector.broadcast %cst_422 : f32 to vector<8x128xf32>
    %1682 = arith.select %1677, %1659, %1681 : vector<8x128xi1>, vector<8x128xf32>
    %1683 = arith.addf %1581, %1682 : vector<8x128xf32>
    %c3_i32_423 = arith.constant 3 : i32
    %1684 = vector.broadcast %c3_i32_423 : i32 to vector<8x128xi32>
    %1685 = arith.cmpi eq, %1654, %1684 : vector<8x128xi32>
    %cst_424 = arith.constant 0.000000e+00 : f32
    %1686 = vector.broadcast %cst_424 : f32 to vector<8x128xf32>
    %1687 = arith.select %1685, %1658, %1686 : vector<8x128xi1>, vector<8x128xf32>
    %1688 = arith.addf %1586, %1687 : vector<8x128xf32>
    %cst_425 = arith.constant 0.000000e+00 : f32
    %1689 = vector.broadcast %cst_425 : f32 to vector<8x128xf32>
    %1690 = arith.select %1685, %1659, %1689 : vector<8x128xi1>, vector<8x128xf32>
    %1691 = arith.addf %1589, %1690 : vector<8x128xf32>
    %1692 = vector.broadcast %cst_225 : f32 to vector<8x128xf32>
    %1693 = arith.addf %1596, %1692 : vector<8x128xf32>
    %1694 = vector.broadcast %cst_226 : f32 to vector<8x128xf32>
    %1695 = arith.cmpf oge, %1693, %1694 : vector<8x128xf32>
    %1696 = vector.broadcast %cst_226 : f32 to vector<8x128xf32>
    %1697 = arith.subf %1693, %1696 : vector<8x128xf32>
    %1698 = arith.select %1695, %1697, %1693 : vector<8x128xi1>, vector<8x128xf32>
    %1699 = vector.broadcast %cst_227 : f32 to vector<8x128xf32>
    %1700 = arith.addf %1602, %1699 : vector<8x128xf32>
    %cst_426 = arith.constant 1.000000e+00 : f32
    %cst_427 = arith.constant 0.000000e+00 : f32
    %1701 = vector.broadcast %cst_426 : f32 to vector<8x128xf32>
    %1702 = vector.broadcast %cst_427 : f32 to vector<8x128xf32>
    %1703 = arith.select %1695, %1701, %1702 : vector<8x128xi1>, vector<8x128xf32>
    %1704 = arith.addf %1700, %1703 : vector<8x128xf32>
    %c8_i32_428 = arith.constant 8 : i32
    %1705 = vector.shape_cast %1664 : vector<8x128xf32> to vector<1x8x128xf32>
    %cst_429 = arith.constant dense<0.000000e+00> : vector<1xf32>
    %1706 = vector.multi_reduction <add>, %1705, %cst_429 [1, 2] : vector<1x8x128xf32> to vector<1xf32>
    %1707 = vector.shape_cast %1706 : vector<1xf32> to vector<1x1x1xf32>
    %1708 = vector.extract %1707[0, 0, 0] : f32 from vector<1x1x1xf32>
    %1709 = vector.shape_cast %1672 : vector<8x128xf32> to vector<1x8x128xf32>
    %cst_430 = arith.constant dense<0.000000e+00> : vector<1xf32>
    %1710 = vector.multi_reduction <add>, %1709, %cst_430 [1, 2] : vector<1x8x128xf32> to vector<1xf32>
    %1711 = vector.shape_cast %1710 : vector<1xf32> to vector<1x1x1xf32>
    %1712 = vector.extract %1711[0, 0, 0] : f32 from vector<1x1x1xf32>
    %1713 = vector.shape_cast %1680 : vector<8x128xf32> to vector<1x8x128xf32>
    %cst_431 = arith.constant dense<0.000000e+00> : vector<1xf32>
    %1714 = vector.multi_reduction <add>, %1713, %cst_431 [1, 2] : vector<1x8x128xf32> to vector<1xf32>
    %1715 = vector.shape_cast %1714 : vector<1xf32> to vector<1x1x1xf32>
    %1716 = vector.extract %1715[0, 0, 0] : f32 from vector<1x1x1xf32>
    %1717 = vector.shape_cast %1688 : vector<8x128xf32> to vector<1x8x128xf32>
    %cst_432 = arith.constant dense<0.000000e+00> : vector<1xf32>
    %1718 = vector.multi_reduction <add>, %1717, %cst_432 [1, 2] : vector<1x8x128xf32> to vector<1xf32>
    %1719 = vector.shape_cast %1718 : vector<1xf32> to vector<1x1x1xf32>
    %1720 = vector.extract %1719[0, 0, 0] : f32 from vector<1x1x1xf32>
    %1721 = vector.shape_cast %1667 : vector<8x128xf32> to vector<1x8x128xf32>
    %cst_433 = arith.constant dense<0.000000e+00> : vector<1xf32>
    %1722 = vector.multi_reduction <add>, %1721, %cst_433 [1, 2] : vector<1x8x128xf32> to vector<1xf32>
    %1723 = vector.shape_cast %1722 : vector<1xf32> to vector<1x1x1xf32>
    %1724 = vector.extract %1723[0, 0, 0] : f32 from vector<1x1x1xf32>
    %1725 = vector.shape_cast %1675 : vector<8x128xf32> to vector<1x8x128xf32>
    %cst_434 = arith.constant dense<0.000000e+00> : vector<1xf32>
    %1726 = vector.multi_reduction <add>, %1725, %cst_434 [1, 2] : vector<1x8x128xf32> to vector<1xf32>
    %1727 = vector.shape_cast %1726 : vector<1xf32> to vector<1x1x1xf32>
    %1728 = vector.extract %1727[0, 0, 0] : f32 from vector<1x1x1xf32>
    %1729 = vector.shape_cast %1683 : vector<8x128xf32> to vector<1x8x128xf32>
    %cst_435 = arith.constant dense<0.000000e+00> : vector<1xf32>
    %1730 = vector.multi_reduction <add>, %1729, %cst_435 [1, 2] : vector<1x8x128xf32> to vector<1xf32>
    %1731 = vector.shape_cast %1730 : vector<1xf32> to vector<1x1x1xf32>
    %1732 = vector.extract %1731[0, 0, 0] : f32 from vector<1x1x1xf32>
    %1733 = vector.shape_cast %1691 : vector<8x128xf32> to vector<1x8x128xf32>
    %cst_436 = arith.constant dense<0.000000e+00> : vector<1xf32>
    %1734 = vector.multi_reduction <add>, %1733, %cst_436 [1, 2] : vector<1x8x128xf32> to vector<1xf32>
    %1735 = vector.shape_cast %1734 : vector<1xf32> to vector<1x1x1xf32>
    %1736 = vector.extract %1735[0, 0, 0] : f32 from vector<1x1x1xf32>
    %cst_437 = arith.constant 0.000000e+00 : f32
    %cst_438 = arith.constant 1.600000e+01 : f32
    %cst_439 = arith.constant 6.400000e+01 : f32
    %c0_i32_440 = arith.constant 0 : i32
    %c8_i32_441 = arith.constant 8 : i32
    %1737 = arith.muli %c0_i32_440, %c8_i32_441 : i32
    %1738 = tpu.assume_multiple %1737, 8 : i32
    %1739 = arith.index_cast %1738 : i32 to index
    %c0_442 = arith.constant 0 : index
    %1740 = vector.load %arg1[%1739, %c0_442] : memref<64x128xf32, #tpu.memory_space<vmem>>, vector<8x128xf32>
    %1741 = vector.broadcast %1708 : f32 to vector<8x128xf32>
    %1742 = arith.subf %1741, %26 : vector<8x128xf32>
    %1743 = vector.broadcast %1724 : f32 to vector<8x128xf32>
    %1744 = arith.subf %1743, %31 : vector<8x128xf32>
    %1745 = arith.mulf %1742, %1742 : vector<8x128xf32>
    %1746 = arith.mulf %1744, %1744 : vector<8x128xf32>
    %1747 = arith.addf %1745, %1746 : vector<8x128xf32>
    %cst_443 = arith.constant 1.000000e+00 : f32
    %1748 = vector.broadcast %cst_443 : f32 to vector<8x128xf32>
    %1749 = arith.maximumf %1748, %1747 : vector<8x128xf32>
    %c0_i32_444 = arith.constant 0 : i32
    %1750 = vector.broadcast %c0_i32_444 : i32 to vector<8x128xi32>
    %1751 = vector.broadcast %1712 : f32 to vector<8x128xf32>
    %1752 = arith.subf %1751, %26 : vector<8x128xf32>
    %1753 = vector.broadcast %1728 : f32 to vector<8x128xf32>
    %1754 = arith.subf %1753, %31 : vector<8x128xf32>
    %1755 = arith.mulf %1752, %1752 : vector<8x128xf32>
    %1756 = arith.mulf %1754, %1754 : vector<8x128xf32>
    %1757 = arith.addf %1755, %1756 : vector<8x128xf32>
    %cst_445 = arith.constant 1.000000e+00 : f32
    %1758 = vector.broadcast %cst_445 : f32 to vector<8x128xf32>
    %1759 = arith.maximumf %1758, %1757 : vector<8x128xf32>
    %1760 = arith.cmpf olt, %1759, %1749 : vector<8x128xf32>
    %c1_i32_446 = arith.constant 1 : i32
    %1761 = vector.broadcast %c1_i32_446 : i32 to vector<8x128xi32>
    %1762 = arith.select %1760, %1761, %1750 : vector<8x128xi1>, vector<8x128xi32>
    %1763 = arith.select %1760, %1759, %1749 : vector<8x128xi1>, vector<8x128xf32>
    %1764 = vector.broadcast %1716 : f32 to vector<8x128xf32>
    %1765 = arith.subf %1764, %26 : vector<8x128xf32>
    %1766 = vector.broadcast %1732 : f32 to vector<8x128xf32>
    %1767 = arith.subf %1766, %31 : vector<8x128xf32>
    %1768 = arith.mulf %1765, %1765 : vector<8x128xf32>
    %1769 = arith.mulf %1767, %1767 : vector<8x128xf32>
    %1770 = arith.addf %1768, %1769 : vector<8x128xf32>
    %cst_447 = arith.constant 1.000000e+00 : f32
    %1771 = vector.broadcast %cst_447 : f32 to vector<8x128xf32>
    %1772 = arith.maximumf %1771, %1770 : vector<8x128xf32>
    %1773 = arith.cmpf olt, %1772, %1763 : vector<8x128xf32>
    %c2_i32_448 = arith.constant 2 : i32
    %1774 = vector.broadcast %c2_i32_448 : i32 to vector<8x128xi32>
    %1775 = arith.select %1773, %1774, %1762 : vector<8x128xi1>, vector<8x128xi32>
    %1776 = arith.select %1773, %1772, %1763 : vector<8x128xi1>, vector<8x128xf32>
    %1777 = vector.broadcast %1720 : f32 to vector<8x128xf32>
    %1778 = arith.subf %1777, %26 : vector<8x128xf32>
    %1779 = vector.broadcast %1736 : f32 to vector<8x128xf32>
    %1780 = arith.subf %1779, %31 : vector<8x128xf32>
    %1781 = arith.mulf %1778, %1778 : vector<8x128xf32>
    %1782 = arith.mulf %1780, %1780 : vector<8x128xf32>
    %1783 = arith.addf %1781, %1782 : vector<8x128xf32>
    %cst_449 = arith.constant 1.000000e+00 : f32
    %1784 = vector.broadcast %cst_449 : f32 to vector<8x128xf32>
    %1785 = arith.maximumf %1784, %1783 : vector<8x128xf32>
    %1786 = arith.cmpf olt, %1785, %1776 : vector<8x128xf32>
    %c3_i32_450 = arith.constant 3 : i32
    %1787 = vector.broadcast %c3_i32_450 : i32 to vector<8x128xi32>
    %1788 = arith.select %1786, %1787, %1775 : vector<8x128xi1>, vector<8x128xi32>
    %1789 = arith.select %1786, %1785, %1776 : vector<8x128xi1>, vector<8x128xf32>
    %1790 = math.sqrt %1789 : vector<8x128xf32>
    %1791 = arith.divf %1740, %1790 : vector<8x128xf32>
    %1792 = arith.mulf %26, %1791 : vector<8x128xf32>
    %1793 = arith.mulf %31, %1791 : vector<8x128xf32>
    %c0_i32_451 = arith.constant 0 : i32
    %1794 = vector.broadcast %c0_i32_451 : i32 to vector<8x128xi32>
    %1795 = arith.cmpi eq, %1788, %1794 : vector<8x128xi32>
    %cst_452 = arith.constant 0.000000e+00 : f32
    %1796 = vector.broadcast %cst_452 : f32 to vector<8x128xf32>
    %1797 = arith.select %1795, %1792, %1796 : vector<8x128xi1>, vector<8x128xf32>
    %1798 = arith.addf %32, %1797 : vector<8x128xf32>
    %cst_453 = arith.constant 0.000000e+00 : f32
    %1799 = vector.broadcast %cst_453 : f32 to vector<8x128xf32>
    %1800 = arith.select %1795, %1793, %1799 : vector<8x128xi1>, vector<8x128xf32>
    %1801 = arith.addf %32, %1800 : vector<8x128xf32>
    %c1_i32_454 = arith.constant 1 : i32
    %1802 = vector.broadcast %c1_i32_454 : i32 to vector<8x128xi32>
    %1803 = arith.cmpi eq, %1788, %1802 : vector<8x128xi32>
    %cst_455 = arith.constant 0.000000e+00 : f32
    %1804 = vector.broadcast %cst_455 : f32 to vector<8x128xf32>
    %1805 = arith.select %1803, %1792, %1804 : vector<8x128xi1>, vector<8x128xf32>
    %1806 = arith.addf %32, %1805 : vector<8x128xf32>
    %cst_456 = arith.constant 0.000000e+00 : f32
    %1807 = vector.broadcast %cst_456 : f32 to vector<8x128xf32>
    %1808 = arith.select %1803, %1793, %1807 : vector<8x128xi1>, vector<8x128xf32>
    %1809 = arith.addf %32, %1808 : vector<8x128xf32>
    %c2_i32_457 = arith.constant 2 : i32
    %1810 = vector.broadcast %c2_i32_457 : i32 to vector<8x128xi32>
    %1811 = arith.cmpi eq, %1788, %1810 : vector<8x128xi32>
    %cst_458 = arith.constant 0.000000e+00 : f32
    %1812 = vector.broadcast %cst_458 : f32 to vector<8x128xf32>
    %1813 = arith.select %1811, %1792, %1812 : vector<8x128xi1>, vector<8x128xf32>
    %1814 = arith.addf %32, %1813 : vector<8x128xf32>
    %cst_459 = arith.constant 0.000000e+00 : f32
    %1815 = vector.broadcast %cst_459 : f32 to vector<8x128xf32>
    %1816 = arith.select %1811, %1793, %1815 : vector<8x128xi1>, vector<8x128xf32>
    %1817 = arith.addf %32, %1816 : vector<8x128xf32>
    %c3_i32_460 = arith.constant 3 : i32
    %1818 = vector.broadcast %c3_i32_460 : i32 to vector<8x128xi32>
    %1819 = arith.cmpi eq, %1788, %1818 : vector<8x128xi32>
    %cst_461 = arith.constant 0.000000e+00 : f32
    %1820 = vector.broadcast %cst_461 : f32 to vector<8x128xf32>
    %1821 = arith.select %1819, %1792, %1820 : vector<8x128xi1>, vector<8x128xf32>
    %1822 = arith.addf %32, %1821 : vector<8x128xf32>
    %cst_462 = arith.constant 0.000000e+00 : f32
    %1823 = vector.broadcast %cst_462 : f32 to vector<8x128xf32>
    %1824 = arith.select %1819, %1793, %1823 : vector<8x128xi1>, vector<8x128xf32>
    %1825 = arith.addf %32, %1824 : vector<8x128xf32>
    %1826 = vector.broadcast %cst_437 : f32 to vector<8x128xf32>
    %1827 = arith.addf %31, %1826 : vector<8x128xf32>
    %1828 = vector.broadcast %cst_438 : f32 to vector<8x128xf32>
    %1829 = arith.cmpf oge, %1827, %1828 : vector<8x128xf32>
    %1830 = vector.broadcast %cst_438 : f32 to vector<8x128xf32>
    %1831 = arith.subf %1827, %1830 : vector<8x128xf32>
    %1832 = arith.select %1829, %1831, %1827 : vector<8x128xi1>, vector<8x128xf32>
    %1833 = vector.broadcast %cst_439 : f32 to vector<8x128xf32>
    %1834 = arith.addf %26, %1833 : vector<8x128xf32>
    %cst_463 = arith.constant 1.000000e+00 : f32
    %cst_464 = arith.constant 0.000000e+00 : f32
    %1835 = vector.broadcast %cst_463 : f32 to vector<8x128xf32>
    %1836 = vector.broadcast %cst_464 : f32 to vector<8x128xf32>
    %1837 = arith.select %1829, %1835, %1836 : vector<8x128xi1>, vector<8x128xf32>
    %1838 = arith.addf %1834, %1837 : vector<8x128xf32>
    %c1_i32_465 = arith.constant 1 : i32
    %c8_i32_466 = arith.constant 8 : i32
    %1839 = arith.muli %c1_i32_465, %c8_i32_466 : i32
    %1840 = tpu.assume_multiple %1839, 8 : i32
    %1841 = arith.index_cast %1840 : i32 to index
    %c0_467 = arith.constant 0 : index
    %1842 = vector.load %arg1[%1841, %c0_467] : memref<64x128xf32, #tpu.memory_space<vmem>>, vector<8x128xf32>
    %1843 = vector.broadcast %1708 : f32 to vector<8x128xf32>
    %1844 = arith.subf %1843, %1838 : vector<8x128xf32>
    %1845 = vector.broadcast %1724 : f32 to vector<8x128xf32>
    %1846 = arith.subf %1845, %1832 : vector<8x128xf32>
    %1847 = arith.mulf %1844, %1844 : vector<8x128xf32>
    %1848 = arith.mulf %1846, %1846 : vector<8x128xf32>
    %1849 = arith.addf %1847, %1848 : vector<8x128xf32>
    %cst_468 = arith.constant 1.000000e+00 : f32
    %1850 = vector.broadcast %cst_468 : f32 to vector<8x128xf32>
    %1851 = arith.maximumf %1850, %1849 : vector<8x128xf32>
    %c0_i32_469 = arith.constant 0 : i32
    %1852 = vector.broadcast %c0_i32_469 : i32 to vector<8x128xi32>
    %1853 = vector.broadcast %1712 : f32 to vector<8x128xf32>
    %1854 = arith.subf %1853, %1838 : vector<8x128xf32>
    %1855 = vector.broadcast %1728 : f32 to vector<8x128xf32>
    %1856 = arith.subf %1855, %1832 : vector<8x128xf32>
    %1857 = arith.mulf %1854, %1854 : vector<8x128xf32>
    %1858 = arith.mulf %1856, %1856 : vector<8x128xf32>
    %1859 = arith.addf %1857, %1858 : vector<8x128xf32>
    %cst_470 = arith.constant 1.000000e+00 : f32
    %1860 = vector.broadcast %cst_470 : f32 to vector<8x128xf32>
    %1861 = arith.maximumf %1860, %1859 : vector<8x128xf32>
    %1862 = arith.cmpf olt, %1861, %1851 : vector<8x128xf32>
    %c1_i32_471 = arith.constant 1 : i32
    %1863 = vector.broadcast %c1_i32_471 : i32 to vector<8x128xi32>
    %1864 = arith.select %1862, %1863, %1852 : vector<8x128xi1>, vector<8x128xi32>
    %1865 = arith.select %1862, %1861, %1851 : vector<8x128xi1>, vector<8x128xf32>
    %1866 = vector.broadcast %1716 : f32 to vector<8x128xf32>
    %1867 = arith.subf %1866, %1838 : vector<8x128xf32>
    %1868 = vector.broadcast %1732 : f32 to vector<8x128xf32>
    %1869 = arith.subf %1868, %1832 : vector<8x128xf32>
    %1870 = arith.mulf %1867, %1867 : vector<8x128xf32>
    %1871 = arith.mulf %1869, %1869 : vector<8x128xf32>
    %1872 = arith.addf %1870, %1871 : vector<8x128xf32>
    %cst_472 = arith.constant 1.000000e+00 : f32
    %1873 = vector.broadcast %cst_472 : f32 to vector<8x128xf32>
    %1874 = arith.maximumf %1873, %1872 : vector<8x128xf32>
    %1875 = arith.cmpf olt, %1874, %1865 : vector<8x128xf32>
    %c2_i32_473 = arith.constant 2 : i32
    %1876 = vector.broadcast %c2_i32_473 : i32 to vector<8x128xi32>
    %1877 = arith.select %1875, %1876, %1864 : vector<8x128xi1>, vector<8x128xi32>
    %1878 = arith.select %1875, %1874, %1865 : vector<8x128xi1>, vector<8x128xf32>
    %1879 = vector.broadcast %1720 : f32 to vector<8x128xf32>
    %1880 = arith.subf %1879, %1838 : vector<8x128xf32>
    %1881 = vector.broadcast %1736 : f32 to vector<8x128xf32>
    %1882 = arith.subf %1881, %1832 : vector<8x128xf32>
    %1883 = arith.mulf %1880, %1880 : vector<8x128xf32>
    %1884 = arith.mulf %1882, %1882 : vector<8x128xf32>
    %1885 = arith.addf %1883, %1884 : vector<8x128xf32>
    %cst_474 = arith.constant 1.000000e+00 : f32
    %1886 = vector.broadcast %cst_474 : f32 to vector<8x128xf32>
    %1887 = arith.maximumf %1886, %1885 : vector<8x128xf32>
    %1888 = arith.cmpf olt, %1887, %1878 : vector<8x128xf32>
    %c3_i32_475 = arith.constant 3 : i32
    %1889 = vector.broadcast %c3_i32_475 : i32 to vector<8x128xi32>
    %1890 = arith.select %1888, %1889, %1877 : vector<8x128xi1>, vector<8x128xi32>
    %1891 = arith.select %1888, %1887, %1878 : vector<8x128xi1>, vector<8x128xf32>
    %1892 = math.sqrt %1891 : vector<8x128xf32>
    %1893 = arith.divf %1842, %1892 : vector<8x128xf32>
    %1894 = arith.mulf %1838, %1893 : vector<8x128xf32>
    %1895 = arith.mulf %1832, %1893 : vector<8x128xf32>
    %c0_i32_476 = arith.constant 0 : i32
    %1896 = vector.broadcast %c0_i32_476 : i32 to vector<8x128xi32>
    %1897 = arith.cmpi eq, %1890, %1896 : vector<8x128xi32>
    %cst_477 = arith.constant 0.000000e+00 : f32
    %1898 = vector.broadcast %cst_477 : f32 to vector<8x128xf32>
    %1899 = arith.select %1897, %1894, %1898 : vector<8x128xi1>, vector<8x128xf32>
    %1900 = arith.addf %1798, %1899 : vector<8x128xf32>
    %cst_478 = arith.constant 0.000000e+00 : f32
    %1901 = vector.broadcast %cst_478 : f32 to vector<8x128xf32>
    %1902 = arith.select %1897, %1895, %1901 : vector<8x128xi1>, vector<8x128xf32>
    %1903 = arith.addf %1801, %1902 : vector<8x128xf32>
    %c1_i32_479 = arith.constant 1 : i32
    %1904 = vector.broadcast %c1_i32_479 : i32 to vector<8x128xi32>
    %1905 = arith.cmpi eq, %1890, %1904 : vector<8x128xi32>
    %cst_480 = arith.constant 0.000000e+00 : f32
    %1906 = vector.broadcast %cst_480 : f32 to vector<8x128xf32>
    %1907 = arith.select %1905, %1894, %1906 : vector<8x128xi1>, vector<8x128xf32>
    %1908 = arith.addf %1806, %1907 : vector<8x128xf32>
    %cst_481 = arith.constant 0.000000e+00 : f32
    %1909 = vector.broadcast %cst_481 : f32 to vector<8x128xf32>
    %1910 = arith.select %1905, %1895, %1909 : vector<8x128xi1>, vector<8x128xf32>
    %1911 = arith.addf %1809, %1910 : vector<8x128xf32>
    %c2_i32_482 = arith.constant 2 : i32
    %1912 = vector.broadcast %c2_i32_482 : i32 to vector<8x128xi32>
    %1913 = arith.cmpi eq, %1890, %1912 : vector<8x128xi32>
    %cst_483 = arith.constant 0.000000e+00 : f32
    %1914 = vector.broadcast %cst_483 : f32 to vector<8x128xf32>
    %1915 = arith.select %1913, %1894, %1914 : vector<8x128xi1>, vector<8x128xf32>
    %1916 = arith.addf %1814, %1915 : vector<8x128xf32>
    %cst_484 = arith.constant 0.000000e+00 : f32
    %1917 = vector.broadcast %cst_484 : f32 to vector<8x128xf32>
    %1918 = arith.select %1913, %1895, %1917 : vector<8x128xi1>, vector<8x128xf32>
    %1919 = arith.addf %1817, %1918 : vector<8x128xf32>
    %c3_i32_485 = arith.constant 3 : i32
    %1920 = vector.broadcast %c3_i32_485 : i32 to vector<8x128xi32>
    %1921 = arith.cmpi eq, %1890, %1920 : vector<8x128xi32>
    %cst_486 = arith.constant 0.000000e+00 : f32
    %1922 = vector.broadcast %cst_486 : f32 to vector<8x128xf32>
    %1923 = arith.select %1921, %1894, %1922 : vector<8x128xi1>, vector<8x128xf32>
    %1924 = arith.addf %1822, %1923 : vector<8x128xf32>
    %cst_487 = arith.constant 0.000000e+00 : f32
    %1925 = vector.broadcast %cst_487 : f32 to vector<8x128xf32>
    %1926 = arith.select %1921, %1895, %1925 : vector<8x128xi1>, vector<8x128xf32>
    %1927 = arith.addf %1825, %1926 : vector<8x128xf32>
    %1928 = vector.broadcast %cst_437 : f32 to vector<8x128xf32>
    %1929 = arith.addf %1832, %1928 : vector<8x128xf32>
    %1930 = vector.broadcast %cst_438 : f32 to vector<8x128xf32>
    %1931 = arith.cmpf oge, %1929, %1930 : vector<8x128xf32>
    %1932 = vector.broadcast %cst_438 : f32 to vector<8x128xf32>
    %1933 = arith.subf %1929, %1932 : vector<8x128xf32>
    %1934 = arith.select %1931, %1933, %1929 : vector<8x128xi1>, vector<8x128xf32>
    %1935 = vector.broadcast %cst_439 : f32 to vector<8x128xf32>
    %1936 = arith.addf %1838, %1935 : vector<8x128xf32>
    %cst_488 = arith.constant 1.000000e+00 : f32
    %cst_489 = arith.constant 0.000000e+00 : f32
    %1937 = vector.broadcast %cst_488 : f32 to vector<8x128xf32>
    %1938 = vector.broadcast %cst_489 : f32 to vector<8x128xf32>
    %1939 = arith.select %1931, %1937, %1938 : vector<8x128xi1>, vector<8x128xf32>
    %1940 = arith.addf %1936, %1939 : vector<8x128xf32>
    %c2_i32_490 = arith.constant 2 : i32
    %c8_i32_491 = arith.constant 8 : i32
    %1941 = arith.muli %c2_i32_490, %c8_i32_491 : i32
    %1942 = tpu.assume_multiple %1941, 8 : i32
    %1943 = arith.index_cast %1942 : i32 to index
    %c0_492 = arith.constant 0 : index
    %1944 = vector.load %arg1[%1943, %c0_492] : memref<64x128xf32, #tpu.memory_space<vmem>>, vector<8x128xf32>
    %1945 = vector.broadcast %1708 : f32 to vector<8x128xf32>
    %1946 = arith.subf %1945, %1940 : vector<8x128xf32>
    %1947 = vector.broadcast %1724 : f32 to vector<8x128xf32>
    %1948 = arith.subf %1947, %1934 : vector<8x128xf32>
    %1949 = arith.mulf %1946, %1946 : vector<8x128xf32>
    %1950 = arith.mulf %1948, %1948 : vector<8x128xf32>
    %1951 = arith.addf %1949, %1950 : vector<8x128xf32>
    %cst_493 = arith.constant 1.000000e+00 : f32
    %1952 = vector.broadcast %cst_493 : f32 to vector<8x128xf32>
    %1953 = arith.maximumf %1952, %1951 : vector<8x128xf32>
    %c0_i32_494 = arith.constant 0 : i32
    %1954 = vector.broadcast %c0_i32_494 : i32 to vector<8x128xi32>
    %1955 = vector.broadcast %1712 : f32 to vector<8x128xf32>
    %1956 = arith.subf %1955, %1940 : vector<8x128xf32>
    %1957 = vector.broadcast %1728 : f32 to vector<8x128xf32>
    %1958 = arith.subf %1957, %1934 : vector<8x128xf32>
    %1959 = arith.mulf %1956, %1956 : vector<8x128xf32>
    %1960 = arith.mulf %1958, %1958 : vector<8x128xf32>
    %1961 = arith.addf %1959, %1960 : vector<8x128xf32>
    %cst_495 = arith.constant 1.000000e+00 : f32
    %1962 = vector.broadcast %cst_495 : f32 to vector<8x128xf32>
    %1963 = arith.maximumf %1962, %1961 : vector<8x128xf32>
    %1964 = arith.cmpf olt, %1963, %1953 : vector<8x128xf32>
    %c1_i32_496 = arith.constant 1 : i32
    %1965 = vector.broadcast %c1_i32_496 : i32 to vector<8x128xi32>
    %1966 = arith.select %1964, %1965, %1954 : vector<8x128xi1>, vector<8x128xi32>
    %1967 = arith.select %1964, %1963, %1953 : vector<8x128xi1>, vector<8x128xf32>
    %1968 = vector.broadcast %1716 : f32 to vector<8x128xf32>
    %1969 = arith.subf %1968, %1940 : vector<8x128xf32>
    %1970 = vector.broadcast %1732 : f32 to vector<8x128xf32>
    %1971 = arith.subf %1970, %1934 : vector<8x128xf32>
    %1972 = arith.mulf %1969, %1969 : vector<8x128xf32>
    %1973 = arith.mulf %1971, %1971 : vector<8x128xf32>
    %1974 = arith.addf %1972, %1973 : vector<8x128xf32>
    %cst_497 = arith.constant 1.000000e+00 : f32
    %1975 = vector.broadcast %cst_497 : f32 to vector<8x128xf32>
    %1976 = arith.maximumf %1975, %1974 : vector<8x128xf32>
    %1977 = arith.cmpf olt, %1976, %1967 : vector<8x128xf32>
    %c2_i32_498 = arith.constant 2 : i32
    %1978 = vector.broadcast %c2_i32_498 : i32 to vector<8x128xi32>
    %1979 = arith.select %1977, %1978, %1966 : vector<8x128xi1>, vector<8x128xi32>
    %1980 = arith.select %1977, %1976, %1967 : vector<8x128xi1>, vector<8x128xf32>
    %1981 = vector.broadcast %1720 : f32 to vector<8x128xf32>
    %1982 = arith.subf %1981, %1940 : vector<8x128xf32>
    %1983 = vector.broadcast %1736 : f32 to vector<8x128xf32>
    %1984 = arith.subf %1983, %1934 : vector<8x128xf32>
    %1985 = arith.mulf %1982, %1982 : vector<8x128xf32>
    %1986 = arith.mulf %1984, %1984 : vector<8x128xf32>
    %1987 = arith.addf %1985, %1986 : vector<8x128xf32>
    %cst_499 = arith.constant 1.000000e+00 : f32
    %1988 = vector.broadcast %cst_499 : f32 to vector<8x128xf32>
    %1989 = arith.maximumf %1988, %1987 : vector<8x128xf32>
    %1990 = arith.cmpf olt, %1989, %1980 : vector<8x128xf32>
    %c3_i32_500 = arith.constant 3 : i32
    %1991 = vector.broadcast %c3_i32_500 : i32 to vector<8x128xi32>
    %1992 = arith.select %1990, %1991, %1979 : vector<8x128xi1>, vector<8x128xi32>
    %1993 = arith.select %1990, %1989, %1980 : vector<8x128xi1>, vector<8x128xf32>
    %1994 = math.sqrt %1993 : vector<8x128xf32>
    %1995 = arith.divf %1944, %1994 : vector<8x128xf32>
    %1996 = arith.mulf %1940, %1995 : vector<8x128xf32>
    %1997 = arith.mulf %1934, %1995 : vector<8x128xf32>
    %c0_i32_501 = arith.constant 0 : i32
    %1998 = vector.broadcast %c0_i32_501 : i32 to vector<8x128xi32>
    %1999 = arith.cmpi eq, %1992, %1998 : vector<8x128xi32>
    %cst_502 = arith.constant 0.000000e+00 : f32
    %2000 = vector.broadcast %cst_502 : f32 to vector<8x128xf32>
    %2001 = arith.select %1999, %1996, %2000 : vector<8x128xi1>, vector<8x128xf32>
    %2002 = arith.addf %1900, %2001 : vector<8x128xf32>
    %cst_503 = arith.constant 0.000000e+00 : f32
    %2003 = vector.broadcast %cst_503 : f32 to vector<8x128xf32>
    %2004 = arith.select %1999, %1997, %2003 : vector<8x128xi1>, vector<8x128xf32>
    %2005 = arith.addf %1903, %2004 : vector<8x128xf32>
    %c1_i32_504 = arith.constant 1 : i32
    %2006 = vector.broadcast %c1_i32_504 : i32 to vector<8x128xi32>
    %2007 = arith.cmpi eq, %1992, %2006 : vector<8x128xi32>
    %cst_505 = arith.constant 0.000000e+00 : f32
    %2008 = vector.broadcast %cst_505 : f32 to vector<8x128xf32>
    %2009 = arith.select %2007, %1996, %2008 : vector<8x128xi1>, vector<8x128xf32>
    %2010 = arith.addf %1908, %2009 : vector<8x128xf32>
    %cst_506 = arith.constant 0.000000e+00 : f32
    %2011 = vector.broadcast %cst_506 : f32 to vector<8x128xf32>
    %2012 = arith.select %2007, %1997, %2011 : vector<8x128xi1>, vector<8x128xf32>
    %2013 = arith.addf %1911, %2012 : vector<8x128xf32>
    %c2_i32_507 = arith.constant 2 : i32
    %2014 = vector.broadcast %c2_i32_507 : i32 to vector<8x128xi32>
    %2015 = arith.cmpi eq, %1992, %2014 : vector<8x128xi32>
    %cst_508 = arith.constant 0.000000e+00 : f32
    %2016 = vector.broadcast %cst_508 : f32 to vector<8x128xf32>
    %2017 = arith.select %2015, %1996, %2016 : vector<8x128xi1>, vector<8x128xf32>
    %2018 = arith.addf %1916, %2017 : vector<8x128xf32>
    %cst_509 = arith.constant 0.000000e+00 : f32
    %2019 = vector.broadcast %cst_509 : f32 to vector<8x128xf32>
    %2020 = arith.select %2015, %1997, %2019 : vector<8x128xi1>, vector<8x128xf32>
    %2021 = arith.addf %1919, %2020 : vector<8x128xf32>
    %c3_i32_510 = arith.constant 3 : i32
    %2022 = vector.broadcast %c3_i32_510 : i32 to vector<8x128xi32>
    %2023 = arith.cmpi eq, %1992, %2022 : vector<8x128xi32>
    %cst_511 = arith.constant 0.000000e+00 : f32
    %2024 = vector.broadcast %cst_511 : f32 to vector<8x128xf32>
    %2025 = arith.select %2023, %1996, %2024 : vector<8x128xi1>, vector<8x128xf32>
    %2026 = arith.addf %1924, %2025 : vector<8x128xf32>
    %cst_512 = arith.constant 0.000000e+00 : f32
    %2027 = vector.broadcast %cst_512 : f32 to vector<8x128xf32>
    %2028 = arith.select %2023, %1997, %2027 : vector<8x128xi1>, vector<8x128xf32>
    %2029 = arith.addf %1927, %2028 : vector<8x128xf32>
    %2030 = vector.broadcast %cst_437 : f32 to vector<8x128xf32>
    %2031 = arith.addf %1934, %2030 : vector<8x128xf32>
    %2032 = vector.broadcast %cst_438 : f32 to vector<8x128xf32>
    %2033 = arith.cmpf oge, %2031, %2032 : vector<8x128xf32>
    %2034 = vector.broadcast %cst_438 : f32 to vector<8x128xf32>
    %2035 = arith.subf %2031, %2034 : vector<8x128xf32>
    %2036 = arith.select %2033, %2035, %2031 : vector<8x128xi1>, vector<8x128xf32>
    %2037 = vector.broadcast %cst_439 : f32 to vector<8x128xf32>
    %2038 = arith.addf %1940, %2037 : vector<8x128xf32>
    %cst_513 = arith.constant 1.000000e+00 : f32
    %cst_514 = arith.constant 0.000000e+00 : f32
    %2039 = vector.broadcast %cst_513 : f32 to vector<8x128xf32>
    %2040 = vector.broadcast %cst_514 : f32 to vector<8x128xf32>
    %2041 = arith.select %2033, %2039, %2040 : vector<8x128xi1>, vector<8x128xf32>
    %2042 = arith.addf %2038, %2041 : vector<8x128xf32>
    %c3_i32_515 = arith.constant 3 : i32
    %c8_i32_516 = arith.constant 8 : i32
    %2043 = arith.muli %c3_i32_515, %c8_i32_516 : i32
    %2044 = tpu.assume_multiple %2043, 8 : i32
    %2045 = arith.index_cast %2044 : i32 to index
    %c0_517 = arith.constant 0 : index
    %2046 = vector.load %arg1[%2045, %c0_517] : memref<64x128xf32, #tpu.memory_space<vmem>>, vector<8x128xf32>
    %2047 = vector.broadcast %1708 : f32 to vector<8x128xf32>
    %2048 = arith.subf %2047, %2042 : vector<8x128xf32>
    %2049 = vector.broadcast %1724 : f32 to vector<8x128xf32>
    %2050 = arith.subf %2049, %2036 : vector<8x128xf32>
    %2051 = arith.mulf %2048, %2048 : vector<8x128xf32>
    %2052 = arith.mulf %2050, %2050 : vector<8x128xf32>
    %2053 = arith.addf %2051, %2052 : vector<8x128xf32>
    %cst_518 = arith.constant 1.000000e+00 : f32
    %2054 = vector.broadcast %cst_518 : f32 to vector<8x128xf32>
    %2055 = arith.maximumf %2054, %2053 : vector<8x128xf32>
    %c0_i32_519 = arith.constant 0 : i32
    %2056 = vector.broadcast %c0_i32_519 : i32 to vector<8x128xi32>
    %2057 = vector.broadcast %1712 : f32 to vector<8x128xf32>
    %2058 = arith.subf %2057, %2042 : vector<8x128xf32>
    %2059 = vector.broadcast %1728 : f32 to vector<8x128xf32>
    %2060 = arith.subf %2059, %2036 : vector<8x128xf32>
    %2061 = arith.mulf %2058, %2058 : vector<8x128xf32>
    %2062 = arith.mulf %2060, %2060 : vector<8x128xf32>
    %2063 = arith.addf %2061, %2062 : vector<8x128xf32>
    %cst_520 = arith.constant 1.000000e+00 : f32
    %2064 = vector.broadcast %cst_520 : f32 to vector<8x128xf32>
    %2065 = arith.maximumf %2064, %2063 : vector<8x128xf32>
    %2066 = arith.cmpf olt, %2065, %2055 : vector<8x128xf32>
    %c1_i32_521 = arith.constant 1 : i32
    %2067 = vector.broadcast %c1_i32_521 : i32 to vector<8x128xi32>
    %2068 = arith.select %2066, %2067, %2056 : vector<8x128xi1>, vector<8x128xi32>
    %2069 = arith.select %2066, %2065, %2055 : vector<8x128xi1>, vector<8x128xf32>
    %2070 = vector.broadcast %1716 : f32 to vector<8x128xf32>
    %2071 = arith.subf %2070, %2042 : vector<8x128xf32>
    %2072 = vector.broadcast %1732 : f32 to vector<8x128xf32>
    %2073 = arith.subf %2072, %2036 : vector<8x128xf32>
    %2074 = arith.mulf %2071, %2071 : vector<8x128xf32>
    %2075 = arith.mulf %2073, %2073 : vector<8x128xf32>
    %2076 = arith.addf %2074, %2075 : vector<8x128xf32>
    %cst_522 = arith.constant 1.000000e+00 : f32
    %2077 = vector.broadcast %cst_522 : f32 to vector<8x128xf32>
    %2078 = arith.maximumf %2077, %2076 : vector<8x128xf32>
    %2079 = arith.cmpf olt, %2078, %2069 : vector<8x128xf32>
    %c2_i32_523 = arith.constant 2 : i32
    %2080 = vector.broadcast %c2_i32_523 : i32 to vector<8x128xi32>
    %2081 = arith.select %2079, %2080, %2068 : vector<8x128xi1>, vector<8x128xi32>
    %2082 = arith.select %2079, %2078, %2069 : vector<8x128xi1>, vector<8x128xf32>
    %2083 = vector.broadcast %1720 : f32 to vector<8x128xf32>
    %2084 = arith.subf %2083, %2042 : vector<8x128xf32>
    %2085 = vector.broadcast %1736 : f32 to vector<8x128xf32>
    %2086 = arith.subf %2085, %2036 : vector<8x128xf32>
    %2087 = arith.mulf %2084, %2084 : vector<8x128xf32>
    %2088 = arith.mulf %2086, %2086 : vector<8x128xf32>
    %2089 = arith.addf %2087, %2088 : vector<8x128xf32>
    %cst_524 = arith.constant 1.000000e+00 : f32
    %2090 = vector.broadcast %cst_524 : f32 to vector<8x128xf32>
    %2091 = arith.maximumf %2090, %2089 : vector<8x128xf32>
    %2092 = arith.cmpf olt, %2091, %2082 : vector<8x128xf32>
    %c3_i32_525 = arith.constant 3 : i32
    %2093 = vector.broadcast %c3_i32_525 : i32 to vector<8x128xi32>
    %2094 = arith.select %2092, %2093, %2081 : vector<8x128xi1>, vector<8x128xi32>
    %2095 = arith.select %2092, %2091, %2082 : vector<8x128xi1>, vector<8x128xf32>
    %2096 = math.sqrt %2095 : vector<8x128xf32>
    %2097 = arith.divf %2046, %2096 : vector<8x128xf32>
    %2098 = arith.mulf %2042, %2097 : vector<8x128xf32>
    %2099 = arith.mulf %2036, %2097 : vector<8x128xf32>
    %c0_i32_526 = arith.constant 0 : i32
    %2100 = vector.broadcast %c0_i32_526 : i32 to vector<8x128xi32>
    %2101 = arith.cmpi eq, %2094, %2100 : vector<8x128xi32>
    %cst_527 = arith.constant 0.000000e+00 : f32
    %2102 = vector.broadcast %cst_527 : f32 to vector<8x128xf32>
    %2103 = arith.select %2101, %2098, %2102 : vector<8x128xi1>, vector<8x128xf32>
    %2104 = arith.addf %2002, %2103 : vector<8x128xf32>
    %cst_528 = arith.constant 0.000000e+00 : f32
    %2105 = vector.broadcast %cst_528 : f32 to vector<8x128xf32>
    %2106 = arith.select %2101, %2099, %2105 : vector<8x128xi1>, vector<8x128xf32>
    %2107 = arith.addf %2005, %2106 : vector<8x128xf32>
    %c1_i32_529 = arith.constant 1 : i32
    %2108 = vector.broadcast %c1_i32_529 : i32 to vector<8x128xi32>
    %2109 = arith.cmpi eq, %2094, %2108 : vector<8x128xi32>
    %cst_530 = arith.constant 0.000000e+00 : f32
    %2110 = vector.broadcast %cst_530 : f32 to vector<8x128xf32>
    %2111 = arith.select %2109, %2098, %2110 : vector<8x128xi1>, vector<8x128xf32>
    %2112 = arith.addf %2010, %2111 : vector<8x128xf32>
    %cst_531 = arith.constant 0.000000e+00 : f32
    %2113 = vector.broadcast %cst_531 : f32 to vector<8x128xf32>
    %2114 = arith.select %2109, %2099, %2113 : vector<8x128xi1>, vector<8x128xf32>
    %2115 = arith.addf %2013, %2114 : vector<8x128xf32>
    %c2_i32_532 = arith.constant 2 : i32
    %2116 = vector.broadcast %c2_i32_532 : i32 to vector<8x128xi32>
    %2117 = arith.cmpi eq, %2094, %2116 : vector<8x128xi32>
    %cst_533 = arith.constant 0.000000e+00 : f32
    %2118 = vector.broadcast %cst_533 : f32 to vector<8x128xf32>
    %2119 = arith.select %2117, %2098, %2118 : vector<8x128xi1>, vector<8x128xf32>
    %2120 = arith.addf %2018, %2119 : vector<8x128xf32>
    %cst_534 = arith.constant 0.000000e+00 : f32
    %2121 = vector.broadcast %cst_534 : f32 to vector<8x128xf32>
    %2122 = arith.select %2117, %2099, %2121 : vector<8x128xi1>, vector<8x128xf32>
    %2123 = arith.addf %2021, %2122 : vector<8x128xf32>
    %c3_i32_535 = arith.constant 3 : i32
    %2124 = vector.broadcast %c3_i32_535 : i32 to vector<8x128xi32>
    %2125 = arith.cmpi eq, %2094, %2124 : vector<8x128xi32>
    %cst_536 = arith.constant 0.000000e+00 : f32
    %2126 = vector.broadcast %cst_536 : f32 to vector<8x128xf32>
    %2127 = arith.select %2125, %2098, %2126 : vector<8x128xi1>, vector<8x128xf32>
    %2128 = arith.addf %2026, %2127 : vector<8x128xf32>
    %cst_537 = arith.constant 0.000000e+00 : f32
    %2129 = vector.broadcast %cst_537 : f32 to vector<8x128xf32>
    %2130 = arith.select %2125, %2099, %2129 : vector<8x128xi1>, vector<8x128xf32>
    %2131 = arith.addf %2029, %2130 : vector<8x128xf32>
    %2132 = vector.broadcast %cst_437 : f32 to vector<8x128xf32>
    %2133 = arith.addf %2036, %2132 : vector<8x128xf32>
    %2134 = vector.broadcast %cst_438 : f32 to vector<8x128xf32>
    %2135 = arith.cmpf oge, %2133, %2134 : vector<8x128xf32>
    %2136 = vector.broadcast %cst_438 : f32 to vector<8x128xf32>
    %2137 = arith.subf %2133, %2136 : vector<8x128xf32>
    %2138 = arith.select %2135, %2137, %2133 : vector<8x128xi1>, vector<8x128xf32>
    %2139 = vector.broadcast %cst_439 : f32 to vector<8x128xf32>
    %2140 = arith.addf %2042, %2139 : vector<8x128xf32>
    %cst_538 = arith.constant 1.000000e+00 : f32
    %cst_539 = arith.constant 0.000000e+00 : f32
    %2141 = vector.broadcast %cst_538 : f32 to vector<8x128xf32>
    %2142 = vector.broadcast %cst_539 : f32 to vector<8x128xf32>
    %2143 = arith.select %2135, %2141, %2142 : vector<8x128xi1>, vector<8x128xf32>
    %2144 = arith.addf %2140, %2143 : vector<8x128xf32>
    %c4_i32_540 = arith.constant 4 : i32
    %c8_i32_541 = arith.constant 8 : i32
    %2145 = arith.muli %c4_i32_540, %c8_i32_541 : i32
    %2146 = tpu.assume_multiple %2145, 8 : i32
    %2147 = arith.index_cast %2146 : i32 to index
    %c0_542 = arith.constant 0 : index
    %2148 = vector.load %arg1[%2147, %c0_542] : memref<64x128xf32, #tpu.memory_space<vmem>>, vector<8x128xf32>
    %2149 = vector.broadcast %1708 : f32 to vector<8x128xf32>
    %2150 = arith.subf %2149, %2144 : vector<8x128xf32>
    %2151 = vector.broadcast %1724 : f32 to vector<8x128xf32>
    %2152 = arith.subf %2151, %2138 : vector<8x128xf32>
    %2153 = arith.mulf %2150, %2150 : vector<8x128xf32>
    %2154 = arith.mulf %2152, %2152 : vector<8x128xf32>
    %2155 = arith.addf %2153, %2154 : vector<8x128xf32>
    %cst_543 = arith.constant 1.000000e+00 : f32
    %2156 = vector.broadcast %cst_543 : f32 to vector<8x128xf32>
    %2157 = arith.maximumf %2156, %2155 : vector<8x128xf32>
    %c0_i32_544 = arith.constant 0 : i32
    %2158 = vector.broadcast %c0_i32_544 : i32 to vector<8x128xi32>
    %2159 = vector.broadcast %1712 : f32 to vector<8x128xf32>
    %2160 = arith.subf %2159, %2144 : vector<8x128xf32>
    %2161 = vector.broadcast %1728 : f32 to vector<8x128xf32>
    %2162 = arith.subf %2161, %2138 : vector<8x128xf32>
    %2163 = arith.mulf %2160, %2160 : vector<8x128xf32>
    %2164 = arith.mulf %2162, %2162 : vector<8x128xf32>
    %2165 = arith.addf %2163, %2164 : vector<8x128xf32>
    %cst_545 = arith.constant 1.000000e+00 : f32
    %2166 = vector.broadcast %cst_545 : f32 to vector<8x128xf32>
    %2167 = arith.maximumf %2166, %2165 : vector<8x128xf32>
    %2168 = arith.cmpf olt, %2167, %2157 : vector<8x128xf32>
    %c1_i32_546 = arith.constant 1 : i32
    %2169 = vector.broadcast %c1_i32_546 : i32 to vector<8x128xi32>
    %2170 = arith.select %2168, %2169, %2158 : vector<8x128xi1>, vector<8x128xi32>
    %2171 = arith.select %2168, %2167, %2157 : vector<8x128xi1>, vector<8x128xf32>
    %2172 = vector.broadcast %1716 : f32 to vector<8x128xf32>
    %2173 = arith.subf %2172, %2144 : vector<8x128xf32>
    %2174 = vector.broadcast %1732 : f32 to vector<8x128xf32>
    %2175 = arith.subf %2174, %2138 : vector<8x128xf32>
    %2176 = arith.mulf %2173, %2173 : vector<8x128xf32>
    %2177 = arith.mulf %2175, %2175 : vector<8x128xf32>
    %2178 = arith.addf %2176, %2177 : vector<8x128xf32>
    %cst_547 = arith.constant 1.000000e+00 : f32
    %2179 = vector.broadcast %cst_547 : f32 to vector<8x128xf32>
    %2180 = arith.maximumf %2179, %2178 : vector<8x128xf32>
    %2181 = arith.cmpf olt, %2180, %2171 : vector<8x128xf32>
    %c2_i32_548 = arith.constant 2 : i32
    %2182 = vector.broadcast %c2_i32_548 : i32 to vector<8x128xi32>
    %2183 = arith.select %2181, %2182, %2170 : vector<8x128xi1>, vector<8x128xi32>
    %2184 = arith.select %2181, %2180, %2171 : vector<8x128xi1>, vector<8x128xf32>
    %2185 = vector.broadcast %1720 : f32 to vector<8x128xf32>
    %2186 = arith.subf %2185, %2144 : vector<8x128xf32>
    %2187 = vector.broadcast %1736 : f32 to vector<8x128xf32>
    %2188 = arith.subf %2187, %2138 : vector<8x128xf32>
    %2189 = arith.mulf %2186, %2186 : vector<8x128xf32>
    %2190 = arith.mulf %2188, %2188 : vector<8x128xf32>
    %2191 = arith.addf %2189, %2190 : vector<8x128xf32>
    %cst_549 = arith.constant 1.000000e+00 : f32
    %2192 = vector.broadcast %cst_549 : f32 to vector<8x128xf32>
    %2193 = arith.maximumf %2192, %2191 : vector<8x128xf32>
    %2194 = arith.cmpf olt, %2193, %2184 : vector<8x128xf32>
    %c3_i32_550 = arith.constant 3 : i32
    %2195 = vector.broadcast %c3_i32_550 : i32 to vector<8x128xi32>
    %2196 = arith.select %2194, %2195, %2183 : vector<8x128xi1>, vector<8x128xi32>
    %2197 = arith.select %2194, %2193, %2184 : vector<8x128xi1>, vector<8x128xf32>
    %2198 = math.sqrt %2197 : vector<8x128xf32>
    %2199 = arith.divf %2148, %2198 : vector<8x128xf32>
    %2200 = arith.mulf %2144, %2199 : vector<8x128xf32>
    %2201 = arith.mulf %2138, %2199 : vector<8x128xf32>
    %c0_i32_551 = arith.constant 0 : i32
    %2202 = vector.broadcast %c0_i32_551 : i32 to vector<8x128xi32>
    %2203 = arith.cmpi eq, %2196, %2202 : vector<8x128xi32>
    %cst_552 = arith.constant 0.000000e+00 : f32
    %2204 = vector.broadcast %cst_552 : f32 to vector<8x128xf32>
    %2205 = arith.select %2203, %2200, %2204 : vector<8x128xi1>, vector<8x128xf32>
    %2206 = arith.addf %2104, %2205 : vector<8x128xf32>
    %cst_553 = arith.constant 0.000000e+00 : f32
    %2207 = vector.broadcast %cst_553 : f32 to vector<8x128xf32>
    %2208 = arith.select %2203, %2201, %2207 : vector<8x128xi1>, vector<8x128xf32>
    %2209 = arith.addf %2107, %2208 : vector<8x128xf32>
    %c1_i32_554 = arith.constant 1 : i32
    %2210 = vector.broadcast %c1_i32_554 : i32 to vector<8x128xi32>
    %2211 = arith.cmpi eq, %2196, %2210 : vector<8x128xi32>
    %cst_555 = arith.constant 0.000000e+00 : f32
    %2212 = vector.broadcast %cst_555 : f32 to vector<8x128xf32>
    %2213 = arith.select %2211, %2200, %2212 : vector<8x128xi1>, vector<8x128xf32>
    %2214 = arith.addf %2112, %2213 : vector<8x128xf32>
    %cst_556 = arith.constant 0.000000e+00 : f32
    %2215 = vector.broadcast %cst_556 : f32 to vector<8x128xf32>
    %2216 = arith.select %2211, %2201, %2215 : vector<8x128xi1>, vector<8x128xf32>
    %2217 = arith.addf %2115, %2216 : vector<8x128xf32>
    %c2_i32_557 = arith.constant 2 : i32
    %2218 = vector.broadcast %c2_i32_557 : i32 to vector<8x128xi32>
    %2219 = arith.cmpi eq, %2196, %2218 : vector<8x128xi32>
    %cst_558 = arith.constant 0.000000e+00 : f32
    %2220 = vector.broadcast %cst_558 : f32 to vector<8x128xf32>
    %2221 = arith.select %2219, %2200, %2220 : vector<8x128xi1>, vector<8x128xf32>
    %2222 = arith.addf %2120, %2221 : vector<8x128xf32>
    %cst_559 = arith.constant 0.000000e+00 : f32
    %2223 = vector.broadcast %cst_559 : f32 to vector<8x128xf32>
    %2224 = arith.select %2219, %2201, %2223 : vector<8x128xi1>, vector<8x128xf32>
    %2225 = arith.addf %2123, %2224 : vector<8x128xf32>
    %c3_i32_560 = arith.constant 3 : i32
    %2226 = vector.broadcast %c3_i32_560 : i32 to vector<8x128xi32>
    %2227 = arith.cmpi eq, %2196, %2226 : vector<8x128xi32>
    %cst_561 = arith.constant 0.000000e+00 : f32
    %2228 = vector.broadcast %cst_561 : f32 to vector<8x128xf32>
    %2229 = arith.select %2227, %2200, %2228 : vector<8x128xi1>, vector<8x128xf32>
    %2230 = arith.addf %2128, %2229 : vector<8x128xf32>
    %cst_562 = arith.constant 0.000000e+00 : f32
    %2231 = vector.broadcast %cst_562 : f32 to vector<8x128xf32>
    %2232 = arith.select %2227, %2201, %2231 : vector<8x128xi1>, vector<8x128xf32>
    %2233 = arith.addf %2131, %2232 : vector<8x128xf32>
    %2234 = vector.broadcast %cst_437 : f32 to vector<8x128xf32>
    %2235 = arith.addf %2138, %2234 : vector<8x128xf32>
    %2236 = vector.broadcast %cst_438 : f32 to vector<8x128xf32>
    %2237 = arith.cmpf oge, %2235, %2236 : vector<8x128xf32>
    %2238 = vector.broadcast %cst_438 : f32 to vector<8x128xf32>
    %2239 = arith.subf %2235, %2238 : vector<8x128xf32>
    %2240 = arith.select %2237, %2239, %2235 : vector<8x128xi1>, vector<8x128xf32>
    %2241 = vector.broadcast %cst_439 : f32 to vector<8x128xf32>
    %2242 = arith.addf %2144, %2241 : vector<8x128xf32>
    %cst_563 = arith.constant 1.000000e+00 : f32
    %cst_564 = arith.constant 0.000000e+00 : f32
    %2243 = vector.broadcast %cst_563 : f32 to vector<8x128xf32>
    %2244 = vector.broadcast %cst_564 : f32 to vector<8x128xf32>
    %2245 = arith.select %2237, %2243, %2244 : vector<8x128xi1>, vector<8x128xf32>
    %2246 = arith.addf %2242, %2245 : vector<8x128xf32>
    %c5_i32_565 = arith.constant 5 : i32
    %c8_i32_566 = arith.constant 8 : i32
    %2247 = arith.muli %c5_i32_565, %c8_i32_566 : i32
    %2248 = tpu.assume_multiple %2247, 8 : i32
    %2249 = arith.index_cast %2248 : i32 to index
    %c0_567 = arith.constant 0 : index
    %2250 = vector.load %arg1[%2249, %c0_567] : memref<64x128xf32, #tpu.memory_space<vmem>>, vector<8x128xf32>
    %2251 = vector.broadcast %1708 : f32 to vector<8x128xf32>
    %2252 = arith.subf %2251, %2246 : vector<8x128xf32>
    %2253 = vector.broadcast %1724 : f32 to vector<8x128xf32>
    %2254 = arith.subf %2253, %2240 : vector<8x128xf32>
    %2255 = arith.mulf %2252, %2252 : vector<8x128xf32>
    %2256 = arith.mulf %2254, %2254 : vector<8x128xf32>
    %2257 = arith.addf %2255, %2256 : vector<8x128xf32>
    %cst_568 = arith.constant 1.000000e+00 : f32
    %2258 = vector.broadcast %cst_568 : f32 to vector<8x128xf32>
    %2259 = arith.maximumf %2258, %2257 : vector<8x128xf32>
    %c0_i32_569 = arith.constant 0 : i32
    %2260 = vector.broadcast %c0_i32_569 : i32 to vector<8x128xi32>
    %2261 = vector.broadcast %1712 : f32 to vector<8x128xf32>
    %2262 = arith.subf %2261, %2246 : vector<8x128xf32>
    %2263 = vector.broadcast %1728 : f32 to vector<8x128xf32>
    %2264 = arith.subf %2263, %2240 : vector<8x128xf32>
    %2265 = arith.mulf %2262, %2262 : vector<8x128xf32>
    %2266 = arith.mulf %2264, %2264 : vector<8x128xf32>
    %2267 = arith.addf %2265, %2266 : vector<8x128xf32>
    %cst_570 = arith.constant 1.000000e+00 : f32
    %2268 = vector.broadcast %cst_570 : f32 to vector<8x128xf32>
    %2269 = arith.maximumf %2268, %2267 : vector<8x128xf32>
    %2270 = arith.cmpf olt, %2269, %2259 : vector<8x128xf32>
    %c1_i32_571 = arith.constant 1 : i32
    %2271 = vector.broadcast %c1_i32_571 : i32 to vector<8x128xi32>
    %2272 = arith.select %2270, %2271, %2260 : vector<8x128xi1>, vector<8x128xi32>
    %2273 = arith.select %2270, %2269, %2259 : vector<8x128xi1>, vector<8x128xf32>
    %2274 = vector.broadcast %1716 : f32 to vector<8x128xf32>
    %2275 = arith.subf %2274, %2246 : vector<8x128xf32>
    %2276 = vector.broadcast %1732 : f32 to vector<8x128xf32>
    %2277 = arith.subf %2276, %2240 : vector<8x128xf32>
    %2278 = arith.mulf %2275, %2275 : vector<8x128xf32>
    %2279 = arith.mulf %2277, %2277 : vector<8x128xf32>
    %2280 = arith.addf %2278, %2279 : vector<8x128xf32>
    %cst_572 = arith.constant 1.000000e+00 : f32
    %2281 = vector.broadcast %cst_572 : f32 to vector<8x128xf32>
    %2282 = arith.maximumf %2281, %2280 : vector<8x128xf32>
    %2283 = arith.cmpf olt, %2282, %2273 : vector<8x128xf32>
    %c2_i32_573 = arith.constant 2 : i32
    %2284 = vector.broadcast %c2_i32_573 : i32 to vector<8x128xi32>
    %2285 = arith.select %2283, %2284, %2272 : vector<8x128xi1>, vector<8x128xi32>
    %2286 = arith.select %2283, %2282, %2273 : vector<8x128xi1>, vector<8x128xf32>
    %2287 = vector.broadcast %1720 : f32 to vector<8x128xf32>
    %2288 = arith.subf %2287, %2246 : vector<8x128xf32>
    %2289 = vector.broadcast %1736 : f32 to vector<8x128xf32>
    %2290 = arith.subf %2289, %2240 : vector<8x128xf32>
    %2291 = arith.mulf %2288, %2288 : vector<8x128xf32>
    %2292 = arith.mulf %2290, %2290 : vector<8x128xf32>
    %2293 = arith.addf %2291, %2292 : vector<8x128xf32>
    %cst_574 = arith.constant 1.000000e+00 : f32
    %2294 = vector.broadcast %cst_574 : f32 to vector<8x128xf32>
    %2295 = arith.maximumf %2294, %2293 : vector<8x128xf32>
    %2296 = arith.cmpf olt, %2295, %2286 : vector<8x128xf32>
    %c3_i32_575 = arith.constant 3 : i32
    %2297 = vector.broadcast %c3_i32_575 : i32 to vector<8x128xi32>
    %2298 = arith.select %2296, %2297, %2285 : vector<8x128xi1>, vector<8x128xi32>
    %2299 = arith.select %2296, %2295, %2286 : vector<8x128xi1>, vector<8x128xf32>
    %2300 = math.sqrt %2299 : vector<8x128xf32>
    %2301 = arith.divf %2250, %2300 : vector<8x128xf32>
    %2302 = arith.mulf %2246, %2301 : vector<8x128xf32>
    %2303 = arith.mulf %2240, %2301 : vector<8x128xf32>
    %c0_i32_576 = arith.constant 0 : i32
    %2304 = vector.broadcast %c0_i32_576 : i32 to vector<8x128xi32>
    %2305 = arith.cmpi eq, %2298, %2304 : vector<8x128xi32>
    %cst_577 = arith.constant 0.000000e+00 : f32
    %2306 = vector.broadcast %cst_577 : f32 to vector<8x128xf32>
    %2307 = arith.select %2305, %2302, %2306 : vector<8x128xi1>, vector<8x128xf32>
    %2308 = arith.addf %2206, %2307 : vector<8x128xf32>
    %cst_578 = arith.constant 0.000000e+00 : f32
    %2309 = vector.broadcast %cst_578 : f32 to vector<8x128xf32>
    %2310 = arith.select %2305, %2303, %2309 : vector<8x128xi1>, vector<8x128xf32>
    %2311 = arith.addf %2209, %2310 : vector<8x128xf32>
    %c1_i32_579 = arith.constant 1 : i32
    %2312 = vector.broadcast %c1_i32_579 : i32 to vector<8x128xi32>
    %2313 = arith.cmpi eq, %2298, %2312 : vector<8x128xi32>
    %cst_580 = arith.constant 0.000000e+00 : f32
    %2314 = vector.broadcast %cst_580 : f32 to vector<8x128xf32>
    %2315 = arith.select %2313, %2302, %2314 : vector<8x128xi1>, vector<8x128xf32>
    %2316 = arith.addf %2214, %2315 : vector<8x128xf32>
    %cst_581 = arith.constant 0.000000e+00 : f32
    %2317 = vector.broadcast %cst_581 : f32 to vector<8x128xf32>
    %2318 = arith.select %2313, %2303, %2317 : vector<8x128xi1>, vector<8x128xf32>
    %2319 = arith.addf %2217, %2318 : vector<8x128xf32>
    %c2_i32_582 = arith.constant 2 : i32
    %2320 = vector.broadcast %c2_i32_582 : i32 to vector<8x128xi32>
    %2321 = arith.cmpi eq, %2298, %2320 : vector<8x128xi32>
    %cst_583 = arith.constant 0.000000e+00 : f32
    %2322 = vector.broadcast %cst_583 : f32 to vector<8x128xf32>
    %2323 = arith.select %2321, %2302, %2322 : vector<8x128xi1>, vector<8x128xf32>
    %2324 = arith.addf %2222, %2323 : vector<8x128xf32>
    %cst_584 = arith.constant 0.000000e+00 : f32
    %2325 = vector.broadcast %cst_584 : f32 to vector<8x128xf32>
    %2326 = arith.select %2321, %2303, %2325 : vector<8x128xi1>, vector<8x128xf32>
    %2327 = arith.addf %2225, %2326 : vector<8x128xf32>
    %c3_i32_585 = arith.constant 3 : i32
    %2328 = vector.broadcast %c3_i32_585 : i32 to vector<8x128xi32>
    %2329 = arith.cmpi eq, %2298, %2328 : vector<8x128xi32>
    %cst_586 = arith.constant 0.000000e+00 : f32
    %2330 = vector.broadcast %cst_586 : f32 to vector<8x128xf32>
    %2331 = arith.select %2329, %2302, %2330 : vector<8x128xi1>, vector<8x128xf32>
    %2332 = arith.addf %2230, %2331 : vector<8x128xf32>
    %cst_587 = arith.constant 0.000000e+00 : f32
    %2333 = vector.broadcast %cst_587 : f32 to vector<8x128xf32>
    %2334 = arith.select %2329, %2303, %2333 : vector<8x128xi1>, vector<8x128xf32>
    %2335 = arith.addf %2233, %2334 : vector<8x128xf32>
    %2336 = vector.broadcast %cst_437 : f32 to vector<8x128xf32>
    %2337 = arith.addf %2240, %2336 : vector<8x128xf32>
    %2338 = vector.broadcast %cst_438 : f32 to vector<8x128xf32>
    %2339 = arith.cmpf oge, %2337, %2338 : vector<8x128xf32>
    %2340 = vector.broadcast %cst_438 : f32 to vector<8x128xf32>
    %2341 = arith.subf %2337, %2340 : vector<8x128xf32>
    %2342 = arith.select %2339, %2341, %2337 : vector<8x128xi1>, vector<8x128xf32>
    %2343 = vector.broadcast %cst_439 : f32 to vector<8x128xf32>
    %2344 = arith.addf %2246, %2343 : vector<8x128xf32>
    %cst_588 = arith.constant 1.000000e+00 : f32
    %cst_589 = arith.constant 0.000000e+00 : f32
    %2345 = vector.broadcast %cst_588 : f32 to vector<8x128xf32>
    %2346 = vector.broadcast %cst_589 : f32 to vector<8x128xf32>
    %2347 = arith.select %2339, %2345, %2346 : vector<8x128xi1>, vector<8x128xf32>
    %2348 = arith.addf %2344, %2347 : vector<8x128xf32>
    %c6_i32_590 = arith.constant 6 : i32
    %c8_i32_591 = arith.constant 8 : i32
    %2349 = arith.muli %c6_i32_590, %c8_i32_591 : i32
    %2350 = tpu.assume_multiple %2349, 8 : i32
    %2351 = arith.index_cast %2350 : i32 to index
    %c0_592 = arith.constant 0 : index
    %2352 = vector.load %arg1[%2351, %c0_592] : memref<64x128xf32, #tpu.memory_space<vmem>>, vector<8x128xf32>
    %2353 = vector.broadcast %1708 : f32 to vector<8x128xf32>
    %2354 = arith.subf %2353, %2348 : vector<8x128xf32>
    %2355 = vector.broadcast %1724 : f32 to vector<8x128xf32>
    %2356 = arith.subf %2355, %2342 : vector<8x128xf32>
    %2357 = arith.mulf %2354, %2354 : vector<8x128xf32>
    %2358 = arith.mulf %2356, %2356 : vector<8x128xf32>
    %2359 = arith.addf %2357, %2358 : vector<8x128xf32>
    %cst_593 = arith.constant 1.000000e+00 : f32
    %2360 = vector.broadcast %cst_593 : f32 to vector<8x128xf32>
    %2361 = arith.maximumf %2360, %2359 : vector<8x128xf32>
    %c0_i32_594 = arith.constant 0 : i32
    %2362 = vector.broadcast %c0_i32_594 : i32 to vector<8x128xi32>
    %2363 = vector.broadcast %1712 : f32 to vector<8x128xf32>
    %2364 = arith.subf %2363, %2348 : vector<8x128xf32>
    %2365 = vector.broadcast %1728 : f32 to vector<8x128xf32>
    %2366 = arith.subf %2365, %2342 : vector<8x128xf32>
    %2367 = arith.mulf %2364, %2364 : vector<8x128xf32>
    %2368 = arith.mulf %2366, %2366 : vector<8x128xf32>
    %2369 = arith.addf %2367, %2368 : vector<8x128xf32>
    %cst_595 = arith.constant 1.000000e+00 : f32
    %2370 = vector.broadcast %cst_595 : f32 to vector<8x128xf32>
    %2371 = arith.maximumf %2370, %2369 : vector<8x128xf32>
    %2372 = arith.cmpf olt, %2371, %2361 : vector<8x128xf32>
    %c1_i32_596 = arith.constant 1 : i32
    %2373 = vector.broadcast %c1_i32_596 : i32 to vector<8x128xi32>
    %2374 = arith.select %2372, %2373, %2362 : vector<8x128xi1>, vector<8x128xi32>
    %2375 = arith.select %2372, %2371, %2361 : vector<8x128xi1>, vector<8x128xf32>
    %2376 = vector.broadcast %1716 : f32 to vector<8x128xf32>
    %2377 = arith.subf %2376, %2348 : vector<8x128xf32>
    %2378 = vector.broadcast %1732 : f32 to vector<8x128xf32>
    %2379 = arith.subf %2378, %2342 : vector<8x128xf32>
    %2380 = arith.mulf %2377, %2377 : vector<8x128xf32>
    %2381 = arith.mulf %2379, %2379 : vector<8x128xf32>
    %2382 = arith.addf %2380, %2381 : vector<8x128xf32>
    %cst_597 = arith.constant 1.000000e+00 : f32
    %2383 = vector.broadcast %cst_597 : f32 to vector<8x128xf32>
    %2384 = arith.maximumf %2383, %2382 : vector<8x128xf32>
    %2385 = arith.cmpf olt, %2384, %2375 : vector<8x128xf32>
    %c2_i32_598 = arith.constant 2 : i32
    %2386 = vector.broadcast %c2_i32_598 : i32 to vector<8x128xi32>
    %2387 = arith.select %2385, %2386, %2374 : vector<8x128xi1>, vector<8x128xi32>
    %2388 = arith.select %2385, %2384, %2375 : vector<8x128xi1>, vector<8x128xf32>
    %2389 = vector.broadcast %1720 : f32 to vector<8x128xf32>
    %2390 = arith.subf %2389, %2348 : vector<8x128xf32>
    %2391 = vector.broadcast %1736 : f32 to vector<8x128xf32>
    %2392 = arith.subf %2391, %2342 : vector<8x128xf32>
    %2393 = arith.mulf %2390, %2390 : vector<8x128xf32>
    %2394 = arith.mulf %2392, %2392 : vector<8x128xf32>
    %2395 = arith.addf %2393, %2394 : vector<8x128xf32>
    %cst_599 = arith.constant 1.000000e+00 : f32
    %2396 = vector.broadcast %cst_599 : f32 to vector<8x128xf32>
    %2397 = arith.maximumf %2396, %2395 : vector<8x128xf32>
    %2398 = arith.cmpf olt, %2397, %2388 : vector<8x128xf32>
    %c3_i32_600 = arith.constant 3 : i32
    %2399 = vector.broadcast %c3_i32_600 : i32 to vector<8x128xi32>
    %2400 = arith.select %2398, %2399, %2387 : vector<8x128xi1>, vector<8x128xi32>
    %2401 = arith.select %2398, %2397, %2388 : vector<8x128xi1>, vector<8x128xf32>
    %2402 = math.sqrt %2401 : vector<8x128xf32>
    %2403 = arith.divf %2352, %2402 : vector<8x128xf32>
    %2404 = arith.mulf %2348, %2403 : vector<8x128xf32>
    %2405 = arith.mulf %2342, %2403 : vector<8x128xf32>
    %c0_i32_601 = arith.constant 0 : i32
    %2406 = vector.broadcast %c0_i32_601 : i32 to vector<8x128xi32>
    %2407 = arith.cmpi eq, %2400, %2406 : vector<8x128xi32>
    %cst_602 = arith.constant 0.000000e+00 : f32
    %2408 = vector.broadcast %cst_602 : f32 to vector<8x128xf32>
    %2409 = arith.select %2407, %2404, %2408 : vector<8x128xi1>, vector<8x128xf32>
    %2410 = arith.addf %2308, %2409 : vector<8x128xf32>
    %cst_603 = arith.constant 0.000000e+00 : f32
    %2411 = vector.broadcast %cst_603 : f32 to vector<8x128xf32>
    %2412 = arith.select %2407, %2405, %2411 : vector<8x128xi1>, vector<8x128xf32>
    %2413 = arith.addf %2311, %2412 : vector<8x128xf32>
    %c1_i32_604 = arith.constant 1 : i32
    %2414 = vector.broadcast %c1_i32_604 : i32 to vector<8x128xi32>
    %2415 = arith.cmpi eq, %2400, %2414 : vector<8x128xi32>
    %cst_605 = arith.constant 0.000000e+00 : f32
    %2416 = vector.broadcast %cst_605 : f32 to vector<8x128xf32>
    %2417 = arith.select %2415, %2404, %2416 : vector<8x128xi1>, vector<8x128xf32>
    %2418 = arith.addf %2316, %2417 : vector<8x128xf32>
    %cst_606 = arith.constant 0.000000e+00 : f32
    %2419 = vector.broadcast %cst_606 : f32 to vector<8x128xf32>
    %2420 = arith.select %2415, %2405, %2419 : vector<8x128xi1>, vector<8x128xf32>
    %2421 = arith.addf %2319, %2420 : vector<8x128xf32>
    %c2_i32_607 = arith.constant 2 : i32
    %2422 = vector.broadcast %c2_i32_607 : i32 to vector<8x128xi32>
    %2423 = arith.cmpi eq, %2400, %2422 : vector<8x128xi32>
    %cst_608 = arith.constant 0.000000e+00 : f32
    %2424 = vector.broadcast %cst_608 : f32 to vector<8x128xf32>
    %2425 = arith.select %2423, %2404, %2424 : vector<8x128xi1>, vector<8x128xf32>
    %2426 = arith.addf %2324, %2425 : vector<8x128xf32>
    %cst_609 = arith.constant 0.000000e+00 : f32
    %2427 = vector.broadcast %cst_609 : f32 to vector<8x128xf32>
    %2428 = arith.select %2423, %2405, %2427 : vector<8x128xi1>, vector<8x128xf32>
    %2429 = arith.addf %2327, %2428 : vector<8x128xf32>
    %c3_i32_610 = arith.constant 3 : i32
    %2430 = vector.broadcast %c3_i32_610 : i32 to vector<8x128xi32>
    %2431 = arith.cmpi eq, %2400, %2430 : vector<8x128xi32>
    %cst_611 = arith.constant 0.000000e+00 : f32
    %2432 = vector.broadcast %cst_611 : f32 to vector<8x128xf32>
    %2433 = arith.select %2431, %2404, %2432 : vector<8x128xi1>, vector<8x128xf32>
    %2434 = arith.addf %2332, %2433 : vector<8x128xf32>
    %cst_612 = arith.constant 0.000000e+00 : f32
    %2435 = vector.broadcast %cst_612 : f32 to vector<8x128xf32>
    %2436 = arith.select %2431, %2405, %2435 : vector<8x128xi1>, vector<8x128xf32>
    %2437 = arith.addf %2335, %2436 : vector<8x128xf32>
    %2438 = vector.broadcast %cst_437 : f32 to vector<8x128xf32>
    %2439 = arith.addf %2342, %2438 : vector<8x128xf32>
    %2440 = vector.broadcast %cst_438 : f32 to vector<8x128xf32>
    %2441 = arith.cmpf oge, %2439, %2440 : vector<8x128xf32>
    %2442 = vector.broadcast %cst_438 : f32 to vector<8x128xf32>
    %2443 = arith.subf %2439, %2442 : vector<8x128xf32>
    %2444 = arith.select %2441, %2443, %2439 : vector<8x128xi1>, vector<8x128xf32>
    %2445 = vector.broadcast %cst_439 : f32 to vector<8x128xf32>
    %2446 = arith.addf %2348, %2445 : vector<8x128xf32>
    %cst_613 = arith.constant 1.000000e+00 : f32
    %cst_614 = arith.constant 0.000000e+00 : f32
    %2447 = vector.broadcast %cst_613 : f32 to vector<8x128xf32>
    %2448 = vector.broadcast %cst_614 : f32 to vector<8x128xf32>
    %2449 = arith.select %2441, %2447, %2448 : vector<8x128xi1>, vector<8x128xf32>
    %2450 = arith.addf %2446, %2449 : vector<8x128xf32>
    %c7_i32_615 = arith.constant 7 : i32
    %c8_i32_616 = arith.constant 8 : i32
    %2451 = arith.muli %c7_i32_615, %c8_i32_616 : i32
    %2452 = tpu.assume_multiple %2451, 8 : i32
    %2453 = arith.index_cast %2452 : i32 to index
    %c0_617 = arith.constant 0 : index
    %2454 = vector.load %arg1[%2453, %c0_617] : memref<64x128xf32, #tpu.memory_space<vmem>>, vector<8x128xf32>
    %2455 = vector.broadcast %1708 : f32 to vector<8x128xf32>
    %2456 = arith.subf %2455, %2450 : vector<8x128xf32>
    %2457 = vector.broadcast %1724 : f32 to vector<8x128xf32>
    %2458 = arith.subf %2457, %2444 : vector<8x128xf32>
    %2459 = arith.mulf %2456, %2456 : vector<8x128xf32>
    %2460 = arith.mulf %2458, %2458 : vector<8x128xf32>
    %2461 = arith.addf %2459, %2460 : vector<8x128xf32>
    %cst_618 = arith.constant 1.000000e+00 : f32
    %2462 = vector.broadcast %cst_618 : f32 to vector<8x128xf32>
    %2463 = arith.maximumf %2462, %2461 : vector<8x128xf32>
    %c0_i32_619 = arith.constant 0 : i32
    %2464 = vector.broadcast %c0_i32_619 : i32 to vector<8x128xi32>
    %2465 = vector.broadcast %1712 : f32 to vector<8x128xf32>
    %2466 = arith.subf %2465, %2450 : vector<8x128xf32>
    %2467 = vector.broadcast %1728 : f32 to vector<8x128xf32>
    %2468 = arith.subf %2467, %2444 : vector<8x128xf32>
    %2469 = arith.mulf %2466, %2466 : vector<8x128xf32>
    %2470 = arith.mulf %2468, %2468 : vector<8x128xf32>
    %2471 = arith.addf %2469, %2470 : vector<8x128xf32>
    %cst_620 = arith.constant 1.000000e+00 : f32
    %2472 = vector.broadcast %cst_620 : f32 to vector<8x128xf32>
    %2473 = arith.maximumf %2472, %2471 : vector<8x128xf32>
    %2474 = arith.cmpf olt, %2473, %2463 : vector<8x128xf32>
    %c1_i32_621 = arith.constant 1 : i32
    %2475 = vector.broadcast %c1_i32_621 : i32 to vector<8x128xi32>
    %2476 = arith.select %2474, %2475, %2464 : vector<8x128xi1>, vector<8x128xi32>
    %2477 = arith.select %2474, %2473, %2463 : vector<8x128xi1>, vector<8x128xf32>
    %2478 = vector.broadcast %1716 : f32 to vector<8x128xf32>
    %2479 = arith.subf %2478, %2450 : vector<8x128xf32>
    %2480 = vector.broadcast %1732 : f32 to vector<8x128xf32>
    %2481 = arith.subf %2480, %2444 : vector<8x128xf32>
    %2482 = arith.mulf %2479, %2479 : vector<8x128xf32>
    %2483 = arith.mulf %2481, %2481 : vector<8x128xf32>
    %2484 = arith.addf %2482, %2483 : vector<8x128xf32>
    %cst_622 = arith.constant 1.000000e+00 : f32
    %2485 = vector.broadcast %cst_622 : f32 to vector<8x128xf32>
    %2486 = arith.maximumf %2485, %2484 : vector<8x128xf32>
    %2487 = arith.cmpf olt, %2486, %2477 : vector<8x128xf32>
    %c2_i32_623 = arith.constant 2 : i32
    %2488 = vector.broadcast %c2_i32_623 : i32 to vector<8x128xi32>
    %2489 = arith.select %2487, %2488, %2476 : vector<8x128xi1>, vector<8x128xi32>
    %2490 = arith.select %2487, %2486, %2477 : vector<8x128xi1>, vector<8x128xf32>
    %2491 = vector.broadcast %1720 : f32 to vector<8x128xf32>
    %2492 = arith.subf %2491, %2450 : vector<8x128xf32>
    %2493 = vector.broadcast %1736 : f32 to vector<8x128xf32>
    %2494 = arith.subf %2493, %2444 : vector<8x128xf32>
    %2495 = arith.mulf %2492, %2492 : vector<8x128xf32>
    %2496 = arith.mulf %2494, %2494 : vector<8x128xf32>
    %2497 = arith.addf %2495, %2496 : vector<8x128xf32>
    %cst_624 = arith.constant 1.000000e+00 : f32
    %2498 = vector.broadcast %cst_624 : f32 to vector<8x128xf32>
    %2499 = arith.maximumf %2498, %2497 : vector<8x128xf32>
    %2500 = arith.cmpf olt, %2499, %2490 : vector<8x128xf32>
    %c3_i32_625 = arith.constant 3 : i32
    %2501 = vector.broadcast %c3_i32_625 : i32 to vector<8x128xi32>
    %2502 = arith.select %2500, %2501, %2489 : vector<8x128xi1>, vector<8x128xi32>
    %2503 = arith.select %2500, %2499, %2490 : vector<8x128xi1>, vector<8x128xf32>
    %2504 = math.sqrt %2503 : vector<8x128xf32>
    %2505 = arith.divf %2454, %2504 : vector<8x128xf32>
    %2506 = arith.mulf %2450, %2505 : vector<8x128xf32>
    %2507 = arith.mulf %2444, %2505 : vector<8x128xf32>
    %c0_i32_626 = arith.constant 0 : i32
    %2508 = vector.broadcast %c0_i32_626 : i32 to vector<8x128xi32>
    %2509 = arith.cmpi eq, %2502, %2508 : vector<8x128xi32>
    %cst_627 = arith.constant 0.000000e+00 : f32
    %2510 = vector.broadcast %cst_627 : f32 to vector<8x128xf32>
    %2511 = arith.select %2509, %2506, %2510 : vector<8x128xi1>, vector<8x128xf32>
    %2512 = arith.addf %2410, %2511 : vector<8x128xf32>
    %cst_628 = arith.constant 0.000000e+00 : f32
    %2513 = vector.broadcast %cst_628 : f32 to vector<8x128xf32>
    %2514 = arith.select %2509, %2507, %2513 : vector<8x128xi1>, vector<8x128xf32>
    %2515 = arith.addf %2413, %2514 : vector<8x128xf32>
    %c1_i32_629 = arith.constant 1 : i32
    %2516 = vector.broadcast %c1_i32_629 : i32 to vector<8x128xi32>
    %2517 = arith.cmpi eq, %2502, %2516 : vector<8x128xi32>
    %cst_630 = arith.constant 0.000000e+00 : f32
    %2518 = vector.broadcast %cst_630 : f32 to vector<8x128xf32>
    %2519 = arith.select %2517, %2506, %2518 : vector<8x128xi1>, vector<8x128xf32>
    %2520 = arith.addf %2418, %2519 : vector<8x128xf32>
    %cst_631 = arith.constant 0.000000e+00 : f32
    %2521 = vector.broadcast %cst_631 : f32 to vector<8x128xf32>
    %2522 = arith.select %2517, %2507, %2521 : vector<8x128xi1>, vector<8x128xf32>
    %2523 = arith.addf %2421, %2522 : vector<8x128xf32>
    %c2_i32_632 = arith.constant 2 : i32
    %2524 = vector.broadcast %c2_i32_632 : i32 to vector<8x128xi32>
    %2525 = arith.cmpi eq, %2502, %2524 : vector<8x128xi32>
    %cst_633 = arith.constant 0.000000e+00 : f32
    %2526 = vector.broadcast %cst_633 : f32 to vector<8x128xf32>
    %2527 = arith.select %2525, %2506, %2526 : vector<8x128xi1>, vector<8x128xf32>
    %2528 = arith.addf %2426, %2527 : vector<8x128xf32>
    %cst_634 = arith.constant 0.000000e+00 : f32
    %2529 = vector.broadcast %cst_634 : f32 to vector<8x128xf32>
    %2530 = arith.select %2525, %2507, %2529 : vector<8x128xi1>, vector<8x128xf32>
    %2531 = arith.addf %2429, %2530 : vector<8x128xf32>
    %c3_i32_635 = arith.constant 3 : i32
    %2532 = vector.broadcast %c3_i32_635 : i32 to vector<8x128xi32>
    %2533 = arith.cmpi eq, %2502, %2532 : vector<8x128xi32>
    %cst_636 = arith.constant 0.000000e+00 : f32
    %2534 = vector.broadcast %cst_636 : f32 to vector<8x128xf32>
    %2535 = arith.select %2533, %2506, %2534 : vector<8x128xi1>, vector<8x128xf32>
    %2536 = arith.addf %2434, %2535 : vector<8x128xf32>
    %cst_637 = arith.constant 0.000000e+00 : f32
    %2537 = vector.broadcast %cst_637 : f32 to vector<8x128xf32>
    %2538 = arith.select %2533, %2507, %2537 : vector<8x128xi1>, vector<8x128xf32>
    %2539 = arith.addf %2437, %2538 : vector<8x128xf32>
    %2540 = vector.broadcast %cst_437 : f32 to vector<8x128xf32>
    %2541 = arith.addf %2444, %2540 : vector<8x128xf32>
    %2542 = vector.broadcast %cst_438 : f32 to vector<8x128xf32>
    %2543 = arith.cmpf oge, %2541, %2542 : vector<8x128xf32>
    %2544 = vector.broadcast %cst_438 : f32 to vector<8x128xf32>
    %2545 = arith.subf %2541, %2544 : vector<8x128xf32>
    %2546 = arith.select %2543, %2545, %2541 : vector<8x128xi1>, vector<8x128xf32>
    %2547 = vector.broadcast %cst_439 : f32 to vector<8x128xf32>
    %2548 = arith.addf %2450, %2547 : vector<8x128xf32>
    %cst_638 = arith.constant 1.000000e+00 : f32
    %cst_639 = arith.constant 0.000000e+00 : f32
    %2549 = vector.broadcast %cst_638 : f32 to vector<8x128xf32>
    %2550 = vector.broadcast %cst_639 : f32 to vector<8x128xf32>
    %2551 = arith.select %2543, %2549, %2550 : vector<8x128xi1>, vector<8x128xf32>
    %2552 = arith.addf %2548, %2551 : vector<8x128xf32>
    %c8_i32_640 = arith.constant 8 : i32
    %2553 = vector.shape_cast %2512 : vector<8x128xf32> to vector<1x8x128xf32>
    %cst_641 = arith.constant dense<0.000000e+00> : vector<1xf32>
    %2554 = vector.multi_reduction <add>, %2553, %cst_641 [1, 2] : vector<1x8x128xf32> to vector<1xf32>
    %2555 = vector.shape_cast %2554 : vector<1xf32> to vector<1x1x1xf32>
    %2556 = vector.extract %2555[0, 0, 0] : f32 from vector<1x1x1xf32>
    %2557 = vector.shape_cast %2520 : vector<8x128xf32> to vector<1x8x128xf32>
    %cst_642 = arith.constant dense<0.000000e+00> : vector<1xf32>
    %2558 = vector.multi_reduction <add>, %2557, %cst_642 [1, 2] : vector<1x8x128xf32> to vector<1xf32>
    %2559 = vector.shape_cast %2558 : vector<1xf32> to vector<1x1x1xf32>
    %2560 = vector.extract %2559[0, 0, 0] : f32 from vector<1x1x1xf32>
    %2561 = vector.shape_cast %2528 : vector<8x128xf32> to vector<1x8x128xf32>
    %cst_643 = arith.constant dense<0.000000e+00> : vector<1xf32>
    %2562 = vector.multi_reduction <add>, %2561, %cst_643 [1, 2] : vector<1x8x128xf32> to vector<1xf32>
    %2563 = vector.shape_cast %2562 : vector<1xf32> to vector<1x1x1xf32>
    %2564 = vector.extract %2563[0, 0, 0] : f32 from vector<1x1x1xf32>
    %2565 = vector.shape_cast %2536 : vector<8x128xf32> to vector<1x8x128xf32>
    %cst_644 = arith.constant dense<0.000000e+00> : vector<1xf32>
    %2566 = vector.multi_reduction <add>, %2565, %cst_644 [1, 2] : vector<1x8x128xf32> to vector<1xf32>
    %2567 = vector.shape_cast %2566 : vector<1xf32> to vector<1x1x1xf32>
    %2568 = vector.extract %2567[0, 0, 0] : f32 from vector<1x1x1xf32>
    %2569 = vector.shape_cast %2515 : vector<8x128xf32> to vector<1x8x128xf32>
    %cst_645 = arith.constant dense<0.000000e+00> : vector<1xf32>
    %2570 = vector.multi_reduction <add>, %2569, %cst_645 [1, 2] : vector<1x8x128xf32> to vector<1xf32>
    %2571 = vector.shape_cast %2570 : vector<1xf32> to vector<1x1x1xf32>
    %2572 = vector.extract %2571[0, 0, 0] : f32 from vector<1x1x1xf32>
    %2573 = vector.shape_cast %2523 : vector<8x128xf32> to vector<1x8x128xf32>
    %cst_646 = arith.constant dense<0.000000e+00> : vector<1xf32>
    %2574 = vector.multi_reduction <add>, %2573, %cst_646 [1, 2] : vector<1x8x128xf32> to vector<1xf32>
    %2575 = vector.shape_cast %2574 : vector<1xf32> to vector<1x1x1xf32>
    %2576 = vector.extract %2575[0, 0, 0] : f32 from vector<1x1x1xf32>
    %2577 = vector.shape_cast %2531 : vector<8x128xf32> to vector<1x8x128xf32>
    %cst_647 = arith.constant dense<0.000000e+00> : vector<1xf32>
    %2578 = vector.multi_reduction <add>, %2577, %cst_647 [1, 2] : vector<1x8x128xf32> to vector<1xf32>
    %2579 = vector.shape_cast %2578 : vector<1xf32> to vector<1x1x1xf32>
    %2580 = vector.extract %2579[0, 0, 0] : f32 from vector<1x1x1xf32>
    %2581 = vector.shape_cast %2539 : vector<8x128xf32> to vector<1x8x128xf32>
    %cst_648 = arith.constant dense<0.000000e+00> : vector<1xf32>
    %2582 = vector.multi_reduction <add>, %2581, %cst_648 [1, 2] : vector<1x8x128xf32> to vector<1xf32>
    %2583 = vector.shape_cast %2582 : vector<1xf32> to vector<1x1x1xf32>
    %2584 = vector.extract %2583[0, 0, 0] : f32 from vector<1x1x1xf32>
    %c0_649 = arith.constant 0 : index
    %c0_650 = arith.constant 0 : index
    %2585 = memref.load %arg2[%c0_649, %c0_650] : memref<4x2xf32, #tpu.memory_space<smem>>
    memref.store %2556, %arg2[%c0_649, %c0_650] : memref<4x2xf32, #tpu.memory_space<smem>>
    %c0_651 = arith.constant 0 : index
    %c1_652 = arith.constant 1 : index
    %2586 = memref.load %arg2[%c0_651, %c1_652] : memref<4x2xf32, #tpu.memory_space<smem>>
    memref.store %2572, %arg2[%c0_651, %c1_652] : memref<4x2xf32, #tpu.memory_space<smem>>
    %c1_653 = arith.constant 1 : index
    %c0_654 = arith.constant 0 : index
    %2587 = memref.load %arg2[%c1_653, %c0_654] : memref<4x2xf32, #tpu.memory_space<smem>>
    memref.store %2560, %arg2[%c1_653, %c0_654] : memref<4x2xf32, #tpu.memory_space<smem>>
    %c1_655 = arith.constant 1 : index
    %c1_656 = arith.constant 1 : index
    %2588 = memref.load %arg2[%c1_655, %c1_656] : memref<4x2xf32, #tpu.memory_space<smem>>
    memref.store %2576, %arg2[%c1_655, %c1_656] : memref<4x2xf32, #tpu.memory_space<smem>>
    %c2_657 = arith.constant 2 : index
    %c0_658 = arith.constant 0 : index
    %2589 = memref.load %arg2[%c2_657, %c0_658] : memref<4x2xf32, #tpu.memory_space<smem>>
    memref.store %2564, %arg2[%c2_657, %c0_658] : memref<4x2xf32, #tpu.memory_space<smem>>
    %c2_659 = arith.constant 2 : index
    %c1_660 = arith.constant 1 : index
    %2590 = memref.load %arg2[%c2_659, %c1_660] : memref<4x2xf32, #tpu.memory_space<smem>>
    memref.store %2580, %arg2[%c2_659, %c1_660] : memref<4x2xf32, #tpu.memory_space<smem>>
    %c3_661 = arith.constant 3 : index
    %c0_662 = arith.constant 0 : index
    %2591 = memref.load %arg2[%c3_661, %c0_662] : memref<4x2xf32, #tpu.memory_space<smem>>
    memref.store %2568, %arg2[%c3_661, %c0_662] : memref<4x2xf32, #tpu.memory_space<smem>>
    %c3_663 = arith.constant 3 : index
    %c1_664 = arith.constant 1 : index
    %2592 = memref.load %arg2[%c3_663, %c1_664] : memref<4x2xf32, #tpu.memory_space<smem>>
    memref.store %2584, %arg2[%c3_663, %c1_664] : memref<4x2xf32, #tpu.memory_space<smem>>
    return
  }
}

</mosaic_0001>

<bundles_post_ra>
// kernel: tpu_custom_call.1
= control target key start
LH: loop header
LB: loop body
LE: loop exit
PB: predicated region body
PF: predicated region fallthrough
CT: control target
= control target key end

     0   :  { %7 = vsyncpa [#allocation4], 0  ;;  %s4480_s0 = inlined_call_operand.vmem [shape: f32[4,2], index: 0, kind: input, shape index: {}]   ;;  %s4481_s1 = inlined_call_operand.hbm [shape: f32[64,128], index: 1, kind: input, shape index: {}]   ;;  %s4482_s2 = inlined_call_operand.vmem [shape: f32[4,2], index: 2, kind: output, shape index: {}]  }
   0x1   :  { %8 = vsyncpa [#allocation3], 0 }
   0x2   :  { %9 = vsyncpa [#allocation5], 0  ;;  %s16_s11 = sshll.u32 %s4480_s0, 4  ;;  %s17_s11 = int_to_ptr.vmem [resolvable:$true] %s16_s11 }
   0x3   :  { %s2124_s12 = scalar_lea.vmem %s17_s11, 64  ;;  %p2129_p1 = scmp.lt.s32.totalorder %s17_s11, %s17_s11 }
   0x4   :  { %p2125_p0 = scmp.ne.s32.totalorder %s17_s11, %s2124_s12  ;;  %p2130_p2 = scmp.lt.s32.totalorder %s2124_s12, %s2124_s12 }
   0x6   :  { %p2131_p3 = por %p2130_p2, %p2129_p1 }
   0x8   :  { %p2132_p4 = pnand %p2131_p3, %p2125_p0 }
   0xa   :  { %2135 = shalt.err (!%p2132_p4)
}
   0xb   :  { %s2176_s13 = smov [#allocation2]   ;;  %s2177_s14 = smov [#allocation6]  }
   0xc   :  { %19 = dma.vmem_to_smem %s17_s11, 64, %s2176_s13, [#allocation4]  }
   0xd   :  { %s25_s15 = sshll.u32 %s2177_s14, 4  ;;  %s2136_s18 = scalar_lea.hbm %s4481_s1, 1024  ;;  %s26_s15 = int_to_ptr.vmem [resolvable:$true] %s25_s15 }
   0xe   :  { %p2137_p5 = scmp.ne.s32.totalorder %s4481_s1, %s2136_s18  ;;  %p2140_p6 = scmp.lt.u32.totalorder %s2136_s18, %s4481_s1 }
  0x10   :  { %p2142_p7 = pnand %p2140_p6, %p2137_p5 }
  0x12   :  { %2145 = shalt.err (!%p2142_p7)
}
  0x13   :  { %s2146_s22 = scalar_lea.vmem %s26_s15, 1024  ;;  %p2151_p9 = scmp.lt.s32.totalorder %s26_s15, %s26_s15 }
  0x14   :  { %p2147_p8 = scmp.ne.s32.totalorder %s26_s15, %s2146_s22  ;;  %p2152_p10 = scmp.lt.s32.totalorder %s2146_s22, %s2146_s22 }
  0x16   :  { %p2153_p11 = por %p2152_p10, %p2151_p9 }
  0x18   :  { %p2154_p12 = pnand %p2153_p11, %p2147_p8 }
  0x1a   :  { %2157 = shalt.err (!%p2154_p12)
}
  0x1b   :  { %s2178_s23 = smov 128   ;;  %s2179_s24 = smov 8  }
  0x1c   :  { %31 = dma.hbm_to_vmem [thread:$0]  %s4481_s1, 1024, %s26_s15, [#allocation3], %s2178_s23, %s2178_s23, %s2179_s24  }
  0x1d   :  { %2170 = dma.done.wait [#allocation4], 64  }
  0x1e   :  { %2171 = vsyncadd [#allocation4], 4294967232 }
  0x1f   :  { %2172 = dma.done.wait [#allocation3], 1024  }
  0x20   :  { %2173 = vsyncadd [#allocation3], 4294966272 }
  0x21   :  { %38 = sfence }
  0x22   :  { %v39_v0 = vlaneseq  ;;  %s60_s27 = sld [smem:[#allocation2]]  ;;  %s1946_s3 = sld [smem:[#allocation2 + $0x1]]  ;;  %v2180_v47 = vmov 0.0  }
  0x23   :  { %s1943_s28 = sld [smem:[#allocation2 + $0x80]]  ;;  %s1947_s4 = sld [smem:[#allocation2 + $0x81]] }
  0x24   :  { %v40_v1 = vshrl.u32 %v39_v0, 7  ;;  %v42_v2 = vand.u32 127, %v39_v0  ;;  %s1944_s29 = sld [smem:[#allocation2 + $0x100]]  ;;  %s1948_s1 = sld [smem:[#allocation2 + $0x101]] }
  0x25   :  { %s1945_s30 = sld [smem:[#allocation2 + $0x180]]  ;;  %s1949_s5 = sld [smem:[#allocation2 + $0x181]] }
  0x26   :  { %v43_v3 = vmul.u32 128, %v40_v1 }
  0x28   :  { %v44_v4 = vadd.s32 %v43_v3, %v42_v2  ;;  %v2213_v13 = vstv %s60_s27  ;;  %v2219_v18 = vstv %s1946_s3 }
  0x29   :  { %v2215_v14 = vstv %s1943_s28  ;;  %v2223_v21 = vstv %s1947_s4  ;;  %s1930_s28 = sshll.u32 %s4482_s2, 4  ;;  %s1931_s28 = int_to_ptr.vmem [resolvable:$true] %s1930_s28 }
  0x2a   :  { %v45_v5 = vcvt.s32.f32 %v44_v4  ;;  %v2217_v15 = vstv %s1944_s29  ;;  %v2225_v22 = vstv %s1948_s1  ;;  %s2158_s4 = scalar_lea.vmem %s1931_s28, 64  ;;  %p2163_p0 = scmp.lt.s32.totalorder %s1931_s28, %s1931_s28 }
  0x2b   :  { %v2221_v19 = vstv %s1945_s30  ;;  %v2229_v24 = vstv %s1949_s5  ;;  %p2159_p13 = scmp.ne.s32.totalorder %s1931_s28, %s2158_s4  ;;  %p2164_p1 = scmp.lt.s32.totalorder %s2158_s4, %s2158_s4 }
  0x2c   :  { %v46_v6 = vmul.f32 0.0625, %v45_v5 }
  0x2d   :  { %p2165_p2 = por %p2164_p1, %p2163_p0 }
  0x2e   :  { %v47_v7 = vfloor.f32 %v46_v6 }
  0x2f   :  { %p2166_p3 = pnand %p2165_p2, %p2159_p13 }
  0x30   :  { %v48_v8 = vmul.f32 16.0, %v47_v7  ;;  %v51_v9 = vadd.f32 1.0, %v47_v7 }
  0x32   :  { %v49_v10 = vsub.f32 %v45_v5, %v48_v8 }
  0x34   :  { %vm50_vm0 = vcmp.ge.f32.partialorder %v49_v10, 16.0  ;;  %v1941_v11 = vadd.f32 -16.0, %v49_v10 }
  0x35   :  { %v52_v12 = vsel %vm50_vm0, %v51_v9, %v47_v7 }
  0x36   :  { %v54_v16 = vsel %vm50_vm0, %v1941_v11, %v49_v10  ;;  %v1942_v17 = vadd.f32 -1.0, %v52_v12 }
  0x37   :  { %vm55_vm1 = vcmp.lt.f32.partialorder %v54_v16, 0.0  ;;  %v58_v20 = vadd.f32 16.0, %v54_v16 }
  0x38   :  { %v2227_v23 = vsel %vm55_vm1, %v1942_v17, %v52_v12 }
  0x39   :  { %4547 = vst [vmem:[#allocation11_spill] sm:$0xff] %v2227_v23  ;;  %v2231_v25 = vsel %vm55_vm1, %v58_v20, %v54_v16  ;;  %v70_v26 = vsub.f32 %v2213_v13, %v2227_v23  ;;  %v78_v27 = vsub.f32 %v2215_v14, %v2227_v23  ;;  %v89_v28 = vsub.f32 %v2217_v15, %v2227_v23 }
  0x3a   :  { %4548 = vst [vmem:[#allocation12_spill] sm:$0xff] %v2231_v25  ;;  %v72_v29 = vsub.f32 %v2219_v18, %v2231_v25  ;;  %v80_v30 = vsub.f32 %v2223_v21, %v2231_v25  ;;  %v91_v31 = vsub.f32 %v2225_v22, %v2231_v25  ;;  %v100_v32 = vsub.f32 %v2221_v19, %v2227_v23 }
  0x3b   :  { %v73_v33 = vmul.f32 %v70_v26, %v70_v26  ;;  %v81_v34 = vmul.f32 %v78_v27, %v78_v27  ;;  %v92_v35 = vmul.f32 %v89_v28, %v89_v28  ;;  %v102_v36 = vsub.f32 %v2229_v24, %v2231_v25 }
  0x3c   :  { %v74_v37 = vmul.f32 %v72_v29, %v72_v29  ;;  %v82_v38 = vmul.f32 %v80_v30, %v80_v30  ;;  %v93_v39 = vmul.f32 %v91_v31, %v91_v31  ;;  %v103_v40 = vmul.f32 %v100_v32, %v100_v32 }
  0x3d   :  { %v104_v41 = vmul.f32 %v102_v36, %v102_v36  ;;  %vm142_vm2 = vcmp.ge.f32.partialorder %v2231_v25, 16.0  ;;  %v1950_v42 = vadd.f32 -16.0, %v2231_v25  ;;  %v145_v43 = vadd.f32 64.0, %v2227_v23 }
  0x3e   :  { %v75_v44 = vadd.f32 %v74_v37, %v73_v33  ;;  %v83_v45 = vadd.f32 %v82_v38, %v81_v34  ;;  %v94_v46 = vadd.f32 %v93_v39, %v92_v35  ;;  %v146_v48 = vsel %vm142_vm2, 1.0, %v2180_v47 }
  0x3f   :  { %v105_v49 = vadd.f32 %v104_v41, %v103_v40  ;;  %v2254_v50 = vsel %vm142_vm2, %v1950_v42, %v2231_v25  ;;  %v2256_v51 = vadd.f32 %v146_v48, %v145_v43 }
  0x40   :  { %4549 = vst [vmem:[#allocation13_spill] sm:$0xff] %v2254_v50  ;;  %v76_v52 = vmax.f32 %v75_v44, 1.0  ;;  %v84_v53 = vmax.f32 %v83_v45, 1.0  ;;  %v95_v54 = vmax.f32 %v94_v46, 1.0  ;;  %v151_v55 = vsub.f32 %v2219_v18, %v2254_v50 }
  0x41   :  { %4550 = vst [vmem:[#allocation14_spill] sm:$0xff] %v2256_v51  ;;  %v106_v56 = vmax.f32 %v105_v49, 1.0  ;;  %v150_v57 = vsub.f32 %v2213_v13, %v2256_v51  ;;  %v156_v58 = vsub.f32 %v2215_v14, %v2256_v51  ;;  %v157_v59 = vsub.f32 %v2223_v21, %v2254_v50 }
  0x42   :  { %vm2266_vm3 = vcmp.lt.f32.partialorder %v84_v53, %v76_v52  ;;  %v153_v61 = vmul.f32 %v151_v55, %v151_v55  ;;  %v165_v62 = vsub.f32 %v2217_v15, %v2256_v51  ;;  %v166_v63 = vsub.f32 %v2225_v22, %v2254_v50 }
  0x43   :  { %v87_v0 = vsel %vm2266_vm3, %v84_v53, %v76_v52  ;;  %v152_v1 = vmul.f32 %v150_v57, %v150_v57  ;;  %v158_v2 = vmul.f32 %v156_v58, %v156_v58  ;;  %v159_v4 = vmul.f32 %v157_v59, %v157_v59 }
  0x44   :  { %vm2276_vm4 = vcmp.lt.f32.partialorder %v95_v54, %v87_v0  ;;  %v167_v5 = vmul.f32 %v165_v62, %v165_v62  ;;  %v168_v6 = vmul.f32 %v166_v63, %v166_v63  ;;  %v174_v9 = vsub.f32 %v2221_v19, %v2256_v51 }
  0x45   :  { %v98_v7 = vsel %vm2276_vm4, %v95_v54, %v87_v0  ;;  %v154_v8 = vadd.f32 %v153_v61, %v152_v1  ;;  %v160_v11 = vadd.f32 %v159_v4, %v158_v2  ;;  %v175_v16 = vsub.f32 %v2229_v24, %v2254_v50 }
  0x46   :  { %vm2284_vm5 = vcmp.lt.f32.partialorder %v106_v56, %v98_v7  ;;  %v169_v12 = vadd.f32 %v168_v6, %v167_v5  ;;  %v176_v26 = vmul.f32 %v174_v9, %v174_v9  ;;  %vm215_vm6 = vcmp.ge.f32.partialorder %v2254_v50, 16.0 }
  0x47   :  { %v109_v17 = vsel %vm2284_vm5, %v106_v56, %v98_v7  ;;  %v155_v20 = vmax.f32 %v154_v8, 1.0  ;;  %v161_v27 = vmax.f32 %v160_v11, 1.0  ;;  %v177_v29 = vmul.f32 %v175_v16, %v175_v16 }
  0x48   :  { %2012 = vrsqrt.f32 %v109_v17  ;;  %v170_v28 = vmax.f32 %v169_v12, 1.0  ;;  %v1951_v30 = vadd.f32 -16.0, %v2254_v50  ;;  %v218_v31 = vadd.f32 64.0, %v2256_v51 }
  0x49   :  { %vm2295_vm7 = vcmp.lt.f32.partialorder %v161_v27, %v155_v20  ;;  %v178_v33 = vadd.f32 %v177_v29, %v176_v26  ;;  %v219_v34 = vsel %vm215_vm6, 1.0, %v2180_v47  ;;  %v4496_v55 = vmov 0  }
  0x4a   :  { %v164_v35 = vsel %vm2295_vm7, %v161_v27, %v155_v20  ;;  %v2303_v36 = vsel %vm215_vm6, %v1951_v30, %v2254_v50  ;;  %v2305_v37 = vadd.f32 %v219_v34, %v218_v31  ;;  %v86_v56 = vsel %vm2266_vm3, 1, %v4496_v55 }
  0x4b   :  { %4559 = vst [vmem:[#allocation15_spill] sm:$0xff] %v2303_v36  ;;  %vm2307_vm8 = vcmp.lt.f32.partialorder %v170_v28, %v164_v35  ;;  %v179_v39 = vmax.f32 %v178_v33, 1.0  ;;  %v224_v40 = vsub.f32 %v2219_v18, %v2303_v36  ;;  %v230_v41 = vsub.f32 %v2223_v21, %v2303_v36 }
  0x4c   :  { %4560 = vst [vmem:[#allocation16_spill] sm:$0xff] %v2305_v37  ;;  %v173_v42 = vsel %vm2307_vm8, %v170_v28, %v164_v35  ;;  %v223_v43 = vsub.f32 %v2213_v13, %v2305_v37  ;;  %v229_v44 = vsub.f32 %v2215_v14, %v2305_v37  ;;  %v238_v49 = vsub.f32 %v2217_v15, %v2305_v37 }
  0x4d   :  { %vm2321_vm9 = vcmp.lt.f32.partialorder %v179_v39, %v173_v42  ;;  %v226_v46 = vmul.f32 %v224_v40, %v224_v40  ;;  %v232_v48 = vmul.f32 %v230_v41, %v230_v41  ;;  %vm112_vm10 = vcmp.eq.f32.partialorder %v109_v17, inf }
  0x4e   :  { %v2329_v52 = vsel %vm2321_vm9, %v179_v39, %v173_v42  ;;  %v225_v53 = vmul.f32 %v223_v43, %v223_v43  ;;  %v231_v54 = vmul.f32 %v229_v44, %v229_v44  ;;  %vm114_vm11 = vcmp.eq.f32.partialorder %v109_v17, 0.0 }
  0x4f   :  { %2014 = vrsqrt.f32 %v2329_v52  ;;  %v115_v58 = vand.u32 2147483648, %v109_v17  ;;  %v239_v62 = vsub.f32 %v2225_v22, %v2303_v36  ;;  %v240_v0 = vmul.f32 %v238_v49, %v238_v49 }
  0x50   :  { %v227_v59 = vadd.f32 %v226_v46, %v225_v53  ;;  %v233_v61 = vadd.f32 %v232_v48, %v231_v54  ;;  %v247_v1 = vsub.f32 %v2221_v19, %v2305_v37  ;;  %v248_v60 = vsub.f32 %v2229_v24, %v2303_v36 }
  0x51   :  { %v241_v5 = vmul.f32 %v239_v62, %v239_v62  ;;  %vm288_vm12 = vcmp.ge.f32.partialorder %v2303_v36, 16.0  ;;  %v1952_v9 = vadd.f32 -16.0, %v2303_v36  ;;  %v291_v20 = vadd.f32 64.0, %v2305_v37 }
  0x52   :  { %v2013_v57 = vpop.eup %2012  ;;  %v228_v2 = vmax.f32 %v227_v59, 1.0  ;;  %v234_v4 = vmax.f32 %v233_v61, 1.0  ;;  %v249_v7 = vmul.f32 %v247_v1, %v247_v1  ;;  %v250_v8 = vmul.f32 %v248_v60, %v248_v60 }
  0x53   :  { %v111_v63 = vmul.f32 %v2013_v57, %v109_v17  ;;  %v242_v16 = vadd.f32 %v241_v5, %v240_v0  ;;  %v97_v26 = vsel %vm2276_vm4, 2, %v86_v56  ;;  %v163_v29 = vsel %vm2295_vm7, 1, %v4496_v55 }
  0x54   :  { %vm2345_vm13 = vcmp.lt.f32.partialorder %v234_v4, %v228_v2  ;;  %v251_v28 = vadd.f32 %v250_v8, %v249_v7  ;;  %v2358_v30 = vsel %vm288_vm12, %v1952_v9, %v2303_v36  ;;  %v292_v31 = vsel %vm288_vm12, 1.0, %v2180_v47 }
  0x55   :  { %v113_v6 = vsel %vm112_vm10, %v109_v17, %v111_v63  ;;  %v237_v27 = vsel %vm2345_vm13, %v234_v4, %v228_v2  ;;  %v243_v17 = vmax.f32 %v242_v16, 1.0  ;;  %v2361_v34 = vadd.f32 %v292_v31, %v291_v20 }
  0x56   :  { %v116_v11 = vsel %vm114_vm11, %v115_v58, %v113_v6  ;;  %v252_v33 = vmax.f32 %v251_v28, 1.0  ;;  %v297_v3 = vsub.f32 %v2219_v18, %v2358_v30  ;;  %vm185_vm14 = vcmp.eq.f32.partialorder %v2329_v52, inf }
  0x57   :  { %2016 = vrcp.f32 %v116_v11  ;;  %4567 = vst [vmem:[#allocation17_spill] sm:$0xff] %v2361_v34  ;;  %vm187_vm15 = vcmp.eq.f32.partialorder %v2329_v52, 0.0  ;;  %vm2367_vm0 = vcmp.lt.f32.partialorder %v243_v17, %v237_v27  ;;  %v303_v35 = vsub.f32 %v2223_v21, %v2358_v30  ;;  %v68_v11 = vld [vmem:[#allocation6] sm:$0xff] }
  0x58   :  { %v188_v40 = vand.u32 2147483648, %v2329_v52  ;;  %v246_v41 = vsel %vm2367_vm0, %v243_v17, %v237_v27  ;;  %v296_v42 = vsub.f32 %v2213_v13, %v2361_v34  ;;  %v299_v43 = vmul.f32 %v297_v3, %v297_v3 }
  0x59   :  { %v2015_v39 = vpop.eup %2014  ;;  %vm2379_vm1 = vcmp.lt.f32.partialorder %v252_v33, %v246_v41  ;;  %v302_v48 = vsub.f32 %v2215_v14, %v2361_v34  ;;  %v312_v49 = vsub.f32 %v2225_v22, %v2358_v30  ;;  %v311_v56 = vsub.f32 %v2217_v15, %v2361_v34 }
  0x5a   :  { %v184_v44 = vmul.f32 %v2015_v39, %v2329_v52  ;;  %v2389_v53 = vsel %vm2379_vm1, %v252_v33, %v246_v41  ;;  %v298_v54 = vmul.f32 %v296_v42, %v296_v42  ;;  %v321_v57 = vsub.f32 %v2229_v24, %v2358_v30 }
  0x5b   :  { %v172_v58 = vsel %vm2307_vm8, 2, %v163_v29  ;;  %2018 = vrsqrt.f32 %v2389_v53  ;;  %v305_v61 = vmul.f32 %v303_v35, %v303_v35  ;;  %v2403_v62 = vsel %vm2284_vm5, 3, %v97_v26 }
  0x5c   :  { %v186_v59 = vsel %vm185_vm14, %v2329_v52, %v184_v44  ;;  %v300_v0 = vadd.f32 %v299_v43, %v298_v54  ;;  %vm361_vm2 = vcmp.ge.f32.partialorder %v2358_v30, 16.0  ;;  %v304_v38 = vmul.f32 %v302_v48, %v302_v48 }
  0x5d   :  { %v189_v63 = vsel %vm187_vm15, %v188_v40, %v186_v59  ;;  %v313_v1 = vmul.f32 %v311_v56, %v311_v56  ;;  %v314_v60 = vmul.f32 %v312_v49, %v312_v49  ;;  %v2410_v2 = vsel %vm2321_vm9, 3, %v172_v58 }
  0x5e   :  { %2020 = vrcp.f32 %v189_v63  ;;  %v320_v4 = vsub.f32 %v2221_v19, %v2361_v34  ;;  %v323_v10 = vmul.f32 %v321_v57, %v321_v57  ;;  %v1953_v5 = vadd.f32 -16.0, %v2358_v30 }
  0x5f   :  { %v301_v6 = vmax.f32 %v300_v0, 1.0  ;;  %v306_v52 = vadd.f32 %v305_v61, %v304_v38  ;;  %v315_v7 = vadd.f32 %v314_v60, %v313_v1  ;;  %v364_v8 = vadd.f32 64.0, %v2361_v34  ;;  %v149_v0 = vld [vmem:[#allocation6 + $0x8] sm:$0xff] }
  0x60   :  { %v236_v16 = vsel %vm2345_vm13, 1, %v4496_v55  ;;  %vm258_vm3 = vcmp.eq.f32.partialorder %v2389_v53, inf  ;;  %v322_v45 = vmul.f32 %v320_v4, %v320_v4  ;;  %v365_v20 = vsel %vm361_vm2, 1.0, %v2180_v47 }
  0x61   :  { %v2017_v9 = vpop.eup %2016  ;;  %v307_v26 = vmax.f32 %v306_v52, 1.0  ;;  %v316_v27 = vmax.f32 %v315_v7, 1.0  ;;  %v2426_v28 = vsel %vm361_vm2, %v1953_v5, %v2358_v30  ;;  %v2428_v29 = vadd.f32 %v365_v20, %v364_v8 }
  0x62   :  { %v261_v17 = vand.u32 2147483648, %v2389_v53  ;;  %v324_v12 = vadd.f32 %v323_v10, %v322_v45  ;;  %v370_v31 = vsub.f32 %v2219_v18, %v2426_v28  ;;  %v376_v33 = vsub.f32 %v2223_v21, %v2426_v28 }
  0x63   :  { %4572 = vst [vmem:[#allocation18_spill] sm:$0xff] %v2428_v29  ;;  %v2435_v3 = vmul.f32 %v2017_v9, %v68_v11  ;;  %vm2437_vm4 = vcmp.lt.f32.partialorder %v307_v26, %v301_v6  ;;  %v369_v39 = vsub.f32 %v2213_v13, %v2428_v29  ;;  %v375_v40 = vsub.f32 %v2215_v14, %v2428_v29 }
  0x64   :  { %v310_v41 = vsel %vm2437_vm4, %v307_v26, %v301_v6  ;;  %v325_v42 = vmax.f32 %v324_v12, 1.0  ;;  %v372_v43 = vmul.f32 %v370_v31, %v370_v31  ;;  %v385_v44 = vsub.f32 %v2225_v22, %v2426_v28 }
  0x65   :  { %v2019_v48 = vpop.eup %2018  ;;  %vm2449_vm5 = vcmp.lt.f32.partialorder %v316_v27, %v310_v41  ;;  %v371_v54 = vmul.f32 %v369_v39, %v369_v39  ;;  %v377_v56 = vmul.f32 %v375_v40, %v375_v40  ;;  %v378_v57 = vmul.f32 %v376_v33, %v376_v33 }
  0x66   :  { %v245_v58 = vsel %vm2367_vm0, 2, %v236_v16  ;;  %v257_v59 = vmul.f32 %v2019_v48, %v2389_v53  ;;  %vm260_vm6 = vcmp.eq.f32.partialorder %v2389_v53, 0.0  ;;  %v319_v61 = vsel %vm2449_vm5, %v316_v27, %v310_v41 }
  0x67   :  { %vm2459_vm7 = vcmp.lt.f32.partialorder %v325_v42, %v319_v61  ;;  %v373_v1 = vadd.f32 %v372_v43, %v371_v54  ;;  %v379_v60 = vadd.f32 %v378_v57, %v377_v56  ;;  %v384_v4 = vsub.f32 %v2217_v15, %v2428_v29 }
  0x68   :  { %v2021_v63 = vpop.eup %2020  ;;  %v2467_v32 = vmul.f32 %v2435_v3, %v2227_v23  ;;  %vm4486_vm8 = vcmp.eq.s32.totalorder %v2403_v62, 2  ;;  %v259_v10 = vsel %vm258_vm3, %v2389_v53, %v257_v59  ;;  %v2475_v5 = vsel %vm2459_vm7, %v325_v42, %v319_v61 }
  0x69   :  { %vm4485_vm9 = vcmp.eq.s32.totalorder %v2410_v2, 2  ;;  %v262_v6 = vsel %vm260_vm6, %v261_v17, %v259_v10  ;;  %2022 = vrsqrt.f32 %v2475_v5  ;;  %v387_v52 = vmul.f32 %v385_v44, %v385_v44 }
  0x6a   :  { %v2479_v7 = vmul.f32 %v2021_v63, %v149_v0  ;;  %v2483_v8 = vsel %vm2379_vm1, 3, %v245_v58  ;;  %2024 = vrcp.f32 %v262_v6  ;;  %v309_v53 = vsel %vm2437_vm4, 1, %v4496_v55 }
  0x6b   :  { %v374_v9 = vmax.f32 %v373_v1, 1.0  ;;  %v380_v11 = vmax.f32 %v379_v60, 1.0  ;;  %v386_v16 = vmul.f32 %v384_v4, %v384_v4  ;;  %v393_v45 = vsub.f32 %v2221_v19, %v2428_v29  ;;  %v222_v1 = vld [vmem:[#allocation6 + $0x10] sm:$0xff] }
  0x6c   :  { %v132_v20 = vsel %vm4486_vm8, %v2467_v32, 0.0  ;;  %v394_v46 = vsub.f32 %v2229_v24, %v2426_v28  ;;  %vm434_vm10 = vcmp.ge.f32.partialorder %v2426_v28, 16.0  ;;  %v1954_v26 = vadd.f32 -16.0, %v2426_v28 }
  0x6d   :  { %v318_v27 = vsel %vm2449_vm5, 2, %v309_v53  ;;  %vm2499_vm11 = vcmp.lt.f32.partialorder %v380_v11, %v374_v9  ;;  %v388_v12 = vadd.f32 %v387_v52, %v386_v16  ;;  %v395_v31 = vmul.f32 %v393_v45, %v393_v45 }
  0x6e   :  { %v2505_v33 = vmul.f32 %v2479_v7, %v2256_v51  ;;  %v383_v35 = vsel %vm2499_vm11, %v380_v11, %v374_v9  ;;  %v396_v39 = vmul.f32 %v394_v46, %v394_v46  ;;  %v2510_v40 = vsel %vm434_vm10, %v1954_v26, %v2426_v28 }
  0x6f   :  { %v389_v41 = vmax.f32 %v388_v12, 1.0  ;;  %v437_v42 = vadd.f32 64.0, %v2428_v29  ;;  %v438_v43 = vsel %vm434_vm10, 1.0, %v2180_v47  ;;  %v443_v44 = vsub.f32 %v2219_v18, %v2510_v40 }
  0x70   :  { %v2518_v48 = vsel %vm2459_vm7, 3, %v318_v27  ;;  %vm331_vm12 = vcmp.eq.f32.partialorder %v2475_v5, inf  ;;  %vm333_vm13 = vcmp.eq.f32.partialorder %v2475_v5, 0.0  ;;  %v397_v49 = vadd.f32 %v396_v39, %v395_v31 }
  0x71   :  { %v334_v54 = vand.u32 2147483648, %v2475_v5  ;;  %vm2523_vm14 = vcmp.lt.f32.partialorder %v389_v41, %v383_v35  ;;  %v2527_v57 = vadd.f32 %v438_v43, %v437_v42  ;;  %v449_v58 = vsub.f32 %v2223_v21, %v2510_v40 }
  0x72   :  { %v205_v59 = vsel %vm4485_vm9, %v2505_v33, 0.0  ;;  %v392_v61 = vsel %vm2523_vm14, %v389_v41, %v383_v35  ;;  %v398_v63 = vmax.f32 %v397_v49, 1.0  ;;  %v458_v0 = vsub.f32 %v2225_v22, %v2510_v40 }
  0x73   :  { %4583 = vst [vmem:[#allocation19_spill] sm:$0xff] %v2527_v57  ;;  %v2023_v38 = vpop.eup %2022  ;;  %v2541_v60 = vsel %vm2499_vm11, 1, %v4496_v55  ;;  %v442_v4 = vsub.f32 %v2213_v13, %v2527_v57  ;;  %v445_v10 = vmul.f32 %v443_v44, %v443_v44  ;;  %v467_v6 = vsub.f32 %v2229_v24, %v2510_v40 }
  0x74   :  { %v2025_v52 = vpop.eup %2024  ;;  %v330_v53 = vmul.f32 %v2023_v38, %v2475_v5  ;;  %vm2548_vm15 = vcmp.lt.f32.partialorder %v398_v63, %v392_v61  ;;  %v448_v11 = vsub.f32 %v2215_v14, %v2527_v57  ;;  %v457_v16 = vsub.f32 %v2217_v15, %v2527_v57 }
  0x75   :  { %vm4484_vm0 = vcmp.eq.s32.totalorder %v2483_v8, 2  ;;  %v401_v45 = vsel %vm2548_vm15, %v398_v63, %v392_v61  ;;  %v444_v46 = vmul.f32 %v442_v4, %v442_v4  ;;  %v451_v26 = vmul.f32 %v449_v58, %v449_v58 }
  0x76   :  { %v466_v27 = vsub.f32 %v2221_v19, %v2527_v57  ;;  %v2561_v17 = vmul.f32 %v2025_v52, %v222_v1  ;;  %v332_v12 = vsel %vm331_vm12, %v2475_v5, %v330_v53  ;;  %2026 = vrsqrt.f32 %v401_v45 }
  0x77   :  { %v460_v31 = vmul.f32 %v458_v0, %v458_v0  ;;  %v206_v35 = vadd.f32 %v205_v59, %v132_v20  ;;  %v391_v39 = vsel %vm2523_vm14, 2, %v2541_v60  ;;  %v469_v41 = vmul.f32 %v467_v6, %v467_v6 }
  0x78   :  { %vm507_vm1 = vcmp.ge.f32.partialorder %v2510_v40, 16.0  ;;  %v335_v42 = vsel %vm333_vm13, %v334_v54, %v332_v12  ;;  %v446_v43 = vadd.f32 %v445_v10, %v444_v46  ;;  %v450_v44 = vmul.f32 %v448_v11, %v448_v11 }
  0x79   :  { %v459_v49 = vmul.f32 %v457_v16, %v457_v16  ;;  %vm404_vm2 = vcmp.eq.f32.partialorder %v401_v45, inf  ;;  %v468_v58 = vmul.f32 %v466_v27, %v466_v27  ;;  %v1955_v61 = vadd.f32 -16.0, %v2510_v40 }
  0x7a   :  { %v510_v63 = vadd.f32 64.0, %v2527_v57  ;;  %v2576_v20 = vmul.f32 %v2561_v17, %v2305_v37  ;;  %v447_v56 = vmax.f32 %v446_v43, 1.0  ;;  %v452_v59 = vadd.f32 %v451_v26, %v450_v44 }
  0x7b   :  { %v461_v0 = vadd.f32 %v460_v31, %v459_v49  ;;  %2028 = vrcp.f32 %v335_v42  ;;  %v470_v38 = vadd.f32 %v469_v41, %v468_v58  ;;  %v2581_v5 = vsel %vm507_vm1, %v1955_v61, %v2510_v40 }
  0x7c   :  { %v511_v54 = vsel %vm507_vm1, 1.0, %v2180_v47  ;;  %v453_v1 = vmax.f32 %v452_v59, 1.0  ;;  %v516_v10 = vsub.f32 %v2219_v18, %v2581_v5  ;;  %vm406_vm3 = vcmp.eq.f32.partialorder %v401_v45, 0.0 }
  0x7d   :  { %v462_v60 = vmax.f32 %v461_v0, 1.0  ;;  %v2586_v4 = vadd.f32 %v511_v54, %v510_v63  ;;  %v471_v6 = vmax.f32 %v470_v38, 1.0  ;;  %v522_v52 = vsub.f32 %v2223_v21, %v2581_v5 }
  0x7e   :  { %v531_v53 = vsub.f32 %v2225_v22, %v2581_v5  ;;  %vm2594_vm4 = vcmp.lt.f32.partialorder %v453_v1, %v447_v56  ;;  %v518_v46 = vmul.f32 %v516_v10, %v516_v10  ;;  %v407_v27 = vand.u32 2147483648, %v401_v45 }
  0x7f   :  { %v515_v16 = vsub.f32 %v2213_v13, %v2586_v4  ;;  %v521_v26 = vsub.f32 %v2215_v14, %v2586_v4  ;;  %v456_v12 = vsel %vm2594_vm4, %v453_v1, %v447_v56  ;;  %v524_v31 = vmul.f32 %v522_v52, %v522_v52 }
  0x80   :  { %v530_v41 = vsub.f32 %v2217_v15, %v2586_v4  ;;  %v2027_v42 = vpop.eup %2026  ;;  %v278_v43 = vsel %vm4484_vm0, %v2576_v20, 0.0  ;;  %vm2609_vm5 = vcmp.lt.f32.partialorder %v462_v60, %v456_v12  ;;  %v533_v59 = vmul.f32 %v531_v53, %v531_v53 }
  0x81   :  { %v517_v49 = vmul.f32 %v515_v16, %v515_v16  ;;  %v523_v58 = vmul.f32 %v521_v26, %v521_v26  ;;  %v403_v61 = vmul.f32 %v2027_v42, %v401_v45  ;;  %v465_v63 = vsel %vm2609_vm5, %v462_v60, %v456_v12 }
  0x82   :  { %v532_v56 = vmul.f32 %v530_v41, %v530_v41  ;;  %vm2615_vm6 = vcmp.lt.f32.partialorder %v471_v6, %v465_v63  ;;  %v539_v1 = vsub.f32 %v2221_v19, %v2586_v4  ;;  %v540_v60 = vsub.f32 %v2229_v24, %v2581_v5 }
  0x83   :  { %v519_v38 = vadd.f32 %v518_v46, %v517_v49  ;;  %v525_v54 = vadd.f32 %v524_v31, %v523_v58  ;;  %v405_v10 = vsel %vm404_vm2, %v401_v45, %v403_v61  ;;  %v2624_v52 = vsel %vm2615_vm6, %v471_v6, %v465_v63  ;;  %v295_v46 = vld [vmem:[#allocation6 + $0x18] sm:$0xff] }
  0x84   :  { %v408_v53 = vsel %vm406_vm3, %v407_v27, %v405_v10  ;;  %2030 = vrsqrt.f32 %v2624_v52  ;;  %v2630_v26 = vadd.f32 %v278_v43, %v206_v35  ;;  %vm4483_vm7 = vcmp.eq.s32.totalorder %v2518_v48, 2 }
  0x85   :  { %v2029_v16 = vpop.eup %2028  ;;  %v2635_v12 = vsel %vm2548_vm15, 3, %v391_v39  ;;  %vm121_vm10 = vcmp.eq.s32.totalorder %v2403_v62, 0  ;;  %v520_v6 = vmax.f32 %v519_v38, 1.0  ;;  %v526_v31 = vmax.f32 %v525_v54, 1.0 }
  0x86   :  { %v534_v41 = vadd.f32 %v533_v59, %v532_v56  ;;  %v541_v42 = vmul.f32 %v539_v1, %v539_v1  ;;  %2032 = vrcp.f32 %v408_v53  ;;  %v542_v45 = vmul.f32 %v540_v60, %v540_v60 }
  0x87   :  { %vm580_vm11 = vcmp.ge.f32.partialorder %v2581_v5, 16.0  ;;  %v1956_v35 = vadd.f32 -16.0, %v2581_v5  ;;  %v2640_v27 = vmul.f32 %v2029_v16, %v295_v46  ;;  %vm2642_vm12 = vcmp.lt.f32.partialorder %v526_v31, %v520_v6 }
  0x88   :  { %v535_v9 = vmax.f32 %v534_v41, 1.0  ;;  %v583_v39 = vadd.f32 64.0, %v2586_v4  ;;  %vm194_vm13 = vcmp.eq.s32.totalorder %v2410_v2, 0  ;;  %v455_v49 = vsel %vm2594_vm4, 1, %v4496_v55 }
  0x89   :  { %v529_v58 = vsel %vm2642_vm12, %v526_v31, %v520_v6  ;;  %v543_v61 = vadd.f32 %v542_v45, %v541_v42  ;;  %v2654_v63 = vsel %vm580_vm11, %v1956_v35, %v2581_v5  ;;  %vm477_vm14 = vcmp.eq.f32.partialorder %v2624_v52, inf }
  0x8a   :  { %vm2657_vm15 = vcmp.lt.f32.partialorder %v535_v9, %v529_v58  ;;  %v584_v59 = vsel %vm580_vm11, 1.0, %v2180_v47  ;;  %v589_v38 = vsub.f32 %v2219_v18, %v2654_v63  ;;  %v595_v10 = vsub.f32 %v2223_v21, %v2654_v63 }
  0x8b   :  { %v538_v11 = vsel %vm2657_vm15, %v535_v9, %v529_v58  ;;  %v544_v54 = vmax.f32 %v543_v61, 1.0  ;;  %v2666_v1 = vadd.f32 %v584_v59, %v583_v39  ;;  %v2672_v60 = vmul.f32 %v2640_v27, %v2361_v34 }
  0x8c   :  { %vm479_vm1 = vcmp.eq.f32.partialorder %v2624_v52, 0.0  ;;  %v480_v47 = vand.u32 2147483648, %v2624_v52  ;;  %v604_v18 = vsub.f32 %v2225_v22, %v2654_v63  ;;  %v591_v41 = vmul.f32 %v589_v38, %v589_v38 }
  0x8d   :  { %vm2678_vm2 = vcmp.lt.f32.partialorder %v544_v54, %v538_v11  ;;  %v588_v16 = vsub.f32 %v2213_v13, %v2666_v1  ;;  %v594_v21 = vsub.f32 %v2215_v14, %v2666_v1  ;;  %v603_v46 = vsub.f32 %v2217_v15, %v2666_v1 }
  0x8e   :  { %v2031_v6 = vpop.eup %2030  ;;  %v2690_v31 = vsel %vm2678_vm2, %v544_v54, %v538_v11  ;;  %v612_v22 = vsub.f32 %v2221_v19, %v2666_v1  ;;  %v613_v42 = vsub.f32 %v2229_v24, %v2654_v63  ;;  %v597_v14 = vmul.f32 %v595_v10, %v595_v10  ;;  %v368_v24 = vld [vmem:[#allocation6 + $0x20] sm:$0xff] }
  0x8f   :  { %v476_v13 = vmul.f32 %v2031_v6, %v2624_v52  ;;  %2034 = vrsqrt.f32 %v2690_v31  ;;  %v606_v45 = vmul.f32 %v604_v18, %v604_v18  ;;  %v351_v15 = vsel %vm4483_vm7, %v2672_v60, 0.0 }
  0x90   :  { %v464_v35 = vsel %vm2609_vm5, 2, %v455_v49  ;;  %v590_v9 = vmul.f32 %v588_v16, %v588_v16  ;;  %v122_v19 = vsel %vm121_vm10, %v2467_v32, 0.0  ;;  %v2033_v39 = vpop.eup %2032  ;;  %v596_v61 = vmul.f32 %v594_v21, %v594_v21 }
  0x91   :  { %v478_v58 = vsel %vm477_vm14, %v2624_v52, %v476_v13  ;;  %v605_v59 = vmul.f32 %v603_v46, %v603_v46  ;;  %v614_v38 = vmul.f32 %v612_v22, %v612_v22  ;;  %v528_v44 = vsel %vm2642_vm12, 1, %v4496_v55 }
  0x92   :  { %v481_v11 = vsel %vm479_vm1, %v480_v47, %v478_v58  ;;  %v592_v49 = vadd.f32 %v591_v41, %v590_v9  ;;  %v615_v54 = vmul.f32 %v613_v42, %v613_v42  ;;  %v598_v10 = vadd.f32 %v597_v14, %v596_v61  ;;  %v441_v58 = vld [vmem:[#allocation6 + $0x28] sm:$0xff] }
  0x93   :  { %2036 = vrcp.f32 %v481_v11  ;;  %v607_v18 = vadd.f32 %v606_v45, %v605_v59  ;;  %v195_v16 = vsel %vm194_vm13, %v2505_v33, 0.0  ;;  %v2717_v6 = vmul.f32 %v2033_v39, %v368_v24 }
  0x94   :  { %v593_v21 = vmax.f32 %v592_v49, 1.0  ;;  %v616_v46 = vadd.f32 %v615_v54, %v614_v38  ;;  %vm267_vm3 = vcmp.eq.s32.totalorder %v2483_v8, 0  ;;  %vm4487_vm4 = vcmp.eq.s32.totalorder %v2635_v12, 2 }
  0x95   :  { %v599_v52 = vmax.f32 %v598_v10, 1.0  ;;  %v608_v43 = vmax.f32 %v607_v18, 1.0  ;;  %vm4492_vm5 = vcmp.eq.s32.totalorder %v2403_v62, 3  ;;  %v352_v47 = vadd.f32 %v351_v15, %v2630_v26 }
  0x96   :  { %v2725_v41 = vsel %vm2615_vm6, 3, %v464_v35  ;;  %v537_v22 = vsel %vm2657_vm15, 2, %v528_v44  ;;  %v196_v42 = vadd.f32 %v195_v16, %v122_v19  ;;  %vm550_vm11 = vcmp.eq.f32.partialorder %v2690_v31, inf }
  0x97   :  { %vm2730_vm12 = vcmp.lt.f32.partialorder %v599_v52, %v593_v21  ;;  %v617_v14 = vmax.f32 %v616_v46, 1.0  ;;  %v268_v45 = vsel %vm267_vm3, %v2576_v20, 0.0  ;;  %v2739_v0 = vmul.f32 %v2717_v6, %v2428_v29 }
  0x98   :  { %v553_v26 = vand.u32 2147483648, %v2690_v31  ;;  %v602_v56 = vsel %vm2730_vm12, %v599_v52, %v593_v21  ;;  %vm4493_vm6 = vcmp.eq.s32.totalorder %v2518_v48, 0  ;;  %v137_v9 = vsel %vm4492_vm5, %v2467_v32, 0.0 }
  0x99   :  { %v2035_v15 = vpop.eup %2034  ;;  %vm2745_vm14 = vcmp.lt.f32.partialorder %v608_v43, %v602_v56  ;;  %vm4491_vm15 = vcmp.eq.s32.totalorder %v2410_v2, 3  ;;  %vm4490_vm1 = vcmp.eq.s32.totalorder %v2483_v8, 3  ;;  %vm552_vm7 = vcmp.eq.f32.partialorder %v2690_v31, 0.0 }
  0x9a   :  { %v549_v19 = vmul.f32 %v2035_v15, %v2690_v31  ;;  %v611_v39 = vsel %vm2745_vm14, %v608_v43, %v602_v56  ;;  %v269_v24 = vadd.f32 %v268_v45, %v196_v42  ;;  %v341_v59 = vsel %vm4493_vm6, %v2672_v60, 0.0 }
  0x9b   :  { %vm2758_vm0 = vcmp.lt.f32.partialorder %v617_v14, %v611_v39  ;;  %vm4488_vm9 = vcmp.eq.s32.totalorder %v2635_v12, 0  ;;  %v210_v38 = vsel %vm4491_vm15, %v2505_v33, 0.0  ;;  %v283_v54 = vsel %vm4490_vm1, %v2576_v20, 0.0 }
  0x9c   :  { %v551_v11 = vsel %vm550_vm11, %v2690_v31, %v549_v19  ;;  %v2774_v44 = vsel %vm2758_vm0, %v617_v14, %v611_v39  ;;  %v211_v49 = vadd.f32 %v210_v38, %v137_v9  ;;  %v424_v18 = vsel %vm4487_vm4, %v2739_v0, 0.0  ;;  %v514_v39 = vld [vmem:[#allocation6 + $0x30] sm:$0xff] }
  0x9d   :  { %v2037_v10 = vpop.eup %2036  ;;  %v554_v16 = vsel %vm552_vm7, %v553_v26, %v551_v11  ;;  %2038 = vrsqrt.f32 %v2774_v44  ;;  %vm4489_vm8 = vcmp.eq.s32.totalorder %v2518_v48, 3  ;;  %v601_v21 = vsel %vm2730_vm12, 1, %v4496_v55 }
  0x9e   :  { %v2784_v31 = vmul.f32 %v2037_v10, %v441_v58  ;;  %2040 = vrcp.f32 %v554_v16  ;;  %v342_v46 = vadd.f32 %v341_v59, %v269_v24  ;;  %vm4494_vm11 = vcmp.eq.s32.totalorder %v2725_v41, 2 }
  0x9f   :  { %v414_v52 = vsel %vm4488_vm9, %v2739_v0, 0.0  ;;  %v284_v43 = vadd.f32 %v283_v54, %v211_v49  ;;  %v425_v42 = vadd.f32 %v424_v18, %v352_v47  ;;  %v2795_v14 = vsel %vm2678_vm2, 3, %v537_v22 }
  0xa0   :  { %vm486_vm7 = vcmp.eq.s32.totalorder %v2725_v41, 0  ;;  %v356_v13 = vsel %vm4489_vm8, %v2672_v60, 0.0  ;;  %v610_v45 = vsel %vm2745_vm14, 2, %v601_v21  ;;  %vm428_vm12 = vcmp.eq.s32.totalorder %v2635_v12, 3 }
  0xa1   :  { %vm126_vm4 = vcmp.eq.s32.totalorder %v2403_v62, 1  ;;  %vm199_vm9 = vcmp.eq.s32.totalorder %v2410_v2, 1  ;;  %v484_v53 = vmul.f32 %v2784_v31, %v2527_v57  ;;  %vm623_vm2 = vcmp.eq.f32.partialorder %v2774_v44, inf }
  0xa2   :  { %v415_v47 = vadd.f32 %v414_v52, %v342_v46  ;;  %v127_v22 = vsel %vm126_vm4, %v2467_v32, 0.0  ;;  %vm4495_vm8 = vcmp.eq.s32.totalorder %v2795_v14, 2  ;;  %vm625_vm14 = vcmp.eq.f32.partialorder %v2774_v44, 0.0 }
  0xa3   :  { %v357_v26 = vadd.f32 %v356_v13, %v284_v43  ;;  %vm501_vm1 = vcmp.eq.s32.totalorder %v2725_v41, 3  ;;  %v200_v56 = vsel %vm199_vm9, %v2505_v33, 0.0  ;;  %v429_v15 = vsel %vm428_vm12, %v2739_v0, 0.0 }
  0xa4   :  { %v201_v35 = vadd.f32 %v200_v56, %v127_v22  ;;  %vm272_vm15 = vcmp.eq.s32.totalorder %v2483_v8, 1  ;;  %vm345_vm5 = vcmp.eq.s32.totalorder %v2518_v48, 1  ;;  %v626_v32 = vand.u32 2147483648, %v2774_v44 }
  0xa5   :  { %v273_v9 = vsel %vm272_vm15, %v2576_v20, 0.0  ;;  %v346_v19 = vsel %vm345_vm5, %v2672_v60, 0.0  ;;  %vm418_vm6 = vcmp.eq.s32.totalorder %v2635_v12, 1  ;;  %v497_v33 = vsel %vm4494_vm11, %v484_v53, 0.0 }
  0xa6   :  { %v487_v24 = vsel %vm486_vm7, %v484_v53, 0.0  ;;  %v502_v58 = vsel %vm501_vm1, %v484_v53, 0.0  ;;  %v274_v59 = vadd.f32 %v273_v9, %v201_v35  ;;  %v430_v11 = vadd.f32 %v429_v15, %v357_v26 }
  0xa7   :  { %v2039_v38 = vpop.eup %2038  ;;  %v120_v20 = vmul.f32 %v2435_v3, %v2231_v25  ;;  %v193_v60 = vmul.f32 %v2479_v7, %v2254_v50  ;;  %v2843_v49 = vmul.f32 %v2561_v17, %v2303_v36  ;;  %v419_v16 = vsel %vm418_vm6, %v2739_v0, 0.0 }
  0xa8   :  { %v2041_v54 = vpop.eup %2040  ;;  %v622_v10 = vmul.f32 %v2039_v38, %v2774_v44  ;;  %v347_v18 = vadd.f32 %v346_v19, %v274_v59  ;;  %vm491_vm11 = vcmp.eq.s32.totalorder %v2725_v41, 1  ;;  %v339_v17 = vmul.f32 %v2640_v27, %v2358_v30 }
  0xa9   :  { %v556_v21 = vmul.f32 %v2041_v54, %v514_v39  ;;  %v129_v3 = vsel %vm126_vm4, %v120_v20, 0.0  ;;  %v202_v7 = vsel %vm199_vm9, %v193_v60, 0.0  ;;  %v275_v0 = vsel %vm272_vm15, %v2843_v49, 0.0 }
  0xaa   :  { %v624_v46 = vsel %vm623_vm2, %v2774_v44, %v622_v10  ;;  %v203_v52 = vadd.f32 %v202_v7, %v129_v3  ;;  %v2864_v43 = vmul.f32 %v2717_v6, %v2426_v28  ;;  %vm559_vm9 = vcmp.eq.s32.totalorder %v2795_v14, 0 }
  0xab   :  { %v557_v13 = vmul.f32 %v556_v21, %v2586_v4  ;;  %v627_v22 = vsel %vm625_vm14, %v626_v32, %v624_v46  ;;  %v420_v27 = vadd.f32 %v419_v16, %v347_v18  ;;  %v2872_v26 = vsel %vm2758_vm0, 3, %v610_v45  ;;  %v587_v46 = vld [vmem:[#allocation6 + $0x38] sm:$0xff] }
  0xac   :  { %2042 = vrcp.f32 %v627_v22  ;;  %vm574_vm4 = vcmp.eq.s32.totalorder %v2795_v14, 3  ;;  %v492_v56 = vsel %vm491_vm11, %v484_v53, 0.0  ;;  %v498_v6 = vadd.f32 %v497_v33, %v425_v42 }
  0xad   :  { %v488_v15 = vadd.f32 %v487_v24, %v415_v47  ;;  %v503_v35 = vadd.f32 %v502_v58, %v430_v11  ;;  %v276_v9 = vadd.f32 %v275_v0, %v203_v52  ;;  %v570_v44 = vsel %vm4495_vm8, %v557_v13, 0.0 }
  0xae   :  { %vm564_vm15 = vcmp.eq.s32.totalorder %v2795_v14, 1  ;;  %v348_v61 = vsel %vm345_vm5, %v339_v17, 0.0  ;;  %v421_v45 = vsel %vm418_vm6, %v2864_v43, 0.0  ;;  %v493_v32 = vadd.f32 %v492_v56, %v420_v27 }
  0xaf   :  { %v485_v53 = vmul.f32 %v2784_v31, %v2510_v40  ;;  %v2888_v42 = vmul.f32 %v556_v21, %v2581_v5  ;;  %v124_v47 = vsel %vm121_vm10, %v120_v20, 0.0  ;;  %vm642_vm0 = vcmp.eq.s32.totalorder %v2872_v26, 2 }
  0xb0   :  { %v560_v19 = vsel %vm559_vm9, %v557_v13, 0.0  ;;  %vm632_vm5 = vcmp.eq.s32.totalorder %v2872_v26, 0  ;;  %v575_v33 = vsel %vm574_vm4, %v557_v13, 0.0  ;;  %vm647_vm6 = vcmp.eq.s32.totalorder %v2872_v26, 3 }
  0xb1   :  { %vm637_vm2 = vcmp.eq.s32.totalorder %v2872_v26, 1  ;;  %v197_v31 = vsel %vm194_vm13, %v193_v60, 0.0  ;;  %v270_v39 = vsel %vm267_vm3, %v2843_v49, 0.0  ;;  %v571_v24 = vadd.f32 %v570_v44, %v498_v6 }
  0xb2   :  { %v565_v58 = vsel %vm564_vm15, %v557_v13, 0.0  ;;  %v349_v59 = vadd.f32 %v348_v61, %v276_v9  ;;  %v198_v38 = vadd.f32 %v197_v31, %v124_v47  ;;  %vm4604_vm10 = vcmp.eq.s32.totalorder %v2518_v48, 0 }
  0xb3   :  { %v343_v11 = vsel %vm4604_vm10, %v339_v17, 0.0  ;;  %vm4605_vm14 = vcmp.eq.s32.totalorder %v2403_v62, 3  ;;  %vm4606_vm8 = vcmp.eq.s32.totalorder %v2410_v2, 3  ;;  %vm4607_vm13 = vcmp.eq.s32.totalorder %v2483_v8, 3 }
  0xb4   :  { %v139_v54 = vsel %vm4605_vm14, %v120_v20, 0.0  ;;  %v212_v10 = vsel %vm4606_vm8, %v193_v60, 0.0  ;;  %v285_v18 = vsel %vm4607_vm13, %v2843_v49, 0.0  ;;  %v561_v16 = vadd.f32 %v560_v19, %v488_v15 }
  0xb5   :  { %v494_v21 = vsel %vm491_vm11, %v485_v53, 0.0  ;;  %v271_v3 = vadd.f32 %v270_v39, %v198_v38  ;;  %v213_v7 = vadd.f32 %v212_v10, %v139_v54  ;;  %vm4608_vm3 = vcmp.eq.s32.totalorder %v2635_v12, 0 }
  0xb6   :  { %v416_v52 = vsel %vm4608_vm3, %v2864_v43, 0.0  ;;  %vm4609_vm10 = vcmp.eq.s32.totalorder %v2518_v48, 3  ;;  %vm4610_vm8 = vcmp.eq.s32.totalorder %v2403_v62, 2  ;;  %vm4611_vm14 = vcmp.eq.s32.totalorder %v2410_v2, 2  ;;  %v2043_v9 = vpop.eup %2042 }
  0xb7   :  { %v358_v0 = vsel %vm4609_vm10, %v339_v17, 0.0  ;;  %v134_v13 = vsel %vm4610_vm8, %v120_v20, 0.0  ;;  %v207_v22 = vsel %vm4611_vm14, %v193_v60, 0.0  ;;  %v422_v27 = vadd.f32 %v421_v45, %v349_v59 }
  0xb8   :  { %v344_v56 = vadd.f32 %v343_v11, %v271_v3  ;;  %v286_v6 = vadd.f32 %v285_v18, %v213_v7  ;;  %v208_v15 = vadd.f32 %v207_v22, %v134_v13  ;;  %v489_v44 = vsel %vm486_vm7, %v485_v53, 0.0 }
  0xb9   :  { %v431_v61 = vsel %vm428_vm12, %v2864_v43, 0.0  ;;  %vm4612_vm11 = vcmp.eq.s32.totalorder %v2483_v8, 2  ;;  %vm4613_vm13 = vcmp.eq.s32.totalorder %v2518_v48, 2  ;;  %v629_v20 = vmul.f32 %v2043_v9, %v587_v46 }
  0xba   :  { %v280_v62 = vsel %vm4612_vm11, %v2843_v49, 0.0  ;;  %v353_v2 = vsel %vm4613_vm13, %v339_v17, 0.0  ;;  %v417_v60 = vadd.f32 %v416_v52, %v344_v56  ;;  %v359_v45 = vadd.f32 %v358_v0, %v286_v6 }
  0xbb   :  { %v281_v47 = vadd.f32 %v280_v62, %v208_v15  ;;  %v576_v19 = vadd.f32 %v575_v33, %v503_v35  ;;  %v566_v31 = vadd.f32 %v565_v58, %v493_v32  ;;  %v567_v39 = vsel %vm564_vm15, %v2888_v42, 0.0 }
  0xbc   :  { %v562_v59 = vsel %vm559_vm9, %v2888_v42, 0.0  ;;  %v630_v8 = vmul.f32 %v629_v20, %v2666_v1  ;;  %v495_v49 = vadd.f32 %v494_v21, %v422_v27  ;;  %v504_v48 = vsel %vm501_vm1, %v485_v53, 0.0 }
  0xbd   :  { %vm4614_vm7 = vcmp.eq.s32.totalorder %v2635_v12, 2  ;;  %v631_v35 = vmul.f32 %v629_v20, %v2654_v63  ;;  %v490_v32 = vadd.f32 %v489_v44, %v417_v60  ;;  %v432_v33 = vadd.f32 %v431_v61, %v359_v45 }
  0xbe   :  { %v426_v17 = vsel %vm4614_vm7, %v2864_v43, 0.0  ;;  %v354_v58 = vadd.f32 %v353_v2, %v281_v47  ;;  %v643_v38 = vsel %vm642_vm0, %v630_v8, 0.0  ;;  %v633_v11 = vsel %vm632_vm5, %v630_v8, 0.0 }
  0xbf   :  { %v648_v54 = vsel %vm647_vm6, %v630_v8, 0.0  ;;  %v638_v10 = vsel %vm637_vm2, %v630_v8, 0.0  ;;  %v644_v18 = vadd.f32 %v643_v38, %v571_v24  ;;  %v634_v12 = vadd.f32 %v633_v11, %v561_v16 }
  0xc0   :  { %v649_v43 = vadd.f32 %v648_v54, %v576_v19  ;;  %v639_v21 = vadd.f32 %v638_v10, %v566_v31  ;;  %v568_v3 = vadd.f32 %v567_v39, %v495_v49  ;;  %vm4615_vm1 = vcmp.eq.s32.totalorder %v2725_v41, 2 }
  0xc1   :  { %v499_v7 = vsel %vm4615_vm1, %v485_v53, 0.0  ;;  %670 = vadd.xlane.f32.xlu1 %v644_v18  ;;  %652 = vadd.xlane.f32.xlu0 %v634_v12  ;;  %v640_v46 = vsel %vm637_vm2, %v631_v35, 0.0  ;;  %v563_v52 = vadd.f32 %v562_v59, %v490_v32  ;;  %v505_v0 = vadd.f32 %v504_v48, %v432_v33 }
  0xc2   :  { %v427_v13 = vadd.f32 %v426_v17, %v354_v58  ;;  %v635_v22 = vsel %vm632_vm5, %v631_v35, 0.0  ;;  %v577_v24 = vsel %vm574_vm4, %v2888_v42, 0.0  ;;  %vm4616_vm12 = vcmp.eq.s32.totalorder %v2795_v14, 2 }
  0xc3   :  { %v572_v41 = vsel %vm4616_vm12, %v2888_v42, 0.0  ;;  %v641_v16 = vadd.f32 %v640_v46, %v568_v3  ;;  %v636_v27 = vadd.f32 %v635_v22, %v563_v52  ;;  %v578_v56 = vadd.f32 %v577_v24, %v505_v0 }
  0xc4   :  { %v500_v53 = vadd.f32 %v499_v7, %v427_v13  ;;  %v650_v15 = vsel %vm647_vm6, %v631_v35, 0.0  ;;  %v645_v9 = vsel %vm642_vm0, %v631_v35, 0.0 }
  0xc5   :  { %679 = vadd.xlane.f32.xlu1 %v649_v43  ;;  %661 = vadd.xlane.f32.xlu0 %v639_v21  ;;  %v651_v44 = vadd.f32 %v650_v15, %v578_v56 }
  0xc6   :  { %v573_v6 = vadd.f32 %v572_v41, %v500_v53 }
  0xc8   :  { %v646_v61 = vadd.f32 %v645_v9, %v573_v6 }
  0xc9   :  { %697 = vadd.xlane.f32.xlu1 %v641_v16  ;;  %688 = vadd.xlane.f32.xlu0 %v636_v27 }
  0xcd   :  { %715 = vadd.xlane.f32.xlu1 %v651_v44  ;;  %706 = vadd.xlane.f32.xlu0 %v646_v61 }
 0x14e   :  { %v671_v14 = vpop.xlane.xlu1 %670  ;;  %v653_v42 = vpop.xlane.xlu0 %652 }
 0x14f   :  { %v672_v62 = vrot.slane %v671_v14, 4  ;;  %v654_v2 = vrot.slane %v653_v42, 4 }
 0x151   :  { %v673_v20 = vadd.f32 %v672_v62, %v671_v14  ;;  %v655_v60 = vadd.f32 %v654_v2, %v653_v42 }
 0x152   :  { %v680_v45 = vpop.xlane.xlu1 %679  ;;  %v662_v47 = vpop.xlane.xlu0 %661 }
 0x153   :  { %v674_v19 = vrot.slane %v673_v20, 2  ;;  %v656_v31 = vrot.slane %v655_v60, 2  ;;  %v681_v39 = vrot.slane %v680_v45, 4  ;;  %v663_v59 = vrot.slane %v662_v47, 4 }
 0x155   :  { %v682_v26 = vadd.f32 %v681_v39, %v680_v45  ;;  %v664_v8 = vadd.f32 %v663_v59, %v662_v47  ;;  %v657_v49 = vadd.f32 %v656_v31, %v655_v60  ;;  %v675_v35 = vadd.f32 %v674_v19, %v673_v20 }
 0x156   :  { %v698_v48 = vpop.xlane.xlu1 %697  ;;  %v689_v17 = vpop.xlane.xlu0 %688 }
 0x157   :  { %v683_v32 = vrot.slane %v682_v26, 2  ;;  %v665_v33 = vrot.slane %v664_v8, 2  ;;  %v699_v58 = vrot.slane %v698_v48, 4  ;;  %v690_v38 = vrot.slane %v689_v17, 4 }
 0x158   :  { %v658_v11 = vrot.slane %v657_v49, 1  ;;  %v676_v7 = vrot.slane %v675_v35, 1 }
 0x159   :  { %v700_v54 = vadd.f32 %v699_v58, %v698_v48  ;;  %v691_v10 = vadd.f32 %v690_v38, %v689_v17  ;;  %v666_v18 = vadd.f32 %v665_v33, %v664_v8  ;;  %v684_v12 = vadd.f32 %v683_v32, %v682_v26 }
 0x15a   :  { %v716_v43 = vpop.xlane.xlu1 %715  ;;  %v707_v21 = vpop.xlane.xlu0 %706  ;;  %v659_v3 = vadd.f32 %v658_v11, %v657_v49  ;;  %v677_v6 = vadd.f32 %v676_v7, %v675_v35 }
 0x15b   :  { %v701_v46 = vrot.slane %v700_v54, 2  ;;  %v692_v52 = vrot.slane %v691_v10, 2  ;;  %v717_v0 = vrot.slane %v716_v43, 4  ;;  %v708_v13 = vrot.slane %v707_v21, 4 }
 0x15c   :  { %1957 = vpush %v659_v3  ;;  %v667_v22 = vrot.slane %v666_v18, 1  ;;  %v685_v24 = vrot.slane %v684_v12, 1 }
 0x15d   :  { %v718_v41 = vadd.f32 %v717_v0, %v716_v43  ;;  %v709_v53 = vadd.f32 %v708_v13, %v707_v21  ;;  %v693_v16 = vadd.f32 %v692_v52, %v691_v10  ;;  %v702_v27 = vadd.f32 %v701_v46, %v700_v54 }
 0x15e   :  { %v668_v56 = vadd.f32 %v667_v22, %v666_v18  ;;  %v686_v15 = vadd.f32 %v685_v24, %v684_v12 }
 0x15f   :  { %v719_v9 = vrot.slane %v718_v41, 2  ;;  %v710_v44 = vrot.slane %v709_v53, 2  ;;  %v694_v61 = vrot.slane %v693_v16, 1  ;;  %v703_v14 = vrot.slane %v702_v27, 1 }
 0x160   :  { %1959 = vpush %v668_v56 }
 0x161   :  { %1961 = vpush %v677_v6  ;;  %v695_v42 = vadd.f32 %v694_v61, %v693_v16  ;;  %v704_v62 = vadd.f32 %v703_v14, %v702_v27  ;;  %v711_v2 = vadd.f32 %v710_v44, %v709_v53  ;;  %v720_v20 = vadd.f32 %v719_v9, %v718_v41 }
 0x162   :  { %1963 = vpush %v686_v15 }
 0x163   :  { %1965 = vpush %v695_v42  ;;  %v712_v60 = vrot.slane %v711_v2, 1  ;;  %v721_v45 = vrot.slane %v720_v20, 1 }
 0x164   :  { %1967 = vpush %v704_v62 }
 0x165   :  { %v713_v47 = vadd.f32 %v712_v60, %v711_v2  ;;  %v722_v19 = vadd.f32 %v721_v45, %v720_v20 }
 0x167   :  { %1969 = vpush %v713_v47 }
 0x168   :  { %1971 = vpush %v722_v19 }
 0x18d   :  { %s1958_s6 = spop %1957 }
 0x18e   :  { %v2974_v31 = vstv %s1958_s6 }
 0x18f   :  { %v725_v39 = vsub.f32 %v2974_v31, %v2227_v23  ;;  %v796_v59 = vsub.f32 %v2974_v31, %v2256_v51  ;;  %v860_v26 = vsub.f32 %v2974_v31, %v2305_v37  ;;  %v924_v8 = vsub.f32 %v2974_v31, %v2361_v34 }
 0x190   :  { %v988_v48 = vsub.f32 %v2974_v31, %v2428_v29  ;;  %v1052_v17 = vsub.f32 %v2974_v31, %v2527_v57  ;;  %v1116_v35 = vsub.f32 %v2974_v31, %v2586_v4 }
 0x191   :  { %s1960_s7 = spop %1959  ;;  %v728_v32 = vmul.f32 %v725_v39, %v725_v39  ;;  %v798_v33 = vmul.f32 %v796_v59, %v796_v59  ;;  %v2996_v11 = vmul.f32 %v860_v26, %v860_v26  ;;  %v2998_v54 = vmul.f32 %v924_v8, %v924_v8 }
 0x192   :  { %s1962_s8 = spop %1961  ;;  %v2984_v49 = vstv %s1960_s7  ;;  %v3012_v7 = vmul.f32 %v988_v48, %v988_v48  ;;  %v3014_v46 = vmul.f32 %v1052_v17, %v1052_v17  ;;  %v3018_v0 = vmul.f32 %v1116_v35, %v1116_v35 }
 0x193   :  { %s1964_s9 = spop %1963  ;;  %v733_v58 = vsub.f32 %v2984_v49, %v2227_v23  ;;  %v2994_v38 = vstv %s1962_s8  ;;  %v802_v10 = vsub.f32 %v2984_v49, %v2256_v51  ;;  %v866_v18 = vsub.f32 %v2984_v49, %v2305_v37 }
 0x194   :  { %s1966_s10 = spop %1965  ;;  %v930_v12 = vsub.f32 %v2984_v49, %v2361_v34  ;;  %v994_v43 = vsub.f32 %v2984_v49, %v2428_v29  ;;  %v1058_v21 = vsub.f32 %v2984_v49, %v2527_v57  ;;  %v744_v52 = vsub.f32 %v2994_v38, %v2227_v23 }
 0x195   :  { %v3010_v3 = vstv %s1966_s10  ;;  %v736_v13 = vmul.f32 %v733_v58, %v733_v58  ;;  %v3022_v22 = vsub.f32 %v2984_v49, %v2586_v4  ;;  %v811_v24 = vsub.f32 %v2994_v38, %v2256_v51  ;;  %s1968_s11 = spop %1967 }
 0x196   :  { %v875_v41 = vsub.f32 %v2994_v38, %v2305_v37  ;;  %v804_v53 = vmul.f32 %v802_v10, %v802_v10  ;;  %v868_v16 = vmul.f32 %v866_v18, %v866_v18  ;;  %v3028_v27 = vstv %s1964_s9 }
 0x197   :  { %v727_v56 = vsub.f32 %v3010_v3, %v2231_v25  ;;  %v3032_v6 = vmul.f32 %v930_v12, %v930_v12  ;;  %v3034_v15 = vmul.f32 %v994_v43, %v994_v43  ;;  %v3036_v9 = vmul.f32 %v1058_v21, %v1058_v21 }
 0x198   :  { %v939_v44 = vsub.f32 %v2994_v38, %v2361_v34  ;;  %v747_v61 = vmul.f32 %v744_v52, %v744_v52  ;;  %v1003_v14 = vsub.f32 %v2994_v38, %v2428_v29  ;;  %v1067_v42 = vsub.f32 %v2994_v38, %v2527_v57  ;;  %s1970_s12 = spop %1969 }
 0x199   :  { %v797_v62 = vsub.f32 %v3010_v3, %v2254_v50  ;;  %v813_v2 = vmul.f32 %v811_v24, %v811_v24  ;;  %v3046_v20 = vmul.f32 %v875_v41, %v875_v41  ;;  %v755_v60 = vsub.f32 %v3028_v27, %v2227_v23  ;;  %s1972_s13 = spop %1971 }
 0x19a   :  { %v3050_v45 = vstv %s1968_s11  ;;  %v820_v47 = vsub.f32 %v3028_v27, %v2256_v51  ;;  %v729_v19 = vmul.f32 %v727_v56, %v727_v56  ;;  %v861_v39 = vsub.f32 %v3010_v3, %v2303_v36 }
 0x19b   :  { %v735_v59 = vsub.f32 %v3050_v45, %v2231_v25  ;;  %v884_v26 = vsub.f32 %v3028_v27, %v2305_v37  ;;  %v948_v8 = vsub.f32 %v3028_v27, %v2361_v34  ;;  %v1012_v48 = vsub.f32 %v3028_v27, %v2428_v29 }
 0x19c   :  { %v803_v17 = vsub.f32 %v3050_v45, %v2254_v50  ;;  %v3066_v35 = vmul.f32 %v939_v44, %v939_v44  ;;  %v799_v58 = vmul.f32 %v797_v62, %v797_v62  ;;  %v867_v18 = vsub.f32 %v3050_v45, %v2303_v36 }
 0x19d   :  { %v737_v10 = vmul.f32 %v735_v59, %v735_v59  ;;  %v3070_v12 = vmul.f32 %v1003_v14, %v1003_v14  ;;  %v3072_v43 = vmul.f32 %v1067_v42, %v1067_v42  ;;  %v3076_v21 = vsub.f32 %v3028_v27, %v2527_v57 }
 0x19e   :  { %v805_v52 = vmul.f32 %v803_v17, %v803_v17  ;;  %v758_v24 = vmul.f32 %v755_v60, %v755_v60  ;;  %v822_v41 = vmul.f32 %v820_v47, %v820_v47  ;;  %v730_v56 = vadd.f32 %v729_v19, %v728_v32 }
 0x19f   :  { %v863_v44 = vmul.f32 %v861_v39, %v861_v39  ;;  %v3078_v55 = vmul.f32 %v884_v26, %v884_v26  ;;  %v3080_v62 = vmul.f32 %v948_v8, %v948_v8  ;;  %v3082_v59 = vmul.f32 %v1012_v48, %v1012_v48 }
 0x1a0   :  { %v738_v14 = vadd.f32 %v737_v10, %v736_v13  ;;  %v800_v29 = vadd.f32 %v799_v58, %v798_v33  ;;  %v806_v42 = vadd.f32 %v805_v52, %v804_v53  ;;  %v869_v34 = vmul.f32 %v867_v18, %v867_v18 }
 0x1a1   :  { %v3084_v37 = vstv %s1970_s12  ;;  %v925_v17 = vsub.f32 %v3010_v3, %v2358_v30  ;;  %v731_v19 = vmax.f32 %v730_v56, 1.0  ;;  %v864_v33 = vadd.f32 %v863_v44, %v2996_v11 }
 0x1a2   :  { %v746_v60 = vsub.f32 %v3084_v37, %v2231_v25  ;;  %v812_v32 = vsub.f32 %v3084_v37, %v2254_v50  ;;  %v876_v47 = vsub.f32 %v3084_v37, %v2303_v36  ;;  %v989_v13 = vsub.f32 %v3010_v3, %v2426_v28 }
 0x1a3   :  { %v3099_v53 = vsub.f32 %v3010_v3, %v2510_v40  ;;  %v739_v39 = vmax.f32 %v738_v14, 1.0  ;;  %v931_v26 = vsub.f32 %v3050_v45, %v2358_v30  ;;  %v801_v58 = vmax.f32 %v800_v29, 1.0 }
 0x1a4   :  { %v748_v8 = vmul.f32 %v746_v60, %v746_v60  ;;  %v814_v48 = vmul.f32 %v812_v32, %v812_v32  ;;  %v807_v10 = vmax.f32 %v806_v42, 1.0  ;;  %v870_v18 = vadd.f32 %v869_v34, %v868_v16 }
 0x1a5   :  { %v3103_v52 = vstv %s1972_s13  ;;  %v878_v44 = vmul.f32 %v876_v47, %v876_v47  ;;  %v865_v51 = vmax.f32 %v864_v33, 1.0  ;;  %v927_v23 = vmul.f32 %v925_v17, %v925_v17 }
 0x1a6   :  { %v749_v56 = vadd.f32 %v748_v8, %v747_v61  ;;  %v815_v11 = vadd.f32 %v814_v48, %v813_v2  ;;  %v757_v57 = vsub.f32 %v3103_v52, %v2231_v25  ;;  %v3109_v14 = vsub.f32 %v3010_v3, %v2581_v5 }
 0x1a7   :  { %v821_v60 = vsub.f32 %v3103_v52, %v2254_v50  ;;  %vm3113_vm9 = vcmp.lt.f32.partialorder %v739_v39, %v731_v19  ;;  %v933_v34 = vmul.f32 %v931_v26, %v931_v26  ;;  %v871_v2 = vmax.f32 %v870_v18, 1.0 }
 0x1a8   :  { %v750_v16 = vmax.f32 %v749_v56, 1.0  ;;  %v759_v61 = vmul.f32 %v757_v57, %v757_v57  ;;  %v940_v42 = vsub.f32 %v3084_v37, %v2358_v30  ;;  %v885_v17 = vsub.f32 %v3103_v52, %v2303_v36 }
 0x1a9   :  { %v823_v32 = vmul.f32 %v821_v60, %v821_v60  ;;  %vm3121_vm4 = vcmp.lt.f32.partialorder %v807_v10, %v801_v58  ;;  %v816_v33 = vmax.f32 %v815_v11, 1.0  ;;  %v879_v8 = vadd.f32 %v878_v44, %v3046_v20 }
 0x1aa   :  { %v760_v48 = vadd.f32 %v759_v61, %v758_v24  ;;  %v928_v26 = vadd.f32 %v927_v23, %v2998_v54  ;;  %v995_v57 = vsub.f32 %v3050_v45, %v2426_v28  ;;  %v887_v18 = vmul.f32 %v885_v17, %v885_v17 }
 0x1ab   :  { %v742_v56 = vsel %vm3113_vm9, %v739_v39, %v731_v19  ;;  %v934_v60 = vadd.f32 %v933_v34, %v3032_v6  ;;  %v824_v50 = vadd.f32 %v823_v32, %v822_v41  ;;  %v942_v11 = vmul.f32 %v940_v42, %v940_v42 }
 0x1ac   :  { %v761_v36 = vmax.f32 %v760_v48, 1.0  ;;  %vm3132_vm15 = vcmp.lt.f32.partialorder %v750_v16, %v742_v56  ;;  %v949_v20 = vsub.f32 %v3103_v52, %v2358_v30  ;;  %v810_v54 = vsel %vm3121_vm4, %v807_v10, %v801_v58 }
 0x1ad   :  { %v753_v23 = vsel %vm3132_vm15, %v750_v16, %v742_v56  ;;  %v880_v24 = vmax.f32 %v879_v8, 1.0  ;;  %vm3146_vm5 = vcmp.lt.f32.partialorder %v816_v33, %v810_v54  ;;  %vm3150_vm6 = vcmp.lt.f32.partialorder %v871_v2, %v865_v51 }
 0x1ae   :  { %vm3142_vm0 = vcmp.lt.f32.partialorder %v761_v36, %v753_v23  ;;  %v991_v39 = vmul.f32 %v989_v13, %v989_v13  ;;  %v1059_v44 = vsub.f32 %v3050_v45, %v2510_v40  ;;  %v888_v34 = vadd.f32 %v887_v18, %v3078_v55 }
 0x1af   :  { %v764_v58 = vsel %vm3142_vm0, %v761_v36, %v753_v23  ;;  %v929_v10 = vmax.f32 %v928_v26, 1.0  ;;  %v935_v16 = vmax.f32 %v934_v60, 1.0  ;;  %v825_v61 = vmax.f32 %v824_v50, 1.0 }
 0x1b0   :  { %2044 = vrsqrt.f32 %v764_v58  ;;  %v943_v42 = vadd.f32 %v942_v11, %v3066_v35  ;;  %v951_v32 = vmul.f32 %v949_v20, %v949_v20  ;;  %v819_v17 = vsel %vm3146_vm5, %v816_v33, %v810_v54 }
 0x1b1   :  { %v874_v13 = vsel %vm3150_vm6, %v871_v2, %v865_v51  ;;  %v997_v8 = vmul.f32 %v995_v57, %v995_v57  ;;  %v1004_v55 = vsub.f32 %v3084_v37, %v2426_v28  ;;  %vm3166_vm2 = vcmp.lt.f32.partialorder %v825_v61, %v819_v17  ;;  %v2108_v57 = vld [vmem:[#allocation6] sm:$0xff] }
 0x1b2   :  { %vm3170_vm3 = vcmp.lt.f32.partialorder %v880_v24, %v874_v13  ;;  %v1068_v36 = vsub.f32 %v3084_v37, %v2510_v40  ;;  %v889_v35 = vmax.f32 %v888_v34, 1.0  ;;  %v3178_v33 = vsel %vm3166_vm2, %v825_v61, %v819_v17 }
 0x1b3   :  { %v883_v51 = vsel %vm3170_vm3, %v880_v24, %v874_v13  ;;  %v1055_v2 = vmul.f32 %v3099_v53, %v3099_v53  ;;  %v1013_v26 = vsub.f32 %v3103_v52, %v2426_v28  ;;  %2046 = vrsqrt.f32 %v3178_v33 }
 0x1b4   :  { %vm3187_vm10 = vcmp.lt.f32.partialorder %v935_v16, %v929_v10  ;;  %v1061_v18 = vmul.f32 %v1059_v44, %v1059_v44  ;;  %vm3191_vm8 = vcmp.lt.f32.partialorder %v889_v35, %v883_v51  ;;  %v944_v60 = vmax.f32 %v943_v42, 1.0 }
 0x1b5   :  { %v952_v11 = vadd.f32 %v951_v32, %v3080_v62  ;;  %v1006_v20 = vmul.f32 %v1004_v55, %v1004_v55  ;;  %v3198_v53 = vsel %vm3191_vm8, %v889_v35, %v883_v51  ;;  %v992_v23 = vadd.f32 %v991_v39, %v3012_v7 }
 0x1b6   :  { %v998_v54 = vadd.f32 %v997_v8, %v3034_v15  ;;  %v3204_v24 = vsub.f32 %v3050_v45, %v2581_v5  ;;  %v1070_v44 = vmul.f32 %v1068_v36, %v1068_v36  ;;  %2048 = vrsqrt.f32 %v3198_v53 }
 0x1b7   :  { %v938_v34 = vsel %vm3187_vm10, %v935_v16, %v929_v10  ;;  %v1015_v62 = vmul.f32 %v1013_v26, %v1013_v26  ;;  %v953_v42 = vmax.f32 %v952_v11, 1.0  ;;  %v993_v32 = vmax.f32 %v992_v23, 1.0 }
 0x1b8   :  { %vm3209_vm14 = vcmp.lt.f32.partialorder %v944_v60, %v938_v34  ;;  %v1077_v7 = vsub.f32 %v3103_v52, %v2510_v40  ;;  %v4639_v15 = vmov 0   ;;  %v999_v13 = vmax.f32 %v998_v54, 1.0 }
 0x1b9   :  { %v741_v39 = vsel %vm3113_vm9, 1, %v4639_v15  ;;  %v947_v17 = vsel %vm3209_vm14, %v944_v60, %v938_v34  ;;  %vm767_vm11 = vcmp.eq.f32.partialorder %v764_v58, inf  ;;  %v1007_v55 = vadd.f32 %v1006_v20, %v3070_v12 }
 0x1ba   :  { %v2045_v8 = vpop.eup %2044  ;;  %v752_v10 = vsel %vm3132_vm15, 2, %v741_v39  ;;  %vm3222_vm13 = vcmp.lt.f32.partialorder %v953_v42, %v947_v17  ;;  %v1056_v35 = vadd.f32 %v1055_v2, %v3014_v46  ;;  %v1062_v51 = vadd.f32 %v1061_v18, %v3036_v9 }
 0x1bb   :  { %v766_v36 = vmul.f32 %v2045_v8, %v764_v58  ;;  %v3229_v29 = vsel %vm3222_vm13, %v953_v42, %v947_v17  ;;  %v770_v26 = vand.u32 2147483648, %v764_v58  ;;  %vm3234_vm7 = vcmp.lt.f32.partialorder %v999_v13, %v993_v32 }
 0x1bc   :  { %2050 = vrsqrt.f32 %v3229_v29  ;;  %v1016_v60 = vadd.f32 %v1015_v62, %v3082_v59  ;;  %v3241_v12 = vsel %vm3142_vm0, 3, %v752_v10  ;;  %vm769_vm1 = vcmp.eq.f32.partialorder %v764_v58, 0.0 }
 0x1bd   :  { %v768_v11 = vsel %vm767_vm11, %v764_v58, %v766_v36  ;;  %v809_v46 = vsel %vm3121_vm4, 1, %v4639_v15  ;;  %v2047_v9 = vpop.eup %2046  ;;  %vm831_vm12 = vcmp.eq.f32.partialorder %v3178_v33, inf  ;;  %vm833_vm9 = vcmp.eq.f32.partialorder %v3178_v33, 0.0 }
 0x1be   :  { %v771_v2 = vsel %vm769_vm1, %v770_v26, %v768_v11  ;;  %v1008_v18 = vmax.f32 %v1007_v55, 1.0  ;;  %v830_v20 = vmul.f32 %v2047_v9, %v3178_v33  ;;  %v1002_v59 = vsel %vm3234_vm7, %v999_v13, %v993_v32 }
 0x1bf   :  { %v1057_v19 = vmax.f32 %v1056_v35, 1.0  ;;  %v1063_v23 = vmax.f32 %v1062_v51, 1.0  ;;  %2052 = vrcp.f32 %v771_v2  ;;  %v834_v58 = vand.u32 2147483648, %v3178_v33 }
 0x1c0   :  { %vm3252_vm15 = vcmp.lt.f32.partialorder %v1008_v18, %v1002_v59  ;;  %v1017_v54 = vmax.f32 %v1016_v60, 1.0  ;;  %v2049_v34 = vpop.eup %2048  ;;  %v832_v62 = vsel %vm831_vm12, %v3178_v33, %v830_v20  ;;  %v1071_v39 = vadd.f32 %v1070_v44, %v3072_v43 }
 0x1c1   :  { %v1011_v42 = vsel %vm3252_vm15, %v1008_v18, %v1002_v59  ;;  %v1079_v17 = vmul.f32 %v1077_v7, %v1077_v7  ;;  %v835_v32 = vsel %vm833_vm9, %v834_v58, %v832_v62  ;;  %v894_v13 = vmul.f32 %v2049_v34, %v3198_v53 }
 0x1c2   :  { %vm3261_vm4 = vcmp.lt.f32.partialorder %v1017_v54, %v1011_v42  ;;  %v1119_v10 = vmul.f32 %v3109_v14, %v3109_v14  ;;  %2054 = vrcp.f32 %v835_v32  ;;  %vm895_vm0 = vcmp.eq.f32.partialorder %v3198_v53, inf }
 0x1c3   :  { %v3270_v33 = vsel %vm3261_vm4, %v1017_v54, %v1011_v42  ;;  %vm3272_vm11 = vcmp.lt.f32.partialorder %v1063_v23, %v1057_v19  ;;  %v896_v44 = vsel %vm895_vm0, %v3198_v53, %v894_v13  ;;  %v898_v7 = vand.u32 2147483648, %v3198_v53 }
 0x1c4   :  { %2056 = vrsqrt.f32 %v3270_v33  ;;  %v1078_v14 = vmul.f32 %v3076_v21, %v3076_v21  ;;  %v818_v55 = vsel %vm3146_vm5, 2, %v809_v46  ;;  %v873_v36 = vsel %vm3150_vm6, 1, %v4639_v15 }
 0x1c5   :  { %vm897_vm1 = vcmp.eq.f32.partialorder %v3198_v53, 0.0  ;;  %v1072_v35 = vmax.f32 %v1071_v39, 1.0  ;;  %v1066_v60 = vsel %vm3272_vm11, %v1063_v23, %v1057_v19  ;;  %v1120_v9 = vadd.f32 %v1119_v10, %v3018_v0 }
 0x1c6   :  { %v2051_v51 = vpop.eup %2050  ;;  %v899_v26 = vsel %vm897_vm1, %v898_v7, %v896_v44  ;;  %v1080_v11 = vadd.f32 %v1079_v17, %v1078_v14  ;;  %v1124_v41 = vmul.f32 %v3022_v22, %v3022_v22  ;;  %v1125_v53 = vmul.f32 %v3204_v24, %v3204_v24 }
 0x1c7   :  { %v958_v21 = vmul.f32 %v2051_v51, %v3229_v29  ;;  %vm3291_vm12 = vcmp.lt.f32.partialorder %v1072_v35, %v1066_v60  ;;  %vm959_vm5 = vcmp.eq.f32.partialorder %v3229_v29, inf  ;;  %v962_v46 = vand.u32 2147483648, %v3229_v29 }
 0x1c8   :  { %v1075_v2 = vsel %vm3291_vm12, %v1072_v35, %v1066_v60  ;;  %v1081_v0 = vmax.f32 %v1080_v11, 1.0  ;;  %v1126_v20 = vadd.f32 %v1125_v53, %v1124_v41  ;;  %v1131_v59 = vsub.f32 %v2994_v38, %v2586_v4 }
 0x1c9   :  { %v960_v18 = vsel %vm959_vm5, %v3229_v29, %v958_v21  ;;  %v1132_v22 = vsub.f32 %v3084_v37, %v2581_v5  ;;  %v2053_v19 = vpop.eup %2052  ;;  %v882_v24 = vsel %vm3170_vm3, 2, %v873_v36  ;;  %2058 = vrcp.f32 %v899_v26  ;;  %v2109_v36 = vld [vmem:[#allocation6 + $0x8] sm:$0xff] }
 0x1ca   :  { %vm961_vm6 = vcmp.eq.f32.partialorder %v3229_v29, 0.0  ;;  %vm3311_vm9 = vcmp.lt.f32.partialorder %v1081_v0, %v1075_v2  ;;  %v1121_v34 = vmax.f32 %v1120_v9, 1.0  ;;  %v1127_v62 = vmax.f32 %v1126_v20, 1.0 }
 0x1cb   :  { %v963_v58 = vsel %vm961_vm6, %v962_v46, %v960_v18  ;;  %v3317_v54 = vsel %vm3311_vm9, %v1081_v0, %v1075_v2  ;;  %v3321_v42 = vsel %vm3166_vm2, 3, %v818_v55  ;;  %v3326_v50 = vsel %vm3187_vm10, 1, %v4639_v15  ;;  %v4656_v0 = vld [vmem:[#allocation11_spill] sm:$0xff] }
 0x1cc   :  { %2060 = vrsqrt.f32 %v3317_v54  ;;  %v1180_v29 = vsub.f32 %v2974_v31, %v2666_v1  ;;  %v2055_v39 = vpop.eup %2054  ;;  %v3333_v17 = vsel %vm3191_vm8, 3, %v882_v24  ;;  %v946_v48 = vsel %vm3209_vm14, 2, %v3326_v50  ;;  %v4665_v50 = vld [vmem:[#allocation17_spill] sm:$0xff] }
 0x1cd   :  { %v1133_v32 = vmul.f32 %v1131_v59, %v1131_v59  ;;  %v1134_v13 = vmul.f32 %v1132_v22, %v1132_v22  ;;  %v3338_v44 = vmul.f32 %v2108_v57, %v2053_v19  ;;  %vm781_vm2 = vcmp.eq.s32.totalorder %v3241_v12, 1  ;;  %v4659_v59 = vld [vmem:[#allocation14_spill] sm:$0xff] }
 0x1ce   :  { %v2057_v10 = vpop.eup %2056  ;;  %2062 = vrcp.f32 %v963_v58  ;;  %vm1023_vm3 = vcmp.eq.f32.partialorder %v3270_v33, inf  ;;  %v1140_v31 = vsub.f32 %v3028_v27, %v2586_v4  ;;  %vm845_vm10 = vcmp.eq.s32.totalorder %v3321_v42, 1 }
 0x1cf   :  { %v1022_v56 = vmul.f32 %v2057_v10, %v3270_v33  ;;  %vm3346_vm8 = vcmp.lt.f32.partialorder %v1127_v62, %v1121_v34  ;;  %v1135_v14 = vadd.f32 %v1134_v13, %v1133_v32  ;;  %v1141_v55 = vsub.f32 %v3103_v52, %v2581_v5  ;;  %v2110_v10 = vld [vmem:[#allocation6 + $0x10] sm:$0xff] }
 0x1d0   :  { %v3352_v35 = vmul.f32 %v2109_v36, %v2055_v39  ;;  %vm1025_vm0 = vcmp.eq.f32.partialorder %v3270_v33, 0.0  ;;  %v1026_v51 = vand.u32 2147483648, %v3270_v33  ;;  %v1181_v26 = vsub.f32 %v3010_v3, %v2654_v63 }
 0x1d1   :  { %v1024_v60 = vsel %vm1023_vm3, %v3270_v33, %v1022_v56  ;;  %v1136_v11 = vmax.f32 %v1135_v14, 1.0  ;;  %v1143_v9 = vmul.f32 %v1141_v55, %v1141_v55  ;;  %v1186_v21 = vsub.f32 %v2984_v49, %v2666_v1 }
 0x1d2   :  { %v1130_v41 = vsel %vm3346_vm8, %v1127_v62, %v1121_v34  ;;  %v1142_v53 = vmul.f32 %v1140_v31, %v1140_v31  ;;  %v1183_v46 = vmul.f32 %v1181_v26, %v1181_v26  ;;  %v1187_v2 = vsub.f32 %v3050_v45, %v2654_v63 }
 0x1d3   :  { %v3367_v18 = vmul.f32 %v3338_v44, %v4656_v0  ;;  %v1001_v3 = vsel %vm3234_vm7, 1, %v4639_v15  ;;  %v1027_v33 = vsel %vm1025_vm0, %v1026_v51, %v1024_v60  ;;  %vm3372_vm1 = vcmp.lt.f32.partialorder %v1136_v11, %v1130_v41  ;;  %v2059_v49 = vpop.eup %2058 }
 0x1d4   :  { %v3378_v22 = vmul.f32 %v3352_v35, %v4659_v59  ;;  %vm1087_vm5 = vcmp.eq.f32.partialorder %v3317_v54, inf  ;;  %v1144_v45 = vadd.f32 %v1143_v9, %v1142_v53  ;;  %v1182_v19 = vmul.f32 %v1180_v29, %v1180_v29 }
 0x1d5   :  { %vm1089_vm6 = vcmp.eq.f32.partialorder %v3317_v54, 0.0  ;;  %v1139_v25 = vsel %vm3372_vm1, %v1136_v11, %v1130_v41  ;;  %v1188_v24 = vmul.f32 %v1186_v21, %v1186_v21  ;;  %v1189_v58 = vmul.f32 %v1187_v2, %v1187_v2  ;;  %v4662_v41 = vld [vmem:[#allocation16_spill] sm:$0xff] }
 0x1d6   :  { %v2061_v34 = vpop.eup %2060  ;;  %2064 = vrcp.f32 %v1027_v33  ;;  %v1090_v62 = vand.u32 2147483648, %v3317_v54  ;;  %v1145_v39 = vmax.f32 %v1144_v45, 1.0  ;;  %v1184_v32 = vadd.f32 %v1183_v46, %v1182_v19  ;;  %v2111_v46 = vld [vmem:[#allocation6 + $0x18] sm:$0xff] }
 0x1d7   :  { %v782_v13 = vsel %vm781_vm2, %v3367_v18, 0.0  ;;  %v3388_v57 = vmul.f32 %v2110_v10, %v2059_v49  ;;  %v1086_v29 = vmul.f32 %v2061_v34, %v3317_v54  ;;  %v1190_v31 = vadd.f32 %v1189_v58, %v1188_v24 }
 0x1d8   :  { %v2063_v56 = vpop.eup %2062  ;;  %v846_v14 = vsel %vm845_vm10, %v3378_v22, 0.0  ;;  %vm3394_vm7 = vcmp.lt.f32.partialorder %v1145_v39, %v1139_v25  ;;  %v1195_v36 = vsub.f32 %v2994_v38, %v2666_v1  ;;  %v1196_v51 = vsub.f32 %v3084_v37, %v2654_v63 }
 0x1d9   :  { %v1088_v26 = vsel %vm1087_vm5, %v3317_v54, %v1086_v29  ;;  %v3407_v60 = vsel %vm3394_vm7, %v1145_v39, %v1139_v25  ;;  %v1204_v11 = vsub.f32 %v3028_v27, %v2666_v1  ;;  %v1205_v9 = vsub.f32 %v3103_v52, %v2654_v63 }
 0x1da   :  { %v1091_v38 = vsel %vm1089_vm6, %v1090_v62, %v1088_v26  ;;  %2066 = vrsqrt.f32 %v3407_v60  ;;  %v1185_v37 = vmax.f32 %v1184_v32, 1.0  ;;  %v1191_v21 = vmax.f32 %v1190_v31, 1.0 }
 0x1db   :  { %v3418_v53 = vmul.f32 %v3388_v57, %v4662_v41  ;;  %v3420_v2 = vmul.f32 %v2111_v46, %v2063_v56  ;;  %v1010_v27 = vsel %vm3252_vm15, 2, %v1001_v3  ;;  %2068 = vrcp.f32 %v1091_v38  ;;  %v2112_v56 = vld [vmem:[#allocation6 + $0x20] sm:$0xff]  ;;  %v4670_v46 = vld [vmem:[#allocation18_spill] sm:$0xff] }
 0x1dc   :  { %v847_v33 = vadd.f32 %v846_v14, %v782_v13  ;;  %v1197_v52 = vmul.f32 %v1195_v36, %v1195_v36  ;;  %v1198_v49 = vmul.f32 %v1196_v51, %v1196_v51  ;;  %vm909_vm3 = vcmp.eq.s32.totalorder %v3333_v17, 1 }
 0x1dd   :  { %v3431_v54 = vsel %vm3222_vm13, 3, %v946_v48  ;;  %v1206_v45 = vmul.f32 %v1204_v11, %v1204_v11  ;;  %v1207_v19 = vmul.f32 %v1205_v9, %v1205_v9  ;;  %v3435_v47 = vsel %vm3261_vm4, 3, %v1010_v27 }
 0x1de   :  { %v1065_v3 = vsel %vm3272_vm11, 1, %v4639_v15  ;;  %vm3440_vm15 = vcmp.lt.f32.partialorder %v1191_v21, %v1185_v37  ;;  %v1199_v61 = vadd.f32 %v1198_v49, %v1197_v52  ;;  %v910_v16 = vsel %vm909_vm3, %v3418_v53, 0.0  ;;  %v2113_v49 = vld [vmem:[#allocation6 + $0x28] sm:$0xff] }
 0x1df   :  { %v3449_v48 = vmul.f32 %v3420_v2, %v4665_v50  ;;  %v1074_v8 = vsel %vm3291_vm12, 2, %v1065_v3  ;;  %v1208_v24 = vadd.f32 %v1207_v19, %v1206_v45  ;;  %v911_v43 = vadd.f32 %v910_v16, %v847_v33 }
 0x1e0   :  { %v2065_v58 = vpop.eup %2064  ;;  %v1200_v34 = vmax.f32 %v1199_v61, 1.0  ;;  %vm776_vm14 = vcmp.eq.s32.totalorder %v3241_v12, 0  ;;  %vm4516_vm13 = vcmp.eq.s32.totalorder %v3321_v42, 0  ;;  %vm973_vm4 = vcmp.eq.s32.totalorder %v3431_v54, 1 }
 0x1e1   :  { %v1194_v62 = vsel %vm3440_vm15, %v1191_v21, %v1185_v37  ;;  %v777_v39 = vsel %vm776_vm14, %v3367_v18, 0.0  ;;  %v841_v6 = vsel %vm4516_vm13, %v3378_v22, 0.0  ;;  %vm1037_vm11 = vcmp.eq.s32.totalorder %v3435_v47, 1 }
 0x1e2   :  { %v3467_v32 = vsel %vm3311_vm9, 3, %v1074_v8  ;;  %v1129_v13 = vsel %vm3346_vm8, 1, %v4639_v15  ;;  %vm3472_vm12 = vcmp.lt.f32.partialorder %v1200_v34, %v1194_v62  ;;  %v1209_v29 = vmax.f32 %v1208_v24, 1.0 }
 0x1e3   :  { %v974_v31 = vsel %vm973_vm4, %v3449_v48, 0.0  ;;  %v3479_v14 = vmul.f32 %v2112_v56, %v2065_v58  ;;  %v1138_v23 = vsel %vm3372_vm1, 2, %v1129_v13  ;;  %v1203_v36 = vsel %vm3472_vm12, %v1200_v34, %v1194_v62  ;;  %v4671_v34 = vld [vmem:[#allocation19_spill] sm:$0xff] }
 0x1e4   :  { %v2067_v7 = vpop.eup %2066  ;;  %v975_v51 = vadd.f32 %v974_v31, %v911_v43  ;;  %vm1151_vm9 = vcmp.eq.f32.partialorder %v3407_v60, inf  ;;  %vm3486_vm8 = vcmp.lt.f32.partialorder %v1209_v29, %v1203_v36  ;;  %v842_v11 = vadd.f32 %v841_v6, %v777_v39 }
 0x1e5   :  { %v2069_v9 = vpop.eup %2068  ;;  %v1150_v38 = vmul.f32 %v2067_v7, %v3407_v60  ;;  %vm1153_vm0 = vcmp.eq.f32.partialorder %v3407_v60, 0.0  ;;  %v3494_v20 = vsel %vm3486_vm8, %v1209_v29, %v1203_v36  ;;  %vm791_vm1 = vcmp.eq.s32.totalorder %v3241_v12, 3 }
 0x1e6   :  { %v1154_v37 = vand.u32 2147483648, %v3407_v60  ;;  %2070 = vrsqrt.f32 %v3494_v20  ;;  %vm904_vm5 = vcmp.eq.s32.totalorder %v3333_v17, 0  ;;  %v792_v21 = vsel %vm791_vm1, %v3367_v18, 0.0 }
 0x1e7   :  { %v3505_v27 = vmul.f32 %v3479_v14, %v4670_v46  ;;  %vm4524_vm6 = vcmp.eq.s32.totalorder %v3467_v32, 1  ;;  %v1152_v33 = vsel %vm1151_vm9, %v3407_v60, %v1150_v38  ;;  %v905_v52 = vsel %vm904_vm5, %v3418_v53, 0.0  ;;  %v4672_v38 = vld [vmem:[#allocation12_spill] sm:$0xff] }
 0x1e8   :  { %vm4519_vm13 = vcmp.eq.s32.totalorder %v3321_v42, 3  ;;  %v3513_v45 = vmul.f32 %v2113_v49, %v2069_v9  ;;  %v1155_v19 = vsel %vm1153_vm0, %v1154_v37, %v1152_v33  ;;  %v906_v3 = vadd.f32 %v905_v52, %v842_v11  ;;  %v4674_v52 = vld [vmem:[#allocation15_spill] sm:$0xff] }
 0x1e9   :  { %v856_v61 = vsel %vm4519_vm13, %v3378_v22, 0.0  ;;  %2072 = vrcp.f32 %v1155_v19  ;;  %v1193_v60 = vsel %vm3440_vm15, 1, %v4639_v15  ;;  %vm4518_vm9 = vcmp.eq.s32.totalorder %v3431_v54, 0 }
 0x1ea   :  { %v857_v16 = vadd.f32 %v856_v61, %v792_v21  ;;  %v3524_v8 = vsel %vm3394_vm7, 3, %v1138_v23  ;;  %v1202_v24 = vsel %vm3472_vm12, 2, %v1193_v60  ;;  %v969_v58 = vsel %vm4518_vm9, %v3449_v48, 0.0  ;;  %v4673_v21 = vld [vmem:[#allocation13_spill] sm:$0xff] }
 0x1eb   :  { %vm4517_vm0 = vcmp.eq.s32.totalorder %v3435_v47, 0  ;;  %v1038_v25 = vsel %vm1037_vm11, %v3505_v27, 0.0  ;;  %vm1096_vm7 = vcmp.eq.s32.totalorder %v3467_v32, 0  ;;  %vm4520_vm15 = vcmp.eq.s32.totalorder %v3333_v17, 3 }
 0x1ec   :  { %v1033_v43 = vsel %vm4517_vm0, %v3505_v27, 0.0  ;;  %v1039_v55 = vadd.f32 %v1038_v25, %v975_v51  ;;  %v3542_v62 = vmul.f32 %v3513_v45, %v4671_v34  ;;  %v970_v39 = vadd.f32 %v969_v58, %v906_v3 }
 0x1ed   :  { %v920_v6 = vsel %vm4520_vm15, %v3418_v53, 0.0  ;;  %v3549_v13 = vsel %vm3486_vm8, 3, %v1202_v24  ;;  %vm4522_vm12 = vcmp.eq.s32.totalorder %v3241_v12, 2  ;;  %vm4521_vm0 = vcmp.eq.s32.totalorder %v3321_v42, 2  ;;  %v2114_v24 = vld [vmem:[#allocation6 + $0x30] sm:$0xff] }
 0x1ee   :  { %v921_v10 = vadd.f32 %v920_v6, %v857_v16  ;;  %vm1215_vm9 = vcmp.eq.f32.partialorder %v3494_v20, inf  ;;  %vm1217_vm13 = vcmp.eq.f32.partialorder %v3494_v20, 0.0  ;;  %v787_v29 = vsel %vm4522_vm12, %v3367_v18, 0.0 }
 0x1ef   :  { %v851_v31 = vsel %vm4521_vm0, %v3378_v22, 0.0  ;;  %v1218_v56 = vand.u32 2147483648, %v3494_v20  ;;  %vm983_vm8 = vcmp.eq.s32.totalorder %v3431_v54, 3  ;;  %vm4523_vm15 = vcmp.eq.s32.totalorder %v3333_v17, 2 }
 0x1f0   :  { %v852_v23 = vadd.f32 %v851_v31, %v787_v29  ;;  %v2071_v36 = vpop.eup %2070  ;;  %v1102_v7 = vsel %vm4524_vm6, %v3542_v62, 0.0  ;;  %v1034_v51 = vadd.f32 %v1033_v43, %v970_v39  ;;  %v984_v18 = vsel %vm983_vm8, %v3449_v48, 0.0 }
 0x1f1   :  { %v915_v22 = vsel %vm4523_vm15, %v3418_v53, 0.0  ;;  %v1214_v26 = vmul.f32 %v2071_v36, %v3494_v20  ;;  %v985_v11 = vadd.f32 %v984_v18, %v921_v10  ;;  %vm1047_vm0 = vcmp.eq.s32.totalorder %v3435_v47, 3 }
 0x1f2   :  { %v916_v9 = vadd.f32 %v915_v22, %v852_v23  ;;  %vm4526_vm12 = vcmp.eq.s32.totalorder %v3431_v54, 2  ;;  %v775_v37 = vmul.f32 %v3338_v44, %v4672_v38  ;;  %v839_v33 = vmul.f32 %v3352_v35, %v4673_v21 }
 0x1f3   :  { %v3582_v49 = vmul.f32 %v3388_v57, %v4674_v52  ;;  %v2073_v19 = vpop.eup %2072  ;;  %v1216_v53 = vsel %vm1215_vm9, %v3494_v20, %v1214_v26  ;;  %v1097_v3 = vsel %vm1096_vm7, %v3542_v62, 0.0  ;;  %v1048_v44 = vsel %vm1047_vm0, %v3505_v27, 0.0 }
 0x1f4   :  { %v979_v35 = vsel %vm4526_vm12, %v3449_v48, 0.0  ;;  %vm1165_vm15 = vcmp.eq.s32.totalorder %v3524_v8, 1  ;;  %v1219_v57 = vsel %vm1217_vm13, %v1218_v56, %v1216_v53  ;;  %vm1160_vm6 = vcmp.eq.s32.totalorder %v3524_v8, 0 }
 0x1f5   :  { %v980_v61 = vadd.f32 %v979_v35, %v916_v9  ;;  %v784_v60 = vsel %vm781_vm2, %v775_v37, 0.0  ;;  %v848_v16 = vsel %vm845_vm10, %v839_v33, 0.0  ;;  %v1157_v58 = vmul.f32 %v2114_v24, %v2073_v19 }
 0x1f6   :  { %2074 = vrcp.f32 %v1219_v57  ;;  %v849_v25 = vadd.f32 %v848_v16, %v784_v60  ;;  %v3606_v48 = vmul.f32 %v3420_v2, %v2358_v30  ;;  %v1103_v43 = vadd.f32 %v1102_v7, %v1039_v55 }
 0x1f7   :  { %v1049_v20 = vadd.f32 %v1048_v44, %v985_v11  ;;  %vm4525_vm13 = vcmp.eq.s32.totalorder %v3435_v47, 2  ;;  %v912_v39 = vsel %vm909_vm3, %v3582_v49, 0.0  ;;  %v1098_v6 = vadd.f32 %v1097_v3, %v1034_v51 }
 0x1f8   :  { %v1043_v10 = vsel %vm4525_vm13, %v3505_v27, 0.0  ;;  %v913_v29 = vadd.f32 %v912_v39, %v849_v25  ;;  %v3617_v31 = vmul.f32 %v3479_v14, %v2426_v28  ;;  %vm1111_vm2 = vcmp.eq.s32.totalorder %v3467_v32, 3  ;;  %v2115_v39 = vld [vmem:[#allocation6 + $0x38] sm:$0xff] }
 0x1f9   :  { %vm4527_vm10 = vcmp.eq.s32.totalorder %v3524_v8, 3  ;;  %v1044_v2 = vadd.f32 %v1043_v10, %v980_v61  ;;  %v779_v55 = vsel %vm776_vm14, %v775_v37, 0.0  ;;  %v1158_v56 = vmul.f32 %v1157_v58, %v2586_v4 }
 0x1fa   :  { %v1112_v23 = vsel %vm1111_vm2, %v3542_v62, 0.0  ;;  %vm1106_vm3 = vcmp.eq.s32.totalorder %v3467_v32, 2  ;;  %v976_v14 = vsel %vm973_vm4, %v3606_v48, 0.0  ;;  %vm1170_vm9 = vcmp.eq.s32.totalorder %v3524_v8, 2 }
 0x1fb   :  { %v1113_v27 = vadd.f32 %v1112_v23, %v1049_v20  ;;  %v977_v36 = vadd.f32 %v976_v14, %v913_v29  ;;  %vm4675_vm13 = vcmp.eq.s32.totalorder %v3321_v42, 0  ;;  %vm1229_vm14 = vcmp.eq.s32.totalorder %v3549_v13, 1 }
 0x1fc   :  { %v843_v7 = vsel %vm4675_vm13, %v839_v33, 0.0  ;;  %vm1224_vm12 = vcmp.eq.s32.totalorder %v3549_v13, 0  ;;  %v1107_v51 = vsel %vm1106_vm3, %v3542_v62, 0.0  ;;  %v1040_v18 = vsel %vm1037_vm11, %v3617_v31, 0.0 }
 0x1fd   :  { %v3644_v22 = vmul.f32 %v3513_v45, %v2510_v40  ;;  %v844_v26 = vadd.f32 %v843_v7, %v779_v55  ;;  %v1108_v11 = vadd.f32 %v1107_v51, %v1044_v2  ;;  %v3647_v9 = vmul.f32 %v1157_v58, %v2581_v5 }
 0x1fe   :  { %v907_v19 = vsel %vm904_vm5, %v3582_v49, 0.0  ;;  %v794_v62 = vsel %vm791_vm1, %v775_v37, 0.0  ;;  %v1166_v53 = vsel %vm1165_vm15, %v1158_v56, 0.0  ;;  %v1161_v3 = vsel %vm1160_vm6, %v1158_v56, 0.0 }
 0x1ff   :  { %v908_v45 = vadd.f32 %v907_v19, %v844_v26  ;;  %vm4676_vm4 = vcmp.eq.s32.totalorder %v3321_v42, 3  ;;  %v1176_v35 = vsel %vm4527_vm10, %v1158_v56, 0.0  ;;  %vm1239_vm11 = vcmp.eq.s32.totalorder %v3549_v13, 3 }
 0x200   :  { %v858_v44 = vsel %vm4676_vm4, %v839_v33, 0.0  ;;  %v1041_v57 = vadd.f32 %v1040_v18, %v977_v36  ;;  %vm4677_vm5 = vcmp.eq.s32.totalorder %v3431_v54, 0  ;;  %v2075_v16 = vpop.eup %2074  ;;  %vm1234_vm1 = vcmp.eq.s32.totalorder %v3549_v13, 2 }
 0x201   :  { %v971_v61 = vsel %vm4677_vm5, %v3606_v48, 0.0  ;;  %v859_v60 = vadd.f32 %v858_v44, %v794_v62  ;;  %vm4678_vm13 = vcmp.eq.s32.totalorder %v3333_v17, 3  ;;  %vm4679_vm4 = vcmp.eq.s32.totalorder %v3241_v12, 2 }
 0x202   :  { %v972_v24 = vadd.f32 %v971_v61, %v908_v45  ;;  %v922_v58 = vsel %vm4678_vm13, %v3582_v49, 0.0  ;;  %v789_v25 = vsel %vm4679_vm4, %v775_v37, 0.0  ;;  %vm4680_vm10 = vcmp.eq.s32.totalorder %v3321_v42, 2 }
 0x203   :  { %v853_v20 = vsel %vm4680_vm10, %v839_v33, 0.0  ;;  %v1221_v10 = vmul.f32 %v2115_v39, %v2075_v16  ;;  %vm4681_vm5 = vcmp.eq.s32.totalorder %v3435_v47, 0  ;;  %v923_v2 = vadd.f32 %v922_v58, %v859_v60 }
 0x204   :  { %v1035_v29 = vsel %vm4681_vm5, %v3617_v31, 0.0  ;;  %v854_v55 = vadd.f32 %v853_v20, %v789_v25  ;;  %v1167_v23 = vadd.f32 %v1166_v53, %v1103_v43  ;;  %v1162_v14 = vadd.f32 %v1161_v3, %v1098_v6 }
 0x205   :  { %v1036_v36 = vadd.f32 %v1035_v29, %v972_v24  ;;  %v986_v7 = vsel %vm983_vm8, %v3606_v48, 0.0  ;;  %v1222_v12 = vmul.f32 %v1221_v10, %v2666_v1  ;;  %vm4682_vm10 = vcmp.eq.s32.totalorder %v3467_v32, 1 }
 0x206   :  { %v1104_v42 = vsel %vm4682_vm10, %v3644_v22, 0.0  ;;  %v987_v37 = vadd.f32 %v986_v7, %v923_v2  ;;  %vm4683_vm13 = vcmp.eq.s32.totalorder %v3333_v17, 2  ;;  %v1177_v51 = vadd.f32 %v1176_v35, %v1113_v27 }
 0x207   :  { %v917_v33 = vsel %vm4683_vm13, %v3582_v49, 0.0  ;;  %v1171_v43 = vsel %vm1170_vm9, %v1158_v56, 0.0  ;;  %v1105_v6 = vadd.f32 %v1104_v42, %v1041_v57  ;;  %v1230_v26 = vsel %vm1229_vm14, %v1222_v12, 0.0 }
 0x208   :  { %v918_v18 = vadd.f32 %v917_v33, %v854_v55  ;;  %v1225_v19 = vsel %vm1224_vm12, %v1222_v12, 0.0  ;;  %v1172_v62 = vadd.f32 %v1171_v43, %v1108_v11  ;;  %v1099_v53 = vsel %vm1096_vm7, %v3644_v22, 0.0 }
 0x209   :  { %v1231_v3 = vadd.f32 %v1230_v26, %v1167_v23  ;;  %v1226_v17 = vadd.f32 %v1225_v19, %v1162_v14  ;;  %v1100_v49 = vadd.f32 %v1099_v53, %v1036_v36  ;;  %v1050_v56 = vsel %vm1047_vm0, %v3617_v31, 0.0 }
 0x20a   :  { %v1168_v27 = vsel %vm1165_vm15, %v3647_v9, 0.0  ;;  %v1163_v45 = vsel %vm1160_vm6, %v3647_v9, 0.0  ;;  %v1051_v11 = vadd.f32 %v1050_v56, %v987_v37  ;;  %vm4684_vm8 = vcmp.eq.s32.totalorder %v3431_v54, 2 }
 0x20b   :  { %v981_v44 = vsel %vm4684_vm8, %v3606_v48, 0.0  ;;  %1253 = vadd.xlane.f32.xlu1 %v1231_v3  ;;  %1244 = vadd.xlane.f32.xlu0 %v1226_v17  ;;  %v1240_v35 = vsel %vm1239_vm11, %v1222_v12, 0.0  ;;  %v1169_v57 = vadd.f32 %v1168_v27, %v1105_v6  ;;  %v1114_v61 = vsel %vm1111_vm2, %v3644_v22, 0.0 }
 0x20c   :  { %v982_v60 = vadd.f32 %v981_v44, %v918_v18  ;;  %v1241_v16 = vadd.f32 %v1240_v35, %v1177_v51  ;;  %v1235_v24 = vsel %vm1234_vm1, %v1222_v12, 0.0  ;;  %v1223_v58 = vmul.f32 %v1221_v10, %v2654_v63 }
 0x20d   :  { %vm4685_vm6 = vcmp.eq.s32.totalorder %v3435_v47, 2  ;;  %v1236_v48 = vadd.f32 %v1235_v24, %v1172_v62  ;;  %v1164_v25 = vadd.f32 %v1163_v45, %v1100_v49  ;;  %v1115_v20 = vadd.f32 %v1114_v61, %v1051_v11 }
 0x20e   :  { %v1045_v54 = vsel %vm4685_vm6, %v3617_v31, 0.0  ;;  %v1109_v29 = vsel %vm1106_vm3, %v3644_v22, 0.0  ;;  %v1232_v55 = vsel %vm1229_vm14, %v1223_v58, 0.0  ;;  %v1227_v10 = vsel %vm1224_vm12, %v1223_v58, 0.0 }
 0x20f   :  { %v1046_v39 = vadd.f32 %v1045_v54, %v982_v60  ;;  %1271 = vadd.xlane.f32.xlu1 %v1241_v16  ;;  %1262 = vadd.xlane.f32.xlu0 %v1236_v48  ;;  %vm4686_vm0 = vcmp.eq.s32.totalorder %v3524_v8, 3  ;;  %v1173_v31 = vsel %vm1170_vm9, %v3647_v9, 0.0  ;;  %v1233_v23 = vadd.f32 %v1232_v55, %v1169_v57 }
 0x210   :  { %v1178_v47 = vsel %vm4686_vm0, %v3647_v9, 0.0  ;;  %v1228_v32 = vadd.f32 %v1227_v10, %v1164_v25  ;;  %v1242_v36 = vsel %vm1239_vm11, %v1223_v58, 0.0  ;;  %v1237_v7 = vsel %vm1234_vm1, %v1223_v58, 0.0 }
 0x211   :  { %v1110_v2 = vadd.f32 %v1109_v29, %v1046_v39  ;;  %v1179_v22 = vadd.f32 %v1178_v47, %v1115_v20 }
 0x213   :  { %v1174_v14 = vadd.f32 %v1173_v31, %v1110_v2  ;;  %1289 = vadd.xlane.f32.xlu1 %v1233_v23  ;;  %1280 = vadd.xlane.f32.xlu0 %v1228_v32  ;;  %v1243_v12 = vadd.f32 %v1242_v36, %v1179_v22 }
 0x215   :  { %v1238_v42 = vadd.f32 %v1237_v7, %v1174_v14 }
 0x217   :  { %1307 = vadd.xlane.f32.xlu1 %v1243_v12  ;;  %1298 = vadd.xlane.f32.xlu0 %v1238_v42 }
 0x298   :  { %v1254_v37 = vpop.xlane.xlu1 %1253  ;;  %v1245_v33 = vpop.xlane.xlu0 %1244 }
 0x299   :  { %v1255_v8 = vrot.slane %v1254_v37, 4  ;;  %v1246_v9 = vrot.slane %v1245_v33, 4 }
 0x29b   :  { %v1256_v51 = vadd.f32 %v1255_v8, %v1254_v37  ;;  %v1247_v43 = vadd.f32 %v1246_v9, %v1245_v33 }
 0x29c   :  { %v1272_v6 = vpop.xlane.xlu1 %1271  ;;  %v1263_v18 = vpop.xlane.xlu0 %1262 }
 0x29d   :  { %v1257_v26 = vrot.slane %v1256_v51, 2  ;;  %v1248_v19 = vrot.slane %v1247_v43, 2  ;;  %v1273_v62 = vrot.slane %v1272_v6, 4  ;;  %v1264_v53 = vrot.slane %v1263_v18, 4 }
 0x29f   :  { %v1274_v3 = vadd.f32 %v1273_v62, %v1272_v6  ;;  %v1265_v17 = vadd.f32 %v1264_v53, %v1263_v18  ;;  %v1249_v13 = vadd.f32 %v1248_v19, %v1247_v43  ;;  %v1258_v49 = vadd.f32 %v1257_v26, %v1256_v51 }
 0x2a0   :  { %v1290_v56 = vpop.xlane.xlu1 %1289  ;;  %v1281_v27 = vpop.xlane.xlu0 %1280 }
 0x2a1   :  { %v1275_v45 = vrot.slane %v1274_v3, 2  ;;  %v1266_v11 = vrot.slane %v1265_v17, 2  ;;  %v1291_v44 = vrot.slane %v1290_v56, 4  ;;  %v1282_v35 = vrot.slane %v1281_v27, 4 }
 0x2a2   :  { %v1250_v57 = vrot.slane %v1249_v13, 1  ;;  %v1259_v61 = vrot.slane %v1258_v49, 1 }
 0x2a3   :  { %v1292_v60 = vadd.f32 %v1291_v44, %v1290_v56  ;;  %v1283_v16 = vadd.f32 %v1282_v35, %v1281_v27  ;;  %v1267_v24 = vadd.f32 %v1266_v11, %v1265_v17  ;;  %v1276_v58 = vadd.f32 %v1275_v45, %v1274_v3 }
 0x2a4   :  { %v1308_v54 = vpop.xlane.xlu1 %1307  ;;  %v1299_v48 = vpop.xlane.xlu0 %1298  ;;  %v1251_v25 = vadd.f32 %v1250_v57, %v1249_v13  ;;  %v1260_v20 = vadd.f32 %v1259_v61, %v1258_v49 }
 0x2a5   :  { %v1293_v39 = vrot.slane %v1292_v60, 2  ;;  %v1284_v29 = vrot.slane %v1283_v16, 2  ;;  %v1309_v2 = vrot.slane %v1308_v54, 4  ;;  %v1300_v55 = vrot.slane %v1299_v48, 4 }
 0x2a6   :  { %1973 = vpush %v1251_v25  ;;  %v1268_v10 = vrot.slane %v1267_v24, 1  ;;  %v1277_v47 = vrot.slane %v1276_v58, 1 }
 0x2a7   :  { %v1310_v31 = vadd.f32 %v1309_v2, %v1308_v54  ;;  %v1301_v23 = vadd.f32 %v1300_v55, %v1299_v48  ;;  %1975 = vpush %v1260_v20  ;;  %v1285_v32 = vadd.f32 %v1284_v29, %v1283_v16  ;;  %v1294_v22 = vadd.f32 %v1293_v39, %v1292_v60 }
 0x2a8   :  { %v1269_v14 = vadd.f32 %v1268_v10, %v1267_v24  ;;  %v1278_v36 = vadd.f32 %v1277_v47, %v1276_v58 }
 0x2a9   :  { %v1311_v7 = vrot.slane %v1310_v31, 2  ;;  %v1302_v12 = vrot.slane %v1301_v23, 2  ;;  %v1286_v42 = vrot.slane %v1285_v32, 1  ;;  %v1295_v37 = vrot.slane %v1294_v22, 1 }
 0x2aa   :  { %1977 = vpush %v1269_v14 }
 0x2ab   :  { %1979 = vpush %v1278_v36  ;;  %v1287_v33 = vadd.f32 %v1286_v42, %v1285_v32  ;;  %v1296_v8 = vadd.f32 %v1295_v37, %v1294_v22  ;;  %v1303_v9 = vadd.f32 %v1302_v12, %v1301_v23  ;;  %v1312_v51 = vadd.f32 %v1311_v7, %v1310_v31 }
 0x2ad   :  { %1981 = vpush %v1287_v33  ;;  %v1304_v43 = vrot.slane %v1303_v9, 1  ;;  %v1313_v6 = vrot.slane %v1312_v51, 1 }
 0x2ae   :  { %1983 = vpush %v1296_v8 }
 0x2af   :  { %v1305_v18 = vadd.f32 %v1304_v43, %v1303_v9  ;;  %v1314_v26 = vadd.f32 %v1313_v6, %v1312_v51 }
 0x2b1   :  { %1985 = vpush %v1305_v18 }
 0x2b2   :  { %1987 = vpush %v1314_v26 }
 0x2d7   :  { %s1974_s14 = spop %1973 }
 0x2d8   :  { %v3736_v19 = vstv %s1974_s14  ;;  %s1976_s15 = spop %1975 }
 0x2d9   :  { %v1317_v62 = vsub.f32 %v3736_v19, %v4656_v0  ;;  %v3740_v53 = vstv %s1976_s15  ;;  %v1388_v3 = vsub.f32 %v3736_v19, %v4659_v59  ;;  %v1452_v17 = vsub.f32 %v3736_v19, %v4662_v41 }
 0x2da   :  { %v1516_v13 = vsub.f32 %v3736_v19, %v4665_v50  ;;  %v1580_v49 = vsub.f32 %v3736_v19, %v4670_v46  ;;  %v1644_v56 = vsub.f32 %v3736_v19, %v4671_v34  ;;  %v1325_v27 = vsub.f32 %v3740_v53, %v4656_v0 }
 0x2db   :  { %s1978_s16 = spop %1977  ;;  %v1320_v45 = vmul.f32 %v1317_v62, %v1317_v62  ;;  %v3758_v11 = vsub.f32 %v3736_v19, %v2586_v4  ;;  %v1394_v44 = vsub.f32 %v3740_v53, %v4659_v59  ;;  %v1390_v57 = vmul.f32 %v1388_v3, %v1388_v3 }
 0x2dc   :  { %s3750_s17 = spop %1979  ;;  %v3762_v35 = vstv %s1978_s16  ;;  %v1454_v61 = vmul.f32 %v1452_v17, %v1452_v17  ;;  %v1458_v60 = vsub.f32 %v3740_v53, %v4662_v41  ;;  %v1522_v16 = vsub.f32 %v3740_v53, %v4665_v50 }
 0x2dd   :  { %v3768_v24 = vmul.f32 %v1516_v13, %v1516_v13  ;;  %v3770_v58 = vmul.f32 %v1580_v49, %v1580_v49  ;;  %v1586_v54 = vsub.f32 %v3740_v53, %v4670_v46  ;;  %v3776_v25 = vmul.f32 %v1644_v56, %v1644_v56 }
 0x2de   :  { %s1982_s18 = spop %1981  ;;  %v1328_v20 = vmul.f32 %v1325_v27, %v1325_v27  ;;  %v1650_v39 = vsub.f32 %v3740_v53, %v4671_v34  ;;  %v1336_v29 = vsub.f32 %v3762_v35, %v4656_v0  ;;  %v1396_v2 = vmul.f32 %v1394_v44, %v1394_v44 }
 0x2df   :  { %v3774_v48 = vstv %s1982_s18  ;;  %v1403_v55 = vsub.f32 %v3762_v35, %v4659_v59  ;;  %v1467_v10 = vsub.f32 %v3762_v35, %v4662_v41  ;;  %v1531_v47 = vsub.f32 %v3762_v35, %v4665_v50  ;;  %s1984_s19 = spop %1983 }
 0x2e0   :  { %v3788_v31 = vmul.f32 %v1458_v60, %v1458_v60  ;;  %v3790_v23 = vmul.f32 %v1522_v16, %v1522_v16  ;;  %v3794_v32 = vsub.f32 %v3740_v53, %v2586_v4  ;;  %v1319_v22 = vsub.f32 %v3774_v48, %v4672_v38 }
 0x2e1   :  { %v3798_v14 = vmul.f32 %v1586_v54, %v1586_v54  ;;  %v1595_v36 = vsub.f32 %v3762_v35, %v4670_v46  ;;  %v1659_v7 = vsub.f32 %v3762_v35, %v4671_v34  ;;  %v3805_v12 = vstv %s3750_s17 }
 0x2e2   :  { %v3807_v42 = vmul.f32 %v1650_v39, %v1650_v39  ;;  %v1339_v37 = vmul.f32 %v1336_v29, %v1336_v29  ;;  %v1389_v33 = vsub.f32 %v3774_v48, %v4673_v21  ;;  %v3811_v8 = vstv %s1984_s19  ;;  %s1986_s20 = spop %1985 }
 0x2e3   :  { %v1405_v9 = vmul.f32 %v1403_v55, %v1403_v55  ;;  %v3813_v51 = vmul.f32 %v1467_v10, %v1467_v10  ;;  %v3815_v43 = vmul.f32 %v1531_v47, %v1531_v47  ;;  %v1453_v6 = vsub.f32 %v3774_v48, %v4674_v52  ;;  %s1988_s0 = spop %1987 }
 0x2e4   :  { %v1347_v18 = vsub.f32 %v3805_v12, %v4656_v0  ;;  %v1321_v26 = vmul.f32 %v1319_v22, %v1319_v22  ;;  %v1327_v62 = vsub.f32 %v3811_v8, %v4672_v38  ;;  %v1395_v3 = vsub.f32 %v3811_v8, %v4673_v21 }
 0x2e5   :  { %v3825_v17 = vmul.f32 %v1595_v36, %v1595_v36  ;;  %v3827_v13 = vmul.f32 %v1659_v7, %v1659_v7  ;;  %v1412_v49 = vsub.f32 %v3805_v12, %v4659_v59  ;;  %v1517_v56 = vsub.f32 %v3774_v48, %v2358_v30 }
 0x2e6   :  { %v1476_v27 = vsub.f32 %v3805_v12, %v4662_v41  ;;  %v1391_v44 = vmul.f32 %v1389_v33, %v1389_v33  ;;  %v1329_v60 = vmul.f32 %v1327_v62, %v1327_v62  ;;  %v1397_v16 = vmul.f32 %v1395_v3, %v1395_v3 }
 0x2e7   :  { %v1540_v54 = vsub.f32 %v3805_v12, %v4665_v50  ;;  %v3839_v39 = vsub.f32 %v3805_v12, %v4670_v46  ;;  %v1455_v29 = vmul.f32 %v1453_v6, %v1453_v6  ;;  %v1459_v55 = vsub.f32 %v3811_v8, %v4674_v52 }
 0x2e8   :  { %v1350_v10 = vmul.f32 %v1347_v18, %v1347_v18  ;;  %v3845_v47 = vsub.f32 %v3805_v12, %v4671_v34  ;;  %v1322_v22 = vadd.f32 %v1321_v26, %v1320_v45  ;;  %v1330_v36 = vadd.f32 %v1329_v60, %v1328_v20 }
 0x2e9   :  { %v1414_v7 = vmul.f32 %v1412_v49, %v1412_v49  ;;  %v1519_v33 = vmul.f32 %v1517_v56, %v1517_v56  ;;  %v1523_v62 = vsub.f32 %v3811_v8, %v2358_v30  ;;  %v3849_v3 = vstv %s1986_s20 }
 0x2ea   :  { %v1478_v46 = vmul.f32 %v1476_v27, %v1476_v27  ;;  %v1392_v50 = vadd.f32 %v1391_v44, %v1390_v57  ;;  %v1398_v6 = vadd.f32 %v1397_v16, %v1396_v2  ;;  %v1338_v41 = vsub.f32 %v3849_v3, %v4672_v38 }
 0x2eb   :  { %v3853_v18 = vadd.f32 %v1455_v29, %v1454_v61  ;;  %v1461_v59 = vmul.f32 %v1459_v55, %v1459_v55  ;;  %v1404_v45 = vsub.f32 %v3849_v3, %v4673_v21  ;;  %v1468_v20 = vsub.f32 %v3849_v3, %v4674_v52 }
 0x2ec   :  { %v3859_v26 = vmul.f32 %v1540_v54, %v1540_v54  ;;  %v1323_v49 = vmax.f32 %v1322_v22, 1.0  ;;  %v1331_v56 = vmax.f32 %v1330_v36, 1.0  ;;  %v1340_v27 = vmul.f32 %v1338_v41, %v1338_v41 }
 0x2ed   :  { %v3862_v57 = vadd.f32 %v1519_v33, %v3768_v24  ;;  %v1581_v61 = vsub.f32 %v3774_v48, %v2426_v28  ;;  %v1525_v2 = vmul.f32 %v1523_v62, %v1523_v62  ;;  %v1406_v44 = vmul.f32 %v1404_v45, %v1404_v45 }
 0x2ee   :  { %v1393_v60 = vmax.f32 %v1392_v50, 1.0  ;;  %v1399_v16 = vmax.f32 %v1398_v6, 1.0  ;;  %v1341_v29 = vadd.f32 %v1340_v27, %v1339_v37  ;;  %v3866_v55 = vstv %s1988_s0 }
 0x2ef   :  { %v1457_v34 = vmax.f32 %v3853_v18, 1.0  ;;  %v1462_v54 = vadd.f32 %v1461_v59, %v3788_v31  ;;  %v1407_v22 = vadd.f32 %v1406_v44, %v1405_v9  ;;  %v1470_v36 = vmul.f32 %v1468_v20, %v1468_v20 }
 0x2f0   :  { %vm3870_vm7 = vcmp.lt.f32.partialorder %v1331_v56, %v1323_v49  ;;  %v1342_v24 = vmax.f32 %v1341_v29, 1.0  ;;  %v1349_v33 = vsub.f32 %v3866_v55, %v4672_v38  ;;  %v1413_v50 = vsub.f32 %v3866_v55, %v4673_v21 }
 0x2f1   :  { %v1521_v37 = vmax.f32 %v3862_v57, 1.0  ;;  %v1526_v62 = vadd.f32 %v1525_v2, %v3790_v23  ;;  %v1532_v59 = vsub.f32 %v3849_v3, %v2358_v30  ;;  %v1477_v31 = vsub.f32 %v3866_v55, %v4674_v52 }
 0x2f2   :  { %vm3884_vm15 = vcmp.lt.f32.partialorder %v1399_v16, %v1393_v60  ;;  %v1408_v6 = vmax.f32 %v1407_v22, 1.0  ;;  %v1351_v18 = vmul.f32 %v1349_v33, %v1349_v33  ;;  %v1415_v45 = vmul.f32 %v1413_v50, %v1413_v50 }
 0x2f3   :  { %v1463_v20 = vmax.f32 %v1462_v54, 1.0  ;;  %v1587_v27 = vsub.f32 %v3811_v8, %v2426_v28  ;;  %v1471_v57 = vadd.f32 %v1470_v36, %v3813_v51  ;;  %v1334_v23 = vsel %vm3870_vm7, %v1331_v56, %v1323_v49 }
 0x2f4   :  { %v1352_v2 = vadd.f32 %v1351_v18, %v1350_v10  ;;  %v1416_v44 = vadd.f32 %v1415_v45, %v1414_v7  ;;  %v1479_v29 = vmul.f32 %v1477_v31, %v1477_v31  ;;  %vm3893_vm12 = vcmp.lt.f32.partialorder %v1342_v24, %v1334_v23 }
 0x2f5   :  { %v1527_v21 = vmax.f32 %v1526_v62, 1.0  ;;  %v1534_v22 = vmul.f32 %v1532_v59, %v1532_v59  ;;  %v1345_v54 = vsel %vm3893_vm12, %v1342_v24, %v1334_v23  ;;  %v1402_v33 = vsel %vm3884_vm15, %v1399_v16, %v1393_v60 }
 0x2f6   :  { %v1353_v50 = vmax.f32 %v1352_v2, 1.0  ;;  %v1417_v51 = vmax.f32 %v1416_v44, 1.0  ;;  %v1541_v49 = vsub.f32 %v3866_v55, %v2358_v30  ;;  %vm3903_vm2 = vcmp.lt.f32.partialorder %v1408_v6, %v1402_v33 }
 0x2f7   :  { %v1606_v7 = vmul.f32 %v3839_v39, %v3839_v39  ;;  %v1472_v56 = vmax.f32 %v1471_v57, 1.0  ;;  %v1596_v36 = vsub.f32 %v3849_v3, %v2426_v28  ;;  %v1411_v24 = vsel %vm3903_vm2, %v1408_v6, %v1402_v33 }
 0x2f8   :  { %v1480_v60 = vadd.f32 %v1479_v29, %v1478_v46  ;;  %vm3913_vm3 = vcmp.lt.f32.partialorder %v1353_v50, %v1345_v54  ;;  %vm3917_vm9 = vcmp.lt.f32.partialorder %v1417_v51, %v1411_v24  ;;  %vm3921_vm14 = vcmp.lt.f32.partialorder %v1463_v20, %v1457_v34 }
 0x2f9   :  { %v1583_v39 = vmul.f32 %v1581_v61, %v1581_v61  ;;  %v1535_v31 = vadd.f32 %v1534_v22, %v3815_v43  ;;  %v1356_v18 = vsel %vm3913_vm3, %v1353_v50, %v1345_v54  ;;  %v3930_v46 = vsel %vm3917_vm9, %v1417_v51, %v1411_v24 }
 0x2fa   :  { %v1589_v6 = vmul.f32 %v1587_v27, %v1587_v27  ;;  %v1543_v45 = vmul.f32 %v1541_v49, %v1541_v49  ;;  %2076 = vrsqrt.f32 %v1356_v18  ;;  %vm3932_vm11 = vcmp.lt.f32.partialorder %v1527_v21, %v1521_v37 }
 0x2fb   :  { %v1645_v23 = vsub.f32 %v3774_v48, %v2510_v40  ;;  %v1651_v43 = vsub.f32 %v3811_v8, %v2510_v40  ;;  %2078 = vrsqrt.f32 %v3930_v46  ;;  %v1466_v61 = vsel %vm3921_vm14, %v1463_v20, %v1457_v34 }
 0x2fc   :  { %v1598_v2 = vmul.f32 %v1596_v36, %v1596_v36  ;;  %v1481_v44 = vmax.f32 %v1480_v60, 1.0  ;;  %v1605_v27 = vsub.f32 %v3866_v55, %v2426_v28  ;;  %vm3945_vm1 = vcmp.lt.f32.partialorder %v1472_v56, %v1466_v61 }
 0x2fd   :  { %v1660_v22 = vsub.f32 %v3849_v3, %v2510_v40  ;;  %v1475_v54 = vsel %vm3945_vm1, %v1472_v56, %v1466_v61  ;;  %v1530_v33 = vsel %vm3932_vm11, %v1527_v21, %v1521_v37  ;;  %v1536_v50 = vmax.f32 %v1535_v31, 1.0 }
 0x2fe   :  { %vm3955_vm4 = vcmp.lt.f32.partialorder %v1481_v44, %v1475_v54  ;;  %v1544_v20 = vadd.f32 %v1543_v45, %v3859_v26  ;;  %v1584_v51 = vadd.f32 %v1583_v39, %v3770_v58  ;;  %v1590_v49 = vadd.f32 %v1589_v6, %v3798_v14 }
 0x2ff   :  { %v1647_v36 = vmul.f32 %v1645_v23, %v1645_v23  ;;  %v1653_v24 = vmul.f32 %v1651_v43, %v1651_v43  ;;  %v3964_v60 = vsel %vm3955_vm4, %v1481_v44, %v1475_v54  ;;  %vm3966_vm5 = vcmp.lt.f32.partialorder %v1536_v50, %v1530_v33 }
 0x300   :  { %v1709_v21 = vsub.f32 %v3774_v48, %v2581_v5  ;;  %v1607_v37 = vmul.f32 %v1605_v27, %v1605_v27  ;;  %2080 = vrsqrt.f32 %v3964_v60  ;;  %v1599_v58 = vadd.f32 %v1598_v2, %v3825_v17 }
 0x301   :  { %v3976_v14 = vsub.f32 %v3811_v8, %v2581_v5  ;;  %v3981_v26 = vsel %vm3870_vm7, 1, %v4639_v15  ;;  %v1539_v39 = vsel %vm3966_vm5, %v1536_v50, %v1530_v33  ;;  %v1545_v31 = vmax.f32 %v1544_v20, 1.0 }
 0x302   :  { %v1662_v6 = vmul.f32 %v1660_v22, %v1660_v22  ;;  %v1669_v45 = vsub.f32 %v3866_v55, %v2510_v40  ;;  %v1585_v23 = vmax.f32 %v1584_v51, 1.0  ;;  %v1591_v43 = vmax.f32 %v1590_v49, 1.0 }
 0x303   :  { %vm1359_vm10 = vcmp.eq.f32.partialorder %v1356_v18, inf  ;;  %vm3987_vm13 = vcmp.lt.f32.partialorder %v1545_v31, %v1539_v39  ;;  %v1648_v61 = vadd.f32 %v1647_v36, %v3776_v25  ;;  %v1654_v41 = vadd.f32 %v1653_v24, %v3807_v42 }
 0x304   :  { %v2077_v2 = vpop.eup %2076  ;;  %v3995_v44 = vsel %vm3987_vm13, %v1545_v31, %v1539_v39  ;;  %vm3997_vm8 = vcmp.lt.f32.partialorder %v1591_v43, %v1585_v23  ;;  %v1600_v22 = vmax.f32 %v1599_v58, 1.0  ;;  %v1608_v54 = vadd.f32 %v1607_v37, %v1606_v7 }
 0x305   :  { %v2079_v33 = vpop.eup %2078  ;;  %v1358_v50 = vmul.f32 %v2077_v2, %v1356_v18  ;;  %vm1361_vm6 = vcmp.eq.f32.partialorder %v1356_v18, 0.0  ;;  %v1362_v20 = vand.u32 2147483648, %v1356_v18  ;;  %2082 = vrsqrt.f32 %v3995_v44 }
 0x306   :  { %v1422_v25 = vmul.f32 %v2079_v33, %v3930_v46  ;;  %vm1423_vm0 = vcmp.eq.f32.partialorder %v3930_v46, inf  ;;  %v1426_v42 = vand.u32 2147483648, %v3930_v46  ;;  %v1663_v51 = vadd.f32 %v1662_v6, %v3827_v13 }
 0x307   :  { %v1360_v49 = vsel %vm1359_vm10, %v1356_v18, %v1358_v50  ;;  %v1594_v36 = vsel %vm3997_vm8, %v1591_v43, %v1585_v23  ;;  %v1649_v7 = vmax.f32 %v1648_v61, 1.0  ;;  %v1655_v24 = vmax.f32 %v1654_v41, 1.0 }
 0x308   :  { %v1363_v37 = vsel %vm1361_vm6, %v1362_v20, %v1360_v49  ;;  %v1424_v58 = vsel %vm1423_vm0, %v3930_v46, %v1422_v25  ;;  %vm4010_vm7 = vcmp.lt.f32.partialorder %v1600_v22, %v1594_v36  ;;  %v1609_v31 = vmax.f32 %v1608_v54, 1.0 }
 0x309   :  { %v1344_v2 = vsel %vm3893_vm12, 2, %v3981_v26  ;;  %v1401_v13 = vsel %vm3884_vm15, 1, %v4639_v15  ;;  %vm1425_vm10 = vcmp.eq.f32.partialorder %v3930_v46, 0.0  ;;  %v1603_v18 = vsel %vm4010_vm7, %v1600_v22, %v1594_v36 }
 0x30a   :  { %v2081_v6 = vpop.eup %2080  ;;  %v1427_v23 = vsel %vm1425_vm10, %v1426_v42, %v1424_v58  ;;  %vm4023_vm6 = vcmp.lt.f32.partialorder %v1609_v31, %v1603_v18  ;;  %vm4027_vm0 = vcmp.lt.f32.partialorder %v1655_v24, %v1649_v7  ;;  %v1664_v52 = vmax.f32 %v1663_v51, 1.0 }
 0x30b   :  { %2084 = vrcp.f32 %v1363_v37  ;;  %v1410_v9 = vsel %vm3903_vm2, 2, %v1401_v13  ;;  %v1486_v46 = vmul.f32 %v2081_v6, %v3964_v60  ;;  %v4036_v26 = vsel %vm4023_vm6, %v1609_v31, %v1603_v18 }
 0x30c   :  { %v1465_v41 = vsel %vm3921_vm14, 1, %v4639_v15  ;;  %vm1487_vm15 = vcmp.eq.f32.partialorder %v3964_v60, inf  ;;  %v1529_v22 = vsel %vm3932_vm11, 1, %v4639_v15  ;;  %2086 = vrsqrt.f32 %v4036_v26 }
 0x30d   :  { %2088 = vrcp.f32 %v1427_v23  ;;  %v1658_v10 = vsel %vm4027_vm0, %v1655_v24, %v1649_v7  ;;  %v1670_v54 = vmul.f32 %v3845_v47, %v3845_v47  ;;  %v1671_v33 = vmul.f32 %v1669_v45, %v1669_v45 }
 0x30e   :  { %v1488_v50 = vsel %vm1487_vm15, %v3964_v60, %v1486_v46  ;;  %vm4051_vm12 = vcmp.lt.f32.partialorder %v1664_v52, %v1658_v10  ;;  %v1710_v57 = vmul.f32 %v3758_v11, %v3758_v11  ;;  %v1711_v20 = vmul.f32 %v1709_v21, %v1709_v21 }
 0x30f   :  { %v2083_v25 = vpop.eup %2082  ;;  %vm1489_vm2 = vcmp.eq.f32.partialorder %v3964_v60, 0.0  ;;  %v1490_v42 = vand.u32 2147483648, %v3964_v60  ;;  %v1667_v51 = vsel %vm4051_vm12, %v1664_v52, %v1658_v10  ;;  %v1672_v47 = vadd.f32 %v1671_v33, %v1670_v54 }
 0x310   :  { %v1550_v45 = vmul.f32 %v2083_v25, %v3995_v44  ;;  %v1712_v49 = vadd.f32 %v1711_v20, %v1710_v57  ;;  %v1716_v36 = vmul.f32 %v3794_v32, %v3794_v32  ;;  %v1717_v7 = vmul.f32 %v3976_v14, %v3976_v14 }
 0x311   :  { %v1491_v11 = vsel %vm1489_vm2, %v1490_v42, %v1488_v50  ;;  %v1673_v21 = vmax.f32 %v1672_v47, 1.0  ;;  %v1723_v24 = vsub.f32 %v3762_v35, %v2586_v4  ;;  %v1724_v60 = vsub.f32 %v3849_v3, %v2581_v5 }
 0x312   :  { %v1474_v37 = vsel %vm3945_vm1, 2, %v1465_v41  ;;  %v1538_v58 = vsel %vm3966_vm5, 2, %v1529_v22  ;;  %vm1551_vm14 = vcmp.eq.f32.partialorder %v3995_v44, inf  ;;  %v1718_v32 = vadd.f32 %v1717_v7, %v1716_v36 }
 0x313   :  { %v1552_v31 = vsel %vm1551_vm14, %v3995_v44, %v1550_v45  ;;  %v1554_v14 = vand.u32 2147483648, %v3995_v44  ;;  %vm4077_vm11 = vcmp.lt.f32.partialorder %v1673_v21, %v1667_v51  ;;  %v1726_v18 = vmul.f32 %v1724_v60, %v1724_v60 }
 0x314   :  { %2090 = vrcp.f32 %v1491_v11  ;;  %v4083_v29 = vsel %vm4077_vm11, %v1673_v21, %v1667_v51  ;;  %v1713_v6 = vmax.f32 %v1712_v49, 1.0  ;;  %v1733_v56 = vsub.f32 %v3866_v55, %v2581_v5  ;;  %v2117_v51 = vld [vmem:[#allocation6 + $0x8] sm:$0xff] }
 0x315   :  { %v2085_v23 = vpop.eup %2084  ;;  %vm1553_vm1 = vcmp.eq.f32.partialorder %v3995_v44, 0.0  ;;  %2092 = vrsqrt.f32 %v4083_v29  ;;  %v1725_v52 = vmul.f32 %v1723_v24, %v1723_v24  ;;  %v1732_v46 = vsub.f32 %v3805_v12, %v2586_v4 }
 0x316   :  { %v2087_v41 = vpop.eup %2086  ;;  %v4093_v22 = vsel %vm3913_vm3, 3, %v1344_v2  ;;  %v4097_v10 = vsel %vm3917_vm9, 3, %v1410_v9  ;;  %v1555_v54 = vsel %vm1553_vm1, %v1554_v14, %v1552_v31  ;;  %v1719_v33 = vmax.f32 %v1718_v32, 1.0  ;;  %v2116_v9 = vld [vmem:[#allocation6] sm:$0xff]  ;;  %v4727_v14 = vld [vmem:[#allocation14_spill] sm:$0xff] }
 0x317   :  { %v2089_v50 = vpop.eup %2088  ;;  %v4101_v44 = vsel %vm3955_vm4, 3, %v1474_v37  ;;  %v1614_v57 = vmul.f32 %v2087_v41, %v4036_v26  ;;  %v1727_v20 = vadd.f32 %v1726_v18, %v1725_v52  ;;  %v4106_v25 = vsel %vm3987_vm13, 3, %v1538_v58 }
 0x318   :  { %vm1615_vm3 = vcmp.eq.f32.partialorder %v4036_v26, inf  ;;  %vm4109_vm5 = vcmp.lt.f32.partialorder %v1719_v33, %v1713_v6  ;;  %v1735_v62 = vmul.f32 %v1733_v56, %v1733_v56  ;;  %vm1373_vm9 = vcmp.eq.s32.totalorder %v4093_v22, 1 }
 0x319   :  { %vm1437_vm10 = vcmp.eq.s32.totalorder %v4097_v10, 1  ;;  %2094 = vrcp.f32 %v1555_v54  ;;  %v1616_v34 = vsel %vm1615_vm3, %v4036_v26, %v1614_v57  ;;  %v1734_v2 = vmul.f32 %v1732_v46, %v1732_v46  ;;  %v2118_v57 = vld [vmem:[#allocation6 + $0x10] sm:$0xff] }
 0x31a   :  { %v1772_v17 = vsub.f32 %v3736_v19, %v2666_v1  ;;  %v4118_v42 = vmul.f32 %v2116_v9, %v2085_v23  ;;  %v4120_v47 = vmul.f32 %v2117_v51, %v2089_v50  ;;  %v1618_v45 = vand.u32 2147483648, %v4036_v26 }
 0x31b   :  { %v1728_v49 = vmax.f32 %v1727_v20, 1.0  ;;  %vm1617_vm4 = vcmp.eq.f32.partialorder %v4036_v26, 0.0  ;;  %v1722_v36 = vsel %vm4109_vm5, %v1719_v33, %v1713_v6  ;;  %v1736_v7 = vadd.f32 %v1735_v62, %v1734_v2 }
 0x31c   :  { %v1773_v11 = vsub.f32 %v3774_v48, %v2654_v63  ;;  %v1619_v21 = vsel %vm1617_vm4, %v1618_v45, %v1616_v34  ;;  %v1778_v24 = vsub.f32 %v3740_v53, %v2666_v1  ;;  %v1779_v60 = vsub.f32 %v3811_v8, %v2654_v63 }
 0x31d   :  { %vm4128_vm13 = vcmp.lt.f32.partialorder %v1728_v49, %v1722_v36  ;;  %v1737_v37 = vmax.f32 %v1736_v7, 1.0  ;;  %v1774_v58 = vmul.f32 %v1772_v17, %v1772_v17  ;;  %v4140_v48 = vmul.f32 %v4118_v42, %v4656_v0 }
 0x31e   :  { %v1731_v26 = vsel %vm4128_vm13, %v1728_v49, %v1722_v36  ;;  %v1775_v32 = vmul.f32 %v1773_v11, %v1773_v11  ;;  %v2091_v31 = vpop.eup %2090  ;;  %v4144_v18 = vmul.f32 %v4120_v47, %v4727_v14  ;;  %v1780_v6 = vmul.f32 %v1778_v24, %v1778_v24  ;;  %v2119_v24 = vld [vmem:[#allocation6 + $0x18] sm:$0xff] }
 0x31f   :  { %v1781_v53 = vmul.f32 %v1779_v60, %v1779_v60  ;;  %v2093_v56 = vpop.eup %2092  ;;  %v1593_v8 = vsel %vm3997_vm8, 1, %v4639_v15  ;;  %2096 = vrcp.f32 %v1619_v21  ;;  %vm4149_vm15 = vcmp.lt.f32.partialorder %v1737_v37, %v1731_v26  ;;  %v4730_v21 = vld [vmem:[#allocation16_spill] sm:$0xff] }
 0x320   :  { %v1776_v52 = vadd.f32 %v1775_v32, %v1774_v58  ;;  %v1678_v0 = vmul.f32 %v2093_v56, %v4083_v29  ;;  %vm1679_vm2 = vcmp.eq.f32.partialorder %v4083_v29, inf  ;;  %v4157_v46 = vsel %vm4149_vm15, %v1737_v37, %v1731_v26 }
 0x321   :  { %v1782_v41 = vadd.f32 %v1781_v53, %v1780_v6  ;;  %vm1501_vm14 = vcmp.eq.s32.totalorder %v4101_v44, 1  ;;  %vm1681_vm1 = vcmp.eq.f32.partialorder %v4083_v29, 0.0  ;;  %v1682_v27 = vand.u32 2147483648, %v4083_v29  ;;  %v4733_v6 = vld [vmem:[#allocation17_spill] sm:$0xff] }
 0x322   :  { %2098 = vrsqrt.f32 %v4157_v46  ;;  %v1787_v54 = vsub.f32 %v3762_v35, %v2666_v1  ;;  %v1374_v33 = vsel %vm1373_vm9, %v4140_v48, 0.0  ;;  %v1438_v50 = vsel %vm1437_vm10, %v4144_v18, 0.0 }
 0x323   :  { %v4171_v20 = vmul.f32 %v2118_v57, %v2091_v31  ;;  %v1680_v62 = vsel %vm1679_vm2, %v4083_v29, %v1678_v0  ;;  %v2095_v34 = vpop.eup %2094  ;;  %v1777_v17 = vmax.f32 %v1776_v52, 1.0  ;;  %v1783_v9 = vmax.f32 %v1782_v41, 1.0 }
 0x324   :  { %v1683_v2 = vsel %vm1681_vm1, %v1682_v27, %v1680_v62  ;;  %v1788_v35 = vsub.f32 %v3849_v3, %v2654_v63  ;;  %v1602_v51 = vsel %vm4010_vm7, 2, %v1593_v8  ;;  %v1657_v45 = vsel %vm4027_vm0, 1, %v4639_v15 }
 0x325   :  { %2100 = vrcp.f32 %v1683_v2  ;;  %v1796_v49 = vsub.f32 %v3805_v12, %v2666_v1  ;;  %v1666_v29 = vsel %vm4051_vm12, 2, %v1657_v45  ;;  %v1789_v36 = vmul.f32 %v1787_v54, %v1787_v54 }
 0x326   :  { %v1790_v7 = vmul.f32 %v1788_v35, %v1788_v35  ;;  %v1797_v11 = vsub.f32 %v3866_v55, %v2654_v63  ;;  %v1439_v3 = vadd.f32 %v1438_v50, %v1374_v33  ;;  %v4189_v39 = vmul.f32 %v4171_v20, %v4730_v21  ;;  %v2120_v33 = vld [vmem:[#allocation6 + $0x20] sm:$0xff] }
 0x327   :  { %v4191_v61 = vmul.f32 %v2119_v24, %v2095_v34  ;;  %vm1565_vm8 = vcmp.eq.s32.totalorder %v4106_v25, 1  ;;  %vm4194_vm7 = vcmp.lt.f32.partialorder %v1783_v9, %v1777_v17  ;;  %v1798_v60 = vmul.f32 %v1796_v49, %v1796_v49  ;;  %v4738_v49 = vld [vmem:[#allocation18_spill] sm:$0xff] }
 0x328   :  { %v1791_v59 = vadd.f32 %v1790_v7, %v1789_v36  ;;  %v1799_v26 = vmul.f32 %v1797_v11, %v1797_v11  ;;  %v4200_v55 = vsel %vm4023_vm6, 3, %v1602_v51  ;;  %v4204_v37 = vsel %vm4077_vm11, 3, %v1666_v29  ;;  %v2121_v11 = vld [vmem:[#allocation6 + $0x28] sm:$0xff] }
 0x329   :  { %vm1368_vm0 = vcmp.eq.s32.totalorder %v4093_v22, 0  ;;  %vm1432_vm12 = vcmp.eq.s32.totalorder %v4097_v10, 0  ;;  %v2097_v58 = vpop.eup %2096  ;;  %v1502_v13 = vsel %vm1501_vm14, %v4189_v39, 0.0  ;;  %v4219_v53 = vmul.f32 %v4191_v61, %v4733_v6 }
 0x32a   :  { %v1792_v32 = vmax.f32 %v1791_v59, 1.0  ;;  %v1800_v31 = vadd.f32 %v1799_v26, %v1798_v60  ;;  %v1369_v14 = vsel %vm1368_vm0, %v4140_v48, 0.0  ;;  %v1433_v43 = vsel %vm1432_vm12, %v4144_v18, 0.0 }
 0x32b   :  { %v1721_v56 = vsel %vm4109_vm5, 1, %v4639_v15  ;;  %v1786_v8 = vsel %vm4194_vm7, %v1783_v9, %v1777_v17  ;;  %v1503_v0 = vadd.f32 %v1502_v13, %v1439_v3  ;;  %v4232_v50 = vmul.f32 %v2120_v33, %v2097_v58 }
 0x32c   :  { %v2099_v52 = vpop.eup %2098  ;;  %v1730_v41 = vsel %vm4128_vm13, 2, %v1721_v56  ;;  %vm4228_vm6 = vcmp.lt.f32.partialorder %v1792_v32, %v1786_v8  ;;  %v1801_v54 = vmax.f32 %v1800_v31, 1.0  ;;  %v1434_v62 = vadd.f32 %v1433_v43, %v1369_v14 }
 0x32d   :  { %v1742_v57 = vmul.f32 %v2099_v52, %v4157_v46  ;;  %v1795_v16 = vsel %vm4228_vm6, %v1792_v32, %v1786_v8  ;;  %vm1743_vm11 = vcmp.eq.f32.partialorder %v4157_v46, inf  ;;  %vm1745_vm3 = vcmp.eq.f32.partialorder %v4157_v46, 0.0  ;;  %v4739_v32 = vld [vmem:[#allocation19_spill] sm:$0xff] }
 0x32e   :  { %v1746_v19 = vand.u32 2147483648, %v4157_v46  ;;  %vm4240_vm5 = vcmp.lt.f32.partialorder %v1801_v54, %v1795_v16  ;;  %v1566_v17 = vsel %vm1565_vm8, %v4219_v53, 0.0  ;;  %vm1496_vm4 = vcmp.eq.s32.totalorder %v4101_v44, 0 }
 0x32f   :  { %v2101_v2 = vpop.eup %2100  ;;  %v1744_v9 = vsel %vm1743_vm11, %v4157_v46, %v1742_v57  ;;  %v4250_v35 = vsel %vm4240_vm5, %v1801_v54, %v1795_v16  ;;  %v1497_v45 = vsel %vm1496_vm4, %v4189_v39, 0.0  ;;  %vm4537_vm13 = vcmp.eq.s32.totalorder %v4093_v22, 3 }
 0x330   :  { %v1747_v51 = vsel %vm1745_vm3, %v1746_v19, %v1744_v9  ;;  %2102 = vrsqrt.f32 %v4250_v35  ;;  %v4260_v29 = vmul.f32 %v4232_v50, %v4738_v49  ;;  %v1498_v46 = vadd.f32 %v1497_v45, %v1434_v62  ;;  %v2122_v9 = vld [vmem:[#allocation6 + $0x30] sm:$0xff] }
 0x331   :  { %2104 = vrcp.f32 %v1747_v51  ;;  %v1384_v36 = vsel %vm4537_vm13, %v4140_v48, 0.0  ;;  %v1567_v7 = vadd.f32 %v1566_v17, %v1503_v0  ;;  %vm4536_vm2 = vcmp.eq.s32.totalorder %v4200_v55, 1 }
 0x332   :  { %v4266_v3 = vmul.f32 %v2121_v11, %v2101_v2  ;;  %vm4535_vm1 = vcmp.eq.s32.totalorder %v4097_v10, 3  ;;  %vm1693_vm11 = vcmp.eq.s32.totalorder %v4204_v37, 1  ;;  %v1785_v21 = vsel %vm4194_vm7, 1, %v4639_v15  ;;  %v4740_v2 = vld [vmem:[#allocation13_spill] sm:$0xff] }
 0x333   :  { %vm1560_vm3 = vcmp.eq.s32.totalorder %v4106_v25, 0  ;;  %v1448_v24 = vsel %vm4535_vm1, %v4144_v18, 0.0  ;;  %v4279_v59 = vsel %vm4149_vm15, 3, %v1730_v41  ;;  %v1794_v60 = vsel %vm4228_vm6, 2, %v1785_v21 }
 0x334   :  { %v1561_v26 = vsel %vm1560_vm3, %v4219_v53, 0.0  ;;  %v1449_v58 = vadd.f32 %v1448_v24, %v1384_v36  ;;  %v1630_v15 = vsel %vm4536_vm2, %v4260_v29, 0.0  ;;  %vm4538_vm7 = vcmp.eq.s32.totalorder %v4200_v55, 0 }
 0x335   :  { %v1562_v12 = vadd.f32 %v1561_v26, %v1498_v46  ;;  %vm4542_vm1 = vcmp.eq.s32.totalorder %v4204_v37, 0  ;;  %v1631_v23 = vadd.f32 %v1630_v15, %v1567_v7  ;;  %v1686_v31 = vmul.f32 %v4266_v3, %v4739_v32  ;;  %v4741_v46 = vld [vmem:[#allocation15_spill] sm:$0xff] }
 0x336   :  { %v1625_v14 = vsel %vm4538_vm7, %v4260_v29, 0.0  ;;  %vm4541_vm15 = vcmp.eq.s32.totalorder %v4101_v44, 3  ;;  %v4299_v43 = vsel %vm4240_vm5, 3, %v1794_v60  ;;  %vm4539_vm6 = vcmp.eq.s32.totalorder %v4093_v22, 2 }
 0x337   :  { %v1512_v13 = vsel %vm4541_vm15, %v4189_v39, 0.0  ;;  %vm4540_vm2 = vcmp.eq.s32.totalorder %v4097_v10, 2  ;;  %vm1807_vm13 = vcmp.eq.f32.partialorder %v4250_v35, inf  ;;  %v1379_v56 = vsel %vm4539_vm6, %v4140_v48, 0.0 }
 0x338   :  { %v1513_v6 = vadd.f32 %v1512_v13, %v1449_v58  ;;  %v1443_v8 = vsel %vm4540_vm2, %v4144_v18, 0.0  ;;  %vm1809_vm5 = vcmp.eq.f32.partialorder %v4250_v35, 0.0  ;;  %v1810_v52 = vand.u32 2147483648, %v4250_v35 }
 0x339   :  { %v1626_v0 = vadd.f32 %v1625_v14, %v1562_v12  ;;  %v1444_v41 = vadd.f32 %v1443_v8, %v1379_v56  ;;  %v1694_v54 = vsel %vm1693_vm11, %v1686_v31, 0.0  ;;  %v1689_v33 = vsel %vm4542_vm1, %v1686_v31, 0.0 }
 0x33a   :  { %v2103_v27 = vpop.eup %2102  ;;  %vm1575_vm7 = vcmp.eq.s32.totalorder %v4106_v25, 3  ;;  %vm1639_vm6 = vcmp.eq.s32.totalorder %v4200_v55, 3  ;;  %v1695_v57 = vadd.f32 %v1694_v54, %v1631_v23  ;;  %vm4543_vm2 = vcmp.eq.s32.totalorder %v4101_v44, 2 }
 0x33b   :  { %v2105_v48 = vpop.eup %2104  ;;  %v1806_v18 = vmul.f32 %v2103_v27, %v4250_v35  ;;  %v1576_v16 = vsel %vm1575_vm7, %v4219_v53, 0.0  ;;  %vm1757_vm15 = vcmp.eq.s32.totalorder %v4279_v59, 1  ;;  %v1507_v19 = vsel %vm4543_vm2, %v4189_v39, 0.0 }
 0x33c   :  { %v1577_v62 = vadd.f32 %v1576_v16, %v1513_v6  ;;  %v1367_v34 = vmul.f32 %v4118_v42, %v4672_v38  ;;  %v1431_v17 = vmul.f32 %v4120_v47, %v4740_v2  ;;  %v4334_v51 = vmul.f32 %v2122_v9, %v2105_v48  ;;  %v2123_v9 = vld [vmem:[#allocation6 + $0x38] sm:$0xff] }
 0x33d   :  { %v1808_v45 = vsel %vm1807_vm13, %v4250_v35, %v1806_v18  ;;  %vm1752_vm1 = vcmp.eq.s32.totalorder %v4279_v59, 0  ;;  %v1508_v49 = vadd.f32 %v1507_v19, %v1444_v41  ;;  %v4342_v36 = vmul.f32 %v4171_v20, %v4741_v46 }
 0x33e   :  { %v1811_v38 = vsel %vm1809_vm5, %v1810_v52, %v1808_v45  ;;  %v1690_v42 = vadd.f32 %v1689_v33, %v1626_v0  ;;  %v1376_v47 = vsel %vm1373_vm9, %v1367_v34, 0.0  ;;  %v1440_v39 = vsel %vm1437_vm10, %v1431_v17, 0.0 }
 0x33f   :  { %2106 = vrcp.f32 %v1811_v38  ;;  %v1640_v7 = vsel %vm1639_vm6, %v4260_v29, 0.0  ;;  %vm1570_vm13 = vcmp.eq.s32.totalorder %v4106_v25, 2  ;;  %v1441_v11 = vadd.f32 %v1440_v39, %v1376_v47 }
 0x340   :  { %v1641_v20 = vadd.f32 %v1640_v7, %v1577_v62  ;;  %vm1703_vm2 = vcmp.eq.s32.totalorder %v4204_v37, 3  ;;  %v1571_v35 = vsel %vm1570_vm13, %v4219_v53, 0.0  ;;  %v4360_v21 = vmul.f32 %v4191_v61, %v2358_v30 }
 0x341   :  { %v1750_v24 = vmul.f32 %v4334_v51, %v2586_v4  ;;  %vm4546_vm9 = vcmp.eq.s32.totalorder %v4279_v59, 3  ;;  %v1572_v60 = vadd.f32 %v1571_v35, %v1508_v49  ;;  %v1504_v26 = vsel %vm1501_vm14, %v4342_v36, 0.0 }
 0x342   :  { %v1704_v58 = vsel %vm1703_vm2, %v1686_v31, 0.0  ;;  %vm4545_vm10 = vcmp.eq.s32.totalorder %v4200_v55, 2  ;;  %vm4544_vm5 = vcmp.eq.s32.totalorder %v4204_v37, 2  ;;  %v1505_v53 = vadd.f32 %v1504_v26, %v1441_v11 }
 0x343   :  { %v1635_v30 = vsel %vm4545_vm10, %v4260_v29, 0.0  ;;  %v1699_v4 = vsel %vm4544_vm5, %v1686_v31, 0.0  ;;  %v1371_v61 = vsel %vm1368_vm0, %v1367_v34, 0.0  ;;  %v1435_v15 = vsel %vm1432_vm12, %v1431_v17, 0.0 }
 0x344   :  { %v1705_v12 = vadd.f32 %v1704_v58, %v1641_v20  ;;  %vm1762_vm14 = vcmp.eq.s32.totalorder %v4279_v59, 2  ;;  %v1568_v23 = vsel %vm1565_vm8, %v4360_v21, 0.0  ;;  %v4387_v32 = vmul.f32 %v4232_v50, %v2426_v28 }
 0x345   :  { %v1436_v29 = vadd.f32 %v1435_v15, %v1371_v61  ;;  %v1758_v31 = vsel %vm1757_vm15, %v1750_v24, 0.0  ;;  %vm1821_vm0 = vcmp.eq.s32.totalorder %v4299_v43, 1  ;;  %vm1816_vm5 = vcmp.eq.s32.totalorder %v4299_v43, 0 }
 0x346   :  { %v1636_v14 = vadd.f32 %v1635_v30, %v1572_v60  ;;  %v1569_v13 = vadd.f32 %v1568_v23, %v1505_v53  ;;  %v1499_v6 = vsel %vm1496_vm4, %v4342_v36, 0.0  ;;  %v1759_v56 = vadd.f32 %v1758_v31, %v1695_v57 }
 0x347   :  { %v1753_v8 = vsel %vm1752_vm1, %v1750_v24, 0.0  ;;  %v1768_v28 = vsel %vm4546_vm9, %v1750_v24, 0.0  ;;  %v1500_v50 = vadd.f32 %v1499_v6, %v1436_v29  ;;  %v1563_v0 = vsel %vm1560_vm3, %v4360_v21, 0.0 }
 0x348   :  { %v1754_v52 = vadd.f32 %v1753_v8, %v1690_v42  ;;  %vm4742_vm8 = vcmp.eq.s32.totalorder %v4093_v22, 3  ;;  %vm4743_vm12 = vcmp.eq.s32.totalorder %v4097_v10, 3  ;;  %vm1831_vm4 = vcmp.eq.s32.totalorder %v4299_v43, 3 }
 0x349   :  { %v1386_v41 = vsel %vm4742_vm8, %v1367_v34, 0.0  ;;  %v1450_v27 = vsel %vm4743_vm12, %v1431_v17, 0.0  ;;  %vm4744_vm10 = vcmp.eq.s32.totalorder %v4200_v55, 1  ;;  %v1687_v33 = vmul.f32 %v4266_v3, %v2510_v40  ;;  %v2107_v18 = vpop.eup %2106 }
 0x34a   :  { %v1632_v54 = vsel %vm4744_vm10, %v4387_v32, 0.0  ;;  %v1564_v48 = vadd.f32 %v1563_v0, %v1500_v50  ;;  %v1451_v57 = vadd.f32 %v1450_v27, %v1386_v41  ;;  %vm1826_vm3 = vcmp.eq.s32.totalorder %v4299_v43, 2 }
 0x34b   :  { %v1633_v16 = vadd.f32 %v1632_v54, %v1569_v13  ;;  %vm4745_vm8 = vcmp.eq.s32.totalorder %v4101_v44, 3  ;;  %vm4746_vm12 = vcmp.eq.s32.totalorder %v4093_v22, 2  ;;  %vm4747_vm9 = vcmp.eq.s32.totalorder %v4097_v10, 2 }
 0x34c   :  { %v1514_v62 = vsel %vm4745_vm8, %v4342_v36, 0.0  ;;  %v1381_v19 = vsel %vm4746_vm12, %v1367_v34, 0.0  ;;  %v1445_v2 = vsel %vm4747_vm9, %v1431_v17, 0.0  ;;  %v1813_v45 = vmul.f32 %v2123_v9, %v2107_v18 }
 0x34d   :  { %v1700_v49 = vadd.f32 %v1699_v4, %v1636_v14  ;;  %vm4748_vm10 = vcmp.eq.s32.totalorder %v4200_v55, 0  ;;  %v1515_v3 = vadd.f32 %v1514_v62, %v1451_v57  ;;  %v1751_v46 = vmul.f32 %v4334_v51, %v2581_v5 }
 0x34e   :  { %v1627_v40 = vsel %vm4748_vm10, %v4387_v32, 0.0  ;;  %v1578_v22 = vsel %vm1575_vm7, %v4360_v21, 0.0  ;;  %v1446_v34 = vadd.f32 %v1445_v2, %v1381_v19  ;;  %v1814_v10 = vmul.f32 %v1813_v45, %v2666_v1 }
 0x34f   :  { %v1628_v38 = vadd.f32 %v1627_v40, %v1564_v48  ;;  %v1696_v17 = vsel %vm1693_vm11, %v1687_v33, 0.0  ;;  %v1579_v42 = vadd.f32 %v1578_v22, %v1515_v3  ;;  %vm4749_vm9 = vcmp.eq.s32.totalorder %v4101_v44, 2 }
 0x350   :  { %v1509_v47 = vsel %vm4749_vm9, %v4342_v36, 0.0  ;;  %v1769_v39 = vadd.f32 %v1768_v28, %v1705_v12  ;;  %v1763_v5 = vsel %vm1762_vm14, %v1750_v24, 0.0  ;;  %v1697_v51 = vadd.f32 %v1696_v17, %v1633_v16 }
 0x351   :  { %v1510_v7 = vadd.f32 %v1509_v47, %v1446_v34  ;;  %v1822_v11 = vsel %vm1821_vm0, %v1814_v10, 0.0  ;;  %v1817_v1 = vsel %vm1816_vm5, %v1814_v10, 0.0  ;;  %v1764_v20 = vadd.f32 %v1763_v5, %v1700_v49 }
 0x352   :  { %vm4750_vm11 = vcmp.eq.s32.totalorder %v4204_v37, 0  ;;  %v1823_v60 = vadd.f32 %v1822_v11, %v1759_v56  ;;  %v1818_v26 = vadd.f32 %v1817_v1, %v1754_v52  ;;  %v1642_v36 = vsel %vm1639_vm6, %v4387_v32, 0.0 }
 0x353   :  { %v1691_v35 = vsel %vm4750_vm11, %v1687_v33, 0.0  ;;  %v1760_v24 = vsel %vm1757_vm15, %v1751_v46, 0.0  ;;  %v1755_v58 = vsel %vm1752_vm1, %v1751_v46, 0.0  ;;  %v1643_v53 = vadd.f32 %v1642_v36, %v1579_v42 }
 0x354   :  { %v1692_v44 = vadd.f32 %v1691_v35, %v1628_v38  ;;  %v1573_v30 = vsel %vm1570_vm13, %v4360_v21, 0.0  ;;  %1845 = vadd.xlane.f32.xlu1 %v1823_v60  ;;  %1836 = vadd.xlane.f32.xlu0 %v1818_v26  ;;  %v1832_v4 = vsel %vm1831_vm4, %v1814_v10, 0.0  ;;  %v1761_v61 = vadd.f32 %v1760_v24, %v1697_v51 }
 0x355   :  { %v1706_v15 = vsel %vm1703_vm2, %v1687_v33, 0.0  ;;  %v1574_v12 = vadd.f32 %v1573_v30, %v1510_v7  ;;  %v1833_v23 = vadd.f32 %v1832_v4, %v1769_v39  ;;  %v1827_v29 = vsel %vm1826_vm3, %v1814_v10, 0.0 }
 0x356   :  { %v1815_v31 = vmul.f32 %v1813_v45, %v2654_v63  ;;  %vm4751_vm1 = vcmp.eq.s32.totalorder %v4200_v55, 2  ;;  %v1828_v21 = vadd.f32 %v1827_v29, %v1764_v20  ;;  %v1756_v14 = vadd.f32 %v1755_v58, %v1692_v44 }
 0x357   :  { %v1637_v25 = vsel %vm4751_vm1, %v4387_v32, 0.0  ;;  %v1707_v13 = vadd.f32 %v1706_v15, %v1643_v53  ;;  %vm4752_vm7 = vcmp.eq.s32.totalorder %v4204_v37, 2  ;;  %vm4753_vm2 = vcmp.eq.s32.totalorder %v4279_v59, 3 }
 0x358   :  { %v1638_v6 = vadd.f32 %v1637_v25, %v1574_v12  ;;  %v1701_v56 = vsel %vm4752_vm7, %v1687_v33, 0.0  ;;  %1863 = vadd.xlane.f32.xlu1 %v1833_v23  ;;  %1854 = vadd.xlane.f32.xlu0 %v1828_v21  ;;  %v1824_v28 = vsel %vm1821_vm0, %v1815_v31, 0.0  ;;  %v1819_v63 = vsel %vm1816_vm5, %v1815_v31, 0.0 }
 0x359   :  { %v1770_v55 = vsel %vm4753_vm2, %v1751_v46, 0.0  ;;  %v1765_v32 = vsel %vm1762_vm14, %v1751_v46, 0.0  ;;  %v1825_v50 = vadd.f32 %v1824_v28, %v1761_v61  ;;  %v1820_v52 = vadd.f32 %v1819_v63, %v1756_v14 }
 0x35a   :  { %v1702_v8 = vadd.f32 %v1701_v56, %v1638_v6  ;;  %v1771_v0 = vadd.f32 %v1770_v55, %v1707_v13  ;;  %v1834_v41 = vsel %vm1831_vm4, %v1815_v31, 0.0  ;;  %v1829_v27 = vsel %vm1826_vm3, %v1815_v31, 0.0 }
 0x35c   :  { %v1766_v37 = vadd.f32 %v1765_v32, %v1702_v8  ;;  %1881 = vadd.xlane.f32.xlu1 %v1825_v50  ;;  %1872 = vadd.xlane.f32.xlu0 %v1820_v52  ;;  %v1835_v54 = vadd.f32 %v1834_v41, %v1771_v0 }
 0x35e   :  { %v1830_v33 = vadd.f32 %v1829_v27, %v1766_v37 }
 0x360   :  { %1899 = vadd.xlane.f32.xlu1 %v1835_v54  ;;  %1890 = vadd.xlane.f32.xlu0 %v1830_v33 }
 0x3e1   :  { %v1846_v48 = vpop.xlane.xlu1 %1845  ;;  %v1837_v57 = vpop.xlane.xlu0 %1836 }
 0x3e2   :  { %v1847_v59 = vrot.slane %v1846_v48, 4  ;;  %v1838_v18 = vrot.slane %v1837_v57, 4 }
 0x3e4   :  { %v1848_v16 = vadd.f32 %v1847_v59, %v1846_v48  ;;  %v1839_v62 = vadd.f32 %v1838_v18, %v1837_v57 }
 0x3e5   :  { %v1864_v19 = vpop.xlane.xlu1 %1863  ;;  %v1855_v2 = vpop.xlane.xlu0 %1854 }
 0x3e6   :  { %v1849_v9 = vrot.slane %v1848_v16, 2  ;;  %v1840_v45 = vrot.slane %v1839_v62, 2  ;;  %v1865_v49 = vrot.slane %v1864_v19, 4  ;;  %v1856_v40 = vrot.slane %v1855_v2, 4 }
 0x3e8   :  { %v1866_v3 = vadd.f32 %v1865_v49, %v1864_v19  ;;  %v1857_v46 = vadd.f32 %v1856_v40, %v1855_v2  ;;  %v1841_v43 = vadd.f32 %v1840_v45, %v1839_v62  ;;  %v1850_v38 = vadd.f32 %v1849_v9, %v1848_v16 }
 0x3e9   :  { %v1882_v22 = vpop.xlane.xlu1 %1881  ;;  %v1873_v34 = vpop.xlane.xlu0 %1872 }
 0x3ea   :  { %v1867_v10 = vrot.slane %v1866_v3, 2  ;;  %v1858_v17 = vrot.slane %v1857_v46, 2  ;;  %v1883_v42 = vrot.slane %v1882_v22, 4  ;;  %v1874_v47 = vrot.slane %v1873_v34, 4 }
 0x3eb   :  { %v1842_v39 = vrot.slane %v1841_v43, 1  ;;  %v1851_v5 = vrot.slane %v1850_v38, 1 }
 0x3ec   :  { %v1884_v51 = vadd.f32 %v1883_v42, %v1882_v22  ;;  %v1875_v7 = vadd.f32 %v1874_v47, %v1873_v34  ;;  %v1859_v11 = vadd.f32 %v1858_v17, %v1857_v46  ;;  %v1868_v1 = vadd.f32 %v1867_v10, %v1866_v3 }
 0x3ed   :  { %v1900_v20 = vpop.xlane.xlu1 %1899  ;;  %v1891_v35 = vpop.xlane.xlu0 %1890  ;;  %v1843_v60 = vadd.f32 %v1842_v39, %v1841_v43  ;;  %v1852_v26 = vadd.f32 %v1851_v5, %v1850_v38 }
 0x3ee   :  { %v1885_v44 = vrot.slane %v1884_v51, 2  ;;  %v1876_v36 = vrot.slane %v1875_v7, 2  ;;  %v1901_v24 = vrot.slane %v1900_v20, 4  ;;  %v1892_v58 = vrot.slane %v1891_v35, 4 }
 0x3ef   :  { %1989 = vpush %v1843_v60  ;;  %v1860_v53 = vrot.slane %v1859_v11, 1  ;;  %v1869_v30 = vrot.slane %v1868_v1, 1 }
 0x3f0   :  { %v1902_v4 = vadd.f32 %v1901_v24, %v1900_v20  ;;  %v1893_v61 = vadd.f32 %v1892_v58, %v1891_v35  ;;  %1991 = vpush %v1852_v26  ;;  %v1877_v15 = vadd.f32 %v1876_v36, %v1875_v7  ;;  %v1886_v12 = vadd.f32 %v1885_v44, %v1884_v51 }
 0x3f1   :  { %v1861_v23 = vadd.f32 %v1860_v53, %v1859_v11  ;;  %v1870_v29 = vadd.f32 %v1869_v30, %v1868_v1 }
 0x3f2   :  { %v1903_v31 = vrot.slane %v1902_v4, 2  ;;  %v1894_v25 = vrot.slane %v1893_v61, 2  ;;  %v1878_v21 = vrot.slane %v1877_v15, 1  ;;  %v1887_v14 = vrot.slane %v1886_v12, 1 }
 0x3f3   :  { %1993 = vpush %v1861_v23 }
 0x3f4   :  { %v1904_v13 = vadd.f32 %v1903_v31, %v1902_v4  ;;  %v1895_v6 = vadd.f32 %v1894_v25, %v1893_v61  ;;  %1995 = vpush %v1870_v29  ;;  %v1879_v56 = vadd.f32 %v1878_v21, %v1877_v15  ;;  %v1888_v8 = vadd.f32 %v1887_v14, %v1886_v12 }
 0x3f6   :  { %1997 = vpush %v1879_v56  ;;  %v1896_v28 = vrot.slane %v1895_v6, 1  ;;  %v1905_v63 = vrot.slane %v1904_v13, 1 }
 0x3f7   :  { %1999 = vpush %v1888_v8 }
 0x3f8   :  { %v1897_v55 = vadd.f32 %v1896_v28, %v1895_v6  ;;  %v1906_v32 = vadd.f32 %v1905_v63, %v1904_v13 }
 0x3fa   :  { %2001 = vpush %v1897_v55 }
 0x3fb   :  { %2003 = vpush %v1906_v32 }
 0x420   :  { %s1990_s21 = spop %1989 }
 0x421   :  { %1909 = sst [smem:[#allocation7]] %s1990_s21  ;;  %s1992_s22 = spop %1991 }
 0x422   :  { %1913 = sst [smem:[#allocation7 + $0x80]] %s1992_s22 }
 0x424   :  { %s1994_s23 = spop %1993 }
 0x425   :  { %1917 = sst [smem:[#allocation7 + $0x100]] %s1994_s23  ;;  %s1996_s24 = spop %1995 }
 0x426   :  { %1921 = sst [smem:[#allocation7 + $0x180]] %s1996_s24 }
 0x427   :  { %s1998_s25 = spop %1997 }
 0x428   :  { %1911 = sst [smem:[#allocation7 + $0x1]] %s1998_s25  ;;  %s2000_s29 = spop %1999 }
 0x429   :  { %1915 = sst [smem:[#allocation7 + $0x81]] %s2000_s29 }
 0x42b   :  { %s2002_s30 = spop %2001 }
 0x42c   :  { %1919 = sst [smem:[#allocation7 + $0x101]] %s2002_s30  ;;  %s2004_s3 = spop %2003 }
 0x42d   :  { %1923 = sst [smem:[#allocation7 + $0x181]] %s2004_s3 }
 0x42e   :  { %2169 = shalt.err (!%p2166_p3)
}
 0x42f   :  { %s2182_s1 = smov [#allocation7]  }
 0x430   :  { %1933 = dma.smem_to_vmem %s2182_s1, 64, %s1931_s28, [#allocation5]  }
 0x431   :  { %2174 = dma.done.wait [#allocation5], 64  }
 0x432   :  { %2175 = vsyncadd [#allocation5], 4294967232 }
 0x433   :  { %1937 = sfence }
 0x434   :  { %1938 = vsyncpa [#allocation3], 1 }
 0x435   :  { %1939 = vsyncpa [#allocation4], 1 }
 0x436   :  { %1940 = vsyncpa [#allocation5], 1 }

</bundles_post_ra>
